<compile_context>
chip_gen: v7x
topology: tpu7x:2x2x1
jax: 0.10.0
libtpu: 0.0.40
codegen_flags: <defaults>
</compile_context>

<pallas_src>
import functools
import math

import jax
import jax.numpy as jnp
from jax.experimental import pallas as pl
from jax.experimental.pallas import tpu as pltpu


LANE = 128
VMEM_LIMIT = 32 * 1024 * 1024           # safe scoped-VMEM budget on v5e/v6e/v7x
BBOX_CLIP = math.log(1000.0 / 16.0)     # maskrcnn-benchmark BoxCoder clamp


def _round_up(x, m):
    return ((x + m - 1) // m) * m


# ----------------------------------------------------------------------------
# Pallas kernel 1: fully fused backbone conv -> RPN conv -> heads -> decode.
# One (image, row-band) per grid step; everything between the input band and
# the final [rows,128] proposal slab stays in VMEM.
# ----------------------------------------------------------------------------
def _fused_rpn_kernel(x_ref, w1_ref, b1_ref, w2_ref, b2_ref, wh_ref, bh_ref,
                      aux1_ref, aux2_ref, o_ref, feat_ref, *, TB, Wp, W, H, A):
    b = pl.program_id(1)
    C = w2_ref.shape[-1]
    L1 = (TB + 2) * Wp          # feature rows needed by the RPN conv (+1 halo each side)
    L2 = TB * Wp                # output rows of this band

    # ---- backbone 3x3 conv + bias + ReLU: 9 shifted matmuls (tap-fold) ----
    acc1 = jnp.zeros((L1, C), jnp.float32)
    for dh in range(3):
        for dw in range(3):
            off = dh * Wp + dw
            xs = x_ref[off:off + L1, :]                       # [L1, Cin_pad] f32
            acc1 = acc1 + jnp.dot(xs, w1_ref[dh * 3 + dw],
                                  preferred_element_type=jnp.float32)
    feat = jnp.maximum(acc1 + b1_ref[...], 0.0)

    # Zero the positions the RPN conv must see as zero padding (out-of-image
    # rows/cols + lane-garbage cols), then keep the band resident in VMEM.
    colok1 = aux1_ref[:, 0:1]
    row1 = aux1_ref[:, 1:2]
    g_row = row1 + (b * TB - 1).astype(jnp.float32)
    valid1 = (colok1 > 0.5) & (g_row >= 0.0) & (g_row <= float(H - 1))
    feat_ref[0:L1, :] = jnp.where(valid1, feat, 0.0)
    feat_ref[L1:L1 + 8, :] = jnp.zeros((8, C), jnp.float32)   # slack rows for tap slices

    # ---- RPN 3x3 conv + bias + ReLU (same tap-fold, bf16 MXU operands) ----
    acc2 = jnp.zeros((L2, C), jnp.float32)
    for dh in range(3):
        for dw in range(3):
            off = dh * Wp + dw
            fs = feat_ref[off:off + L2, :].astype(jnp.bfloat16)
            acc2 = acc2 + jnp.dot(fs, w2_ref[dh * 3 + dw],
                                  preferred_element_type=jnp.float32)
    rpn_act = jnp.maximum(acc2 + b2_ref[...], 0.0)

    # ---- fused 1x1 cls/box heads: single lane-dense matmul (cls|box|pad=128) ----
    h = jnp.dot(rpn_act.astype(jnp.bfloat16), wh_ref[...],
                preferred_element_type=jnp.float32) + bh_ref[...]

    # ---- anchor decode + validity masking, fused epilogue ----
    logit = h[:, 0:A]
    dx = h[:, A:2 * A]
    dy = h[:, 2 * A:3 * A]
    dws = jnp.minimum(h[:, 3 * A:4 * A], BBOX_CLIP)
    dhs = jnp.minimum(h[:, 4 * A:5 * A], BBOX_CLIP)

    ctr_x = aux2_ref[:, 0:A]
    ctr_y = aux2_ref[:, A:2 * A] + (b * TB).astype(jnp.float32)
    asz = aux2_ref[:, 2 * A:3 * A]
    colok = aux2_ref[:, 3 * A:4 * A]

    pred_cx = dx * asz + ctr_x
    pred_cy = dy * asz + ctr_y
    pred_w = jnp.exp(dws) * asz
    pred_h = jnp.exp(dhs) * asz

    # TODO(synk): clip uses the feature-map extent (stride-1 toy backbone);
    #             switch to the image size if the backbone ever downsamples.
    x1 = jnp.clip(pred_cx - 0.5 * pred_w, 0.0, float(W - 1))
    y1 = jnp.clip(pred_cy - 0.5 * pred_h, 0.0, float(H - 1))
    x2 = jnp.clip(pred_cx + 0.5 * pred_w - 1.0, 0.0, float(W - 1))
    y2 = jnp.clip(pred_cy + 0.5 * pred_h - 1.0, 0.0, float(H - 1))

    valid = (colok > 0.5) & (ctr_y < float(H))
    logit = jnp.where(valid, logit, jnp.full_like(logit, -1e30))
    zero = jnp.zeros_like(x1)
    x1 = jnp.where(valid, x1, zero)
    y1 = jnp.where(valid, y1, zero)
    x2 = jnp.where(valid, x2, zero)
    y2 = jnp.where(valid, y2, zero)

    pad = jnp.zeros((L2, LANE - 5 * A), jnp.float32)
    o_ref[...] = jnp.concatenate([logit, x1, y1, x2, y2, pad], axis=1)


# ----------------------------------------------------------------------------
# Pallas kernel 2: batched IoU (gt vs proposals) for average_recall_RPN.
# Exact division (correctness feedback); one call over the whole batch.
# ----------------------------------------------------------------------------
def _iou_kernel(gt_ref, prop_ref, iou_ref):
    gt = gt_ref[...]        # [G, 4]
    pr = prop_ref[...]      # [4, P]
    gx1, gy1, gx2, gy2 = gt[:, 0:1], gt[:, 1:2], gt[:, 2:3], gt[:, 3:4]
    px1, py1, px2, py2 = pr[0:1], pr[1:2], pr[2:3], pr[3:4]

    g_area = (gx2 - gx1 + 1.0) * (gy2 - gy1 + 1.0)   # [G, 1]
    p_area = (px2 - px1 + 1.0) * (py2 - py1 + 1.0)   # [1, P]

    w = jnp.maximum(jnp.minimum(gx2, px2) - jnp.maximum(gx1, px1) + 1.0, 0.0)
    h = jnp.maximum(jnp.minimum(gy2, py2) - jnp.maximum(gy1, py1) + 1.0, 0.0)
    inter = w * h
    union = jnp.maximum(g_area + p_area - inter, 1e-6)
    iou_ref[...] = inter / union


def iou_matrix_batched(gt, prop_t):
    """gt: [N, G, 4] (xyxy rows), prop_t: [N, 4, P] coord-major -> [N, G, P]."""
    NB, G, _ = gt.shape
    P = prop_t.shape[2]
    return pl.pallas_call(
        _iou_kernel,
        out_shape=jax.ShapeDtypeStruct((NB, G, P), jnp.float32),
        grid_spec=pltpu.PrefetchScalarGridSpec(
            num_scalar_prefetch=0,
            grid=(NB,),
            in_specs=[
                pl.BlockSpec((None, G, 4), lambda b: (b, 0, 0)),
                pl.BlockSpec((None, 4, P), lambda b: (b, 0, 0)),
            ],
            out_specs=pl.BlockSpec((None, G, P), lambda b: (b, 0, 0)),
        ),
        compiler_params=pltpu.CompilerParams(
            dimension_semantics=("parallel",),
            vmem_limit_bytes=VMEM_LIMIT),
    )(gt, prop_t)


# ----------------------------------------------------------------------------
# Parameter init (PyTorch layout) and one-time layout preparation.
# ----------------------------------------------------------------------------
def init_params(key, in_ch=3, out_ch=32, num_anchors=3):
    ks = jax.random.split(key, 4)
    return {
        "bb_w": jax.random.normal(ks[0], (out_ch, in_ch, 3, 3), jnp.float32) * 0.01,
        "bb_b": jnp.zeros((out_ch,), jnp.float32),
        "rpn_w": jax.random.normal(ks[1], (out_ch, out_ch, 3, 3), jnp.float32) * 0.01,
        "rpn_b": jnp.zeros((out_ch,), jnp.float32),
        "cls_w": jax.random.normal(ks[2], (num_anchors, out_ch, 1, 1), jnp.float32) * 0.01,
        "cls_b": jnp.zeros((num_anchors,), jnp.float32),
        "box_w": jax.random.normal(ks[3], (4 * num_anchors, out_ch, 1, 1), jnp.float32) * 0.01,
        "box_b": jnp.zeros((4 * num_anchors,), jnp.float32),
    }


def prepare_params(p_pt, num_anchors):
    """One-time layout prep: PyTorch conv weights -> per-tap matmul layouts and
    a single fused, 128-lane-padded head weight (all transposes hoisted)."""
    A = num_anchors
    C = p_pt["bb_w"].shape[0]
    Cin = p_pt["bb_w"].shape[1]
    Cp = _round_up(max(Cin, 1), 8)

    # backbone 3x3: [Cout, Cin, kh, kw] -> [9, Cin_pad, Cout]  (f32, K is tiny)
    w1 = jnp.transpose(p_pt["bb_w"], (2, 3, 1, 0)).reshape(9, Cin, C)
    w1 = jnp.pad(w1, ((0, 0), (0, Cp - Cin), (0, 0))).astype(jnp.float32)

    # RPN 3x3: [C, C, kh, kw] -> [9, C, C]  (bf16 MXU operands)
    w2 = jnp.transpose(p_pt["rpn_w"], (2, 3, 1, 0)).reshape(9, C, C).astype(jnp.bfloat16)

    # fused 1x1 heads; PyTorch box channels are anchor-major (4a+k), regroup to
    # coordinate-major columns: [cls(A) | dx(A) | dy(A) | dw(A) | dh(A) | 0...]
    w_cls = p_pt["cls_w"].reshape(A, C).T                                   # [C, A]
    w_box = jnp.transpose(p_pt["box_w"].reshape(A, 4, C), (1, 0, 2))        # [4, A, C]
    w_box = w_box.reshape(4 * A, C).T                                       # [C, 4A]
    wh = jnp.concatenate([w_cls, w_box], axis=1)
    wh = jnp.pad(wh, ((0, 0), (0, LANE - 5 * A))).astype(jnp.bfloat16)
    b_box = jnp.transpose(p_pt["box_b"].reshape(A, 4), (1, 0)).reshape(4 * A)
    bh = jnp.pad(jnp.concatenate([p_pt["cls_b"], b_box]), (0, LANE - 5 * A))

    return {
        "w1": w1, "b1": p_pt["bb_b"].reshape(1, C).astype(jnp.float32),
        "w2": w2, "b2": p_pt["rpn_b"].reshape(1, C).astype(jnp.float32),
        "wh": wh, "bh": bh.reshape(1, LANE).astype(jnp.float32),
        "C": C, "Cin": Cin, "Cp": Cp, "A": A,
    }


# ----------------------------------------------------------------------------
# GeneralizedRCNN.forward (getProposals variant): returns average_recall_RPN
# ----------------------------------------------------------------------------
def generalized_rcnn_forward(images_nchw, gt_bboxes, params, num_anchors=3,
                             anchor_sizes=(4.0, 8.0, 16.0), top_n=16, band_rows=8):
    N, Cin, H, W = images_nchw.shape
    A = num_anchors
    C = params["C"]
    Cp = params["Cp"]
    assert 5 * A <= LANE
    Wp = W + 4

    TB = min(band_rows, H)
    if (H % TB) or ((TB * Wp) % 8):
        TB = H                              # fall back to one band per image
    nb = H // TB
    Lb = (TB + 5) * Wp                      # input band length (incl. 2-row halo + slack)
    L1 = (TB + 2) * Wp                      # backbone feature band length
    L2 = TB * Wp                            # output band length

    # --- NHWC, zero-pad spatial halo + channel pad, split into row bands ---
    x = jnp.transpose(images_nchw, (0, 2, 3, 1)).astype(jnp.float32)
    x = jnp.pad(x, ((0, 0), (2, 3), (2, 2), (0, Cp - Cin)))
    xb = jnp.stack([x[:, i * TB:i * TB + TB + 5] for i in range(nb)], axis=1)
    xb = xb.reshape(N, nb, Lb, Cp)

    # --- grid-invariant index / anchor tables (stay resident in VMEM) ---
    rows1 = jnp.repeat(jnp.arange(TB + 2, dtype=jnp.float32), Wp)
    cols1 = jnp.tile(jnp.arange(Wp, dtype=jnp.float32), TB + 2)
    colok1 = ((cols1 >= 1.0) & (cols1 <= float(W))).astype(jnp.float32)
    aux1 = jnp.stack([colok1, rows1], axis=1)                          # [L1, 2]

    rows2 = jnp.repeat(jnp.arange(TB, dtype=jnp.float32), Wp)
    cols2 = jnp.tile(jnp.arange(Wp, dtype=jnp.float32), TB)
    sz = jnp.asarray(anchor_sizes, jnp.float32)
    aux2 = jnp.concatenate([
        jnp.broadcast_to((cols2 + 0.5)[:, None], (L2, A)),             # ctr_x
        jnp.broadcast_to((rows2 + 0.5)[:, None], (L2, A)),             # local ctr_y
        jnp.broadcast_to(sz[None, :], (L2, A)),                        # anchor size
        jnp.broadcast_to((cols2 < float(W)).astype(jnp.float32)[:, None], (L2, A)),
    ], axis=1)                                                         # [L2, 4A]

    kernel = functools.partial(_fused_rpn_kernel, TB=TB, Wp=Wp, W=W, H=H, A=A)
    comb = pl.pallas_call(
        kernel,
        out_shape=jax.ShapeDtypeStruct((N, nb * L2, LANE), jnp.float32),
        grid_spec=pltpu.PrefetchScalarGridSpec(
            num_scalar_prefetch=0,
            grid=(N, nb),
            in_specs=[
                pl.BlockSpec((None, None, Lb, Cp), lambda n, b: (n, b, 0, 0)),
                pl.BlockSpec((9, Cp, C), lambda n, b: (0, 0, 0)),
                pl.BlockSpec((1, C), lambda n, b: (0, 0)),
                pl.BlockSpec((9, C, C), lambda n, b: (0, 0, 0)),
                pl.BlockSpec((1, C), lambda n, b: (0, 0)),
                pl.BlockSpec((C, LANE), lambda n, b: (0, 0)),
                pl.BlockSpec((1, LANE), lambda n, b: (0, 0)),
                pl.BlockSpec((L1, 2), lambda n, b: (0, 0)),
                pl.BlockSpec((L2, 4 * A), lambda n, b: (0, 0)),
            ],
            out_specs=pl.BlockSpec((None, L2, LANE), lambda n, b: (n, b, 0)),
            scratch_shapes=[pltpu.VMEM((L1 + 8, C), jnp.float32)],
        ),
        compiler_params=pltpu.CompilerParams(
            dimension_semantics=("parallel", "parallel"),
            vmem_limit_bytes=VMEM_LIMIT),
    )(xb, params["w1"], params["b1"], params["w2"], params["b2"],
      params["wh"], params["bh"], aux1, aux2)

    # --- proposal selection: rank by RAW logits (sigmoid is monotone) ---
    A_tot = nb * L2 * A
    logits_all = comb[..., 0:A].reshape(N, A_tot)
    boxes_all = jnp.stack(
        [comb[..., A:2 * A], comb[..., 2 * A:3 * A],
         comb[..., 3 * A:4 * A], comb[..., 4 * A:5 * A]], axis=-1
    ).reshape(N, A_tot, 4)
    # TODO(synk): NMS in the RPN post-processor is omitted (plain top-k only).
    top_logits, top_idx = jax.lax.top_k(logits_all, top_n)
    top_scores = jax.nn.sigmoid(top_logits)                    # sigmoid on top_n only
    top_boxes = jnp.take_along_axis(boxes_all, top_idx[..., None], axis=1)

    # mirror the gt-bbox concat done before roi_heads (roi_heads itself omitted)
    _proposal_boxes = jnp.concatenate([gt_bboxes, top_boxes], axis=1)
    _objectness = jnp.concatenate(
        [jnp.ones(gt_bboxes.shape[:2], jnp.float32), top_scores], axis=1)

    # --- average_recall_RPN via one batched IoU kernel (IoU >= 0.5) ---
    iou = iou_matrix_batched(gt_bboxes, jnp.transpose(top_boxes, (0, 2, 1)))
    max_iou = jnp.max(iou, axis=2)                              # [N, G]
    recall_per_img = jnp.mean((max_iou >= 0.5).astype(jnp.float32), axis=1)
    return jnp.mean(recall_per_img)


if __name__ == "__main__":
    key = jax.random.PRNGKey(0)
    k_img, k_par = jax.random.split(key)

    # small, module-consistent shapes: batch=2, RGB, 16x16 images, 2 gt boxes/img
    images = jax.random.normal(k_img, (2, 3, 16, 16), jnp.float32)
    gt_bboxes = jnp.array(
        [[[2.0, 2.0, 9.0, 9.0], [5.0, 6.0, 14.0, 13.0]],
         [[1.0, 3.0, 8.0, 12.0], [10.0, 10.0, 15.0, 15.0]]], jnp.float32)

    num_anchors = 3
    params_pt = init_params(k_par, in_ch=3, out_ch=32, num_anchors=num_anchors)
    params = prepare_params(params_pt, num_anchors)

    avg_recall = generalized_rcnn_forward(images, gt_bboxes, params,
                                          num_anchors=num_anchors)
    jax.block_until_ready(avg_recall)
    print("KERNEL_OK")
</pallas_src>

<mosaic_0001>
module attributes {stable_mosaic.version = 11 : i64} {
  func.func @_fused_rpn_kernel(%arg0: i32, %arg1: i32, %arg2: memref<1x1x260x8xf32, #tpu.memory_space<vmem>>, %arg3: memref<9x8x32xf32, #tpu.memory_space<vmem>>, %arg4: memref<1x32xf32, #tpu.memory_space<vmem>>, %arg5: memref<9x32x32xbf16, #tpu.memory_space<vmem>>, %arg6: memref<1x32xf32, #tpu.memory_space<vmem>>, %arg7: memref<32x128xbf16, #tpu.memory_space<vmem>>, %arg8: memref<1x128xf32, #tpu.memory_space<vmem>>, %arg9: memref<200x2xf32, #tpu.memory_space<vmem>>, %arg10: memref<160x12xf32, #tpu.memory_space<vmem>>, %arg11: memref<1x160x128xf32, #tpu.memory_space<vmem>>, %arg12: memref<208x32xf32, #tpu.memory_space<vmem>>) attributes {dimension_semantics = [#tpu.dimension_semantics<parallel>, #tpu.dimension_semantics<parallel>], iteration_bounds = array<i64: 2, 2>, scalar_prefetch = 0 : i64, scratch_operands = 1 : i64, tpu.core_type = #tpu.core_type<tc>, window_params = [{transform_indices = @transform_0, window_bounds = array<i64: 1, 1, 260, 8>}, {pipeline_mode = #tpu.pipeline_mode<synchronous>, transform_indices = @transform_1, window_bounds = array<i64: 9, 8, 32>}, {pipeline_mode = #tpu.pipeline_mode<synchronous>, transform_indices = @transform_2, window_bounds = array<i64: 1, 32>}, {pipeline_mode = #tpu.pipeline_mode<synchronous>, transform_indices = @transform_3, window_bounds = array<i64: 9, 32, 32>}, {pipeline_mode = #tpu.pipeline_mode<synchronous>, transform_indices = @transform_4, window_bounds = array<i64: 1, 32>}, {pipeline_mode = #tpu.pipeline_mode<synchronous>, transform_indices = @transform_5, window_bounds = array<i64: 32, 128>}, {pipeline_mode = #tpu.pipeline_mode<synchronous>, transform_indices = @transform_6, window_bounds = array<i64: 1, 128>}, {pipeline_mode = #tpu.pipeline_mode<synchronous>, transform_indices = @transform_7, window_bounds = array<i64: 200, 2>}, {pipeline_mode = #tpu.pipeline_mode<synchronous>, transform_indices = @transform_8, window_bounds = array<i64: 160, 12>}, {transform_indices = @transform_9, window_bounds = array<i64: 1, 160, 128>}]} {
    %cst = arith.constant 0.000000e+00 : f32
    %0 = vector.broadcast %cst : f32 to vector<200x32xf32>
    %c0 = arith.constant 0 : index
    %c0_0 = arith.constant 0 : index
    %c0_1 = arith.constant 0 : index
    %c0_2 = arith.constant 0 : index
    %1 = vector.load %arg2[%c0, %c0_0, %c0_1, %c0_2] : memref<1x1x260x8xf32, #tpu.memory_space<vmem>>, vector<1x1x200x8xf32>
    %2 = vector.shape_cast %1 : vector<1x1x200x8xf32> to vector<200x8xf32>
    %c0_3 = arith.constant 0 : index
    %c0_4 = arith.constant 0 : index
    %c0_5 = arith.constant 0 : index
    %3 = vector.load %arg3[%c0_3, %c0_4, %c0_5] : memref<9x8x32xf32, #tpu.memory_space<vmem>>, vector<1x8x32xf32>
    %4 = vector.shape_cast %3 : vector<1x8x32xf32> to vector<8x32xf32>
    %cst_6 = arith.constant dense<0.000000e+00> : vector<200x32xf32>
    %5 = tpu.matmul %2, %4, %cst_6 {dimension_numbers = #tpu.dot_dimension_numbers<[1], [0], [0], [1], [0, 0, 1, 1], [], []>} : vector<200x8xf32>, vector<8x32xf32>, vector<200x32xf32> -> vector<200x32xf32>
    %6 = arith.addf %0, %5 : vector<200x32xf32>
    %c0_7 = arith.constant 0 : index
    %c0_8 = arith.constant 0 : index
    %c1 = arith.constant 1 : index
    %c0_9 = arith.constant 0 : index
    %7 = vector.load %arg2[%c0_7, %c0_8, %c1, %c0_9] : memref<1x1x260x8xf32, #tpu.memory_space<vmem>>, vector<1x1x200x8xf32>
    %8 = vector.shape_cast %7 : vector<1x1x200x8xf32> to vector<200x8xf32>
    %c1_10 = arith.constant 1 : index
    %c0_11 = arith.constant 0 : index
    %c0_12 = arith.constant 0 : index
    %9 = vector.load %arg3[%c1_10, %c0_11, %c0_12] : memref<9x8x32xf32, #tpu.memory_space<vmem>>, vector<1x8x32xf32>
    %10 = vector.shape_cast %9 : vector<1x8x32xf32> to vector<8x32xf32>
    %cst_13 = arith.constant dense<0.000000e+00> : vector<200x32xf32>
    %11 = tpu.matmul %8, %10, %cst_13 {dimension_numbers = #tpu.dot_dimension_numbers<[1], [0], [0], [1], [0, 0, 1, 1], [], []>} : vector<200x8xf32>, vector<8x32xf32>, vector<200x32xf32> -> vector<200x32xf32>
    %12 = arith.addf %6, %11 : vector<200x32xf32>
    %c0_14 = arith.constant 0 : index
    %c0_15 = arith.constant 0 : index
    %c2 = arith.constant 2 : index
    %c0_16 = arith.constant 0 : index
    %13 = vector.load %arg2[%c0_14, %c0_15, %c2, %c0_16] : memref<1x1x260x8xf32, #tpu.memory_space<vmem>>, vector<1x1x200x8xf32>
    %14 = vector.shape_cast %13 : vector<1x1x200x8xf32> to vector<200x8xf32>
    %c2_17 = arith.constant 2 : index
    %c0_18 = arith.constant 0 : index
    %c0_19 = arith.constant 0 : index
    %15 = vector.load %arg3[%c2_17, %c0_18, %c0_19] : memref<9x8x32xf32, #tpu.memory_space<vmem>>, vector<1x8x32xf32>
    %16 = vector.shape_cast %15 : vector<1x8x32xf32> to vector<8x32xf32>
    %cst_20 = arith.constant dense<0.000000e+00> : vector<200x32xf32>
    %17 = tpu.matmul %14, %16, %cst_20 {dimension_numbers = #tpu.dot_dimension_numbers<[1], [0], [0], [1], [0, 0, 1, 1], [], []>} : vector<200x8xf32>, vector<8x32xf32>, vector<200x32xf32> -> vector<200x32xf32>
    %18 = arith.addf %12, %17 : vector<200x32xf32>
    %c0_21 = arith.constant 0 : index
    %c0_22 = arith.constant 0 : index
    %c20 = arith.constant 20 : index
    %c0_23 = arith.constant 0 : index
    %19 = vector.load %arg2[%c0_21, %c0_22, %c20, %c0_23] : memref<1x1x260x8xf32, #tpu.memory_space<vmem>>, vector<1x1x200x8xf32>
    %20 = vector.shape_cast %19 : vector<1x1x200x8xf32> to vector<200x8xf32>
    %c3 = arith.constant 3 : index
    %c0_24 = arith.constant 0 : index
    %c0_25 = arith.constant 0 : index
    %21 = vector.load %arg3[%c3, %c0_24, %c0_25] : memref<9x8x32xf32, #tpu.memory_space<vmem>>, vector<1x8x32xf32>
    %22 = vector.shape_cast %21 : vector<1x8x32xf32> to vector<8x32xf32>
    %cst_26 = arith.constant dense<0.000000e+00> : vector<200x32xf32>
    %23 = tpu.matmul %20, %22, %cst_26 {dimension_numbers = #tpu.dot_dimension_numbers<[1], [0], [0], [1], [0, 0, 1, 1], [], []>} : vector<200x8xf32>, vector<8x32xf32>, vector<200x32xf32> -> vector<200x32xf32>
    %24 = arith.addf %18, %23 : vector<200x32xf32>
    %c0_27 = arith.constant 0 : index
    %c0_28 = arith.constant 0 : index
    %c21 = arith.constant 21 : index
    %c0_29 = arith.constant 0 : index
    %25 = vector.load %arg2[%c0_27, %c0_28, %c21, %c0_29] : memref<1x1x260x8xf32, #tpu.memory_space<vmem>>, vector<1x1x200x8xf32>
    %26 = vector.shape_cast %25 : vector<1x1x200x8xf32> to vector<200x8xf32>
    %c4 = arith.constant 4 : index
    %c0_30 = arith.constant 0 : index
    %c0_31 = arith.constant 0 : index
    %27 = vector.load %arg3[%c4, %c0_30, %c0_31] : memref<9x8x32xf32, #tpu.memory_space<vmem>>, vector<1x8x32xf32>
    %28 = vector.shape_cast %27 : vector<1x8x32xf32> to vector<8x32xf32>
    %cst_32 = arith.constant dense<0.000000e+00> : vector<200x32xf32>
    %29 = tpu.matmul %26, %28, %cst_32 {dimension_numbers = #tpu.dot_dimension_numbers<[1], [0], [0], [1], [0, 0, 1, 1], [], []>} : vector<200x8xf32>, vector<8x32xf32>, vector<200x32xf32> -> vector<200x32xf32>
    %30 = arith.addf %24, %29 : vector<200x32xf32>
    %c0_33 = arith.constant 0 : index
    %c0_34 = arith.constant 0 : index
    %c22 = arith.constant 22 : index
    %c0_35 = arith.constant 0 : index
    %31 = vector.load %arg2[%c0_33, %c0_34, %c22, %c0_35] : memref<1x1x260x8xf32, #tpu.memory_space<vmem>>, vector<1x1x200x8xf32>
    %32 = vector.shape_cast %31 : vector<1x1x200x8xf32> to vector<200x8xf32>
    %c5 = arith.constant 5 : index
    %c0_36 = arith.constant 0 : index
    %c0_37 = arith.constant 0 : index
    %33 = vector.load %arg3[%c5, %c0_36, %c0_37] : memref<9x8x32xf32, #tpu.memory_space<vmem>>, vector<1x8x32xf32>
    %34 = vector.shape_cast %33 : vector<1x8x32xf32> to vector<8x32xf32>
    %cst_38 = arith.constant dense<0.000000e+00> : vector<200x32xf32>
    %35 = tpu.matmul %32, %34, %cst_38 {dimension_numbers = #tpu.dot_dimension_numbers<[1], [0], [0], [1], [0, 0, 1, 1], [], []>} : vector<200x8xf32>, vector<8x32xf32>, vector<200x32xf32> -> vector<200x32xf32>
    %36 = arith.addf %30, %35 : vector<200x32xf32>
    %c0_39 = arith.constant 0 : index
    %c0_40 = arith.constant 0 : index
    %c40 = arith.constant 40 : index
    %c0_41 = arith.constant 0 : index
    %37 = vector.load %arg2[%c0_39, %c0_40, %c40, %c0_41] : memref<1x1x260x8xf32, #tpu.memory_space<vmem>>, vector<1x1x200x8xf32>
    %38 = vector.shape_cast %37 : vector<1x1x200x8xf32> to vector<200x8xf32>
    %c6 = arith.constant 6 : index
    %c0_42 = arith.constant 0 : index
    %c0_43 = arith.constant 0 : index
    %39 = vector.load %arg3[%c6, %c0_42, %c0_43] : memref<9x8x32xf32, #tpu.memory_space<vmem>>, vector<1x8x32xf32>
    %40 = vector.shape_cast %39 : vector<1x8x32xf32> to vector<8x32xf32>
    %cst_44 = arith.constant dense<0.000000e+00> : vector<200x32xf32>
    %41 = tpu.matmul %38, %40, %cst_44 {dimension_numbers = #tpu.dot_dimension_numbers<[1], [0], [0], [1], [0, 0, 1, 1], [], []>} : vector<200x8xf32>, vector<8x32xf32>, vector<200x32xf32> -> vector<200x32xf32>
    %42 = arith.addf %36, %41 : vector<200x32xf32>
    %c0_45 = arith.constant 0 : index
    %c0_46 = arith.constant 0 : index
    %c41 = arith.constant 41 : index
    %c0_47 = arith.constant 0 : index
    %43 = vector.load %arg2[%c0_45, %c0_46, %c41, %c0_47] : memref<1x1x260x8xf32, #tpu.memory_space<vmem>>, vector<1x1x200x8xf32>
    %44 = vector.shape_cast %43 : vector<1x1x200x8xf32> to vector<200x8xf32>
    %c7 = arith.constant 7 : index
    %c0_48 = arith.constant 0 : index
    %c0_49 = arith.constant 0 : index
    %45 = vector.load %arg3[%c7, %c0_48, %c0_49] : memref<9x8x32xf32, #tpu.memory_space<vmem>>, vector<1x8x32xf32>
    %46 = vector.shape_cast %45 : vector<1x8x32xf32> to vector<8x32xf32>
    %cst_50 = arith.constant dense<0.000000e+00> : vector<200x32xf32>
    %47 = tpu.matmul %44, %46, %cst_50 {dimension_numbers = #tpu.dot_dimension_numbers<[1], [0], [0], [1], [0, 0, 1, 1], [], []>} : vector<200x8xf32>, vector<8x32xf32>, vector<200x32xf32> -> vector<200x32xf32>
    %48 = arith.addf %42, %47 : vector<200x32xf32>
    %c0_51 = arith.constant 0 : index
    %c0_52 = arith.constant 0 : index
    %c42 = arith.constant 42 : index
    %c0_53 = arith.constant 0 : index
    %49 = vector.load %arg2[%c0_51, %c0_52, %c42, %c0_53] : memref<1x1x260x8xf32, #tpu.memory_space<vmem>>, vector<1x1x200x8xf32>
    %50 = vector.shape_cast %49 : vector<1x1x200x8xf32> to vector<200x8xf32>
    %c8 = arith.constant 8 : index
    %c0_54 = arith.constant 0 : index
    %c0_55 = arith.constant 0 : index
    %51 = vector.load %arg3[%c8, %c0_54, %c0_55] : memref<9x8x32xf32, #tpu.memory_space<vmem>>, vector<1x8x32xf32>
    %52 = vector.shape_cast %51 : vector<1x8x32xf32> to vector<8x32xf32>
    %cst_56 = arith.constant dense<0.000000e+00> : vector<200x32xf32>
    %53 = tpu.matmul %50, %52, %cst_56 {dimension_numbers = #tpu.dot_dimension_numbers<[1], [0], [0], [1], [0, 0, 1, 1], [], []>} : vector<200x8xf32>, vector<8x32xf32>, vector<200x32xf32> -> vector<200x32xf32>
    %54 = arith.addf %48, %53 : vector<200x32xf32>
    %c0_57 = arith.constant 0 : index
    %c0_58 = arith.constant 0 : index
    %55 = vector.load %arg4[%c0_57, %c0_58] : memref<1x32xf32, #tpu.memory_space<vmem>>, vector<1x32xf32>
    %56 = vector.broadcast %55 : vector<1x32xf32> to vector<200x32xf32>
    %57 = arith.addf %54, %56 : vector<200x32xf32>
    %cst_59 = arith.constant 0.000000e+00 : f32
    %58 = vector.broadcast %cst_59 : f32 to vector<200x32xf32>
    %59 = arith.maximumf %57, %58 : vector<200x32xf32>
    %c0_60 = arith.constant 0 : index
    %c0_61 = arith.constant 0 : index
    %60 = vector.load %arg9[%c0_60, %c0_61] : memref<200x2xf32, #tpu.memory_space<vmem>>, vector<200x1xf32>
    %c0_62 = arith.constant 0 : index
    %c1_63 = arith.constant 1 : index
    %61 = vector.load %arg9[%c0_62, %c1_63] : memref<200x2xf32, #tpu.memory_space<vmem>>, vector<200x1xf32>
    %c8_i32 = arith.constant 8 : i32
    %62 = arith.muli %arg1, %c8_i32 : i32
    %c1_i32 = arith.constant 1 : i32
    %63 = arith.subi %62, %c1_i32 : i32
    %64 = arith.sitofp %63 : i32 to f32
    %65 = vector.broadcast %64 : f32 to vector<200x1xf32>
    %66 = arith.addf %61, %65 : vector<200x1xf32>
    %cst_64 = arith.constant 5.000000e-01 : f32
    %67 = vector.broadcast %cst_64 : f32 to vector<200x1xf32>
    %68 = arith.cmpf ogt, %60, %67 : vector<200x1xf32>
    %cst_65 = arith.constant 0.000000e+00 : f32
    %69 = vector.broadcast %cst_65 : f32 to vector<200x1xf32>
    %70 = arith.cmpf oge, %66, %69 : vector<200x1xf32>
    %71 = arith.andi %68, %70 : vector<200x1xi1>
    %cst_66 = arith.constant 1.500000e+01 : f32
    %72 = vector.broadcast %cst_66 : f32 to vector<200x1xf32>
    %73 = arith.cmpf ole, %66, %72 : vector<200x1xf32>
    %74 = arith.andi %71, %73 : vector<200x1xi1>
    %cst_67 = arith.constant 0.000000e+00 : f32
    %75 = vector.shape_cast %74 : vector<200x1xi1> to vector<200x1xi1>
    %76 = vector.broadcast %75 : vector<200x1xi1> to vector<200x32xi1>
    %77 = vector.broadcast %cst_67 : f32 to vector<200x32xf32>
    %78 = arith.select %76, %59, %77 : vector<200x32xi1>, vector<200x32xf32>
    %c0_68 = arith.constant 0 : index
    %c0_69 = arith.constant 0 : index
    %79 = vector.load %arg12[%c0_68, %c0_69] : memref<208x32xf32, #tpu.memory_space<vmem>>, vector<200x32xf32>
    tpu.vector_store %arg12[%c0_68, %c0_69], %78 {strides = array<i32>} : memref<208x32xf32, #tpu.memory_space<vmem>>, vector<200x32xf32>,
    %cst_70 = arith.constant 0.000000e+00 : f32
    %80 = vector.broadcast %cst_70 : f32 to vector<8x32xf32>
    %c200 = arith.constant 200 : index
    %c0_71 = arith.constant 0 : index
    %81 = vector.load %arg12[%c200, %c0_71] : memref<208x32xf32, #tpu.memory_space<vmem>>, vector<8x32xf32>
    tpu.vector_store %arg12[%c200, %c0_71], %80 {strides = array<i32>} : memref<208x32xf32, #tpu.memory_space<vmem>>, vector<8x32xf32>,
    %cst_72 = arith.constant 0.000000e+00 : f32
    %82 = vector.broadcast %cst_72 : f32 to vector<160x32xf32>
    %c0_73 = arith.constant 0 : index
    %c0_74 = arith.constant 0 : index
    %83 = vector.load %arg12[%c0_73, %c0_74] : memref<208x32xf32, #tpu.memory_space<vmem>>, vector<160x32xf32>
    %84 = arith.truncf %83 : vector<160x32xf32> to vector<160x32xbf16>
    %c0_75 = arith.constant 0 : index
    %c0_76 = arith.constant 0 : index
    %c0_77 = arith.constant 0 : index
    %85 = vector.load %arg5[%c0_75, %c0_76, %c0_77] : memref<9x32x32xbf16, #tpu.memory_space<vmem>>, vector<1x32x32xbf16>
    %86 = vector.shape_cast %85 : vector<1x32x32xbf16> to vector<32x32xbf16>
    %cst_78 = arith.constant dense<0.000000e+00> : vector<160x32xf32>
    %87 = tpu.matmul %84, %86, %cst_78 {dimension_numbers = #tpu.dot_dimension_numbers<[1], [0], [0], [1], [0, 0, 1, 1], [], []>} : vector<160x32xbf16>, vector<32x32xbf16>, vector<160x32xf32> -> vector<160x32xf32>
    %88 = arith.addf %82, %87 : vector<160x32xf32>
    %c1_79 = arith.constant 1 : index
    %c0_80 = arith.constant 0 : index
    %89 = vector.load %arg12[%c1_79, %c0_80] : memref<208x32xf32, #tpu.memory_space<vmem>>, vector<160x32xf32>
    %90 = arith.truncf %89 : vector<160x32xf32> to vector<160x32xbf16>
    %c1_81 = arith.constant 1 : index
    %c0_82 = arith.constant 0 : index
    %c0_83 = arith.constant 0 : index
    %91 = vector.load %arg5[%c1_81, %c0_82, %c0_83] : memref<9x32x32xbf16, #tpu.memory_space<vmem>>, vector<1x32x32xbf16>
    %92 = vector.shape_cast %91 : vector<1x32x32xbf16> to vector<32x32xbf16>
    %cst_84 = arith.constant dense<0.000000e+00> : vector<160x32xf32>
    %93 = tpu.matmul %90, %92, %cst_84 {dimension_numbers = #tpu.dot_dimension_numbers<[1], [0], [0], [1], [0, 0, 1, 1], [], []>} : vector<160x32xbf16>, vector<32x32xbf16>, vector<160x32xf32> -> vector<160x32xf32>
    %94 = arith.addf %88, %93 : vector<160x32xf32>
    %c2_85 = arith.constant 2 : index
    %c0_86 = arith.constant 0 : index
    %95 = vector.load %arg12[%c2_85, %c0_86] : memref<208x32xf32, #tpu.memory_space<vmem>>, vector<160x32xf32>
    %96 = arith.truncf %95 : vector<160x32xf32> to vector<160x32xbf16>
    %c2_87 = arith.constant 2 : index
    %c0_88 = arith.constant 0 : index
    %c0_89 = arith.constant 0 : index
    %97 = vector.load %arg5[%c2_87, %c0_88, %c0_89] : memref<9x32x32xbf16, #tpu.memory_space<vmem>>, vector<1x32x32xbf16>
    %98 = vector.shape_cast %97 : vector<1x32x32xbf16> to vector<32x32xbf16>
    %cst_90 = arith.constant dense<0.000000e+00> : vector<160x32xf32>
    %99 = tpu.matmul %96, %98, %cst_90 {dimension_numbers = #tpu.dot_dimension_numbers<[1], [0], [0], [1], [0, 0, 1, 1], [], []>} : vector<160x32xbf16>, vector<32x32xbf16>, vector<160x32xf32> -> vector<160x32xf32>
    %100 = arith.addf %94, %99 : vector<160x32xf32>
    %c20_91 = arith.constant 20 : index
    %c0_92 = arith.constant 0 : index
    %101 = vector.load %arg12[%c20_91, %c0_92] : memref<208x32xf32, #tpu.memory_space<vmem>>, vector<160x32xf32>
    %102 = arith.truncf %101 : vector<160x32xf32> to vector<160x32xbf16>
    %c3_93 = arith.constant 3 : index
    %c0_94 = arith.constant 0 : index
    %c0_95 = arith.constant 0 : index
    %103 = vector.load %arg5[%c3_93, %c0_94, %c0_95] : memref<9x32x32xbf16, #tpu.memory_space<vmem>>, vector<1x32x32xbf16>
    %104 = vector.shape_cast %103 : vector<1x32x32xbf16> to vector<32x32xbf16>
    %cst_96 = arith.constant dense<0.000000e+00> : vector<160x32xf32>
    %105 = tpu.matmul %102, %104, %cst_96 {dimension_numbers = #tpu.dot_dimension_numbers<[1], [0], [0], [1], [0, 0, 1, 1], [], []>} : vector<160x32xbf16>, vector<32x32xbf16>, vector<160x32xf32> -> vector<160x32xf32>
    %106 = arith.addf %100, %105 : vector<160x32xf32>
    %c21_97 = arith.constant 21 : index
    %c0_98 = arith.constant 0 : index
    %107 = vector.load %arg12[%c21_97, %c0_98] : memref<208x32xf32, #tpu.memory_space<vmem>>, vector<160x32xf32>
    %108 = arith.truncf %107 : vector<160x32xf32> to vector<160x32xbf16>
    %c4_99 = arith.constant 4 : index
    %c0_100 = arith.constant 0 : index
    %c0_101 = arith.constant 0 : index
    %109 = vector.load %arg5[%c4_99, %c0_100, %c0_101] : memref<9x32x32xbf16, #tpu.memory_space<vmem>>, vector<1x32x32xbf16>
    %110 = vector.shape_cast %109 : vector<1x32x32xbf16> to vector<32x32xbf16>
    %cst_102 = arith.constant dense<0.000000e+00> : vector<160x32xf32>
    %111 = tpu.matmul %108, %110, %cst_102 {dimension_numbers = #tpu.dot_dimension_numbers<[1], [0], [0], [1], [0, 0, 1, 1], [], []>} : vector<160x32xbf16>, vector<32x32xbf16>, vector<160x32xf32> -> vector<160x32xf32>
    %112 = arith.addf %106, %111 : vector<160x32xf32>
    %c22_103 = arith.constant 22 : index
    %c0_104 = arith.constant 0 : index
    %113 = vector.load %arg12[%c22_103, %c0_104] : memref<208x32xf32, #tpu.memory_space<vmem>>, vector<160x32xf32>
    %114 = arith.truncf %113 : vector<160x32xf32> to vector<160x32xbf16>
    %c5_105 = arith.constant 5 : index
    %c0_106 = arith.constant 0 : index
    %c0_107 = arith.constant 0 : index
    %115 = vector.load %arg5[%c5_105, %c0_106, %c0_107] : memref<9x32x32xbf16, #tpu.memory_space<vmem>>, vector<1x32x32xbf16>
    %116 = vector.shape_cast %115 : vector<1x32x32xbf16> to vector<32x32xbf16>
    %cst_108 = arith.constant dense<0.000000e+00> : vector<160x32xf32>
    %117 = tpu.matmul %114, %116, %cst_108 {dimension_numbers = #tpu.dot_dimension_numbers<[1], [0], [0], [1], [0, 0, 1, 1], [], []>} : vector<160x32xbf16>, vector<32x32xbf16>, vector<160x32xf32> -> vector<160x32xf32>
    %118 = arith.addf %112, %117 : vector<160x32xf32>
    %c40_109 = arith.constant 40 : index
    %c0_110 = arith.constant 0 : index
    %119 = vector.load %arg12[%c40_109, %c0_110] : memref<208x32xf32, #tpu.memory_space<vmem>>, vector<160x32xf32>
    %120 = arith.truncf %119 : vector<160x32xf32> to vector<160x32xbf16>
    %c6_111 = arith.constant 6 : index
    %c0_112 = arith.constant 0 : index
    %c0_113 = arith.constant 0 : index
    %121 = vector.load %arg5[%c6_111, %c0_112, %c0_113] : memref<9x32x32xbf16, #tpu.memory_space<vmem>>, vector<1x32x32xbf16>
    %122 = vector.shape_cast %121 : vector<1x32x32xbf16> to vector<32x32xbf16>
    %cst_114 = arith.constant dense<0.000000e+00> : vector<160x32xf32>
    %123 = tpu.matmul %120, %122, %cst_114 {dimension_numbers = #tpu.dot_dimension_numbers<[1], [0], [0], [1], [0, 0, 1, 1], [], []>} : vector<160x32xbf16>, vector<32x32xbf16>, vector<160x32xf32> -> vector<160x32xf32>
    %124 = arith.addf %118, %123 : vector<160x32xf32>
    %c41_115 = arith.constant 41 : index
    %c0_116 = arith.constant 0 : index
    %125 = vector.load %arg12[%c41_115, %c0_116] : memref<208x32xf32, #tpu.memory_space<vmem>>, vector<160x32xf32>
    %126 = arith.truncf %125 : vector<160x32xf32> to vector<160x32xbf16>
    %c7_117 = arith.constant 7 : index
    %c0_118 = arith.constant 0 : index
    %c0_119 = arith.constant 0 : index
    %127 = vector.load %arg5[%c7_117, %c0_118, %c0_119] : memref<9x32x32xbf16, #tpu.memory_space<vmem>>, vector<1x32x32xbf16>
    %128 = vector.shape_cast %127 : vector<1x32x32xbf16> to vector<32x32xbf16>
    %cst_120 = arith.constant dense<0.000000e+00> : vector<160x32xf32>
    %129 = tpu.matmul %126, %128, %cst_120 {dimension_numbers = #tpu.dot_dimension_numbers<[1], [0], [0], [1], [0, 0, 1, 1], [], []>} : vector<160x32xbf16>, vector<32x32xbf16>, vector<160x32xf32> -> vector<160x32xf32>
    %130 = arith.addf %124, %129 : vector<160x32xf32>
    %c42_121 = arith.constant 42 : index
    %c0_122 = arith.constant 0 : index
    %131 = vector.load %arg12[%c42_121, %c0_122] : memref<208x32xf32, #tpu.memory_space<vmem>>, vector<160x32xf32>
    %132 = arith.truncf %131 : vector<160x32xf32> to vector<160x32xbf16>
    %c8_123 = arith.constant 8 : index
    %c0_124 = arith.constant 0 : index
    %c0_125 = arith.constant 0 : index
    %133 = vector.load %arg5[%c8_123, %c0_124, %c0_125] : memref<9x32x32xbf16, #tpu.memory_space<vmem>>, vector<1x32x32xbf16>
    %134 = vector.shape_cast %133 : vector<1x32x32xbf16> to vector<32x32xbf16>
    %cst_126 = arith.constant dense<0.000000e+00> : vector<160x32xf32>
    %135 = tpu.matmul %132, %134, %cst_126 {dimension_numbers = #tpu.dot_dimension_numbers<[1], [0], [0], [1], [0, 0, 1, 1], [], []>} : vector<160x32xbf16>, vector<32x32xbf16>, vector<160x32xf32> -> vector<160x32xf32>
    %136 = arith.addf %130, %135 : vector<160x32xf32>
    %c0_127 = arith.constant 0 : index
    %c0_128 = arith.constant 0 : index
    %137 = vector.load %arg6[%c0_127, %c0_128] : memref<1x32xf32, #tpu.memory_space<vmem>>, vector<1x32xf32>
    %138 = vector.broadcast %137 : vector<1x32xf32> to vector<160x32xf32>
    %139 = arith.addf %136, %138 : vector<160x32xf32>
    %cst_129 = arith.constant 0.000000e+00 : f32
    %140 = vector.broadcast %cst_129 : f32 to vector<160x32xf32>
    %141 = arith.maximumf %139, %140 : vector<160x32xf32>
    %142 = arith.truncf %141 : vector<160x32xf32> to vector<160x32xbf16>
    %c0_130 = arith.constant 0 : index
    %c0_131 = arith.constant 0 : index
    %143 = vector.load %arg7[%c0_130, %c0_131] : memref<32x128xbf16, #tpu.memory_space<vmem>>, vector<32x128xbf16>
    %cst_132 = arith.constant dense<0.000000e+00> : vector<160x128xf32>
    %144 = tpu.matmul %142, %143, %cst_132 {dimension_numbers = #tpu.dot_dimension_numbers<[1], [0], [0], [1], [0, 0, 1, 1], [], []>} : vector<160x32xbf16>, vector<32x128xbf16>, vector<160x128xf32> -> vector<160x128xf32>
    %c0_133 = arith.constant 0 : index
    %c0_134 = arith.constant 0 : index
    %145 = vector.load %arg8[%c0_133, %c0_134] : memref<1x128xf32, #tpu.memory_space<vmem>>, vector<1x128xf32>
    %146 = vector.broadcast %145 : vector<1x128xf32> to vector<160x128xf32>
    %147 = arith.addf %144, %146 : vector<160x128xf32>
    %148 = vector.extract_strided_slice %147 {offsets = [0, 0], sizes = [160, 3], strides = [1, 1]} : vector<160x128xf32> to vector<160x3xf32>
    %149 = vector.extract_strided_slice %147 {offsets = [0, 3], sizes = [160, 3], strides = [1, 1]} : vector<160x128xf32> to vector<160x3xf32>
    %150 = vector.extract_strided_slice %147 {offsets = [0, 6], sizes = [160, 3], strides = [1, 1]} : vector<160x128xf32> to vector<160x3xf32>
    %151 = vector.extract_strided_slice %147 {offsets = [0, 9], sizes = [160, 3], strides = [1, 1]} : vector<160x128xf32> to vector<160x3xf32>
    %cst_135 = arith.constant 4.13516665 : f32
    %152 = vector.broadcast %cst_135 : f32 to vector<160x3xf32>
    %153 = arith.minimumf %151, %152 : vector<160x3xf32>
    %154 = vector.extract_strided_slice %147 {offsets = [0, 12], sizes = [160, 3], strides = [1, 1]} : vector<160x128xf32> to vector<160x3xf32>
    %cst_136 = arith.constant 4.13516665 : f32
    %155 = vector.broadcast %cst_136 : f32 to vector<160x3xf32>
    %156 = arith.minimumf %154, %155 : vector<160x3xf32>
    %c0_137 = arith.constant 0 : index
    %c0_138 = arith.constant 0 : index
    %157 = vector.load %arg10[%c0_137, %c0_138] : memref<160x12xf32, #tpu.memory_space<vmem>>, vector<160x3xf32>
    %c0_139 = arith.constant 0 : index
    %c3_140 = arith.constant 3 : index
    %158 = vector.load %arg10[%c0_139, %c3_140] : memref<160x12xf32, #tpu.memory_space<vmem>>, vector<160x3xf32>
    %c8_i32_141 = arith.constant 8 : i32
    %159 = arith.muli %arg1, %c8_i32_141 : i32
    %160 = arith.sitofp %159 : i32 to f32
    %161 = vector.broadcast %160 : f32 to vector<160x3xf32>
    %162 = arith.addf %158, %161 : vector<160x3xf32>
    %c0_142 = arith.constant 0 : index
    %c6_143 = arith.constant 6 : index
    %163 = vector.load %arg10[%c0_142, %c6_143] : memref<160x12xf32, #tpu.memory_space<vmem>>, vector<160x3xf32>
    %c0_144 = arith.constant 0 : index
    %c9 = arith.constant 9 : index
    %164 = vector.load %arg10[%c0_144, %c9] : memref<160x12xf32, #tpu.memory_space<vmem>>, vector<160x3xf32>
    %165 = arith.mulf %149, %163 : vector<160x3xf32>
    %166 = arith.addf %165, %157 : vector<160x3xf32>
    %167 = arith.mulf %150, %163 : vector<160x3xf32>
    %168 = arith.addf %167, %162 : vector<160x3xf32>
    %169 = math.exp %153 : vector<160x3xf32>
    %170 = arith.mulf %169, %163 : vector<160x3xf32>
    %171 = math.exp %156 : vector<160x3xf32>
    %172 = arith.mulf %171, %163 : vector<160x3xf32>
    %cst_145 = arith.constant 5.000000e-01 : f32
    %173 = vector.broadcast %cst_145 : f32 to vector<160x3xf32>
    %174 = arith.mulf %173, %170 : vector<160x3xf32>
    %175 = arith.subf %166, %174 : vector<160x3xf32>
    %cst_146 = arith.constant 0.000000e+00 : f32
    %cst_147 = arith.constant 1.500000e+01 : f32
    %176 = vector.broadcast %cst_146 : f32 to vector<160x3xf32>
    %177 = arith.maximumf %176, %175 : vector<160x3xf32>
    %178 = vector.broadcast %cst_147 : f32 to vector<160x3xf32>
    %179 = arith.minimumf %178, %177 : vector<160x3xf32>
    %cst_148 = arith.constant 5.000000e-01 : f32
    %180 = vector.broadcast %cst_148 : f32 to vector<160x3xf32>
    %181 = arith.mulf %180, %172 : vector<160x3xf32>
    %182 = arith.subf %168, %181 : vector<160x3xf32>
    %cst_149 = arith.constant 0.000000e+00 : f32
    %cst_150 = arith.constant 1.500000e+01 : f32
    %183 = vector.broadcast %cst_149 : f32 to vector<160x3xf32>
    %184 = arith.maximumf %183, %182 : vector<160x3xf32>
    %185 = vector.broadcast %cst_150 : f32 to vector<160x3xf32>
    %186 = arith.minimumf %185, %184 : vector<160x3xf32>
    %cst_151 = arith.constant 5.000000e-01 : f32
    %187 = vector.broadcast %cst_151 : f32 to vector<160x3xf32>
    %188 = arith.mulf %187, %170 : vector<160x3xf32>
    %189 = arith.addf %166, %188 : vector<160x3xf32>
    %cst_152 = arith.constant 1.000000e+00 : f32
    %190 = vector.broadcast %cst_152 : f32 to vector<160x3xf32>
    %191 = arith.subf %189, %190 : vector<160x3xf32>
    %cst_153 = arith.constant 0.000000e+00 : f32
    %cst_154 = arith.constant 1.500000e+01 : f32
    %192 = vector.broadcast %cst_153 : f32 to vector<160x3xf32>
    %193 = arith.maximumf %192, %191 : vector<160x3xf32>
    %194 = vector.broadcast %cst_154 : f32 to vector<160x3xf32>
    %195 = arith.minimumf %194, %193 : vector<160x3xf32>
    %cst_155 = arith.constant 5.000000e-01 : f32
    %196 = vector.broadcast %cst_155 : f32 to vector<160x3xf32>
    %197 = arith.mulf %196, %172 : vector<160x3xf32>
    %198 = arith.addf %168, %197 : vector<160x3xf32>
    %cst_156 = arith.constant 1.000000e+00 : f32
    %199 = vector.broadcast %cst_156 : f32 to vector<160x3xf32>
    %200 = arith.subf %198, %199 : vector<160x3xf32>
    %cst_157 = arith.constant 0.000000e+00 : f32
    %cst_158 = arith.constant 1.500000e+01 : f32
    %201 = vector.broadcast %cst_157 : f32 to vector<160x3xf32>
    %202 = arith.maximumf %201, %200 : vector<160x3xf32>
    %203 = vector.broadcast %cst_158 : f32 to vector<160x3xf32>
    %204 = arith.minimumf %203, %202 : vector<160x3xf32>
    %cst_159 = arith.constant 5.000000e-01 : f32
    %205 = vector.broadcast %cst_159 : f32 to vector<160x3xf32>
    %206 = arith.cmpf ogt, %164, %205 : vector<160x3xf32>
    %cst_160 = arith.constant 1.600000e+01 : f32
    %207 = vector.broadcast %cst_160 : f32 to vector<160x3xf32>
    %208 = arith.cmpf olt, %162, %207 : vector<160x3xf32>
    %209 = arith.andi %206, %208 : vector<160x3xi1>
    %cst_161 = arith.constant -1.000000e+30 : f32
    %210 = vector.broadcast %cst_161 : f32 to vector<160x3xf32>
    %211 = arith.select %209, %148, %210 : vector<160x3xi1>, vector<160x3xf32>
    %cst_162 = arith.constant 0.000000e+00 : f32
    %212 = vector.broadcast %cst_162 : f32 to vector<160x3xf32>
    %213 = arith.select %209, %179, %212 : vector<160x3xi1>, vector<160x3xf32>
    %214 = arith.select %209, %186, %212 : vector<160x3xi1>, vector<160x3xf32>
    %215 = arith.select %209, %195, %212 : vector<160x3xi1>, vector<160x3xf32>
    %216 = arith.select %209, %204, %212 : vector<160x3xi1>, vector<160x3xf32>
    %cst_163 = arith.constant 0.000000e+00 : f32
    %217 = vector.broadcast %cst_163 : f32 to vector<160x113xf32>
    %218 = tpu.concatenate %211, %213, %214, %215, %216, %217 in 1 : vector<160x3xf32>, vector<160x3xf32>, vector<160x3xf32>, vector<160x3xf32>, vector<160x3xf32>, vector<160x113xf32> -> vector<160x128xf32>
    %c0_164 = arith.constant 0 : index
    %c0_165 = arith.constant 0 : index
    %c0_166 = arith.constant 0 : index
    %219 = vector.load %arg11[%c0_164, %c0_165, %c0_166] : memref<1x160x128xf32, #tpu.memory_space<vmem>>, vector<1x160x128xf32>
    %220 = vector.shape_cast %219 : vector<1x160x128xf32> to vector<160x128xf32>
    %221 = vector.shape_cast %218 : vector<160x128xf32> to vector<1x160x128xf32>
    tpu.vector_store %arg11[%c0_164, %c0_165, %c0_166], %221 {strides = array<i32>} : memref<1x160x128xf32, #tpu.memory_space<vmem>>, vector<1x160x128xf32>,
    return
  }
  func.func @transform_0(%arg0: i32, %arg1: i32) -> (i32, i32, i32, i32) {
    %c0_i32 = arith.constant 0 : i32
    %c0_i32_0 = arith.constant 0 : i32
    %c0_i32_1 = arith.constant 0 : i32
    return %arg0, %arg1, %c0_i32, %c0_i32_0 : i32, i32, i32, i32
  }
  func.func @transform_1(%arg0: i32, %arg1: i32) -> (i32, i32, i32) {
    %c0_i32 = arith.constant 0 : i32
    %c0_i32_0 = arith.constant 0 : i32
    %c0_i32_1 = arith.constant 0 : i32
    %c0_i32_2 = arith.constant 0 : i32
    return %c0_i32, %c0_i32_0, %c0_i32_1 : i32, i32, i32
  }
  func.func @transform_2(%arg0: i32, %arg1: i32) -> (i32, i32) {
    %c0_i32 = arith.constant 0 : i32
    %c0_i32_0 = arith.constant 0 : i32
    %c0_i32_1 = arith.constant 0 : i32
    return %c0_i32, %c0_i32_0 : i32, i32
  }
  func.func @transform_3(%arg0: i32, %arg1: i32) -> (i32, i32, i32) {
    %c0_i32 = arith.constant 0 : i32
    %c0_i32_0 = arith.constant 0 : i32
    %c0_i32_1 = arith.constant 0 : i32
    %c0_i32_2 = arith.constant 0 : i32
    return %c0_i32, %c0_i32_0, %c0_i32_1 : i32, i32, i32
  }
  func.func @transform_4(%arg0: i32, %arg1: i32) -> (i32, i32) {
    %c0_i32 = arith.constant 0 : i32
    %c0_i32_0 = arith.constant 0 : i32
    %c0_i32_1 = arith.constant 0 : i32
    return %c0_i32, %c0_i32_0 : i32, i32
  }
  func.func @transform_5(%arg0: i32, %arg1: i32) -> (i32, i32) {
    %c0_i32 = arith.constant 0 : i32
    %c0_i32_0 = arith.constant 0 : i32
    %c0_i32_1 = arith.constant 0 : i32
    return %c0_i32, %c0_i32_0 : i32, i32
  }
  func.func @transform_6(%arg0: i32, %arg1: i32) -> (i32, i32) {
    %c0_i32 = arith.constant 0 : i32
    %c0_i32_0 = arith.constant 0 : i32
    %c0_i32_1 = arith.constant 0 : i32
    return %c0_i32, %c0_i32_0 : i32, i32
  }
  func.func @transform_7(%arg0: i32, %arg1: i32) -> (i32, i32) {
    %c0_i32 = arith.constant 0 : i32
    %c0_i32_0 = arith.constant 0 : i32
    %c0_i32_1 = arith.constant 0 : i32
    return %c0_i32, %c0_i32_0 : i32, i32
  }
  func.func @transform_8(%arg0: i32, %arg1: i32) -> (i32, i32) {
    %c0_i32 = arith.constant 0 : i32
    %c0_i32_0 = arith.constant 0 : i32
    %c0_i32_1 = arith.constant 0 : i32
    return %c0_i32, %c0_i32_0 : i32, i32
  }
  func.func @transform_9(%arg0: i32, %arg1: i32) -> (i32, i32, i32) {
    %c0_i32 = arith.constant 0 : i32
    %c0_i32_0 = arith.constant 0 : i32
    return %arg0, %arg1, %c0_i32 : i32, i32, i32
  }
}

</mosaic_0001>

<bundles_post_ra>
// kernel: tpu_custom_call.1
= control target key start
LH: loop header
LB: loop body
LE: loop exit
PB: predicated region body
PF: predicated region fallthrough
CT: control target
= control target key end

     0   :  { %14 = vsyncpa [#allocation4], 0  ;;  %s14997_s0 = inlined_call_operand.vmem [shape: f32[2,2,260,8], index: 0, kind: input, shape index: {}]   ;;  %s14998_s1 = inlined_call_operand.vmem [shape: f32[9,8,32], index: 1, kind: input, shape index: {}]   ;;  %s14999_s2 = inlined_call_operand.vmem [shape: f32[1,32], index: 2, kind: input, shape index: {}]   ;;  %s15000_s3 = inlined_call_operand.vmem [shape: bf16[9,32,32], index: 3, kind: input, shape index: {}]   ;;  %s15001_s4 = inlined_call_operand.vmem [shape: f32[1,32], index: 4, kind: input, shape index: {}]   ;;  %s15002_s5 = inlined_call_operand.vmem [shape: bf16[32,128], index: 5, kind: input, shape index: {}]   ;;  %s15003_s6 = inlined_call_operand.vmem [shape: f32[1,128], index: 6, kind: input, shape index: {}]   ;;  %s15004_s7 = inlined_call_operand.vmem [shape: f32[200,2], index: 7, kind: input, shape index: {}]   ;;  %s15005_s8 = inlined_call_operand.vmem [shape: f32[160,12], index: 8, kind: input, shape index: {}]   ;;  %s15006_s9 = inlined_call_operand.hbm [shape: f32[2,320,128], index: 9, kind: output, shape index: {}]  }
   0x1   :  { %16 = vsyncpa [#allocation4 + $0x1], 0  ;;  %s10233_s30 = smov 0   ;;  %s10235_s10 = smov 0  }
   0x2   :  { %s10237_s11 = smov 0   ;;  %s10239_s12 = smov 0  }
   0x3   :  { %s10241_s13 = smov 0   ;;  %s10243_s14 = smov 0  }
   0x4   :  { %s10245_s15 = smov 0   ;;  %s10247_s16 = smov 0  }
   0x5 LB: > { %15115 = sst [smem:[#allocation6_spill]] %s10160_s14  ;;  %s8017_s17 = sadd.s32 4294967295, %s10168_s16   ;;  %s10168_s16 = sphi %s10247_s16, %s22_s16   ;;  %s10164_s15 = sphi %s10245_s15, %s15625_s15   ;;  %s10160_s14 = sphi %s10243_s14, %s15624_s14   ;;  %s10156_s13 = sphi %s10241_s13, %s15623_s13   ;;  %s10152_s12 = sphi %s10239_s12, %s15622_s12   ;;  %s10148_s11 = sphi %s10237_s11, %s15628_s11   ;;  %s10144_s10 = sphi %s10235_s10, %s15627_s10   ;;  %s10140_s30 = sphi %s10233_s30, %s15626_s30  }
   0x6   : > { %15116 = sst [smem:[#allocation7_spill]] %s10164_s15  ;;  %s8018_s18 = sadd.s32 4294967294, %s10168_s16  }
   0x7   : > { %s31_s19 = sadd.s32 1, %s10160_s14  ;;  %s34_s20 = sadd.s32 1, %s10164_s15 }
   0x8   : > { %p32_p0 = scmp.ge.s32.totalorder %s31_s19, 2  ;;  %p249_p1 = scmp.ne.s32.totalorder %s10148_s11, %s10144_s10 }
   0x9   : > { %p250_p2 = scmp.eq.s32.totalorder %s8017_s17, 3  ;;  %p255_p5 = scmp.ne.s32.totalorder %s10144_s10, %s10140_s30 }
   0xa   : > { %s15630_s19 = smov (%p32_p0, %s31_s19), 0  ;;  %s15632_s20 = smov (!%p32_p0, %s34_s20), %s10164_s15 }
   0xb   : > { %15117 = sst [smem:[#allocation8_spill]] %s15630_s19  ;;  %s235_s21 = ssub.s32 %s10160_s14, %s15630_s19 }
   0xc   : > { %p10284_p3 = por %p250_p2, %p249_p1  ;;  %p36_p4 = scmp.ge.s32.totalorder %s15632_s20, 2 }
   0xd   : > { %p256_p6 = scmp.eq.s32.totalorder %s8018_s18, 3  ;;  %p8021_p7 = scmp.ge.s32.totalorder %s10168_s16, 1 }
   0xe   : > { %s15634_s20 = smov (%p36_p4, %s15632_s20), 0  ;;  %p310_p9 = scmp.lt.s32.totalorder %s10168_s16, 5 }
   0xf   : > { %15119 = sst [smem:[#allocation9_spill]] %s15634_s20  ;;  %p10293_p8 = por %p256_p6, %p255_p5 }
  0x10   : > { %s234_s24 = ssub.s32 %s10164_s15, %s15634_s20  ;;  %s239_s25 = sadd.s32 1, %s10148_s11 }
  0x11   : > { %s236_s26 = sor.u32 %s235_s21, %s234_s24  ;;  %p311_p10 = pnand %p8021_p7, %p310_p9 }
  0x12   : > { %p237_p11 = scmp.eq.s32.totalorder %s236_s26, 0 }
  0x13   : > { %314 = sbr.rel (%p311_p10) target bundleno = 2152 (0x868), region = 56 }
  0x14   : > { %s10302_s27 = scalar_select %p237_p11, %s10148_s11, %s239_s25  }
  0x16   : > { %15121 = sst [smem:[#allocation10_spill]] %s10302_s27 }
  0x1a   : > { %v8023_v0 = vld [vmem:[%s14998_s1 + $0x8] sm:$0xff]  ;;  %p350_p12 = scmp.lt.s32.totalorder %s10156_s13, 1  ;;  %p352_p13 = scmp.lt.s32.totalorder %s10152_s12, 1  ;;  %v15015_v1 = vmov 0.0   ;;  %vm10171_vm0 = vmmov 0   ;;  %v10320_v2 = vld [vmem:[%s15004_s7 + $0x10] sm:$0xff] }
  0x1b   : > { %8810 = vmatprep.subr.mxu0 %v15015_v1  ;;  %8812 = vmatprep.mubr.msk.f32.mxu0 %vm10171_vm0, %v15015_v1  ;;  %s15010_s17 = sshll.u32 %s10152_s12, 3  ;;  %v15013_v3 = vmov 0   ;;  %v10331_v4 = vld [vmem:[%s15004_s7 + $0x18] sm:$0xff]  ;;  %v10336_v5 = vld [vmem:[%s15004_s7] sm:$0xff]  ;;  %vm15012_vm1 = vcmask 64512   ;;  %v10359_v11 = vld [vmem:[%s15004_s7 + $0x8] sm:$0xff] }
  0x1c   : > { %8811 = vmatpush3.msra.mxu0 %v8023_v0  ;;  %s351_s18 = scalar_select %p350_p12, %s10156_s13, 1  ;;  %9743 = vmatprep.subr.mxu1 %v15015_v1  ;;  %v386_v7 = vld [vmem:[%s14998_s1] sm:$0xff]  ;;  %v10399_v25 = vld [vmem:[%s15004_s7 + $0x30] sm:$0xff]  ;;  %v10418_v31 = vld [vmem:[%s15004_s7 + $0x28] sm:$0xff] }
  0x1d   : > { %8887 = vmatprep.subr.mxu0 %v15015_v1  ;;  %s353_s21 = scalar_select %p352_p13, %s10152_s12, 1  ;;  %9049 = vmatprep.mubr.msk.f32.mxu1 %vm10171_vm0, %v15015_v1  ;;  %v10391_v22 = vld [vmem:[%s15004_s7 + $0x20] sm:$0xff]  ;;  %v10436_v37 = vld [vmem:[%s15004_s7 + $0x38] sm:$0xff]  ;;  %v10458_v44 = vld [vmem:[%s15004_s7 + $0x50] sm:$0xff] }
  0x1e   : > { %s9907_s26 = smul.u32 66, %s351_s18  ;;  %s8258_s28 = sadd.s32 4294967295, %s15010_s17  ;;  %9993 = vset.pattern.permute.xlu1 %v15013_v3  ;;  %9992 = vset.pattern.permute.xlu0 %v15013_v3  ;;  %v10413_v30 = vld [vmem:[%s15004_s7 + $0x40] sm:$0xff]  ;;  %v10478_v50 = vld [vmem:[%s15004_s7 + $0x48] sm:$0xff]  ;;  %v10495_v56 = vld [vmem:[%s15004_s7 + $0x58] sm:$0xff] }
  0x1f   : > { %s9906_s29 = smul.u32 33, %s353_s21  ;;  %s3248_s20 = scvt.s32.f32 %s8258_s28  ;;  %v10473_v49 = vld [vmem:[%s15004_s7 + $0x60] sm:$0xff]  ;;  %v10518_v0 = vld [vmem:[%s15004_s7 + $0x70] sm:$0xff] }
  0x20   : > { %s10173_s14 = smov 127   ;;  %s10174_s24 = smov 125  }
  0x21   : > { %s356_s18 = sadd.s32 %s9907_s26, %s9906_s29  ;;  %v10338_v6 = vstv %s3248_s20  ;;  %s10175_s15 = smov 3  }
  0x22   : > { %s8022_s17 = sshll.u32 %s356_s18, 3  ;;  %v3252_v8 = vadd.f32 %v10338_v6, %v10320_v2  ;;  %v10347_v9 = vadd.f32 %v10338_v6, %v10331_v4  ;;  %v3250_v10 = vadd.f32 %v10338_v6, %v10336_v5  ;;  %v3251_v13 = vadd.f32 %v10338_v6, %v10359_v11  ;;  %s15393_s19 = sshll.u32 %s10152_s12, 3 }
  0x23   : > { %s10354_s20 = scalar_lea.vmem %s14997_s0, %s8022_s17  ;;  %v3254_v24 = vadd.f32 %v10338_v6, %v10391_v22  ;;  %v3256_v26 = vadd.f32 %v10338_v6, %v10399_v25  ;;  %v3258_v33 = vadd.f32 %v10338_v6, %v10413_v30  ;;  %v3255_v35 = vadd.f32 %v10338_v6, %v10418_v31  ;;  %s5889_s21 = scvt.s32.f32 %s15393_s19 }
  0x24   : > { %v387_v12 = vld [vmem:[%s10354_s20 + $0x1] sm:$0xff]  ;;  %vm3302_vm2 = vcmp.ge.f32.partialorder %v3252_v8, 0.0  ;;  %vm3300_vm3 = vcmp.ge.f32.partialorder %v3250_v10, 0.0  ;;  %vm3303_vm4 = vcmp.ge.f32.partialorder %v10347_v9, 0.0  ;;  %v388_v16 = vld [vmem:[%s10354_s20 + $0x9] sm:$0xff]  ;;  %vm3301_vm5 = vcmp.ge.f32.partialorder %v3251_v13, 0.0 }
  0x25   : > { %8813 = vmatmul.mubr.msk.f32.vlgmr.msra.gmra.mrb[0].mxu0 %vm15012_vm1, %v387_v12  ;;  %v3327_v14 = vsel %vm3302_vm2, 1, %v15013_v3  ;;  %v3325_v15 = vsel %vm3300_vm3, 1, %v15013_v3  ;;  %v3328_v17 = vsel %vm3303_vm4, 1, %v15013_v3  ;;  %vm3450_vm6 = vcmp.le.f32.partialorder %v3250_v10, 15.0  ;;  %v389_v19 = vld [vmem:[%s10354_s20 + $0x11] sm:$0xff]  ;;  %v390_v21 = vld [vmem:[%s10354_s20 + $0x19] sm:$0xff] }
  0x26   : > { %8888 = vmatpush3.msra.mxu0 %v386_v7  ;;  %8815 = vmatprep.mubr.msk.f32.mxu0 %vm10171_vm0, %v15015_v1  ;;  %v3326_v18 = vsel %vm3301_vm5, 1, %v15013_v3  ;;  %v3475_v20 = vsel %vm3450_vm6, 1, %v15013_v3  ;;  %vm3452_vm7 = vcmp.le.f32.partialorder %v3252_v8, 15.0  ;;  %vm3451_vm8 = vcmp.le.f32.partialorder %v3251_v13, 15.0  ;;  %v391_v27 = vld [vmem:[%s10354_s20 + $0x21] sm:$0xff]  ;;  %v392_v34 = vld [vmem:[%s10354_s20 + $0x29] sm:$0xff] }
  0x27   : > { %8964 = vmatprep.subr.mxu0 %v15015_v1  ;;  %3354 = vrot.lane.b32.xlu1 %v3327_v14, %s10173_s14  ;;  %v3477_v23 = vsel %vm3452_vm7, 1, %v15013_v3  ;;  %vm3304_vm9 = vcmp.ge.f32.partialorder %v3254_v24, 0.0  ;;  %vm3454_vm10 = vcmp.le.f32.partialorder %v3254_v24, 15.0  ;;  %v3476_v29 = vsel %vm3451_vm8, 1, %v15013_v3  ;;  %v393_v39 = vld [vmem:[%s10354_s20 + $0x31] sm:$0xff]  ;;  %v394_v43 = vld [vmem:[%s10354_s20 + $0x39] sm:$0xff] }
  0x28   : > { %3350 = vrot.lane.b32.xlu0 %v3325_v15, %s10173_s14  ;;  %v3329_v28 = vsel %vm3304_vm9, 1, %v15013_v3  ;;  %v3479_v32 = vsel %vm3454_vm10, 1, %v15013_v3  ;;  %vm3306_vm11 = vcmp.ge.f32.partialorder %v3256_v26, 0.0  ;;  %vm3453_vm12 = vcmp.le.f32.partialorder %v10347_v9, 15.0  ;;  %v395_v48 = vld [vmem:[%s10354_s20 + $0x41] sm:$0xff]  ;;  %v396_v54 = vld [vmem:[%s10354_s20 + $0x49] sm:$0xff] }
  0x29   : > { %8816 = vmatmul.mubr.msk.f32.gmra.mrb[2].mxu0 %vm15012_vm1, %v388_v16  ;;  %v3331_v36 = vsel %vm3306_vm11, 1, %v15013_v3  ;;  %vm3308_vm13 = vcmp.ge.f32.partialorder %v3258_v33, 0.0  ;;  %v3478_v38 = vsel %vm3453_vm12, 1, %v15013_v3  ;;  %vm3305_vm14 = vcmp.ge.f32.partialorder %v3255_v35, 0.0  ;;  %v397_v59 = vld [vmem:[%s10354_s20 + $0x51] sm:$0xff]  ;;  %v398_v63 = vld [vmem:[%s10354_s20 + $0x59] sm:$0xff] }
  0x2a   : > { %8818 = vmatprep.mubr.msk.f32.mxu0 %vm10171_vm0, %v15015_v1  ;;  %v3257_v40 = vadd.f32 %v10338_v6, %v10436_v37  ;;  %v3333_v41 = vsel %vm3308_vm13, 1, %v15013_v3  ;;  %v3330_v42 = vsel %vm3305_vm14, 1, %v15013_v3  ;;  %vm3456_vm15 = vcmp.le.f32.partialorder %v3256_v26, 15.0  ;;  %v399_v10 = vld [vmem:[%s10354_s20 + $0x61] sm:$0xff]  ;;  %s10177_s28 = smov 9   ;;  %s10178_s29 = smov 122  }
  0x2b   : > { %3356 = vrot.lane.b32.xlu1 %v3328_v17, %s10173_s14  ;;  %v3481_v45 = vsel %vm3456_vm15, 1, %v15013_v3  ;;  %vm3458_vm3 = vcmp.le.f32.partialorder %v3258_v33, 15.0  ;;  %v3260_v47 = vadd.f32 %v10338_v6, %v10458_v44  ;;  %vm3455_vm4 = vcmp.le.f32.partialorder %v3255_v35, 15.0  ;;  %v10533_v12 = vld [vmem:[%s15004_s7 + $0x80] sm:$0xff]  ;;  %v10538_v13 = vld [vmem:[%s15004_s7 + $0x68] sm:$0xff]  ;;  %s10179_s17 = smov 119  }
  0x2c   : > { %3352 = vrot.lane.b32.xlu0 %v3326_v18, %s10173_s14  ;;  %vm3307_vm2 = vcmp.ge.f32.partialorder %v3257_v40, 0.0  ;;  %v3483_v51 = vsel %vm3458_vm3, 1, %v15013_v3  ;;  %v3480_v52 = vsel %vm3455_vm4, 1, %v15013_v3  ;;  %v3262_v53 = vadd.f32 %v10338_v6, %v10473_v49  ;;  %v400_v17 = vld [vmem:[%s10354_s20 + $0x69] sm:$0xff]  ;;  %v403_v35 = vld [vmem:[%s10354_s20 + $0x81] sm:$0xff] }
  0x2d   : > { %8819 = vmatmul.mubr.msk.f32.gmra.mrb[4].mxu0 %vm15012_vm1, %v389_v19  ;;  %v3332_v46 = vsel %vm3307_vm2, 1, %v15013_v3  ;;  %vm3310_vm5 = vcmp.ge.f32.partialorder %v3260_v47, 0.0  ;;  %vm3457_vm6 = vcmp.le.f32.partialorder %v3257_v40, 15.0  ;;  %v3259_v55 = vadd.f32 %v10338_v6, %v10478_v50  ;;  %v10555_v19 = vld [vmem:[%s15004_s7 + $0x78] sm:$0xff] }
  0x2e   : > { %8821 = vmatprep.mubr.msk.f32.mxu0 %vm10171_vm0, %v15015_v1  ;;  %v3335_v57 = vsel %vm3310_vm5, 1, %v15013_v3  ;;  %v3482_v58 = vsel %vm3457_vm6, 1, %v15013_v3  ;;  %vm3312_vm7 = vcmp.ge.f32.partialorder %v3262_v53, 0.0  ;;  %v3261_v60 = vadd.f32 %v10338_v6, %v10495_v56 }
  0x2f   : > { %3500 = vrot.lane.b32.xlu1 %v3475_v20, %s10173_s14  ;;  %vm3309_vm8 = vcmp.ge.f32.partialorder %v3259_v55, 0.0  ;;  %v3337_v61 = vsel %vm3312_vm7, 1, %v15013_v3  ;;  %vm3460_vm9 = vcmp.le.f32.partialorder %v3260_v47, 15.0  ;;  %vm3462_vm11 = vcmp.le.f32.partialorder %v3262_v53, 15.0 }
  0x30   : > { %3358 = vrot.lane.b32.xlu0 %v3329_v28, %s10173_s14  ;;  %v3334_v62 = vsel %vm3309_vm8, 1, %v15013_v3  ;;  %vm3311_vm10 = vcmp.ge.f32.partialorder %v3261_v60, 0.0  ;;  %v3485_v7 = vsel %vm3460_vm9, 1, %v15013_v3  ;;  %v3264_v9 = vadd.f32 %v10338_v6, %v10518_v0  ;;  %v402_v28 = vld [vmem:[%s10354_s20 + $0x79] sm:$0xff] }
  0x31   : > { %8822 = vmatmul.mubr.msk.f32.gmra.mrb[6].mxu0 %vm15012_vm1, %v390_v21  ;;  %v3336_v8 = vsel %vm3311_vm10, 1, %v15013_v3  ;;  %vm3459_vm12 = vcmp.le.f32.partialorder %v3259_v55, 15.0  ;;  %v3487_v14 = vsel %vm3462_vm11, 1, %v15013_v3  ;;  %v3266_v16 = vadd.f32 %v10338_v6, %v10533_v12  ;;  %v406_v55 = vld [vmem:[%s10354_s20 + $0x99] sm:$0xff] }
  0x32   : > { %8824 = vmatprep.mubr.msk.f32.mxu0 %vm10171_vm0, %v15015_v1  ;;  %v3484_v15 = vsel %vm3459_vm12, 1, %v15013_v3  ;;  %vm3314_vm13 = vcmp.ge.f32.partialorder %v3264_v9, 0.0  ;;  %vm3461_vm14 = vcmp.le.f32.partialorder %v3261_v60, 15.0  ;;  %v3263_v18 = vadd.f32 %v10338_v6, %v10538_v13 }
  0x33   : > { %3504 = vrot.lane.b32.xlu1 %v3477_v23, %s10173_s14  ;;  %v3339_v20 = vsel %vm3314_vm13, 1, %v15013_v3  ;;  %v3486_v21 = vsel %vm3461_vm14, 1, %v15013_v3  ;;  %vm3316_vm15 = vcmp.ge.f32.partialorder %v3266_v16, 0.0  ;;  %v401_v23 = vld [vmem:[%s10354_s20 + $0x71] sm:$0xff]  ;;  %v3265_v24 = vadd.f32 %v10338_v6, %v10555_v19 }
  0x34   : > { %3502 = vrot.lane.b32.xlu0 %v3476_v29, %s10173_s14  ;;  %vm3313_vm2 = vcmp.ge.f32.partialorder %v3263_v18, 0.0  ;;  %v3341_v26 = vsel %vm3316_vm15, 1, %v15013_v3  ;;  %vm3464_vm3 = vcmp.le.f32.partialorder %v3264_v9, 15.0  ;;  %v10578_v29 = vld [vmem:[%s15004_s7 + $0x90] sm:$0xff]  ;;  %vm3466_vm5 = vcmp.le.f32.partialorder %v3266_v16, 15.0  ;;  %v411_v16 = vld [vmem:[%s10354_s20 + $0xc1] sm:$0xff] }
  0x35   : > { %8825 = vmatmul.mubr.msk.f32.gmra.mrb[8].mxu0 %vm15012_vm1, %v391_v27  ;;  %v3338_v27 = vsel %vm3313_vm2, 1, %v15013_v3  ;;  %vm3315_vm4 = vcmp.ge.f32.partialorder %v3265_v24, 0.0  ;;  %vm3463_vm6 = vcmp.le.f32.partialorder %v3263_v18, 15.0  ;;  %vm3465_vm8 = vcmp.le.f32.partialorder %v3265_v24, 15.0  ;;  %v409_v9 = vld [vmem:[%s10354_s20 + $0xb1] sm:$0xff]  ;;  %v361_v18 = vld [vmem:[%s10354_s20] sm:$0xff] }
  0x36   : > { %8827 = vmatprep.mubr.msk.f32.mxu0 %vm10171_vm0, %v15015_v1  ;;  %v3340_v33 = vsel %vm3315_vm4, 1, %v15013_v3  ;;  %v3488_v40 = vsel %vm3463_vm6, 1, %v15013_v3  ;;  %v3490_v47 = vsel %vm3465_vm8, 1, %v15013_v3  ;;  %v1270_v24 = vld [vmem:[%s10354_s20 + $0x54] sm:$0xff]  ;;  %vm3276_vm2 = vcmp.gt.f32.partialorder %v10359_v11, 0.5  ;;  %v374_v11 = vld [vmem:[%s10354_s20 + $0x68] sm:$0xff] }
  0x37   : > { %3508 = vrot.lane.b32.xlu1 %v3479_v32, %s10173_s14  ;;  %v3489_v32 = vsel %vm3464_vm3, 1, %v15013_v3  ;;  %vm3277_vm6 = vcmp.gt.f32.partialorder %v10320_v2, 0.5 }
  0x38   : > { %3506 = vrot.lane.b32.xlu0 %v3478_v38, %s10173_s14  ;;  %v10598_v38 = vld [vmem:[%s15004_s7 + $0x88] sm:$0xff] }
  0x39   : > { %8828 = vmatmul.mubr.msk.f32.gmra.mrb[10].mxu0 %vm15012_vm1, %v392_v34  ;;  %v3268_v34 = vadd.f32 %v10338_v6, %v10578_v29 }
  0x3a   : > { %8830 = vmatprep.mubr.msk.f32.mxu0 %vm10171_vm0, %v15015_v1 }
  0x3b   : > { %3362 = vrot.lane.b32.xlu1 %v3331_v36, %s10173_s14  ;;  %v10593_v36 = vld [vmem:[%s15004_s7 + $0xa0] sm:$0xff]  ;;  %vm3318_vm7 = vcmp.ge.f32.partialorder %v3268_v34, 0.0  ;;  %vm3468_vm11 = vcmp.le.f32.partialorder %v3268_v34, 15.0 }
  0x3c   : > { %3360 = vrot.lane.b32.xlu0 %v3330_v42, %s10173_s14  ;;  %v404_v42 = vld [vmem:[%s10354_s20 + $0x89] sm:$0xff] }
  0x3d   : > { %8831 = vmatmul.mubr.msk.f32.gmra.mrb[12].mxu0 %vm15012_vm1, %v393_v39  ;;  %v3491_v39 = vsel %vm3466_vm5, 1, %v15013_v3 }
  0x3e   : > { %8833 = vmatprep.mubr.msk.f32.mxu0 %vm10171_vm0, %v15015_v1 }
  0x3f   : > { %3366 = vrot.lane.b32.xlu1 %v3333_v41, %s10173_s14  ;;  %v3270_v41 = vadd.f32 %v10338_v6, %v10593_v36 }
  0x40   : > { %3364 = vrot.lane.b32.xlu0 %v3332_v46, %s10173_s14  ;;  %v3343_v46 = vsel %vm3318_vm7, 1, %v15013_v3 }
  0x41   : > { %8834 = vmatmul.mubr.msk.f32.gmra.mrb[14].mxu0 %vm15012_vm1, %v394_v43  ;;  %v3267_v43 = vadd.f32 %v10338_v6, %v10598_v38  ;;  %vm3320_vm9 = vcmp.ge.f32.partialorder %v3270_v41, 0.0  ;;  %vm3470_vm13 = vcmp.le.f32.partialorder %v3270_v41, 15.0 }
  0x42   : > { %8836 = vmatprep.mubr.msk.f32.mxu0 %vm10171_vm0, %v15015_v1  ;;  %v3495_v60 = vsel %vm3470_vm13, 1, %v15013_v3  ;;  %vm3278_vm13 = vcmp.gt.f32.partialorder %v10331_v4, 0.5  ;;  %v384_v4 = vld [vmem:[%s10354_s20 + $0xb8] sm:$0xff] }
  0x43   : > { %3512 = vrot.lane.b32.xlu1 %v3481_v45, %s10173_s14  ;;  %v10615_v45 = vld [vmem:[%s15004_s7 + $0x98] sm:$0xff]  ;;  %vm3317_vm10 = vcmp.ge.f32.partialorder %v3267_v43, 0.0  ;;  %vm3467_vm14 = vcmp.le.f32.partialorder %v3267_v43, 15.0  ;;  %v367_v43 = vld [vmem:[%s10354_s20 + $0x30] sm:$0xff] }
  0x44   : > { %3510 = vrot.lane.b32.xlu0 %v3480_v52, %s10173_s14  ;;  %v3345_v52 = vsel %vm3320_vm9, 1, %v15013_v3  ;;  %v3342_v53 = vsel %vm3317_vm10, 1, %v15013_v3 }
  0x45   : > { %8837 = vmatmul.mubr.msk.f32.gmra.mrb[16].mxu0 %vm15012_vm1, %v395_v48  ;;  %v405_v48 = vld [vmem:[%s10354_s20 + $0x91] sm:$0xff] }
  0x46   : > { %8839 = vmatprep.mubr.msk.f32.mxu0 %vm10171_vm0, %v15015_v1 }
  0x47   : > { %3516 = vrot.lane.b32.xlu1 %v3483_v51, %s10173_s14  ;;  %v3269_v51 = vadd.f32 %v10338_v6, %v10615_v45 }
  0x48   : > { %3514 = vrot.lane.b32.xlu0 %v3482_v58, %s10173_s14 }
  0x49   : > { %8840 = vmatmul.mubr.msk.f32.gmra.mrb[18].mxu0 %vm15012_vm1, %v396_v54  ;;  %v10634_v54 = vld [vmem:[%s14998_s1 + $0x18] sm:$0xff]  ;;  %vm3319_vm12 = vcmp.ge.f32.partialorder %v3269_v51, 0.0  ;;  %vm3469_vm15 = vcmp.le.f32.partialorder %v3269_v51, 15.0 }
  0x4a   : > { %8842 = vmatprep.mubr.msk.f32.mxu0 %vm10171_vm0, %v15015_v1  ;;  %9744 = vmatpush3.msra.mxu1 %v10634_v54  ;;  %v3344_v58 = vsel %vm3319_vm12, 1, %v15013_v3  ;;  %v368_v51 = vld [vmem:[%s10354_s20 + $0x38] sm:$0xff] }
  0x4b   : > { %3370 = vrot.lane.b32.xlu1 %v3335_v57, %s10173_s14  ;;  %9195 = vmatprep.subr.mxu1 %v15015_v1  ;;  %v3493_v57 = vsel %vm3468_vm11, 1, %v15013_v3  ;;  %vm3275_vm11 = vcmp.gt.f32.partialorder %v10336_v5, 0.5 }
  0x4c   : > { %3368 = vrot.lane.b32.xlu0 %v3334_v62, %s10173_s14  ;;  %v1264_v62 = vld [vmem:[%s10354_s20 + $0x24] sm:$0xff] }
  0x4d   : > { %8843 = vmatmul.mubr.msk.f32.gmra.mrb[20].mxu0 %vm15012_vm1, %v397_v59  ;;  %v407_v59 = vld [vmem:[%s10354_s20 + $0xa1] sm:$0xff]  ;;  %9050 = vmatmul.mubr.msk.f32.vlgmr.msra.gmra.mrb[0].mxu1 %vm15012_vm1, %v1264_v62 }
  0x4e   : > { %8845 = vmatprep.mubr.msk.f32.mxu0 %vm10171_vm0, %v15015_v1  ;;  %9052 = vmatprep.mubr.msk.f32.mxu1 %vm10171_vm0, %v15015_v1 }
  0x4f   : > { %3374 = vrot.lane.b32.xlu1 %v3337_v61, %s10173_s14  ;;  %v3492_v61 = vsel %vm3467_vm14, 1, %v15013_v3 }
  0x50   : > { %3372 = vrot.lane.b32.xlu0 %v3336_v8, %s10173_s14  ;;  %v1265_v8 = vld [vmem:[%s10354_s20 + $0x2c] sm:$0xff] }
  0x51   : > { %8846 = vmatmul.mubr.msk.f32.gmra.mrb[22].mxu0 %vm15012_vm1, %v398_v63  ;;  %v408_v63 = vld [vmem:[%s10354_s20 + $0xa9] sm:$0xff]  ;;  %9053 = vmatmul.mubr.msk.f32.gmra.mrb[2].mxu1 %vm15012_vm1, %v1265_v8 }
  0x52   : > { %8848 = vmatprep.mubr.msk.f32.mxu0 %vm10171_vm0, %v15015_v1  ;;  %9055 = vmatprep.mubr.msk.f32.mxu1 %vm10171_vm0, %v15015_v1 }
  0x53   : > { %3520 = vrot.lane.b32.xlu1 %v3485_v7, %s10173_s14  ;;  %v3494_v7 = vsel %vm3469_vm15, 1, %v15013_v3  ;;  %vm3279_vm15 = vcmp.gt.f32.partialorder %v10391_v22, 0.5 }
  0x54   : > { %3518 = vrot.lane.b32.xlu0 %v3484_v15, %s10173_s14  ;;  %v1267_v15 = vld [vmem:[%s10354_s20 + $0x3c] sm:$0xff] }
  0x55   : > { %8849 = vmatmul.mubr.msk.f32.gmra.mrb[24].mxu0 %vm15012_vm1, %v399_v10  ;;  %v1266_v10 = vld [vmem:[%s10354_s20 + $0x34] sm:$0xff] }
  0x56   : > { %8851 = vmatprep.mubr.msk.f32.mxu0 %vm10171_vm0, %v15015_v1  ;;  %9056 = vmatmul.mubr.msk.f32.gmra.mrb[4].mxu1 %vm15012_vm1, %v1266_v10  ;;  %v1279_v10 = vld [vmem:[%s10354_s20 + $0x9c] sm:$0xff] }
  0x57   : > { %3524 = vrot.lane.b32.xlu1 %v3487_v14, %s10173_s14  ;;  %v410_v14 = vld [vmem:[%s10354_s20 + $0xb9] sm:$0xff]  ;;  %9058 = vmatprep.mubr.msk.f32.mxu1 %vm10171_vm0, %v15015_v1 }
  0x58   : > { %3522 = vrot.lane.b32.xlu0 %v3486_v21, %s10173_s14  ;;  %v1269_v21 = vld [vmem:[%s10354_s20 + $0x4c] sm:$0xff] }
  0x59   : > { %8852 = vmatmul.mubr.msk.f32.gmra.mrb[26].mxu0 %vm15012_vm1, %v400_v17  ;;  %v1268_v17 = vld [vmem:[%s10354_s20 + $0x44] sm:$0xff] }
  0x5a   : > { %8854 = vmatprep.mubr.msk.f32.mxu0 %vm10171_vm0, %v15015_v1  ;;  %9059 = vmatmul.mubr.msk.f32.gmra.mrb[6].mxu1 %vm15012_vm1, %v1267_v15 }
  0x5b   : > { %3378 = vrot.lane.b32.xlu1 %v3339_v20, %s10173_s14  ;;  %9061 = vmatprep.mubr.msk.f32.mxu1 %vm10171_vm0, %v15015_v1  ;;  %v8074_v20 = vld [vmem:[%s14998_s1 + $0x10] sm:$0xff] }
  0x5c   : > { %3376 = vrot.lane.b32.xlu0 %v3338_v27, %s10173_s14  ;;  %v1271_v27 = vld [vmem:[%s10354_s20 + $0x5c] sm:$0xff] }
  0x5d   : > { %8855 = vmatmul.mubr.msk.f32.gmra.mrb[28].mxu0 %vm15012_vm1, %v401_v23  ;;  %v362_v23 = vld [vmem:[%s10354_s20 + $0x8] sm:$0xff] }
  0x5e   : > { %8857 = vmatprep.mubr.msk.f32.mxu0 %vm10171_vm0, %v15015_v1  ;;  %9062 = vmatmul.mubr.msk.f32.gmra.mrb[8].mxu1 %vm15012_vm1, %v1268_v17  ;;  %v1280_v17 = vld [vmem:[%s10354_s20 + $0xa4] sm:$0xff] }
  0x5f   : > { %3382 = vrot.lane.b32.xlu1 %v3341_v26, %s10173_s14  ;;  %9064 = vmatprep.mubr.msk.f32.mxu1 %vm10171_vm0, %v15015_v1  ;;  %v363_v26 = vld [vmem:[%s10354_s20 + $0x10] sm:$0xff] }
  0x60   : > { %3380 = vrot.lane.b32.xlu0 %v3340_v33, %s10173_s14  ;;  %v365_v33 = vld [vmem:[%s10354_s20 + $0x20] sm:$0xff] }
  0x61   : > { %8858 = vmatmul.mubr.msk.f32.gmra.mrb[30].mxu0 %vm15012_vm1, %v402_v28  ;;  %v364_v28 = vld [vmem:[%s10354_s20 + $0x18] sm:$0xff] }
  0x62   : > { %8860 = vmatprep.mubr.msk.f32.mxu0 %vm10171_vm0, %v15015_v1  ;;  %9065 = vmatmul.mubr.msk.f32.gmra.mrb[10].mxu1 %vm15012_vm1, %v1269_v21 }
  0x63   : > { %3528 = vrot.lane.b32.xlu1 %v3489_v32, %s10173_s14  ;;  %9067 = vmatprep.mubr.msk.f32.mxu1 %vm10171_vm0, %v15015_v1  ;;  %v1272_v32 = vld [vmem:[%s10354_s20 + $0x64] sm:$0xff] }
  0x64   : > { %3526 = vrot.lane.b32.xlu0 %v3488_v40, %s10173_s14 }
  0x65   : > { %8861 = vmatmul.mubr.msk.f32.gmra.mrb[32].mxu0 %vm15012_vm1, %v403_v35  ;;  %v1273_v35 = vld [vmem:[%s10354_s20 + $0x6c] sm:$0xff] }
  0x66   : > { %8863 = vmatprep.mubr.msk.f32.mxu0 %vm10171_vm0, %v15015_v1  ;;  %9068 = vmatmul.mubr.msk.f32.gmra.mrb[12].mxu1 %vm15012_vm1, %v1270_v24 }
  0x67   : > { %3532 = vrot.lane.b32.xlu1 %v3491_v39, %s10173_s14  ;;  %9070 = vmatprep.mubr.msk.f32.mxu1 %vm10171_vm0, %v15015_v1  ;;  %v366_v39 = vld [vmem:[%s10354_s20 + $0x28] sm:$0xff] }
  0x68   : > { %3530 = vrot.lane.b32.xlu0 %v3490_v47, %s10173_s14 }
  0x69   : > { %8864 = vmatmul.mubr.msk.f32.gmra.mrb[34].mxu0 %vm15012_vm1, %v404_v42  ;;  %v1274_v42 = vld [vmem:[%s10354_s20 + $0x74] sm:$0xff] }
  0x6a   : > { %8866 = vmatprep.mubr.msk.f32.mxu0 %vm10171_vm0, %v15015_v1  ;;  %9071 = vmatmul.mubr.msk.f32.gmra.mrb[14].mxu1 %vm15012_vm1, %v1271_v27 }
  0x6b   : > { %3386 = vrot.lane.b32.xlu1 %v3343_v46, %s10173_s14  ;;  %9073 = vmatprep.mubr.msk.f32.mxu1 %vm10171_vm0, %v15015_v1 }
  0x6c   : > { %3384 = vrot.lane.b32.xlu0 %v3342_v53, %s10173_s14  ;;  %v1276_v53 = vld [vmem:[%s10354_s20 + $0x84] sm:$0xff] }
  0x6d   : > { %8867 = vmatmul.mubr.msk.f32.gmra.mrb[36].mxu0 %vm15012_vm1, %v405_v48  ;;  %v1275_v48 = vld [vmem:[%s10354_s20 + $0x7c] sm:$0xff] }
  0x6e   : > { %8869 = vmatprep.mubr.msk.f32.mxu0 %vm10171_vm0, %v15015_v1  ;;  %9074 = vmatmul.mubr.msk.f32.gmra.mrb[16].mxu1 %vm15012_vm1, %v1272_v32  ;;  %v375_v32 = vld [vmem:[%s10354_s20 + $0x70] sm:$0xff] }
  0x6f   : > { %3390 = vrot.lane.b32.xlu1 %v3345_v52, %s10173_s14  ;;  %9076 = vmatprep.mubr.msk.f32.mxu1 %vm10171_vm0, %v15015_v1 }
  0x70   : > { %3388 = vrot.lane.b32.xlu0 %v3344_v58, %s10173_s14 }
  0x71   : > { %8870 = vmatmul.mubr.msk.f32.gmra.mrb[38].mxu0 %vm15012_vm1, %v406_v55  ;;  %v369_v55 = vld [vmem:[%s10354_s20 + $0x40] sm:$0xff] }
  0x72   : > { %8872 = vmatprep.mubr.msk.f32.mxu0 %vm10171_vm0, %v15015_v1  ;;  %9077 = vmatmul.mubr.msk.f32.gmra.mrb[18].mxu1 %vm15012_vm1, %v1273_v35 }
  0x73   : > { %3536 = vrot.lane.b32.xlu1 %v3493_v57, %s10173_s14  ;;  %9079 = vmatprep.mubr.msk.f32.mxu1 %vm10171_vm0, %v15015_v1 }
  0x74   : > { %3534 = vrot.lane.b32.xlu0 %v3492_v61, %s10173_s14 }
  0x75   : > { %8873 = vmatmul.mubr.msk.f32.gmra.mrb[40].mxu0 %vm15012_vm1, %v407_v59  ;;  %v1277_v59 = vld [vmem:[%s10354_s20 + $0x8c] sm:$0xff] }
  0x76   : > { %8875 = vmatprep.mubr.msk.f32.mxu0 %vm10171_vm0, %v15015_v1  ;;  %9080 = vmatmul.mubr.msk.f32.gmra.mrb[20].mxu1 %vm15012_vm1, %v1274_v42 }
  0x77   : > { %3540 = vrot.lane.b32.xlu1 %v3495_v60, %s10173_s14  ;;  %9082 = vmatprep.mubr.msk.f32.mxu1 %vm10171_vm0, %v15015_v1  ;;  %v370_v60 = vld [vmem:[%s10354_s20 + $0x48] sm:$0xff] }
  0x78   : > { %3538 = vrot.lane.b32.xlu0 %v3494_v7, %s10173_s14  ;;  %v371_v7 = vld [vmem:[%s10354_s20 + $0x50] sm:$0xff] }
  0x79   : > { %8876 = vmatmul.mubr.msk.f32.gmra.mrb[42].mxu0 %vm15012_vm1, %v408_v63  ;;  %v1278_v63 = vld [vmem:[%s10354_s20 + $0x94] sm:$0xff] }
  0x7a   : > { %8878 = vmatprep.mubr.msk.f32.mxu0 %vm10171_vm0, %v15015_v1  ;;  %9083 = vmatmul.mubr.msk.f32.gmra.mrb[22].mxu1 %vm15012_vm1, %v1275_v48 }
  0x7b   : > { %9085 = vmatprep.mubr.msk.f32.mxu1 %vm10171_vm0, %v15015_v1 }
  0x7d   : > { %8879 = vmatmul.mubr.msk.f32.gmra.mrb[44].mxu0 %vm15012_vm1, %v409_v9 }
  0x7e   : > { %8881 = vmatprep.mubr.msk.f32.mxu0 %vm10171_vm0, %v15015_v1  ;;  %9086 = vmatmul.mubr.msk.f32.gmra.mrb[24].mxu1 %vm15012_vm1, %v1276_v53 }
  0x7f   : > { %9088 = vmatprep.mubr.msk.f32.mxu1 %vm10171_vm0, %v15015_v1 }
  0x81   : > { %8882 = vmatmul.mubr.msk.f32.gmra.mrb[46].mxu0 %vm15012_vm1, %v410_v14  ;;  %v372_v14 = vld [vmem:[%s10354_s20 + $0x58] sm:$0xff] }
  0x82   : > { %8884 = vmatprep.mubr.msk.f32.mxu0 %vm10171_vm0, %v15015_v1  ;;  %9089 = vmatmul.mubr.msk.f32.gmra.mrb[26].mxu1 %vm15012_vm1, %v1277_v59  ;;  %v947_v59 = vld [vmem:[%s10354_s20 + $0x12] sm:$0xff] }
  0x83   : > { %9091 = vmatprep.mubr.msk.f32.mxu1 %vm10171_vm0, %v15015_v1 }
  0x85   : > { %8885 = vmatmul.mubr.msk.f32.gmra.mrb[48].mxu0 %vm15012_vm1, %v411_v16 }
  0x86   : > { %8889 = vmatprep.mubr.msk.f32.mxu0 %vm10171_vm0, %v15015_v1  ;;  %9092 = vmatmul.mubr.msk.f32.gmra.mrb[28].mxu1 %vm15012_vm1, %v1278_v63  ;;  %v379_v63 = vld [vmem:[%s10354_s20 + $0x90] sm:$0xff] }
  0x87   : > { %9094 = vmatprep.mubr.msk.f32.mxu1 %vm10171_vm0, %v15015_v1 }
  0x89   : > { %8890 = vmatmul.mubr.msk.f32.vlgmr.msra.gmra.mrb[50].mxu0 %vm15012_vm1, %v361_v18  ;;  %v373_v18 = vld [vmem:[%s10354_s20 + $0x60] sm:$0xff] }
  0x8a   : > { %8965 = vmatpush3.msra.mxu0 %v8074_v20  ;;  %8892 = vmatprep.mubr.msk.f32.mxu0 %vm10171_vm0, %v15015_v1 }
  0x8b   : > { %9041 = vmatprep.subr.mxu0 %v15015_v1  ;;  %9095 = vmatmul.mubr.msk.f32.gmra.mrb[30].mxu1 %vm15012_vm1, %v1279_v10 }
  0x8c   : > { %9097 = vmatprep.mubr.msk.f32.mxu1 %vm10171_vm0, %v15015_v1 }
  0x8d   : > { %8893 = vmatmul.mubr.msk.f32.gmra.mrb[52].mxu0 %vm15012_vm1, %v362_v23  ;;  %v1281_v23 = vld [vmem:[%s10354_s20 + $0xac] sm:$0xff] }
  0x8e   : > { %8895 = vmatprep.mubr.msk.f32.mxu0 %vm10171_vm0, %v15015_v1 }
  0x8f   : > { %9098 = vmatmul.mubr.msk.f32.gmra.mrb[32].mxu1 %vm15012_vm1, %v1280_v17  ;;  %v1905_v17 = vld [vmem:[%s10354_s20 + $0x5e] sm:$0xff] }
  0x90   : > { %9100 = vmatprep.mubr.msk.f32.mxu1 %vm10171_vm0, %v15015_v1 }
  0x91   : > { %8896 = vmatmul.mubr.msk.f32.gmra.mrb[54].mxu0 %vm15012_vm1, %v363_v26  ;;  %v382_v26 = vld [vmem:[%s10354_s20 + $0xa8] sm:$0xff] }
  0x92   : > { %8898 = vmatprep.mubr.msk.f32.mxu0 %vm10171_vm0, %v15015_v1 }
  0x93   : > { %9101 = vmatmul.mubr.msk.f32.gmra.mrb[34].mxu1 %vm15012_vm1, %v1281_v23 }
  0x94   : > { %9103 = vmatprep.mubr.msk.f32.mxu1 %vm10171_vm0, %v15015_v1 }
  0x95   : > { %8899 = vmatmul.mubr.msk.f32.gmra.mrb[56].mxu0 %vm15012_vm1, %v364_v28  ;;  %v1282_v28 = vld [vmem:[%s10354_s20 + $0xb4] sm:$0xff] }
  0x96   : > { %8901 = vmatprep.mubr.msk.f32.mxu0 %vm10171_vm0, %v15015_v1 }
  0x97   : > { %9104 = vmatmul.mubr.msk.f32.gmra.mrb[36].mxu1 %vm15012_vm1, %v1282_v28  ;;  %v1896_v28 = vld [vmem:[%s10354_s20 + $0x16] sm:$0xff] }
  0x98   : > { %9106 = vmatprep.mubr.msk.f32.mxu1 %vm10171_vm0, %v15015_v1 }
  0x99   : > { %8902 = vmatmul.mubr.msk.f32.gmra.mrb[58].mxu0 %vm15012_vm1, %v365_v33  ;;  %v10734_v34 = vpop.permute.xlu1 %3354 }
  0x9a   : > { %8904 = vmatprep.mubr.msk.f32.mxu0 %vm10171_vm0, %v15015_v1  ;;  %v10740_v40 = vpop.permute.xlu0 %3350  ;;  %vm3402_vm7 = vcmp.ne.s32.totalorder %v10734_v34, 0 }
  0x9b   : > { %vm10839_vm9 = vmand %vm3277_vm6, %vm3402_vm7  ;;  %vm3400_vm12 = vcmp.ne.s32.totalorder %v10740_v40, 0  ;;  %v376_v40 = vld [vmem:[%s10354_s20 + $0x78] sm:$0xff] }
  0x9d   : > { %8905 = vmatmul.mubr.msk.f32.gmra.mrb[60].mxu0 %vm15012_vm1, %v366_v39  ;;  %v10746_v41 = vpop.permute.xlu1 %3356  ;;  %v1283_v39 = vld [vmem:[%s10354_s20 + $0xbc] sm:$0xff] }
  0x9e   : > { %8907 = vmatprep.mubr.msk.f32.mxu0 %vm10171_vm0, %v15015_v1  ;;  %v3353_v46 = vpop.permute.xlu0 %3352  ;;  %vm3403_vm14 = vcmp.ne.s32.totalorder %v10746_v41, 0  ;;  %9107 = vmatmul.mubr.msk.f32.gmra.mrb[38].mxu1 %vm15012_vm1, %v1283_v39  ;;  %v1284_v41 = vld [vmem:[%s10354_s20 + $0xc4] sm:$0xff] }
  0x9f   : > { %vm3401_vm3 = vcmp.ne.s32.totalorder %v3353_v46, 0  ;;  %vm10884_vm7 = vmand %vm3278_vm13, %vm3403_vm14  ;;  %9109 = vmatprep.mubr.msk.f32.mxu1 %vm10171_vm0, %v15015_v1  ;;  %vm3280_vm14 = vcmp.gt.f32.partialorder %v10418_v31, 0.5  ;;  %v377_v46 = vld [vmem:[%s10354_s20 + $0x80] sm:$0xff]  ;;  %v1285_v31 = vld [vmem:[%s10354_s20 + $0xcc] sm:$0xff] }
  0xa0   : > { %vm3426_vm4 = vmand %vm3276_vm2, %vm3401_vm3 }
  0xa1   : > { %8908 = vmatmul.mubr.msk.f32.gmra.mrb[62].mxu0 %vm15012_vm1, %v367_v43  ;;  %v10756_v47 = vpop.permute.xlu1 %3500  ;;  %v1898_v43 = vld [vmem:[%s10354_s20 + $0x26] sm:$0xff] }
  0xa2   : > { %8910 = vmatprep.mubr.msk.f32.mxu0 %vm10171_vm0, %v15015_v1  ;;  %v10772_v57 = vpop.permute.xlu0 %3358  ;;  %9110 = vmatmul.mubr.msk.f32.gmra.mrb[40].mxu1 %vm15012_vm1, %v1284_v41  ;;  %v1899_v41 = vld [vmem:[%s10354_s20 + $0x2e] sm:$0xff] }
  0xa3   : > { %vm3404_vm2 = vcmp.ne.s32.totalorder %v10772_v57, 0  ;;  %9112 = vmatprep.mubr.msk.f32.mxu1 %vm10171_vm0, %v15015_v1 }
  0xa5   : > { %8911 = vmatmul.mubr.msk.f32.gmra.mrb[64].mxu0 %vm15012_vm1, %v368_v51  ;;  %v10766_v52 = vpop.permute.xlu1 %3504 }
  0xa6   : > { %8913 = vmatprep.mubr.msk.f32.mxu0 %vm10171_vm0, %v15015_v1  ;;  %v3503_v61 = vpop.permute.xlu0 %3502  ;;  %vm3552_vm10 = vcmp.ne.s32.totalorder %v10766_v52, 0  ;;  %9113 = vmatmul.mubr.msk.f32.gmra.mrb[42].mxu1 %vm15012_vm1, %v1285_v31  ;;  %v1901_v31 = vld [vmem:[%s10354_s20 + $0x3e] sm:$0xff] }
  0xa7   : > { %vm3551_vm5 = vcmp.ne.s32.totalorder %v3503_v61, 0  ;;  %vm3577_vm3 = vmand %vm10839_vm9, %vm3552_vm10  ;;  %9115 = vmatprep.mubr.msk.f32.mxu1 %vm10171_vm0, %v15015_v1 }
  0xa8   : > { %vm3576_vm8 = vmand %vm3426_vm4, %vm3551_vm5  ;;  %vm3281_vm5 = vcmp.gt.f32.partialorder %v10399_v25, 0.5  ;;  %v3602_v35 = vsel %vm3577_vm3, 1, %v15013_v3 }
  0xa9   : > { %8914 = vmatmul.mubr.msk.f32.gmra.mrb[66].mxu0 %vm15012_vm1, %v369_v55  ;;  %v10778_v58 = vpop.permute.xlu1 %3508  ;;  %v3601_v2 = vsel %vm3576_vm8, 1, %v15013_v3  ;;  %vm10867_vm4 = vmand %vm3275_vm11, %vm3400_vm12  ;;  %vm3550_vm8 = vcmp.ne.s32.totalorder %v10756_v47, 0  ;;  %vm3283_vm12 = vcmp.gt.f32.partialorder %v10413_v30, 0.5  ;;  %v378_v55 = vld [vmem:[%s10354_s20 + $0x88] sm:$0xff] }
  0xaa   : > { %8916 = vmatprep.mubr.msk.f32.mxu0 %vm10171_vm0, %v15015_v1  ;;  %v10794_v8 = vpop.permute.xlu0 %3506  ;;  %3629 = vperm.xlu1 %9993, %v3601_v2   ;;  %vm10895_vm9 = vmand %vm3279_vm15, %vm3404_vm2  ;;  %vm3554_vm10 = vcmp.ne.s32.totalorder %v10778_v58, 0 }
  0xab   : > { %vm3575_vm2 = vmand %vm10867_vm4, %vm3550_vm8 }
  0xac   : > { %v3600_v48 = vsel %vm3575_vm2, 1, %v15013_v3  ;;  %vm3282_vm2 = vcmp.gt.f32.partialorder %v10436_v37, 0.5 }
  0xad   : > { %8917 = vmatmul.mubr.msk.f32.gmra.mrb[68].mxu0 %vm15012_vm1, %v370_v60  ;;  %v10788_v62 = vpop.permute.xlu1 %3362  ;;  %3626 = vperm.xlu0 %9992, %v3600_v48  }
  0xae   : > { %8919 = vmatprep.mubr.msk.f32.mxu0 %vm10171_vm0, %v15015_v1  ;;  %v10806_v15 = vpop.permute.xlu0 %3360  ;;  %vm3406_vm6 = vcmp.ne.s32.totalorder %v10788_v62, 0  ;;  %3632 = vperm.xlu1 %9993, %v3602_v35   ;;  %v1286_v62 = vld [vmem:[%s10354_s20 + $0xd4] sm:$0xff] }
  0xaf   : > { %vm10901_vm11 = vmand %vm3281_vm5, %vm3406_vm6  ;;  %vm3405_vm15 = vcmp.ne.s32.totalorder %v10806_v15, 0  ;;  %vm3553_vm6 = vcmp.ne.s32.totalorder %v10794_v8, 0  ;;  %9116 = vmatmul.mubr.msk.f32.gmra.mrb[44].mxu1 %vm15012_vm1, %v1286_v62  ;;  %v383_v35 = vld [vmem:[%s10354_s20 + $0xb0] sm:$0xff]  ;;  %v948_v62 = vld [vmem:[%s10354_s20 + $0x1a] sm:$0xff] }
  0xb0   : > { %vm3579_vm5 = vmand %vm10895_vm9, %vm3554_vm10  ;;  %vm3285_vm9 = vcmp.gt.f32.partialorder %v10458_v44, 0.5  ;;  %9197 = vmatprep.mubr.msk.f32.mxu1 %vm10171_vm0, %v15015_v1 }
  0xb1   : > { %8920 = vmatmul.mubr.msk.f32.gmra.mrb[70].mxu0 %vm15012_vm1, %v371_v7  ;;  %v10800_v9 = vpop.permute.xlu1 %3366  ;;  %v3604_v52 = vsel %vm3579_vm5, 1, %v15013_v3  ;;  %vm10941_vm8 = vmand %vm3280_vm14, %vm3405_vm15  ;;  %v11201_v7 = vld [vmem:[%s15004_s7 + $0xa8] sm:$0xff] }
  0xb2   : > { %8922 = vmatprep.mubr.msk.f32.mxu0 %vm10171_vm0, %v15015_v1  ;;  %v10819_v20 = vpop.permute.xlu0 %3364  ;;  %vm3408_vm13 = vcmp.ne.s32.totalorder %v10800_v9, 0  ;;  %3638 = vperm.xlu1 %9993, %v3604_v52   ;;  %vm3578_vm15 = vmand %vm10884_vm7, %vm3553_vm6  ;;  %vm3287_vm7 = vcmp.gt.f32.partialorder %v10473_v49, 0.5  ;;  %v945_v52 = vld [vmem:[%s10354_s20 + $0x2] sm:$0xff] }
  0xb3   : > { %vm10931_vm4 = vmand %vm3283_vm12, %vm3408_vm13  ;;  %v3603_v60 = vsel %vm3578_vm15, 1, %v15013_v3  ;;  %vm3286_vm15 = vcmp.gt.f32.partialorder %v10495_v56, 0.5 }
  0xb4   : > { %3635 = vperm.xlu0 %9992, %v3603_v60   ;;  %v11185_v60 = vld [vmem:[%s15004_s7 + $0xb0] sm:$0xff] }
  0xb5   : > { %8923 = vmatmul.mubr.msk.f32.gmra.mrb[72].mxu0 %vm15012_vm1, %v372_v14  ;;  %v10812_v16 = vpop.permute.xlu1 %3512  ;;  %v380_v14 = vld [vmem:[%s10354_s20 + $0x98] sm:$0xff] }
  0xb6   : > { %8925 = vmatprep.mubr.msk.f32.mxu0 %vm10171_vm0, %v15015_v1  ;;  %v10833_v24 = vpop.permute.xlu0 %3510  ;;  %vm3556_vm3 = vcmp.ne.s32.totalorder %v10812_v16, 0 }
  0xb7   : > { %vm3581_vm13 = vmand %vm10901_vm11, %vm3556_vm3  ;;  %vm3555_vm14 = vcmp.ne.s32.totalorder %v10833_v24, 0  ;;  %vm3407_vm11 = vcmp.ne.s32.totalorder %v10819_v20, 0 }
  0xb8   : > { %v3606_v58 = vsel %vm3581_vm13, 1, %v15013_v3  ;;  %vm3284_vm13 = vcmp.gt.f32.partialorder %v10478_v50, 0.5  ;;  %v950_v50 = vld [vmem:[%s10354_s20 + $0x2a] sm:$0xff] }
  0xb9   : > { %8926 = vmatmul.mubr.msk.f32.gmra.mrb[74].mxu0 %vm15012_vm1, %v373_v18  ;;  %v10825_v21 = vpop.permute.xlu1 %3516  ;;  %3644 = vperm.xlu1 %9993, %v3606_v58   ;;  %v381_v18 = vld [vmem:[%s10354_s20 + $0xa0] sm:$0xff] }
  0xba   : > { %8928 = vmatprep.mubr.msk.f32.mxu0 %vm10171_vm0, %v15015_v1  ;;  %v10853_v33 = vpop.permute.xlu0 %3514  ;;  %vm3558_vm12 = vcmp.ne.s32.totalorder %v10825_v21, 0 }
  0xbb   : > { %vm3583_vm6 = vmand %vm10931_vm4, %vm3558_vm12  ;;  %vm3557_vm12 = vcmp.ne.s32.totalorder %v10853_v33, 0 }
  0xbc   : > { %v3608_v61 = vsel %vm3583_vm6, 1, %v15013_v3  ;;  %vm11003_vm4 = vmand %vm3282_vm2, %vm3407_vm11 }
  0xbd   : > { %8929 = vmatmul.mubr.msk.f32.gmra.mrb[76].mxu0 %vm15012_vm1, %v374_v11  ;;  %v10844_v27 = vpop.permute.xlu1 %3370  ;;  %3650 = vperm.xlu1 %9993, %v3608_v61   ;;  %vm3582_vm6 = vmand %vm11003_vm4, %vm3557_vm12  ;;  %v1903_v61 = vld [vmem:[%s10354_s20 + $0x4e] sm:$0xff] }
  0xbe   : > { %8931 = vmatprep.mubr.msk.f32.mxu0 %vm10171_vm0, %v15015_v1  ;;  %v10889_v25 = vpop.permute.xlu0 %3368  ;;  %vm3410_vm10 = vcmp.ne.s32.totalorder %v10844_v27, 0  ;;  %v3607_v16 = vsel %vm3582_vm6, 1, %v15013_v3 }
  0xbf   : > { %vm10975_vm3 = vmand %vm3285_vm9, %vm3410_vm10 }
  0xc0   : > { %vm3580_vm10 = vmand %vm10941_vm8, %vm3555_vm14  ;;  %vm3409_vm14 = vcmp.ne.s32.totalorder %v10889_v25, 0 }
  0xc1   : > { %8932 = vmatmul.mubr.msk.f32.gmra.mrb[78].mxu0 %vm15012_vm1, %v375_v32  ;;  %v10873_v34 = vpop.permute.xlu1 %3374  ;;  %v3605_v9 = vsel %vm3580_vm10, 1, %v15013_v3 }
  0xc2   : > { %8934 = vmatprep.mubr.msk.f32.mxu0 %vm10171_vm0, %v15015_v1  ;;  %v10919_v47 = vpop.permute.xlu0 %3372  ;;  %vm3412_vm5 = vcmp.ne.s32.totalorder %v10873_v34, 0  ;;  %3641 = vperm.xlu0 %9992, %v3605_v9   ;;  %v1897_v34 = vld [vmem:[%s10354_s20 + $0x1e] sm:$0xff] }
  0xc3   : > { %vm11013_vm8 = vmand %vm3287_vm7, %vm3412_vm5  ;;  %vm3411_vm2 = vcmp.ne.s32.totalorder %v10919_v47, 0  ;;  %vm3289_vm7 = vcmp.gt.f32.partialorder %v10518_v0, 0.5 }
  0xc4   : > { %vm11051_vm10 = vmand %vm3286_vm15, %vm3411_vm2 }
  0xc5   : > { %8935 = vmatmul.mubr.msk.f32.gmra.mrb[80].mxu0 %vm15012_vm1, %v376_v40  ;;  %v3521_v22 = vpop.permute.xlu1 %3520 }
  0xc6   : > { %8937 = vmatprep.mubr.msk.f32.mxu0 %vm10171_vm0, %v15015_v1  ;;  %v10962_v57 = vpop.permute.xlu0 %3518  ;;  %vm3560_vm9 = vcmp.ne.s32.totalorder %v3521_v22, 0  ;;  %3647 = vperm.xlu0 %9992, %v3607_v16  }
  0xc7   : > { %vm3585_vm11 = vmand %vm10975_vm3, %vm3560_vm9  ;;  %vm3559_vm4 = vcmp.ne.s32.totalorder %v10962_v57, 0 }
  0xc8   : > { %v3610_v49 = vsel %vm3585_vm11, 1, %v15013_v3  ;;  %vm11041_vm3 = vmand %vm3284_vm13, %vm3409_vm14  ;;  %vm3291_vm13 = vcmp.gt.f32.partialorder %v10533_v12, 0.5  ;;  %vm3288_vm11 = vcmp.gt.f32.partialorder %v10538_v13, 0.5  ;;  %v8152_v12 = vld [vmem:[%s14998_s1 + $0x28] sm:$0xff]  ;;  %v951_v13 = vld [vmem:[%s10354_s20 + $0x32] sm:$0xff] }
  0xc9   : > { %8938 = vmatmul.mubr.msk.f32.gmra.mrb[82].mxu0 %vm15012_vm1, %v377_v46  ;;  %v10951_v30 = vpop.permute.xlu1 %3524  ;;  %3656 = vperm.xlu1 %9993, %v3610_v49   ;;  %v385_v46 = vld [vmem:[%s10354_s20 + $0xc0] sm:$0xff] }
  0xca   : > { %8940 = vmatprep.mubr.msk.f32.mxu0 %vm10171_vm0, %v15015_v1  ;;  %v3523_v8 = vpop.permute.xlu0 %3522  ;;  %vm3562_vm9 = vcmp.ne.s32.totalorder %v10951_v30, 0  ;;  %9196 = vmatpush3.msra.mxu1 %v8152_v12  ;;  %v949_v49 = vld [vmem:[%s10354_s20 + $0x22] sm:$0xff]  ;;  %v952_v12 = vld [vmem:[%s10354_s20 + $0x3a] sm:$0xff] }
  0xcb   : > { %vm3587_vm15 = vmand %vm11013_vm8, %vm3562_vm9  ;;  %vm3290_vm9 = vcmp.gt.f32.partialorder %v10555_v19, 0.5  ;;  %9349 = vmatprep.subr.mxu1 %v15015_v1 }
  0xcc   : > { %v3612_v21 = vsel %vm3587_vm15, 1, %v15013_v3 }
  0xcd   : > { %8941 = vmatmul.mubr.msk.f32.gmra.mrb[84].mxu0 %vm15012_vm1, %v378_v55  ;;  %v3379_v44 = vpop.permute.xlu1 %3378  ;;  %3662 = vperm.xlu1 %9993, %v3612_v21   ;;  %v946_v55 = vld [vmem:[%s10354_s20 + $0xa] sm:$0xff] }
  0xce   : > { %8943 = vmatprep.mubr.msk.f32.mxu0 %vm10171_vm0, %v15015_v1  ;;  %vm3414_vm5 = vcmp.ne.s32.totalorder %v3379_v44, 0  ;;  %v3377_v15 = vpop.permute.xlu0 %3376  ;;  %v3272_v44 = vadd.f32 %v10338_v6, %v11185_v60  ;;  %v1906_v21 = vld [vmem:[%s10354_s20 + $0x66] sm:$0xff] }
  0xcf   : > { %vm11056_vm12 = vmand %vm3289_vm7, %vm3414_vm5  ;;  %vm3413_vm6 = vcmp.ne.s32.totalorder %v3377_v15, 0  ;;  %vm3561_vm5 = vcmp.ne.s32.totalorder %v3523_v8, 0  ;;  %v3271_v8 = vadd.f32 %v10338_v6, %v11201_v7 }
  0xd0   : > { %vm3584_vm7 = vmand %vm11041_vm3, %vm3559_vm4  ;;  %vm15152_vm3 = vcmask 64512  }
  0xd1   : > { %8944 = vmatmul.mubr.msk.f32.gmra.mrb[86].mxu0 %vm15012_vm1, %v379_v63  ;;  %v3383_v37 = vpop.permute.xlu1 %3382  ;;  %v3609_v23 = vsel %vm3584_vm7, 1, %v15013_v3  ;;  %vm11081_vm8 = vmand %vm3288_vm11, %vm3413_vm6 }
  0xd2   : > { %8946 = vmatprep.mubr.msk.f32.mxu0 %vm10171_vm0, %v15015_v1  ;;  %vm3416_vm14 = vcmp.ne.s32.totalorder %v3383_v37, 0  ;;  %v3381_v20 = vpop.permute.xlu0 %3380  ;;  %3653 = vperm.xlu0 %9992, %v3609_v23   ;;  %vm15155_vm6 = vmmov %vm15152_vm3  ;;  %v1904_v37 = vld [vmem:[%s10354_s20 + $0x56] sm:$0xff] }
  0xd3   : > { %vm3415_vm15 = vcmp.ne.s32.totalorder %v3381_v20, 0  ;;  %9198 = vmatmul.mubr.msk.f32.vlgmr.msra.gmra.mrb[46].mxu1 %vm15155_vm6, %v1896_v28  ;;  %vm3292_vm6 = vcmp.gt.f32.partialorder %v10598_v38, 0.5  ;;  %v1900_v38 = vld [vmem:[%s10354_s20 + $0x36] sm:$0xff]  ;;  %v953_v28 = vld [vmem:[%s10354_s20 + $0x42] sm:$0xff] }
  0xd4   : > { %9200 = vmatprep.mubr.msk.f32.mxu1 %vm10171_vm0, %v15015_v1 }
  0xd5   : > { %8947 = vmatmul.mubr.msk.f32.gmra.mrb[88].mxu0 %vm15012_vm1, %v380_v14  ;;  %v3529_v56 = vpop.permute.xlu1 %3528  ;;  %vm11076_vm1 = vmand %vm3291_vm13, %vm3416_vm14 }
  0xd6   : > { %8949 = vmatprep.mubr.msk.f32.mxu0 %vm10171_vm0, %v15015_v1  ;;  %vm3564_vm2 = vcmp.ne.s32.totalorder %v3529_v56, 0  ;;  %v3527_v27 = vpop.permute.xlu0 %3526  ;;  %vm3586_vm14 = vmand %vm11051_vm10, %vm3561_vm5 }
  0xd7   : > { %vm3589_vm4 = vmand %vm11056_vm12, %vm3564_vm2  ;;  %vm3563_vm11 = vcmp.ne.s32.totalorder %v3527_v27, 0  ;;  %v3611_v33 = vsel %vm3586_vm14, 1, %v15013_v3 }
  0xd8   : > { %v3614_v2 = vsel %vm3589_vm4, 1, %v15013_v3  ;;  %vm11103_vm12 = vmand %vm3290_vm9, %vm3415_vm15  ;;  %3659 = vperm.xlu0 %9992, %v3611_v33   ;;  %vm3293_vm15 = vcmp.gt.f32.partialorder %v10578_v29, 0.5 }
  0xd9   : > { %8950 = vmatmul.mubr.msk.f32.gmra.mrb[90].mxu0 %vm15152_vm3, %v381_v18  ;;  %v3533_v24 = vpop.permute.xlu1 %3532  ;;  %3668 = vperm.xlu1 %9993, %v3614_v2   ;;  %vm15156_vm2 = vmmov %vm15152_vm3  ;;  %v1908_v2 = vld [vmem:[%s10354_s20 + $0x76] sm:$0xff] }
  0xda   : > { %8952 = vmatprep.mubr.msk.f32.mxu0 %vm10171_vm0, %v15015_v1  ;;  %vm3566_vm13 = vcmp.ne.s32.totalorder %v3533_v24, 0  ;;  %vm3588_vm7 = vmand %vm11081_vm8, %vm3563_vm11  ;;  %v3531_v39 = vpop.permute.xlu0 %3530  ;;  %v1907_v24 = vld [vmem:[%s10354_s20 + $0x6e] sm:$0xff] }
  0xdb   : > { %vm3591_vm10 = vmand %vm11076_vm1, %vm3566_vm13  ;;  %v3613_v40 = vsel %vm3588_vm7, 1, %v15013_v3  ;;  %vm3565_vm1 = vcmp.ne.s32.totalorder %v3531_v39, 0  ;;  %v1910_v39 = vld [vmem:[%s10354_s20 + $0x86] sm:$0xff] }
  0xdc   : > { %v3616_v5 = vsel %vm3591_vm10, 1, %v15013_v3  ;;  %vm15157_vm5 = vmmov %vm15156_vm2  ;;  %3665 = vperm.xlu0 %9992, %v3613_v40   ;;  %v955_v40 = vld [vmem:[%s10354_s20 + $0x52] sm:$0xff] }
  0xdd   : > { %8953 = vmatmul.mubr.msk.f32.gmra.mrb[92].mxu0 %vm15156_vm2, %v382_v26  ;;  %v3387_v19 = vpop.permute.xlu1 %3386  ;;  %9201 = vmatmul.mubr.msk.f32.gmra.mrb[48].mxu1 %vm15157_vm5, %v1897_v34  ;;  %vm3590_vm8 = vmand %vm11103_vm12, %vm3565_vm1  ;;  %vm3295_vm12 = vcmp.gt.f32.partialorder %v10593_v36, 0.5 }
  0xde   : > { %8955 = vmatprep.mubr.msk.f32.mxu0 %vm10171_vm0, %v15015_v1  ;;  %3674 = vperm.xlu1 %9993, %v3616_v5   ;;  %vm15158_vm9 = vmmov %vm15156_vm2  ;;  %vm3418_vm3 = vcmp.ne.s32.totalorder %v3387_v19, 0  ;;  %v3615_v25 = vsel %vm3590_vm8, 1, %v15013_v3  ;;  %v3385_v22 = vpop.permute.xlu0 %3384  ;;  %v1909_v19 = vld [vmem:[%s10354_s20 + $0x7e] sm:$0xff]  ;;  %v954_v5 = vld [vmem:[%s10354_s20 + $0x4a] sm:$0xff] }
  0xdf   : > { %9203 = vmatprep.mubr.msk.f32.mxu1 %vm10171_vm0, %v15015_v1  ;;  %vm15159_vm4 = vmmov %vm15156_vm2  ;;  %vm3417_vm10 = vcmp.ne.s32.totalorder %v3385_v22, 0 }
  0xe0   : > { %vm3443_vm13 = vmand %vm3293_vm15, %vm3418_vm3  ;;  %3671 = vperm.xlu0 %9992, %v3615_v25   ;;  %vm3294_vm15 = vcmp.gt.f32.partialorder %v10615_v45, 0.5 }
  0xe1   : > { %8956 = vmatmul.mubr.msk.f32.gmra.mrb[94].mxu0 %vm15158_vm9, %v383_v35  ;;  %v3391_v42 = vpop.permute.xlu1 %3390  ;;  %9204 = vmatmul.mubr.msk.f32.gmra.mrb[50].mxu1 %vm15159_vm4, %v1898_v43  ;;  %vm15160_vm14 = vmmov %vm15156_vm2  ;;  %v1911_v43 = vld [vmem:[%s10354_s20 + $0x8e] sm:$0xff] }
  0xe2   : > { %8958 = vmatprep.mubr.msk.f32.mxu0 %vm10171_vm0, %v15015_v1  ;;  %9206 = vmatprep.mubr.msk.f32.mxu1 %vm10171_vm0, %v15015_v1  ;;  %vm3420_vm11 = vcmp.ne.s32.totalorder %v3391_v42, 0  ;;  %v3389_v47 = vpop.permute.xlu0 %3388  ;;  %vm15161_vm1 = vmmov %vm15159_vm4 }
  0xe3   : > { %vm11146_vm5 = vmand %vm3295_vm12, %vm3420_vm11  ;;  %vm3419_vm3 = vcmp.ne.s32.totalorder %v3389_v47, 0 }
  0xe4   : > { %vm15164_vm8 = vmmov %vm15161_vm1 }
  0xe5   : > { %8959 = vmatmul.mubr.msk.f32.gmra.mrb[96].mxu0 %vm15160_vm14, %v384_v4  ;;  %v3537_v29 = vpop.permute.xlu1 %3536  ;;  %9207 = vmatmul.mubr.msk.f32.gmra.mrb[52].mxu1 %vm15161_vm1, %v1899_v41  ;;  %vm3442_vm9 = vmand %vm3292_vm6, %vm3417_vm10  ;;  %v956_v4 = vld [vmem:[%s10354_s20 + $0x5a] sm:$0xff] }
  0xe6   : > { %8961 = vmatprep.mubr.msk.f32.mxu0 %vm10171_vm0, %v15015_v1  ;;  %vm3568_vm2 = vcmp.ne.s32.totalorder %v3537_v29, 0  ;;  %9209 = vmatprep.mubr.msk.f32.mxu1 %vm10171_vm0, %v15015_v1  ;;  %v3535_v53 = vpop.permute.xlu0 %3534  ;;  %vm15165_vm12 = vmmov %vm15161_vm1  ;;  %v1912_v41 = vld [vmem:[%s10354_s20 + $0x96] sm:$0xff] }
  0xe7   : > { %vm3593_vm7 = vmand %vm3443_vm13, %vm3568_vm2  ;;  %vm3567_vm13 = vcmp.ne.s32.totalorder %v3535_v53, 0  ;;  %v1914_v53 = vld [vmem:[%s10354_s20 + $0xa6] sm:$0xff] }
  0xe8   : > { %v3618_v36 = vsel %vm3593_vm7, 1, %v15013_v3  ;;  %vm3592_vm11 = vmand %vm3442_vm9, %vm3567_vm13  ;;  %vm3472_vm13 = vcmp.le.f32.partialorder %v3272_v44, 15.0 }
  0xe9   : > { %8962 = vmatmul.mubr.msk.f32.gmra.mrb[98].mxu0 %vm15164_vm8, %v385_v46  ;;  %v3541_v51 = vpop.permute.xlu1 %3540  ;;  %3680 = vperm.xlu1 %9993, %v3618_v36   ;;  %vm15166_vm6 = vmmov %vm15161_vm1  ;;  %v3617_v45 = vsel %vm3592_vm11, 1, %v15013_v3  ;;  %v3497_v14 = vsel %vm3472_vm13, 1, %v15013_v3  ;;  %v957_v46 = vld [vmem:[%s10354_s20 + $0x62] sm:$0xff] }
  0xea   : > { %8966 = vmatprep.mubr.msk.f32.mxu0 %vm10171_vm0, %v15015_v1  ;;  %vm3570_vm4 = vcmp.ne.s32.totalorder %v3541_v51, 0  ;;  %9210 = vmatmul.mubr.msk.f32.gmra.mrb[54].mxu1 %vm15165_vm12, %v1900_v38  ;;  %vm3444_vm10 = vmand %vm3294_vm15, %vm3419_vm3  ;;  %v3539_v57 = vpop.permute.xlu0 %3538  ;;  %vm3322_vm15 = vcmp.ge.f32.partialorder %v3272_v44, 0.0  ;;  %v1913_v36 = vld [vmem:[%s10354_s20 + $0x9e] sm:$0xff]  ;;  %v958_v51 = vld [vmem:[%s10354_s20 + $0x6a] sm:$0xff] }
  0xeb   : > { %vm3595_vm14 = vmand %vm11146_vm5, %vm3570_vm4  ;;  %9212 = vmatprep.mubr.msk.f32.mxu1 %vm10171_vm0, %v15015_v1  ;;  %3677 = vperm.xlu0 %9992, %v3617_v45   ;;  %vm3569_vm2 = vcmp.ne.s32.totalorder %v3539_v57, 0  ;;  %v3347_v63 = vsel %vm3322_vm15, 1, %v15013_v3  ;;  %v960_v57 = vld [vmem:[%s10354_s20 + $0x7a] sm:$0xff]  ;;  %v961_v44 = vld [vmem:[%s10354_s20 + $0x82] sm:$0xff] }
  0xec   : > { %v3620_v30 = vsel %vm3595_vm14, 1, %v15013_v3  ;;  %vm3594_vm7 = vmand %vm3444_vm10, %vm3569_vm2  ;;  %vm3321_vm14 = vcmp.ge.f32.partialorder %v3271_v8, 0.0 }
  0xed   : > { %8967 = vmatmul.mubr.msk.f32.vlgmr.msra.gmra.mrb[100].mxu0 %vm15166_vm6, %v945_v52  ;;  %3686 = vperm.xlu1 %9993, %v3620_v30   ;;  %vm15167_vm5 = vmmov %vm15161_vm1  ;;  %v3619_v58 = vsel %vm3594_vm7, 1, %v15013_v3  ;;  %v3346_v0 = vsel %vm3321_vm14, 1, %v15013_v3  ;;  %vm3471_vm6 = vcmp.le.f32.partialorder %v3271_v8, 15.0  ;;  %v959_v30 = vld [vmem:[%s10354_s20 + $0x72] sm:$0xff]  ;;  %v962_v8 = vld [vmem:[%s10354_s20 + $0x8a] sm:$0xff] }
  0xee   : > { %9042 = vmatpush3.msra.mxu0 %v10634_v54  ;;  %8969 = vmatprep.mubr.msk.f32.mxu0 %vm10171_vm0, %v15015_v1  ;;  %v1902_v54 = vld [vmem:[%s10354_s20 + $0x46] sm:$0xff]  ;;  %vm15168_vm8 = vmmov %vm15161_vm1  ;;  %v3496_v56 = vsel %vm3471_vm6, 1, %v15013_v3 }
  0xef   : > { %9118 = vmatprep.subr.mxu0 %v15015_v1  ;;  %9213 = vmatmul.mubr.msk.f32.gmra.mrb[56].mxu1 %vm15161_vm1, %v1901_v31  ;;  %vm15169_vm9 = vmmov %vm15161_vm1 }
  0xf0   : > { %9215 = vmatprep.mubr.msk.f32.mxu1 %vm10171_vm0, %v15015_v1  ;;  %3683 = vperm.xlu0 %9992, %v3619_v58   ;;  %vm15170_vm3 = vmmov %vm15161_vm1 }
  0xf1   : > { %8970 = vmatmul.mubr.msk.f32.gmra.mrb[102].mxu0 %vm15167_vm5, %v946_v55  ;;  %3394 = vrot.lane.b32.xlu1 %v3347_v63, %s10173_s14  ;;  %vm15171_vm4 = vmmov %vm15161_vm1  ;;  %v1915_v55 = vld [vmem:[%s10354_s20 + $0xae] sm:$0xff]  ;;  %v1917_v63 = vld [vmem:[%s10354_s20 + $0xbe] sm:$0xff] }
  0xf2   : > { %8972 = vmatprep.mubr.msk.f32.mxu0 %vm10171_vm0, %v15015_v1  ;;  %vm15172_vm12 = vmmov %vm15161_vm1 }
  0xf3   : > { %9216 = vmatmul.mubr.msk.f32.gmra.mrb[58].mxu1 %vm15168_vm8, %v1902_v54  ;;  %vm15173_vm11 = vmmov %vm15161_vm1 }
  0xf4   : > { %9218 = vmatprep.mubr.msk.f32.mxu1 %vm10171_vm0, %v15015_v1  ;;  %3392 = vrot.lane.b32.xlu0 %v3346_v0, %s10173_s14  ;;  %vm15174_vm10 = vmmov %vm15161_vm1 }
  0xf5   : > { %8973 = vmatmul.mubr.msk.f32.gmra.mrb[104].mxu0 %vm15169_vm9, %v947_v59  ;;  %3544 = vrot.lane.b32.xlu1 %v3497_v14, %s10173_s14  ;;  %vm15175_vm2 = vmmov %vm15161_vm1  ;;  %v1916_v59 = vld [vmem:[%s10354_s20 + $0xb6] sm:$0xff] }
  0xf6   : > { %8975 = vmatprep.mubr.msk.f32.mxu0 %vm10171_vm0, %v15015_v1  ;;  %vm15176_vm7 = vmmov %vm15161_vm1  ;;  %v963_v14 = vld [vmem:[%s10354_s20 + $0x92] sm:$0xff] }
  0xf7   : > { %9219 = vmatmul.mubr.msk.f32.gmra.mrb[60].mxu1 %vm15170_vm3, %v1903_v61  ;;  %vm15177_vm5 = vmmov %vm15161_vm1 }
  0xf8   : > { %v11206_v9 = vpop.f32.mrb[0].mxu0  ;;  %9221 = vmatprep.mubr.msk.f32.mxu1 %vm10171_vm0, %v15015_v1  ;;  %3542 = vrot.lane.b32.xlu0 %v3496_v56, %s10173_s14  ;;  %vm15178_vm8 = vmmov %vm15161_vm1 }
  0xf9   : > { %v8814_v10 = vpop.f32.mrb[1].mxu0  ;;  %8976 = vmatmul.mubr.msk.f32.gmra.mrb[106].mxu0 %vm15171_vm4, %v948_v62  ;;  %vm15179_vm9 = vmmov %vm15161_vm1 }
  0xfa   : > { %8978 = vmatprep.mubr.msk.f32.mxu0 %vm10171_vm0, %v15015_v1  ;;  %vm15180_vm15 = vmmov %vm15161_vm1 }
  0xfb   : > { %9222 = vmatmul.mubr.msk.f32.gmra.mrb[62].mxu1 %vm15172_vm12, %v1904_v37  ;;  %vm15181_vm3 = vmmov %vm15161_vm1 }
  0xfc   : > { %v11220_v15 = vpop.f32.mrb[2].mxu0  ;;  %9224 = vmatprep.mubr.msk.f32.mxu1 %vm10171_vm0, %v15015_v1  ;;  %vm15182_vm4 = vmmov %vm15161_vm1 }
  0xfd   : > { %v8817_v16 = vpop.f32.mrb[3].mxu0  ;;  %8979 = vmatmul.mubr.msk.f32.gmra.mrb[108].mxu0 %vm15173_vm11, %v949_v49  ;;  %vm15183_vm13 = vmmov %vm15161_vm1  ;;  %v1918_v49 = vld [vmem:[%s10354_s20 + $0xc6] sm:$0xff] }
  0xfe   : > { %8981 = vmatprep.mubr.msk.f32.mxu0 %vm10171_vm0, %v15015_v1  ;;  %vm15184_vm14 = vmmov %vm15161_vm1 }
  0xff   : > { %9225 = vmatmul.mubr.msk.f32.gmra.mrb[64].mxu1 %vm15174_vm10, %v1905_v17  ;;  %vm15185_vm12 = vmmov %vm15161_vm1  ;;  %v1919_v17 = vld [vmem:[%s10354_s20 + $0xce] sm:$0xff] }
 0x100   : > { %v11232_v18 = vpop.f32.mrb[4].mxu0  ;;  %9227 = vmatprep.mubr.msk.f32.mxu1 %vm10171_vm0, %v15015_v1  ;;  %vm15186_vm11 = vmmov %vm15161_vm1 }
 0x101   : > { %v8820_v20 = vpop.f32.mrb[5].mxu0  ;;  %8982 = vmatmul.mubr.msk.f32.gmra.mrb[110].mxu0 %vm15175_vm2, %v950_v50  ;;  %vm15187_vm6 = vmmov %vm15161_vm1  ;;  %v964_v50 = vld [vmem:[%s10354_s20 + $0x9a] sm:$0xff] }
 0x102   : > { %8984 = vmatprep.mubr.msk.f32.mxu0 %vm10171_vm0, %v15015_v1  ;;  %vm15188_vm10 = vmmov %vm15161_vm1 }
 0x103   : > { %9228 = vmatmul.mubr.msk.f32.gmra.mrb[66].mxu1 %vm15176_vm7, %v1906_v21  ;;  %vm15189_vm2 = vmmov %vm15161_vm1  ;;  %v1920_v21 = vld [vmem:[%s10354_s20 + $0xd6] sm:$0xff] }
 0x104   : > { %v11242_v23 = vpop.f32.mrb[6].mxu0  ;;  %9230 = vmatprep.mubr.msk.f32.mxu1 %vm10171_vm0, %v15015_v1  ;;  %vm15190_vm7 = vmmov %vm15161_vm1 }
 0x105   : > { %v8823_v11 = vpop.f32.mrb[7].mxu0  ;;  %8985 = vmatmul.mubr.msk.f32.gmra.mrb[112].mxu0 %vm15161_vm1, %v951_v13  ;;  %v8204_v13 = vld [vmem:[%s14998_s1 + $0x38] sm:$0xff] }
 0x106   : > { %8987 = vmatprep.mubr.msk.f32.mxu0 %vm10171_vm0, %v15015_v1  ;;  %v965_v11 = vld [vmem:[%s10354_s20 + $0xa2] sm:$0xff]  ;;  %9350 = vmatpush3.msra.mxu1 %v8204_v13 }
 0x107   : > { %9231 = vmatmul.mubr.msk.f32.gmra.mrb[68].mxu1 %vm15177_vm5, %v1907_v24  ;;  %vm15191_vm5 = vmmov %vm15161_vm1 }
 0x108   : > { %v11252_v26 = vpop.f32.mrb[8].mxu0  ;;  %9233 = vmatprep.mubr.msk.f32.mxu1 %vm10171_vm0, %v15015_v1 }
 0x109   : > { %v8826_v27 = vpop.f32.mrb[9].mxu0  ;;  %8988 = vmatmul.mubr.msk.f32.gmra.mrb[114].mxu0 %vm15178_vm8, %v952_v12  ;;  %vm15192_vm8 = vmmov %vm15161_vm1 }
 0x10a   : > { %8990 = vmatprep.mubr.msk.f32.mxu0 %vm10171_vm0, %v15015_v1 }
 0x10b   : > { %9234 = vmatmul.mubr.msk.f32.gmra.mrb[70].mxu1 %vm15179_vm9, %v1908_v2  ;;  %vm15193_vm9 = vmmov %vm15161_vm1  ;;  %v966_v2 = vld [vmem:[%s10354_s20 + $0xaa] sm:$0xff] }
 0x10c   : > { %v11262_v32 = vpop.f32.mrb[10].mxu0  ;;  %9236 = vmatprep.mubr.msk.f32.mxu1 %vm10171_vm0, %v15015_v1 }
 0x10d   : > { %v8829_v33 = vpop.f32.mrb[11].mxu0  ;;  %8991 = vmatmul.mubr.msk.f32.gmra.mrb[116].mxu0 %vm15180_vm15, %v953_v28  ;;  %vm15194_vm15 = vmmov %vm15161_vm1  ;;  %v2530_v28 = vld [vmem:[%s10354_s20 + $0x29] sm:$0xff] }
 0x10e   : > { %8993 = vmatprep.mubr.msk.f32.mxu0 %vm10171_vm0, %v15015_v1 }
 0x10f   : > { %9237 = vmatmul.mubr.msk.f32.gmra.mrb[72].mxu1 %vm15181_vm3, %v1909_v19  ;;  %vm15195_vm3 = vmmov %vm15161_vm1 }
 0x110   : > { %v11272_v34 = vpop.f32.mrb[12].mxu0  ;;  %9239 = vmatprep.mubr.msk.f32.mxu1 %vm10171_vm0, %v15015_v1 }
 0x111   : > { %v8832_v35 = vpop.f32.mrb[13].mxu0  ;;  %8994 = vmatmul.mubr.msk.f32.gmra.mrb[118].mxu0 %vm15182_vm4, %v954_v5  ;;  %vm15196_vm4 = vmmov %vm15161_vm1 }
 0x112   : > { %8996 = vmatprep.mubr.msk.f32.mxu0 %vm10171_vm0, %v15015_v1  ;;  %v2531_v35 = vld [vmem:[%s10354_s20 + $0x31] sm:$0xff] }
 0x113   : > { %9240 = vmatmul.mubr.msk.f32.gmra.mrb[74].mxu1 %vm15183_vm13, %v1910_v39  ;;  %vm15197_vm13 = vmmov %vm15161_vm1  ;;  %v967_v39 = vld [vmem:[%s10354_s20 + $0xb2] sm:$0xff] }
 0x114   : > { %v11282_v42 = vpop.f32.mrb[14].mxu0  ;;  %9242 = vmatprep.mubr.msk.f32.mxu1 %vm10171_vm0, %v15015_v1 }
 0x115   : > { %v8835_v25 = vpop.f32.mrb[15].mxu0  ;;  %8997 = vmatmul.mubr.msk.f32.gmra.mrb[120].mxu0 %vm15184_vm14, %v955_v40  ;;  %vm15198_vm14 = vmmov %vm15161_vm1 }
 0x116   : > { %8999 = vmatprep.mubr.msk.f32.mxu0 %vm10171_vm0, %v15015_v1 }
 0x117   : > { %9243 = vmatmul.mubr.msk.f32.gmra.mrb[76].mxu1 %vm15185_vm12, %v1911_v43  ;;  %vm15199_vm12 = vmmov %vm15161_vm1  ;;  %v2532_v43 = vld [vmem:[%s10354_s20 + $0x39] sm:$0xff] }
 0x118   : > { %v11292_v22 = vpop.f32.mrb[16].mxu0  ;;  %9245 = vmatprep.mubr.msk.f32.mxu1 %vm10171_vm0, %v15015_v1 }
 0x119   : > { %v8838_v29 = vpop.f32.mrb[17].mxu0  ;;  %9000 = vmatmul.mubr.msk.f32.gmra.mrb[122].mxu0 %vm15186_vm11, %v956_v4  ;;  %vm15200_vm11 = vmmov %vm15161_vm1  ;;  %v968_v4 = vld [vmem:[%s10354_s20 + $0xba] sm:$0xff] }
 0x11a   : > { %9002 = vmatprep.mubr.msk.f32.mxu0 %vm10171_vm0, %v15015_v1 }
 0x11b   : > { %9246 = vmatmul.mubr.msk.f32.gmra.mrb[78].mxu1 %vm15187_vm6, %v1912_v41  ;;  %vm15201_vm6 = vmmov %vm15161_vm1 }
 0x11c   : > { %v11302_v47 = vpop.f32.mrb[18].mxu0  ;;  %9248 = vmatprep.mubr.msk.f32.mxu1 %vm10171_vm0, %v15015_v1 }
 0x11d   : > { %v8841_v48 = vpop.f32.mrb[19].mxu0  ;;  %9003 = vmatmul.mubr.msk.f32.gmra.mrb[124].mxu0 %vm15188_vm10, %v957_v46  ;;  %vm15202_vm10 = vmmov %vm15161_vm1 }
 0x11e   : > { %9005 = vmatprep.mubr.msk.f32.mxu0 %vm10171_vm0, %v15015_v1 }
 0x11f   : > { %9249 = vmatmul.mubr.msk.f32.gmra.mrb[80].mxu1 %vm15189_vm2, %v1913_v36  ;;  %vm15203_vm2 = vmmov %vm15161_vm1 }
 0x120   : > { %v11312_v38 = vpop.f32.mrb[20].mxu0  ;;  %9251 = vmatprep.mubr.msk.f32.mxu1 %vm10171_vm0, %v15015_v1  ;;  %v11427_v36 = vpop.f32.mrb[0].mxu1 }
 0x121   : > { %v8844_v52 = vpop.f32.mrb[21].mxu0  ;;  %9006 = vmatmul.mubr.msk.f32.gmra.mrb[126].mxu0 %vm15190_vm7, %v958_v51  ;;  %vm15205_vm7 = vmmov %vm15161_vm1  ;;  %v969_v51 = vld [vmem:[%s10354_s20 + $0xc2] sm:$0xff] }
 0x122   : > { %9008 = vmatprep.mubr.msk.f32.mxu0 %vm10171_vm0, %v15015_v1  ;;  %v2533_v52 = vld [vmem:[%s10354_s20 + $0x41] sm:$0xff] }
 0x123   : > { %9252 = vmatmul.mubr.msk.f32.gmra.mrb[82].mxu1 %vm15161_vm1, %v1914_v53  ;;  %v9051_v53 = vpop.f32.mrb[1].mxu1 }
 0x124   : > { %v11322_v45 = vpop.f32.mrb[22].mxu0  ;;  %9254 = vmatprep.mubr.msk.f32.mxu1 %vm10171_vm0, %v15015_v1  ;;  %v2537_v53 = vld [vmem:[%s10354_s20 + $0x61] sm:$0xff] }
 0x125   : > { %v8847_v31 = vpop.f32.mrb[23].mxu0  ;;  %9009 = vmatmul.mubr.msk.f32.gmra.mrb[128].mxu0 %vm15191_vm5, %v959_v30  ;;  %vm15207_vm5 = vmmov %vm15161_vm1 }
 0x126   : > { %9011 = vmatprep.mubr.msk.f32.mxu0 %vm10171_vm0, %v15015_v1 }
 0x127   : > { %9255 = vmatmul.mubr.msk.f32.gmra.mrb[84].mxu1 %vm15192_vm8, %v1915_v55  ;;  %vm15208_vm8 = vmmov %vm15161_vm1 }
 0x128   : > { %v11332_v58 = vpop.f32.mrb[24].mxu0  ;;  %9257 = vmatprep.mubr.msk.f32.mxu1 %vm10171_vm0, %v15015_v1 }
 0x129   : > { %v8850_v54 = vpop.f32.mrb[25].mxu0  ;;  %9012 = vmatmul.mubr.msk.f32.gmra.mrb[130].mxu0 %vm15193_vm9, %v960_v57  ;;  %v11389_v27 = vpop.permute.xlu1 %3629  ;;  %vm15211_vm9 = vmmov %vm15161_vm1 }
 0x12a   : > { %9014 = vmatprep.mubr.msk.f32.mxu0 %vm10171_vm0, %v15015_v1  ;;  %15204 = vst [vmem:[#allocation11_spill] sm:$0xff] %v11389_v27  ;;  %v11443_v54 = vpop.f32.mrb[2].mxu1 }
 0x12b   : > { %9258 = vmatmul.mubr.msk.f32.gmra.mrb[86].mxu1 %vm15194_vm15, %v1916_v59  ;;  %vm15212_vm15 = vmmov %vm15161_vm1  ;;  %v1262_v59 = vld [vmem:[%s10354_s20 + $0x14] sm:$0xff] }
 0x12c   : > { %v11342_v61 = vpop.f32.mrb[26].mxu0  ;;  %9260 = vmatprep.mubr.msk.f32.mxu1 %vm10171_vm0, %v15015_v1  ;;  %v11419_v29 = vpop.permute.xlu0 %3626 }
 0x12d   : > { %v8853_v62 = vpop.f32.mrb[27].mxu0  ;;  %9015 = vmatmul.mubr.msk.f32.gmra.mrb[132].mxu0 %vm15195_vm3, %v961_v44  ;;  %v11401_v5 = vpop.permute.xlu1 %3632  ;;  %15209 = vst [vmem:[#allocation13_spill] sm:$0xff] %v11419_v29  ;;  %vm15215_vm3 = vmmov %vm15161_vm1  ;;  %v2534_v44 = vld [vmem:[%s10354_s20 + $0x49] sm:$0xff] }
 0x12e   : > { %9017 = vmatprep.mubr.msk.f32.mxu0 %vm10171_vm0, %v15015_v1  ;;  %15206 = vst [vmem:[#allocation12_spill] sm:$0xff] %v11401_v5  ;;  %v9054_v62 = vpop.f32.mrb[3].mxu1 }
 0x12f   : > { %9261 = vmatmul.mubr.msk.f32.gmra.mrb[88].mxu1 %vm15196_vm4, %v1917_v63  ;;  %vm15216_vm4 = vmmov %vm15161_vm1  ;;  %v8126_v63 = vld [vmem:[%s14998_s1 + $0x20] sm:$0xff] }
 0x130   : > { %v11352_v10 = vpop.f32.mrb[28].mxu0  ;;  %9263 = vmatprep.mubr.msk.f32.mxu1 %vm10171_vm0, %v15015_v1 }
 0x131   : > { %v8856_v37 = vpop.f32.mrb[29].mxu0  ;;  %9018 = vmatmul.mubr.msk.f32.gmra.mrb[134].mxu0 %vm15197_vm13, %v962_v8  ;;  %v11421_v41 = vpop.permute.xlu1 %3638  ;;  %vm15219_vm13 = vmmov %vm15161_vm1 }
 0x132   : > { %9020 = vmatprep.mubr.msk.f32.mxu0 %vm10171_vm0, %v15015_v1  ;;  %15210 = vst [vmem:[#allocation14_spill] sm:$0xff] %v11421_v41 }
 0x133   : > { %9264 = vmatmul.mubr.msk.f32.gmra.mrb[90].mxu1 %vm15198_vm14, %v1918_v49  ;;  %v11437_v31 = vpop.permute.xlu0 %3635  ;;  %vm15220_vm14 = vmmov %vm15161_vm1 }
 0x134   : > { %v11362_v0 = vpop.f32.mrb[30].mxu0  ;;  %9266 = vmatprep.mubr.msk.f32.mxu1 %vm10171_vm0, %v15015_v1  ;;  %15214 = vst [vmem:[#allocation16_spill] sm:$0xff] %v11437_v31 }
 0x135   : > { %v8859_v16 = vpop.f32.mrb[31].mxu0  ;;  %9021 = vmatmul.mubr.msk.f32.gmra.mrb[136].mxu0 %vm15199_vm12, %v963_v14  ;;  %vm15223_vm12 = vmmov %vm15161_vm1 }
 0x136   : > { %9023 = vmatprep.mubr.msk.f32.mxu0 %vm10171_vm0, %v15015_v1  ;;  %v11462_v16 = vpop.f32.mrb[4].mxu1 }
 0x137   : > { %9267 = vmatmul.mubr.msk.f32.gmra.mrb[92].mxu1 %vm15200_vm11, %v1919_v17  ;;  %v1263_v17 = vld [vmem:[%s10354_s20 + $0x1c] sm:$0xff]  ;;  %vm15224_vm11 = vmmov %vm15161_vm1 }
 0x138   : > { %v11372_v56 = vpop.f32.mrb[32].mxu0  ;;  %9269 = vmatprep.mubr.msk.f32.mxu1 %vm10171_vm0, %v15015_v1  ;;  %v11435_v30 = vpop.permute.xlu1 %3644 }
 0x139   : > { %v8862_v20 = vpop.f32.mrb[33].mxu0  ;;  %9024 = vmatmul.mubr.msk.f32.gmra.mrb[138].mxu0 %vm15201_vm6, %v964_v50  ;;  %15213 = vst [vmem:[#allocation15_spill] sm:$0xff] %v11435_v30  ;;  %v2535_v50 = vld [vmem:[%s10354_s20 + $0x51] sm:$0xff]  ;;  %vm15227_vm6 = vmmov %vm15161_vm1 }
 0x13a   : > { %9026 = vmatprep.mubr.msk.f32.mxu0 %vm10171_vm0, %v15015_v1  ;;  %v9057_v20 = vpop.f32.mrb[5].mxu1 }
 0x13b   : > { %9270 = vmatmul.mubr.msk.f32.gmra.mrb[94].mxu1 %vm15202_vm10, %v1920_v21  ;;  %vm15228_vm10 = vmmov %vm15161_vm1  ;;  %v2538_v20 = vld [vmem:[%s10354_s20 + $0x69] sm:$0xff] }
 0x13c   : > { %v11385_v24 = vpop.f32.mrb[34].mxu0  ;;  %9351 = vmatprep.mubr.msk.f32.mxu1 %vm10171_vm0, %v15015_v1  ;;  %v11454_v8 = vpop.permute.xlu1 %3650 }
 0x13d   : > { %v8865_v12 = vpop.f32.mrb[35].mxu0  ;;  %9027 = vmatmul.mubr.msk.f32.gmra.mrb[140].mxu0 %vm15203_vm2, %v965_v11  ;;  %15217 = vst [vmem:[#allocation17_spill] sm:$0xff] %v11454_v8  ;;  %vm15231_vm2 = vmmov %vm15161_vm1 }
 0x13e   : > { %9029 = vmatprep.mubr.msk.f32.mxu0 %vm10171_vm0, %v15015_v1 }
 0x13f   : > { %9352 = vmatmul.mubr.msk.f32.vlgmr.msra.gmra.mrb[96].mxu1 %vm15205_vm7, %v2530_v28  ;;  %v1579_v28 = vld [vmem:[%s10354_s20 + $0x15] sm:$0xff]  ;;  %vm15232_vm7 = vmmov %vm15161_vm1 }
 0x140   : > { %v11397_v33 = vpop.f32.mrb[36].mxu0  ;;  %9354 = vmatprep.mubr.msk.f32.mxu1 %vm10171_vm0, %v15015_v1 }
 0x141   : > { %v8868_v19 = vpop.f32.mrb[37].mxu0  ;;  %9030 = vmatmul.mubr.msk.f32.gmra.mrb[142].mxu0 %vm15161_vm1, %v966_v2  ;;  %v11456_v37 = vpop.permute.xlu0 %3641 }
 0x142   : > { %9032 = vmatprep.mubr.msk.f32.mxu0 %vm10171_vm0, %v15015_v1  ;;  %15218 = vst [vmem:[#allocation18_spill] sm:$0xff] %v11456_v37  ;;  %v11479_v2 = vpop.f32.mrb[6].mxu1  ;;  %v2536_v19 = vld [vmem:[%s10354_s20 + $0x59] sm:$0xff] }
 0x143   : > { %9355 = vmatmul.mubr.msk.f32.gmra.mrb[98].mxu1 %vm15207_vm5, %v2531_v35  ;;  %v9060_v35 = vpop.f32.mrb[7].mxu1  ;;  %vm15233_vm5 = vmmov %vm15161_vm1 }
 0x144   : > { %v11409_v40 = vpop.f32.mrb[38].mxu0  ;;  %9357 = vmatprep.mubr.msk.f32.mxu1 %vm10171_vm0, %v15015_v1 }
 0x145   : > { %v8871_v25 = vpop.f32.mrb[39].mxu0  ;;  %9033 = vmatmul.mubr.msk.f32.gmra.mrb[144].mxu0 %vm15208_vm8, %v967_v39  ;;  %v11473_v13 = vpop.permute.xlu0 %3647  ;;  %v8178_v39 = vld [vmem:[%s14998_s1 + $0x30] sm:$0xff]  ;;  %vm15236_vm8 = vmmov %vm15161_vm1 }
 0x146   : > { %9035 = vmatprep.mubr.msk.f32.mxu0 %vm10171_vm0, %v15015_v1  ;;  %15222 = vst [vmem:[#allocation20_spill] sm:$0xff] %v11473_v13 }
 0x147   : > { %9358 = vmatmul.mubr.msk.f32.gmra.mrb[100].mxu1 %vm15211_vm9, %v2532_v43  ;;  %vm15237_vm9 = vmmov %vm15161_vm1 }
 0x148   : > { %v11423_v46 = vpop.f32.mrb[40].mxu0  ;;  %9360 = vmatprep.mubr.msk.f32.mxu1 %vm10171_vm0, %v15015_v1  ;;  %v11471_v21 = vpop.permute.xlu1 %3656 }
 0x149   : > { %v8874_v48 = vpop.f32.mrb[41].mxu0  ;;  %9036 = vmatmul.mubr.msk.f32.gmra.mrb[146].mxu0 %vm15212_vm15, %v968_v4  ;;  %15221 = vst [vmem:[#allocation19_spill] sm:$0xff] %v11471_v21  ;;  %vm15240_vm15 = vmmov %vm15161_vm1 }
 0x14a   : > { %9038 = vmatprep.mubr.msk.f32.mxu0 %vm10171_vm0, %v15015_v1 }
 0x14b   : > { %9361 = vmatmul.mubr.msk.f32.gmra.mrb[102].mxu1 %vm15215_vm3, %v2533_v52  ;;  %v1580_v52 = vld [vmem:[%s10354_s20 + $0x1d] sm:$0xff]  ;;  %vm15241_vm3 = vmmov %vm15161_vm1 }
 0x14c   : > { %v11439_v55 = vpop.f32.mrb[42].mxu0  ;;  %9363 = vmatprep.mubr.msk.f32.mxu1 %vm10171_vm0, %v15015_v1  ;;  %v11490_v25 = vpop.permute.xlu1 %3662 }
 0x14d   : > { %v8877_v57 = vpop.f32.mrb[43].mxu0  ;;  %9039 = vmatmul.mubr.msk.f32.gmra.mrb[148].mxu0 %vm15216_vm4, %v969_v51  ;;  %15225 = vst [vmem:[#allocation21_spill] sm:$0xff] %v11490_v25  ;;  %v11498_v51 = vpop.f32.mrb[8].mxu1  ;;  %vm15243_vm4 = vmmov %vm15161_vm1  ;;  %v11664_v25 = vld [vmem:[%s15004_s7 + $0xb8] sm:$0xff] }
 0x14e   : > { %9043 = vmatprep.mubr.msk.f32.mxu0 %vm10171_vm0, %v15015_v1  ;;  %v9063_v57 = vpop.f32.mrb[9].mxu1 }
 0x14f   : > { %9364 = vmatmul.mubr.msk.f32.gmra.mrb[104].mxu1 %vm15219_vm13, %v2534_v44  ;;  %vm15244_vm13 = vmmov %vm15161_vm1 }
 0x150   : > { %v11458_v49 = vpop.f32.mrb[44].mxu0  ;;  %9366 = vmatprep.mubr.msk.f32.mxu1 %vm10171_vm0, %v15015_v1 }
 0x151   : > { %v8880_v14 = vpop.f32.mrb[45].mxu0  ;;  %9044 = vmatmul.mubr.msk.f32.vlgmr.msra.gmra.mrb[150].mxu0 %vm15220_vm14, %v1262_v59  ;;  %v11492_v43 = vpop.permute.xlu0 %3653  ;;  %vm3297_vm14 = vcmp.gt.f32.partialorder %v11185_v60, 0.5 }
 0x152   : > { %9119 = vmatpush3.msra.mxu0 %v8126_v63  ;;  %9046 = vmatprep.mubr.msk.f32.mxu0 %vm10171_vm0, %v15015_v1  ;;  %15226 = vst [vmem:[#allocation22_spill] sm:$0xff] %v11492_v43  ;;  %v15259_v43 = vmov 0.0  }
 0x153   : > { %9272 = vmatprep.subr.mxu0 %v15015_v1  ;;  %9367 = vmatmul.mubr.msk.f32.gmra.mrb[106].mxu1 %vm15223_vm12, %v2535_v50  ;;  %v11521_v50 = vpop.f32.mrb[10].mxu1  ;;  %vm15246_vm12 = vmmov %vm15161_vm1 }
 0x154   : > { %v11475_v11 = vpop.f32.mrb[46].mxu0  ;;  %9369 = vmatprep.mubr.msk.f32.mxu1 %vm10171_vm0, %v15015_v1 }
 0x155   : > { %v8883_v12 = vpop.f32.mrb[47].mxu0  ;;  %9047 = vmatmul.mubr.msk.f32.gmra.mrb[152].mxu0 %vm15224_vm11, %v1263_v17  ;;  %v1581_v17 = vld [vmem:[%s10354_s20 + $0x25] sm:$0xff]  ;;  %vm15247_vm11 = vmmov %vm15161_vm1 }
 0x156   : > { %9120 = vmatprep.mubr.msk.f32.mxu0 %vm10171_vm0, %v15015_v1 }
 0x157   : > { %9370 = vmatmul.mubr.msk.f32.gmra.mrb[108].mxu1 %vm15227_vm6, %v2536_v19  ;;  %v11507_v59 = vpop.permute.xlu0 %3659 }
 0x158   : > { %v11494_v4 = vpop.f32.mrb[48].mxu0  ;;  %9372 = vmatprep.mubr.msk.f32.mxu1 %vm10171_vm0, %v15015_v1  ;;  %15229 = vst [vmem:[#allocation23_spill] sm:$0xff] %v11507_v59  ;;  %v11509_v62 = vpop.permute.xlu1 %3668 }
 0x159   : > { %v8886_v48 = vpop.f32.mrb[49].mxu0  ;;  %9121 = vmatmul.mubr.msk.f32.vlgmr.msra.gmra.mrb[154].mxu0 %vm15228_vm10, %v1579_v28  ;;  %15230 = vst [vmem:[#allocation24_spill] sm:$0xff] %v11509_v62  ;;  %v9066_v28 = vpop.f32.mrb[11].mxu1 }
 0x15a   : > { %9273 = vmatpush3.msra.mxu0 %v8178_v39  ;;  %9123 = vmatprep.mubr.msk.f32.mxu0 %vm10171_vm0, %v15015_v1  ;;  %v1582_v39 = vld [vmem:[%s10354_s20 + $0x2d] sm:$0xff] }
 0x15b   : > { %9426 = vmatprep.subr.mxu0 %v15015_v1  ;;  %9373 = vmatmul.mubr.msk.f32.gmra.mrb[110].mxu1 %vm15231_vm2, %v2537_v53  ;;  %v11529_v35 = vpop.permute.xlu0 %3665  ;;  %v2539_v53 = vld [vmem:[%s10354_s20 + $0x71] sm:$0xff]  ;;  %vm15249_vm2 = vmmov %vm15161_vm1 }
 0x15c   : > { %v821_v44 = vpop.f32.mrb[50].mxu0  ;;  %9375 = vmatprep.mubr.msk.f32.mxu1 %vm10171_vm0, %v15015_v1  ;;  %15234 = vst [vmem:[#allocation25_spill] sm:$0xff] %v11529_v35 }
 0x15d   : > { %v8891_v63 = vpop.f32.mrb[51].mxu0  ;;  %9124 = vmatmul.mubr.msk.f32.gmra.mrb[156].mxu0 %vm15232_vm7, %v1580_v52  ;;  %v11514_v14 = vadd.f32 %v821_v44, %v11206_v9  ;;  %v11536_v48 = vpop.permute.xlu1 %3674  ;;  %vm15250_vm7 = vmmov %vm15161_vm1 }
 0x15e   : > { %9126 = vmatprep.mubr.msk.f32.mxu0 %vm10171_vm0, %v15015_v1  ;;  %15235 = vst [vmem:[#allocation26_spill] sm:$0xff] %v11536_v48  ;;  %v11538_v52 = vpop.f32.mrb[12].mxu1 }
 0x15f   : > { %9376 = vmatmul.mubr.msk.f32.gmra.mrb[112].mxu1 %vm15161_vm1, %v2538_v20  ;;  %v9069_v57 = vpop.f32.mrb[13].mxu1  ;;  %v11554_v28 = vpop.permute.xlu0 %3671 }
 0x160   : > { %v826_v12 = vpop.f32.mrb[52].mxu0  ;;  %9378 = vmatprep.mubr.msk.f32.mxu1 %vm10171_vm0, %v15015_v1  ;;  %v11551_v20 = vpop.f32.mrb[14].mxu1  ;;  %15238 = vst [vmem:[#allocation27_spill] sm:$0xff] %v11554_v28 }
 0x161   : > { %v8894_v19 = vpop.f32.mrb[53].mxu0  ;;  %9127 = vmatmul.mubr.msk.f32.gmra.mrb[158].mxu0 %vm15233_vm5, %v1581_v17  ;;  %v11527_v9 = vadd.f32 %v826_v12, %v11220_v15  ;;  %v1583_v17 = vld [vmem:[%s10354_s20 + $0x35] sm:$0xff]  ;;  %vm3296_vm5 = vcmp.gt.f32.partialorder %v11201_v7, 0.5 }
 0x162   : > { %9129 = vmatprep.mubr.msk.f32.mxu0 %vm10171_vm0, %v15015_v1  ;;  %v2540_v12 = vld [vmem:[%s10354_s20 + $0x79] sm:$0xff]  ;;  %v9072_v19 = vpop.f32.mrb[15].mxu1 }
 0x163   : > { %9379 = vmatmul.mubr.msk.f32.gmra.mrb[114].mxu1 %vm15236_vm8, %v2539_v53  ;;  %v2541_v19 = vld [vmem:[%s10354_s20 + $0x81] sm:$0xff] }
 0x164   : > { %v831_v44 = vpop.f32.mrb[54].mxu0  ;;  %9381 = vmatprep.mubr.msk.f32.mxu1 %vm10171_vm0, %v15015_v1 }
 0x165   : > { %v8897_v15 = vpop.f32.mrb[55].mxu0  ;;  %9130 = vmatmul.mubr.msk.f32.gmra.mrb[160].mxu0 %vm15237_vm9, %v1582_v39  ;;  %v11544_v63 = vadd.f32 %v831_v44, %v11232_v18  ;;  %v1584_v44 = vld [vmem:[%s10354_s20 + $0x3d] sm:$0xff] }
 0x166   : > { %9132 = vmatprep.mubr.msk.f32.mxu0 %vm10171_vm0, %v15015_v1  ;;  %v11568_v15 = vpop.f32.mrb[16].mxu1 }
 0x167   : > { %9382 = vmatmul.mubr.msk.f32.gmra.mrb[116].mxu1 %vm15240_vm15, %v2540_v12  ;;  %v9075_v3 = vpop.f32.mrb[17].mxu1  ;;  %vm15252_vm15 = vmmov %vm15249_vm2 }
 0x168   : > { %v836_v53 = vpop.f32.mrb[56].mxu0  ;;  %v11556_v39 = vpop.permute.xlu1 %3680  ;;  %9384 = vmatprep.mubr.msk.f32.mxu1 %vm10171_vm0, %v15015_v1 }
 0x169   : > { %15239 = vst [vmem:[#allocation28_spill] sm:$0xff] %v11556_v39  ;;  %v8900_v18 = vpop.f32.mrb[57].mxu0  ;;  %9133 = vmatmul.mubr.msk.f32.gmra.mrb[162].mxu0 %vm15241_vm3, %v1583_v17  ;;  %v11561_v57 = vadd.f32 %v836_v53, %v11242_v23  ;;  %v1585_v53 = vld [vmem:[%s10354_s20 + $0x45] sm:$0xff]  ;;  %v11585_v39 = vpop.f32.mrb[18].mxu1  ;;  %vm15253_vm3 = vmmov %vm15249_vm2 }
 0x16a   : > { %9135 = vmatprep.mubr.msk.f32.mxu0 %vm10171_vm0, %v15015_v1  ;;  %v11583_v3 = vpop.permute.xlu0 %3677 }
 0x16b   : > { %9385 = vmatmul.mubr.msk.f32.gmra.mrb[118].mxu1 %vm15243_vm4, %v2541_v19  ;;  %15245 = vst [vmem:[#allocation30_spill] sm:$0xff] %v11583_v3  ;;  %v2542_v19 = vld [vmem:[%s10354_s20 + $0x89] sm:$0xff] }
 0x16c   : > { %v841_v12 = vpop.f32.mrb[58].mxu0  ;;  %v11571_v18 = vpop.permute.xlu1 %3686  ;;  %9387 = vmatprep.mubr.msk.f32.mxu1 %vm10171_vm0, %v15015_v1 }
 0x16d   : > { %15242 = vst [vmem:[#allocation29_spill] sm:$0xff] %v11571_v18  ;;  %v8903_v17 = vpop.f32.mrb[59].mxu0  ;;  %9136 = vmatmul.mubr.msk.f32.gmra.mrb[164].mxu0 %vm15244_vm13, %v1584_v44  ;;  %v11576_v23 = vadd.f32 %v841_v12, %v11252_v26 }
 0x16e   : > { %9138 = vmatprep.mubr.msk.f32.mxu0 %vm10171_vm0, %v15015_v1  ;;  %v9078_v17 = vpop.f32.mrb[19].mxu1 }
 0x16f   : > { %9388 = vmatmul.mubr.msk.f32.gmra.mrb[120].mxu1 %vm15246_vm12, %v2542_v19  ;;  %v1586_v17 = vld [vmem:[%s10354_s20 + $0x4d] sm:$0xff]  ;;  %v11599_v3 = vpop.permute.xlu0 %3683  ;;  %v11601_v60 = vpop.f32.mrb[20].mxu1  ;;  %vm15254_vm12 = vmmov %vm15249_vm2 }
 0x170   : > { %v846_v18 = vpop.f32.mrb[60].mxu0  ;;  %v3395_v26 = vpop.permute.xlu1 %3394  ;;  %9390 = vmatprep.mubr.msk.f32.mxu1 %vm10171_vm0, %v15015_v1  ;;  %15248 = vst [vmem:[#allocation31_spill] sm:$0xff] %v11599_v3  ;;  %v2543_v19 = vld [vmem:[%s10354_s20 + $0x91] sm:$0xff] }
 0x171   : > { %v8906_v44 = vpop.f32.mrb[61].mxu0  ;;  %9139 = vmatmul.mubr.msk.f32.gmra.mrb[166].mxu0 %vm15247_vm11, %v1585_v53  ;;  %v11592_v12 = vadd.f32 %v846_v18, %v11262_v32  ;;  %vm3422_vm6 = vcmp.ne.s32.totalorder %v3395_v26, 0  ;;  %v9081_v53 = vpop.f32.mrb[21].mxu1  ;;  %v1587_v3 = vld [vmem:[%s10354_s20 + $0x55] sm:$0xff]  ;;  %vm15255_vm11 = vmmov %vm15249_vm2 }
 0x172   : > { %9141 = vmatprep.mubr.msk.f32.mxu0 %vm10171_vm0, %v15015_v1  ;;  %vm3447_vm10 = vmand %vm3297_vm14, %vm3422_vm6 }
 0x173   : > { %9391 = vmatmul.mubr.msk.f32.gmra.mrb[122].mxu1 %vm15249_vm2, %v2543_v19  ;;  %v3393_v53 = vpop.permute.xlu0 %3392  ;;  %v11615_v19 = vpop.f32.mrb[22].mxu1  ;;  %vm15256_vm6 = vmmov %vm15249_vm2 }
 0x174   : > { %v851_v44 = vpop.f32.mrb[62].mxu0  ;;  %v3545_v32 = vpop.permute.xlu1 %3544  ;;  %9393 = vmatprep.mubr.msk.f32.mxu1 %vm10171_vm0, %v15015_v1  ;;  %vm3421_vm9 = vcmp.ne.s32.totalorder %v3393_v53, 0  ;;  %v1588_v53 = vld [vmem:[%s10354_s20 + $0x5d] sm:$0xff] }
 0x175   : > { %v8909_v18 = vpop.f32.mrb[63].mxu0  ;;  %9142 = vmatmul.mubr.msk.f32.gmra.mrb[168].mxu0 %vm15250_vm7, %v1586_v17  ;;  %v11607_v26 = vadd.f32 %v851_v44, %v11272_v34  ;;  %vm3572_vm1 = vcmp.ne.s32.totalorder %v3545_v32, 0  ;;  %v15251_v34 = vmov 0   ;;  %v9084_v44 = vpop.f32.mrb[23].mxu1  ;;  %vm3446_vm4 = vmand %vm3296_vm5, %vm3421_vm9 }
 0x176   : > { %9144 = vmatprep.mubr.msk.f32.mxu0 %vm10171_vm0, %v15015_v1  ;;  %vm3597_vm8 = vmand %vm3447_vm10, %vm3572_vm1  ;;  %v2544_v18 = vld [vmem:[%s10354_s20 + $0x99] sm:$0xff]  ;;  %v11629_v28 = vpop.f32.mrb[24].mxu1 }
 0x177   : > { %v3622_v17 = vsel %vm3597_vm8, 1, %v15251_v34  ;;  %9394 = vmatmul.mubr.msk.f32.gmra.mrb[124].mxu1 %vm15252_vm15, %v2544_v18  ;;  %v3543_v44 = vpop.permute.xlu0 %3542  ;;  %vm15257_vm7 = vmmov %vm15249_vm2 }
 0x178   : > { %v856_v32 = vpop.f32.mrb[64].mxu0  ;;  %3692 = vperm.xlu1 %9993, %v3622_v17   ;;  %9396 = vmatprep.mubr.msk.f32.mxu1 %vm10171_vm0, %v15015_v1  ;;  %v2545_v17 = vld [vmem:[%s10354_s20 + $0xa1] sm:$0xff]  ;;  %vm3571_vm13 = vcmp.ne.s32.totalorder %v3543_v44, 0  ;;  %vm15258_vm8 = vmmov %vm15249_vm2 }
 0x179   : > { %v8912_v48 = vpop.f32.mrb[65].mxu0  ;;  %9145 = vmatmul.mubr.msk.f32.gmra.mrb[170].mxu0 %vm15253_vm3, %v1587_v3  ;;  %v11622_v7 = vadd.f32 %v856_v32, %v11282_v42  ;;  %vm3596_vm14 = vmand %vm3446_vm4, %vm3571_vm13  ;;  %v11643_v44 = vld [vmem:[%s15004_s7 + $0xc0] sm:$0xff] }
 0x17a   : > { %9147 = vmatprep.mubr.msk.f32.mxu0 %vm10171_vm0, %v15015_v1  ;;  %v9087_v48 = vpop.f32.mrb[25].mxu1  ;;  %v3621_v32 = vsel %vm3596_vm14, 1, %v15251_v34  ;;  %vm15260_vm9 = vmmov %vm15249_vm2 }
 0x17b   : > { %9397 = vmatmul.mubr.msk.f32.gmra.mrb[126].mxu1 %vm15254_vm12, %v2545_v17  ;;  %v1589_v17 = vld [vmem:[%s10354_s20 + $0x65] sm:$0xff]  ;;  %3689 = vperm.xlu0 %9992, %v3621_v32   ;;  %v3274_v48 = vadd.f32 %v10338_v6, %v11643_v44  ;;  %vm15261_vm3 = vmmov %vm15249_vm2 }
 0x17c   : > { %v861_v3 = vpop.f32.mrb[66].mxu0  ;;  %9399 = vmatprep.mubr.msk.f32.mxu1 %vm10171_vm0, %v15015_v1  ;;  %vm15262_vm4 = vmmov %vm15249_vm2 }
 0x17d   : > { %v8915_v42 = vpop.f32.mrb[67].mxu0  ;;  %9148 = vmatmul.mubr.msk.f32.gmra.mrb[172].mxu0 %vm15255_vm11, %v1588_v53  ;;  %v11635_v18 = vadd.f32 %v861_v3, %v11292_v22  ;;  %v11648_v53 = vpop.f32.mrb[26].mxu1  ;;  %v2546_v22 = vld [vmem:[%s10354_s20 + $0xa9] sm:$0xff]  ;;  %vm3324_vm10 = vcmp.ge.f32.partialorder %v3274_v48, 0.0  ;;  %vm3474_vm1 = vcmp.le.f32.partialorder %v3274_v48, 15.0  ;;  %vm15263_vm13 = vmmov %vm15249_vm2 }
 0x17e   : > { %9150 = vmatprep.mubr.msk.f32.mxu0 %vm10171_vm0, %v15015_v1  ;;  %v9090_v3 = vpop.f32.mrb[27].mxu1  ;;  %v3349_v32 = vsel %vm3324_vm10, 1, %v15251_v34  ;;  %vm15264_vm14 = vmmov %vm15249_vm2 }
 0x17f   : > { %9400 = vmatmul.mubr.msk.f32.gmra.mrb[128].mxu1 %vm15256_vm6, %v2546_v22  ;;  %v1590_v22 = vld [vmem:[%s10354_s20 + $0x6d] sm:$0xff]  ;;  %3398 = vrot.lane.b32.xlu1 %v3349_v32, %s10173_s14  ;;  %v3499_v32 = vsel %vm3474_vm1, 1, %v15251_v34  ;;  %vm15265_vm12 = vmmov %vm15249_vm2 }
 0x180   : > { %v866_v42 = vpop.f32.mrb[68].mxu0  ;;  %9402 = vmatprep.mubr.msk.f32.mxu1 %vm10171_vm0, %v15015_v1  ;;  %vm15266_vm11 = vmmov %vm15249_vm2 }
 0x181   : > { %v11655_v62 = vadd.f32 %v866_v42, %v11302_v47  ;;  %v8918_v35 = vpop.f32.mrb[69].mxu0  ;;  %9151 = vmatmul.mubr.msk.f32.gmra.mrb[174].mxu0 %vm15249_vm2, %v1589_v17  ;;  %v11670_v47 = vpop.f32.mrb[28].mxu1  ;;  %v3273_v17 = vadd.f32 %v10338_v6, %v11664_v25  ;;  %v1591_v6 = vld [vmem:[%s10354_s20 + $0x75] sm:$0xff]  ;;  %vm15267_vm6 = vmmov %vm15249_vm2 }
 0x182   : > { %9153 = vmatprep.mubr.msk.f32.mxu0 %vm10171_vm0, %v15015_v1  ;;  %v2547_v35 = vld [vmem:[%s10354_s20 + $0xb1] sm:$0xff]  ;;  %v9093_v3 = vpop.f32.mrb[29].mxu1  ;;  %vm15268_vm10 = vmmov %vm15249_vm2 }
 0x183   : > { %9403 = vmatmul.mubr.msk.f32.gmra.mrb[130].mxu1 %vm15257_vm7, %v2547_v35  ;;  %vm3323_vm5 = vcmp.ge.f32.partialorder %v3273_v17, 0.0  ;;  %3548 = vrot.lane.b32.xlu1 %v3499_v32, %s10173_s14  ;;  %vm3473_vm15 = vcmp.le.f32.partialorder %v3273_v17, 15.0  ;;  %v2549_v17 = vld [vmem:[%s10354_s20 + $0xc1] sm:$0xff]  ;;  %vm15269_vm7 = vmmov %vm15249_vm2 }
 0x184   : > { %v871_v42 = vpop.f32.mrb[70].mxu0  ;;  %v3348_v21 = vsel %vm3323_vm5, 1, %v15251_v34  ;;  %9405 = vmatprep.mubr.msk.f32.mxu1 %vm10171_vm0, %v15259_v43  ;;  %vm15270_vm1 = vmmov %vm15249_vm2 }
 0x185   : > { %v11677_v59 = vadd.f32 %v871_v42, %v11312_v38  ;;  %v8921_v1 = vpop.f32.mrb[71].mxu0  ;;  %9154 = vmatmul.mubr.msk.f32.gmra.mrb[176].mxu0 %vm15258_vm8, %v1590_v22  ;;  %v11688_v38 = vpop.f32.mrb[30].mxu1  ;;  %3396 = vrot.lane.b32.xlu0 %v3348_v21, %s10173_s14  ;;  %v3498_v42 = vsel %vm3473_vm15, 1, %v15251_v34  ;;  %v1592_v21 = vld [vmem:[%s10354_s20 + $0x7d] sm:$0xff]  ;;  %vm15271_vm5 = vmmov %vm15270_vm1 }
 0x186   : > { %9156 = vmatprep.mubr.msk.f32.mxu0 %vm10171_vm0, %v15259_v43  ;;  %v2548_v1 = vld [vmem:[%s10354_s20 + $0xb9] sm:$0xff]  ;;  %v9096_v48 = vpop.f32.mrb[31].mxu1  ;;  %vm15272_vm8 = vmmov %vm15270_vm1 }
 0x187   : > { %9406 = vmatmul.mubr.msk.f32.gmra.mrb[132].mxu1 %vm15260_vm9, %v2548_v1  ;;  %v11703_v32 = vpop.f32.mrb[32].mxu1  ;;  %vm15273_vm9 = vmmov %vm15270_vm1 }
 0x188   : > { %v876_v22 = vpop.f32.mrb[72].mxu0  ;;  %9408 = vmatprep.mubr.msk.f32.mxu1 %vm10171_vm0, %v15259_v43  ;;  %vm15274_vm15 = vmmov %vm15270_vm1 }
 0x189   : > { %v11694_v35 = vadd.f32 %v876_v22, %v11322_v45  ;;  %v8924_v3 = vpop.f32.mrb[73].mxu0  ;;  %9157 = vmatmul.mubr.msk.f32.gmra.mrb[178].mxu0 %vm15261_vm3, %v1591_v6  ;;  %3546 = vrot.lane.b32.xlu0 %v3498_v42, %s10173_s14  ;;  %v9099_v45 = vpop.f32.mrb[33].mxu1  ;;  %v1593_v22 = vld [vmem:[%s10354_s20 + $0x85] sm:$0xff]  ;;  %vm15275_vm3 = vmmov %vm15270_vm1  ;;  %s10176_s14 = smov 6  }
 0x18a   : > { %9159 = vmatprep.mubr.msk.f32.mxu0 %vm10171_vm0, %v15259_v43  ;;  %v11717_v3 = vpop.f32.mrb[34].mxu1  ;;  %v2550_v42 = vld [vmem:[%s10354_s20 + $0xc9] sm:$0xff] }
 0x18b   : > { %9409 = vmatmul.mubr.msk.f32.gmra.mrb[134].mxu1 %vm15262_vm4, %v2549_v17  ;;  %v9102_v45 = vpop.f32.mrb[35].mxu1  ;;  %vm15276_vm4 = vmmov %vm15270_vm1 }
 0x18c   : > { %v881_v1 = vpop.f32.mrb[74].mxu0  ;;  %9411 = vmatprep.mubr.msk.f32.mxu1 %vm10171_vm0, %v15259_v43  ;;  %v2551_v45 = vld [vmem:[%s10354_s20 + $0xd1] sm:$0xff] }
 0x18d   : > { %v11709_v6 = vadd.f32 %v881_v1, %v11332_v58  ;;  %v8927_v48 = vpop.f32.mrb[75].mxu0  ;;  %9160 = vmatmul.mubr.msk.f32.gmra.mrb[180].mxu0 %vm15263_vm13, %v1592_v21  ;;  %v1594_v1 = vld [vmem:[%s10354_s20 + $0x8d] sm:$0xff]  ;;  %vm15278_vm13 = vmmov %vm15270_vm1 }
 0x18e   : > { %9162 = vmatprep.mubr.msk.f32.mxu0 %vm10171_vm0, %v15259_v43  ;;  %v11730_v48 = vpop.f32.mrb[36].mxu1 }
 0x18f   : > { %9412 = vmatmul.mubr.msk.f32.gmra.mrb[136].mxu1 %vm15264_vm14, %v2550_v42  ;;  %v9105_v8 = vpop.f32.mrb[37].mxu1  ;;  %vm15280_vm14 = vmmov %vm15270_vm1 }
 0x190   : > { %v886_v17 = vpop.f32.mrb[76].mxu0  ;;  %9414 = vmatprep.mubr.msk.f32.mxu1 %vm10171_vm0, %v15259_v43  ;;  %v2552_v8 = vld [vmem:[%s10354_s20 + $0xd9] sm:$0xff] }
 0x191   : > { %v11722_v58 = vadd.f32 %v886_v17, %v11342_v61  ;;  %v8930_v21 = vpop.f32.mrb[77].mxu0  ;;  %9163 = vmatmul.mubr.msk.f32.gmra.mrb[182].mxu0 %vm15265_vm12, %v1593_v22  ;;  %v1595_v17 = vld [vmem:[%s10354_s20 + $0x95] sm:$0xff]  ;;  %vm15282_vm12 = vmmov %vm15270_vm1 }
 0x192   : > { %9165 = vmatprep.mubr.msk.f32.mxu0 %vm10171_vm0, %v15259_v43  ;;  %v11743_v21 = vpop.f32.mrb[38].mxu1 }
 0x193   : > { %9415 = vmatmul.mubr.msk.f32.gmra.mrb[138].mxu1 %vm15266_vm11, %v2551_v45  ;;  %v9108_v13 = vpop.f32.mrb[39].mxu1  ;;  %vm15284_vm11 = vmmov %vm15270_vm1 }
 0x194   : > { %v891_v42 = vpop.f32.mrb[78].mxu0  ;;  %9417 = vmatprep.mubr.msk.f32.mxu1 %vm10171_vm0, %v15259_v43  ;;  %v2553_v13 = vld [vmem:[%s10354_s20 + $0xe1] sm:$0xff] }
 0x195   : > { %v11735_v61 = vadd.f32 %v891_v42, %v11352_v10  ;;  %v8933_v22 = vpop.f32.mrb[79].mxu0  ;;  %9166 = vmatmul.mubr.msk.f32.gmra.mrb[184].mxu0 %vm15267_vm6, %v1594_v1  ;;  %v1596_v42 = vld [vmem:[%s10354_s20 + $0x9d] sm:$0xff]  ;;  %vm15286_vm6 = vmmov %vm15270_vm1 }
 0x196   : > { %9168 = vmatprep.mubr.msk.f32.mxu0 %vm10171_vm0, %v15259_v43  ;;  %v11756_v22 = vpop.f32.mrb[40].mxu1 }
 0x197   : > { %9418 = vmatmul.mubr.msk.f32.gmra.mrb[140].mxu1 %vm15268_vm10, %v2552_v8  ;;  %v9111_v30 = vpop.f32.mrb[41].mxu1  ;;  %vm15288_vm10 = vmmov %vm15270_vm1 }
 0x198   : > { %v896_v45 = vpop.f32.mrb[80].mxu0  ;;  %9420 = vmatprep.mubr.msk.f32.mxu1 %vm10171_vm0, %v15259_v43  ;;  %v2554_v30 = vld [vmem:[%s10354_s20 + $0xe9] sm:$0xff] }
 0x199   : > { %v11748_v10 = vadd.f32 %v896_v45, %v11362_v0  ;;  %v8936_v1 = vpop.f32.mrb[81].mxu0  ;;  %9169 = vmatmul.mubr.msk.f32.gmra.mrb[186].mxu0 %vm15249_vm2, %v1595_v17  ;;  %v1597_v45 = vld [vmem:[%s10354_s20 + $0xa5] sm:$0xff]  ;;  %vm15289_vm2 = vmmov %vm15270_vm1 }
 0x19a   : > { %9171 = vmatprep.mubr.msk.f32.mxu0 %vm10171_vm0, %v15259_v43  ;;  %v11769_v1 = vpop.f32.mrb[42].mxu1 }
 0x19b   : > { %9421 = vmatmul.mubr.msk.f32.gmra.mrb[142].mxu1 %vm15269_vm7, %v2553_v13  ;;  %v9114_v37 = vpop.f32.mrb[43].mxu1  ;;  %vm15290_vm7 = vmmov %vm15270_vm1 }
 0x19c   : > { %v901_v8 = vpop.f32.mrb[82].mxu0  ;;  %9423 = vmatprep.mubr.msk.f32.mxu1 %vm10171_vm0, %v15259_v43 }
 0x19d   : > { %v11761_v0 = vadd.f32 %v901_v8, %v11372_v56  ;;  %v8939_v17 = vpop.f32.mrb[83].mxu0  ;;  %9172 = vmatmul.mubr.msk.f32.gmra.mrb[188].mxu0 %vm15270_vm1, %v1596_v42  ;;  %v1598_v42 = vld [vmem:[%s10354_s20 + $0xad] sm:$0xff] }
 0x19e   : > { %9174 = vmatprep.mubr.msk.f32.mxu0 %vm10171_vm0, %v15259_v43  ;;  %v11780_v17 = vpop.f32.mrb[44].mxu1 }
 0x19f   : > { %9424 = vmatmul.mubr.msk.f32.gmra.mrb[144].mxu1 %vm15271_vm5, %v2554_v30  ;;  %v9117_v41 = vpop.f32.mrb[45].mxu1  ;;  %vm15291_vm5 = vmmov %vm15270_vm1 }
 0x1a0   : > { %v906_v13 = vpop.f32.mrb[84].mxu0 }
 0x1a1   : > { %v11774_v56 = vadd.f32 %v906_v13, %v11385_v24  ;;  %v8942_v8 = vpop.f32.mrb[85].mxu0  ;;  %9175 = vmatmul.mubr.msk.f32.gmra.mrb[190].mxu0 %vm15272_vm8, %v1597_v45  ;;  %v1599_v24 = vld [vmem:[%s10354_s20 + $0xb5] sm:$0xff]  ;;  %vm15292_vm8 = vmmov %vm15270_vm1 }
 0x1a2   : > { %9177 = vmatprep.mubr.msk.f32.mxu0 %vm10171_vm0, %v15259_v43 }
 0x1a4   : > { %v911_v31 = vpop.f32.mrb[86].mxu0 }
 0x1a5   : > { %v11783_v37 = vadd.f32 %v911_v31, %v11397_v33  ;;  %v8945_v30 = vpop.f32.mrb[87].mxu0  ;;  %9178 = vmatmul.mubr.msk.f32.gmra.mrb[192].mxu0 %vm15273_vm9, %v1598_v42  ;;  %v1600_v33 = vld [vmem:[%s10354_s20 + $0xbd] sm:$0xff]  ;;  %vm15293_vm9 = vmmov %vm15270_vm1 }
 0x1a6   : > { %9180 = vmatprep.mubr.msk.f32.mxu0 %vm10171_vm0, %v15259_v43  ;;  %v11803_v30 = vpop.f32.mrb[46].mxu1 }
 0x1a8   : > { %v916_v45 = vpop.f32.mrb[88].mxu0 }
 0x1a9   : > { %v11790_v13 = vadd.f32 %v916_v45, %v11409_v40  ;;  %v8948_v8 = vpop.f32.mrb[89].mxu0  ;;  %9181 = vmatmul.mubr.msk.f32.gmra.mrb[194].mxu0 %vm15274_vm15, %v1599_v24  ;;  %v1601_v40 = vld [vmem:[%s10354_s20 + $0xc5] sm:$0xff]  ;;  %v9199_v24 = vpop.f32.mrb[47].mxu1  ;;  %vm15294_vm15 = vmmov %vm15270_vm1 }
 0x1aa   : > { %9183 = vmatprep.mubr.msk.f32.mxu0 %vm10171_vm0, %v15259_v43 }
 0x1ac   : > { %v921_v41 = vpop.f32.mrb[90].mxu0 }
 0x1ad   : > { %v11797_v31 = vadd.f32 %v921_v41, %v11423_v46  ;;  %v8951_v42 = vpop.f32.mrb[91].mxu0  ;;  %9184 = vmatmul.mubr.msk.f32.gmra.mrb[196].mxu0 %vm15275_vm3, %v1600_v33  ;;  %v1602_v46 = vld [vmem:[%s10354_s20 + $0xcd] sm:$0xff]  ;;  %vm15295_vm3 = vmmov %vm15270_vm1 }
 0x1ae   : > { %9186 = vmatprep.mubr.msk.f32.mxu0 %vm10171_vm0, %v15259_v43 }
 0x1b0   : > { %v926_v45 = vpop.f32.mrb[92].mxu0  ;;  %v11812_v33 = vpop.f32.mrb[48].mxu1 }
 0x1b1   : > { %v11806_v8 = vadd.f32 %v926_v45, %v11439_v55  ;;  %v8954_v5 = vpop.f32.mrb[93].mxu0  ;;  %9187 = vmatmul.mubr.msk.f32.gmra.mrb[198].mxu0 %vm15276_vm4, %v1601_v40  ;;  %15277 = vst [vmem:[#allocation32_spill] sm:$0xff] %v11812_v33  ;;  %v9202_v41 = vpop.f32.mrb[49].mxu1  ;;  %vm15296_vm4 = vmmov %vm15270_vm1 }
 0x1b2   : > { %9189 = vmatprep.mubr.msk.f32.mxu0 %vm10171_vm0, %v15259_v43  ;;  %v1603_v5 = vld [vmem:[%s10354_s20 + $0xd5] sm:$0xff] }
 0x1b4   : > { %v931_v42 = vpop.f32.mrb[94].mxu0  ;;  %v11821_v55 = vpop.f32.mrb[50].mxu1 }
 0x1b5   : > { %v11815_v27 = vadd.f32 %v931_v42, %v11458_v49  ;;  %v8957_v24 = vpop.f32.mrb[95].mxu0  ;;  %9190 = vmatmul.mubr.msk.f32.gmra.mrb[200].mxu0 %vm15278_vm13, %v1602_v46  ;;  %15279 = vst [vmem:[#allocation33_spill] sm:$0xff] %v11821_v55  ;;  %v9205_v40 = vpop.f32.mrb[51].mxu1  ;;  %v2213_v49 = vld [vmem:[%s10354_s20 + $0x28] sm:$0xff]  ;;  %v8230_v42 = vld [vmem:[%s14998_s1 + $0x40] sm:$0xff]  ;;  %vm15297_vm13 = vmmov %vm15270_vm1 }
 0x1b6   : > { %9192 = vmatprep.mubr.msk.f32.mxu0 %vm10171_vm0, %v15259_v43 }
 0x1b8   : > { %v936_v45 = vpop.f32.mrb[96].mxu0  ;;  %v11830_v46 = vpop.f32.mrb[52].mxu1 }
 0x1b9   : > { %v11824_v29 = vadd.f32 %v936_v45, %v11475_v11  ;;  %v8960_v41 = vpop.f32.mrb[97].mxu0  ;;  %9193 = vmatmul.mubr.msk.f32.gmra.mrb[202].mxu0 %vm15280_vm14, %v1603_v5  ;;  %15281 = vst [vmem:[#allocation34_spill] sm:$0xff] %v11830_v46  ;;  %v9208_v24 = vpop.f32.mrb[53].mxu1  ;;  %v2214_v5 = vld [vmem:[%s10354_s20 + $0x30] sm:$0xff]  ;;  %vm15299_vm14 = vmmov %vm15270_vm1 }
 0x1ba   : > { %9274 = vmatprep.mubr.msk.f32.mxu0 %vm10171_vm0, %v15259_v43 }
 0x1bc   : > { %v941_v40 = vpop.f32.mrb[98].mxu0 }
 0x1bd   : > { %v11836_v55 = vadd.f32 %v941_v40, %v11494_v4  ;;  %v8963_v11 = vpop.f32.mrb[99].mxu0  ;;  %9275 = vmatmul.mubr.msk.f32.vlgmr.msra.gmra.mrb[204].mxu0 %vm15282_vm12, %v2213_v49  ;;  %v11842_v45 = vpop.f32.mrb[54].mxu1  ;;  %v2215_v4 = vld [vmem:[%s10354_s20 + $0x38] sm:$0xff]  ;;  %vm15301_vm12 = vmmov %vm15270_vm1 }
 0x1be   : > { %9427 = vmatpush3.msra.mxu0 %v8230_v42  ;;  %9277 = vmatprep.mubr.msk.f32.mxu0 %vm10171_vm0, %v15259_v43  ;;  %15283 = vst [vmem:[#allocation35_spill] sm:$0xff] %v11842_v45  ;;  %v9211_v41 = vpop.f32.mrb[55].mxu1 }
 0x1c0   : > { %v1113_v46 = vpop.f32.mrb[100].mxu0 }
 0x1c1   : > { %v11845_v33 = vadd.f32 %v1113_v46, %v11514_v14  ;;  %v8968_v24 = vpop.f32.mrb[101].mxu0  ;;  %9278 = vmatmul.mubr.msk.f32.gmra.mrb[206].mxu0 %vm15284_vm11, %v2214_v5  ;;  %v2216_v14 = vld [vmem:[%s10354_s20 + $0x40] sm:$0xff]  ;;  %vm3299_vm11 = vcmp.gt.f32.partialorder %v11643_v44, 0.5 }
 0x1c2   : > { %9280 = vmatprep.mubr.msk.f32.mxu0 %vm10171_vm0, %v15259_v43  ;;  %v11851_v49 = vpop.f32.mrb[56].mxu1 }
 0x1c3   : > { %15285 = vst [vmem:[#allocation36_spill] sm:$0xff] %v11851_v49  ;;  %v9214_v40 = vpop.f32.mrb[57].mxu1 }
 0x1c4   : > { %v1118_v42 = vpop.f32.mrb[102].mxu0 }
 0x1c5   : > { %v11854_v11 = vadd.f32 %v1118_v42, %v11527_v9  ;;  %v8971_v41 = vpop.f32.mrb[103].mxu0  ;;  %9281 = vmatmul.mubr.msk.f32.gmra.mrb[208].mxu0 %vm15286_vm6, %v2215_v4  ;;  %v2217_v9 = vld [vmem:[%s10354_s20 + $0x48] sm:$0xff] }
 0x1c6   : > { %9283 = vmatprep.mubr.msk.f32.mxu0 %vm10171_vm0, %v15259_v43  ;;  %v11860_v46 = vpop.f32.mrb[58].mxu1 }
 0x1c7   : > { %15287 = vst [vmem:[#allocation37_spill] sm:$0xff] %v11860_v46  ;;  %v9217_v24 = vpop.f32.mrb[59].mxu1 }
 0x1c8   : > { %v1123_v5 = vpop.f32.mrb[104].mxu0 }
 0x1c9   : > { %v1239_v45 = vadd.f32 %v1123_v5, %v11544_v63  ;;  %v8974_v49 = vpop.f32.mrb[105].mxu0  ;;  %9284 = vmatmul.mubr.msk.f32.gmra.mrb[210].mxu0 %vm15288_vm10, %v2216_v14  ;;  %v2218_v63 = vld [vmem:[%s10354_s20 + $0x50] sm:$0xff]  ;;  %vm15302_vm10 = vmmov %vm15270_vm1 }
 0x1ca   : > { %9286 = vmatprep.mubr.msk.f32.mxu0 %vm10171_vm0, %v15259_v43  ;;  %v11870_v42 = vpop.f32.mrb[60].mxu1 }
 0x1cb   : > { %v11868_v4 = vadd.f32 %v11427_v36, %v1239_v45  ;;  %v9220_v41 = vpop.f32.mrb[61].mxu1 }
 0x1cc   : > { %v1128_v40 = vpop.f32.mrb[106].mxu0 }
 0x1cd   : > { %v1240_v46 = vadd.f32 %v1128_v40, %v11561_v57  ;;  %v8977_v24 = vpop.f32.mrb[107].mxu0  ;;  %9287 = vmatmul.mubr.msk.f32.gmra.mrb[212].mxu0 %vm15289_vm2, %v2217_v9  ;;  %v2219_v57 = vld [vmem:[%s10354_s20 + $0x58] sm:$0xff] }
 0x1ce   : > { %9289 = vmatprep.mubr.msk.f32.mxu0 %vm10171_vm0, %v15259_v43  ;;  %v11880_v14 = vpop.f32.mrb[62].mxu1 }
 0x1cf   : > { %v11878_v49 = vadd.f32 %v11443_v54, %v1240_v46  ;;  %v9223_v45 = vpop.f32.mrb[63].mxu1 }
 0x1d0   : > { %v1133_v36 = vpop.f32.mrb[108].mxu0 }
 0x1d1   : > { %v1241_v5 = vadd.f32 %v1133_v36, %v11576_v23  ;;  %v8980_v41 = vpop.f32.mrb[109].mxu0  ;;  %9290 = vmatmul.mubr.msk.f32.gmra.mrb[214].mxu0 %vm15290_vm7, %v2218_v63  ;;  %v2220_v23 = vld [vmem:[%s10354_s20 + $0x60] sm:$0xff] }
 0x1d2   : > { %9292 = vmatprep.mubr.msk.f32.mxu0 %vm10171_vm0, %v15259_v43  ;;  %v11890_v40 = vpop.f32.mrb[64].mxu1 }
 0x1d3   : > { %v11888_v9 = vadd.f32 %v11462_v16, %v1241_v5  ;;  %v9226_v46 = vpop.f32.mrb[65].mxu1 }
 0x1d4   : > { %v1138_v54 = vpop.f32.mrb[110].mxu0 }
 0x1d5   : > { %v1242_v24 = vadd.f32 %v1138_v54, %v11592_v12  ;;  %v8983_v45 = vpop.f32.mrb[111].mxu0  ;;  %9293 = vmatmul.mubr.msk.f32.gmra.mrb[216].mxu0 %vm15270_vm1, %v2219_v57  ;;  %v2221_v12 = vld [vmem:[%s10354_s20 + $0x68] sm:$0xff] }
 0x1d6   : > { %9295 = vmatprep.mubr.msk.f32.mxu0 %vm10171_vm0, %v15259_v43  ;;  %v11900_v36 = vpop.f32.mrb[66].mxu1 }
 0x1d7   : > { %v11898_v63 = vadd.f32 %v11479_v2, %v1242_v24  ;;  %v9229_v5 = vpop.f32.mrb[67].mxu1 }
 0x1d8   : > { %v1143_v16 = vpop.f32.mrb[112].mxu0 }
 0x1d9   : > { %v1243_v41 = vadd.f32 %v1143_v16, %v11607_v26  ;;  %v8986_v46 = vpop.f32.mrb[113].mxu0  ;;  %9296 = vmatmul.mubr.msk.f32.gmra.mrb[218].mxu0 %vm15291_vm5, %v2220_v23  ;;  %v2222_v26 = vld [vmem:[%s10354_s20 + $0x70] sm:$0xff]  ;;  %vm3298_vm5 = vcmp.gt.f32.partialorder %v11664_v25, 0.5 }
 0x1da   : > { %9298 = vmatprep.mubr.msk.f32.mxu0 %vm10171_vm0, %v15259_v43  ;;  %v11910_v54 = vpop.f32.mrb[68].mxu1 }
 0x1db   : > { %v11908_v57 = vadd.f32 %v11498_v51, %v1243_v41  ;;  %v9232_v24 = vpop.f32.mrb[69].mxu1 }
 0x1dc   : > { %v1148_v2 = vpop.f32.mrb[114].mxu0 }
 0x1dd   : > { %v1244_v45 = vadd.f32 %v1148_v2, %v11622_v7  ;;  %v8989_v5 = vpop.f32.mrb[115].mxu0  ;;  %9299 = vmatmul.mubr.msk.f32.gmra.mrb[220].mxu0 %vm15292_vm8, %v2221_v12  ;;  %v2223_v7 = vld [vmem:[%s10354_s20 + $0x78] sm:$0xff] }
 0x1de   : > { %9301 = vmatprep.mubr.msk.f32.mxu0 %vm10171_vm0, %v15259_v43  ;;  %v11920_v16 = vpop.f32.mrb[70].mxu1 }
 0x1df   : > { %v11918_v23 = vadd.f32 %v11521_v50, %v1244_v45  ;;  %v9235_v41 = vpop.f32.mrb[71].mxu1 }
 0x1e0   : > { %v1153_v51 = vpop.f32.mrb[116].mxu0 }
 0x1e1   : > { %v1245_v46 = vadd.f32 %v1153_v51, %v11635_v18  ;;  %v8992_v24 = vpop.f32.mrb[117].mxu0  ;;  %9302 = vmatmul.mubr.msk.f32.gmra.mrb[222].mxu0 %vm15293_vm9, %v2222_v26  ;;  %v2224_v18 = vld [vmem:[%s10354_s20 + $0x80] sm:$0xff] }
 0x1e2   : > { %9304 = vmatprep.mubr.msk.f32.mxu0 %vm10171_vm0, %v15259_v43  ;;  %v11930_v2 = vpop.f32.mrb[72].mxu1 }
 0x1e3   : > { %v11928_v12 = vadd.f32 %v11538_v52, %v1245_v46  ;;  %v9238_v45 = vpop.f32.mrb[73].mxu1 }
 0x1e4   : > { %v1158_v50 = vpop.f32.mrb[118].mxu0 }
 0x1e5   : > { %v1246_v5 = vadd.f32 %v1158_v50, %v11655_v62  ;;  %v8995_v41 = vpop.f32.mrb[119].mxu0  ;;  %9305 = vmatmul.mubr.msk.f32.gmra.mrb[224].mxu0 %vm15294_vm15, %v2223_v7  ;;  %v2225_v62 = vld [vmem:[%s10354_s20 + $0x88] sm:$0xff] }
 0x1e6   : > { %9307 = vmatprep.mubr.msk.f32.mxu0 %vm10171_vm0, %v15259_v43  ;;  %v11940_v51 = vpop.f32.mrb[74].mxu1 }
 0x1e7   : > { %v11938_v26 = vadd.f32 %v11551_v20, %v1246_v5  ;;  %v9241_v46 = vpop.f32.mrb[75].mxu1 }
 0x1e8   : > { %v1163_v52 = vpop.f32.mrb[120].mxu0 }
 0x1e9   : > { %v1247_v24 = vadd.f32 %v1163_v52, %v11677_v59  ;;  %v8998_v45 = vpop.f32.mrb[121].mxu0  ;;  %9308 = vmatmul.mubr.msk.f32.gmra.mrb[226].mxu0 %vm15295_vm3, %v2224_v18  ;;  %v2226_v59 = vld [vmem:[%s10354_s20 + $0x90] sm:$0xff]  ;;  %vm15304_vm3 = vmmov %vm15270_vm1 }
 0x1ea   : > { %9310 = vmatprep.mubr.msk.f32.mxu0 %vm10171_vm0, %v15259_v43  ;;  %v11950_v50 = vpop.f32.mrb[76].mxu1 }
 0x1eb   : > { %v11948_v7 = vadd.f32 %v11568_v15, %v1247_v24  ;;  %v9244_v5 = vpop.f32.mrb[77].mxu1 }
 0x1ec   : > { %v1168_v20 = vpop.f32.mrb[122].mxu0 }
 0x1ed   : > { %v1248_v41 = vadd.f32 %v1168_v20, %v11694_v35  ;;  %v9001_v46 = vpop.f32.mrb[123].mxu0  ;;  %9311 = vmatmul.mubr.msk.f32.gmra.mrb[228].mxu0 %vm15296_vm4, %v2225_v62  ;;  %v2227_v35 = vld [vmem:[%s10354_s20 + $0x98] sm:$0xff] }
 0x1ee   : > { %9313 = vmatprep.mubr.msk.f32.mxu0 %vm10171_vm0, %v15259_v43  ;;  %v11960_v52 = vpop.f32.mrb[78].mxu1 }
 0x1ef   : > { %v11958_v18 = vadd.f32 %v11585_v39, %v1248_v41  ;;  %v9247_v24 = vpop.f32.mrb[79].mxu1 }
 0x1f0   : > { %v1173_v15 = vpop.f32.mrb[124].mxu0 }
 0x1f1   : > { %v1249_v45 = vadd.f32 %v1173_v15, %v11709_v6  ;;  %v9004_v5 = vpop.f32.mrb[125].mxu0  ;;  %9314 = vmatmul.mubr.msk.f32.gmra.mrb[230].mxu0 %vm15297_vm13, %v2226_v59  ;;  %v2228_v6 = vld [vmem:[%s10354_s20 + $0xa0] sm:$0xff] }
 0x1f2   : > { %9316 = vmatprep.mubr.msk.f32.mxu0 %vm10171_vm0, %v15259_v43  ;;  %v11970_v20 = vpop.f32.mrb[80].mxu1 }
 0x1f3   : > { %v11968_v62 = vadd.f32 %v11601_v60, %v1249_v45  ;;  %15298 = vst [vmem:[#allocation38_spill] sm:$0xff] %v11970_v20  ;;  %v9250_v41 = vpop.f32.mrb[81].mxu1 }
 0x1f4   : > { %v1178_v39 = vpop.f32.mrb[126].mxu0 }
 0x1f5   : > { %v1250_v46 = vadd.f32 %v1178_v39, %v11722_v58  ;;  %v9007_v24 = vpop.f32.mrb[127].mxu0  ;;  %9317 = vmatmul.mubr.msk.f32.gmra.mrb[232].mxu0 %vm15299_vm14, %v2227_v35  ;;  %v2229_v58 = vld [vmem:[%s10354_s20 + $0xa8] sm:$0xff]  ;;  %vm15305_vm14 = vmmov %vm15270_vm1 }
 0x1f6   : > { %9319 = vmatprep.mubr.msk.f32.mxu0 %vm10171_vm0, %v15259_v43  ;;  %v11982_v60 = vpop.f32.mrb[82].mxu1 }
 0x1f7   : > { %v11978_v59 = vadd.f32 %v11615_v19, %v1250_v46  ;;  %v11980_v15 = vpop.permute.xlu1 %3692  ;;  %v9253_v5 = vpop.f32.mrb[83].mxu1 }
 0x1f8   : > { %15300 = vst [vmem:[#allocation39_spill] sm:$0xff] %v11980_v15  ;;  %v1183_v45 = vpop.f32.mrb[128].mxu0 }
 0x1f9   : > { %v1251_v41 = vadd.f32 %v1183_v45, %v11735_v61  ;;  %v9010_v20 = vpop.f32.mrb[129].mxu0  ;;  %9320 = vmatmul.mubr.msk.f32.gmra.mrb[234].mxu0 %vm15301_vm12, %v2228_v6  ;;  %vm15306_vm12 = vmmov %vm15270_vm1 }
 0x1fa   : > { %9322 = vmatprep.mubr.msk.f32.mxu0 %vm10171_vm0, %v15259_v43  ;;  %v11993_v39 = vpop.f32.mrb[84].mxu1  ;;  %v11997_v6 = vpop.permute.xlu0 %3689 }
 0x1fb   : > { %v11990_v35 = vadd.f32 %v11629_v28, %v1251_v41  ;;  %v3399_v19 = vpop.permute.xlu1 %3398  ;;  %v9256_v24 = vpop.f32.mrb[85].mxu1  ;;  %15303 = vst [vmem:[#allocation40_spill] sm:$0xff] %v11997_v6  ;;  %v2230_v28 = vld [vmem:[%s10354_s20 + $0xb0] sm:$0xff] }
 0x1fc   : > { %v1188_v46 = vpop.f32.mrb[130].mxu0  ;;  %vm3424_vm6 = vcmp.ne.s32.totalorder %v3399_v19, 0 }
 0x1fd   : > { %v1252_v61 = vadd.f32 %v1188_v46, %v11748_v10  ;;  %v9013_v20 = vpop.f32.mrb[131].mxu0  ;;  %9323 = vmatmul.mubr.msk.f32.gmra.mrb[236].mxu0 %vm15302_vm10, %v2229_v58  ;;  %vm3449_vm2 = vmand %vm3299_vm11, %vm3424_vm6 }
 0x1fe   : > { %9325 = vmatprep.mubr.msk.f32.mxu0 %vm10171_vm0, %v15259_v43  ;;  %v12005_v5 = vpop.f32.mrb[86].mxu1  ;;  %v3397_v46 = vpop.permute.xlu0 %3396  ;;  %vm15307_vm11 = vmmov %vm15270_vm1 }
 0x1ff   : > { %v12003_v44 = vadd.f32 %v11648_v53, %v1252_v61  ;;  %v3549_v45 = vpop.permute.xlu1 %3548  ;;  %v9259_v10 = vpop.f32.mrb[87].mxu1  ;;  %v2231_v53 = vld [vmem:[%s10354_s20 + $0xb8] sm:$0xff]  ;;  %vm3423_vm9 = vcmp.ne.s32.totalorder %v3397_v46, 0  ;;  %vm15308_vm6 = vmmov %vm15270_vm1 }
 0x200   : > { %v1193_v41 = vpop.f32.mrb[132].mxu0  ;;  %vm3574_vm7 = vcmp.ne.s32.totalorder %v3549_v45, 0  ;;  %vm3448_vm15 = vmand %vm3298_vm5, %vm3423_vm9  ;;  %v2232_v10 = vld [vmem:[%s10354_s20 + $0xc0] sm:$0xff] }
 0x201   : > { %v1253_v19 = vadd.f32 %v1193_v41, %v11761_v0  ;;  %v9016_v58 = vpop.f32.mrb[133].mxu0  ;;  %9326 = vmatmul.mubr.msk.f32.gmra.mrb[238].mxu0 %vm15270_vm1, %v2230_v28  ;;  %vm3599_vm8 = vmand %vm3449_vm2, %vm3574_vm7 }
 0x202   : > { %9328 = vmatprep.mubr.msk.f32.mxu0 %vm10171_vm0, %v15259_v43  ;;  %v3624_v24 = vsel %vm3599_vm8, 1, %v15251_v34  ;;  %v12017_v0 = vpop.f32.mrb[88].mxu1  ;;  %v3547_v41 = vpop.permute.xlu0 %3546  ;;  %vm15309_vm10 = vmmov %vm15270_vm1 }
 0x203   : > { %v12015_v61 = vadd.f32 %v11670_v47, %v1253_v19  ;;  %3698 = vperm.xlu1 %9993, %v3624_v24   ;;  %v9262_v28 = vpop.f32.mrb[89].mxu1  ;;  %vm3573_vm4 = vcmp.ne.s32.totalorder %v3547_v41, 0  ;;  %vm15310_vm2 = vmmov %vm15270_vm1 }
 0x204   : > { %v1198_v20 = vpop.f32.mrb[134].mxu0  ;;  %vm3598_vm13 = vmand %vm3448_vm15, %vm3573_vm4 }
 0x205   : > { %v1254_v25 = vadd.f32 %v1198_v20, %v11774_v56  ;;  %v9019_v45 = vpop.f32.mrb[135].mxu0  ;;  %9329 = vmatmul.mubr.msk.f32.gmra.mrb[240].mxu0 %vm15304_vm3, %v2231_v53  ;;  %v3623_v46 = vsel %vm3598_vm13, 1, %v15251_v34  ;;  %v2233_v20 = vld [vmem:[%s10354_s20 + $0xc8] sm:$0xff]  ;;  %vm15311_vm7 = vmmov %vm15270_vm1 }
 0x206   : > { %9331 = vmatprep.mubr.msk.f32.mxu0 %vm10171_vm0, %v15259_v43  ;;  %v12027_v19 = vpop.f32.mrb[90].mxu1  ;;  %3695 = vperm.xlu0 %9992, %v3623_v46   ;;  %vm15312_vm5 = vmmov %vm15270_vm1 }
 0x207   : > { %v12025_v47 = vadd.f32 %v11688_v38, %v1254_v25  ;;  %v9265_v56 = vpop.f32.mrb[91].mxu1  ;;  %vm15313_vm8 = vmmov %vm15270_vm1 }
 0x208   : > { %v1203_v58 = vpop.f32.mrb[136].mxu0  ;;  %vm15314_vm9 = vmmov %vm15270_vm1 }
 0x209   : > { %v1255_v53 = vadd.f32 %v1203_v58, %v11783_v37  ;;  %v9022_v24 = vpop.f32.mrb[137].mxu0  ;;  %9332 = vmatmul.mubr.msk.f32.gmra.mrb[242].mxu0 %vm15305_vm14, %v2232_v10  ;;  %v2234_v37 = vld [vmem:[%s10354_s20 + $0xd0] sm:$0xff]  ;;  %vm15316_vm15 = vmmov %vm15270_vm1 }
 0x20a   : > { %9334 = vmatprep.mubr.msk.f32.mxu0 %vm10171_vm0, %v15259_v43  ;;  %v12038_v28 = vpop.f32.mrb[92].mxu1  ;;  %vm15319_vm3 = vmmov %vm15270_vm1 }
 0x20b   : > { %v12036_v38 = vadd.f32 %v11703_v32, %v1255_v53  ;;  %v9268_v45 = vpop.f32.mrb[93].mxu1  ;;  %vm15322_vm4 = vmmov %vm15270_vm1 }
 0x20c   : > { %v1208_v25 = vpop.f32.mrb[138].mxu0  ;;  %vm15325_vm13 = vmmov %vm15270_vm1 }
 0x20d   : > { %v1256_v41 = vadd.f32 %v1208_v25, %v11790_v13  ;;  %v9025_v56 = vpop.f32.mrb[139].mxu0  ;;  %9335 = vmatmul.mubr.msk.f32.gmra.mrb[244].mxu0 %vm15306_vm12, %v2233_v20  ;;  %v2235_v13 = vld [vmem:[%s10354_s20 + $0xd8] sm:$0xff]  ;;  %vm15328_vm14 = vmmov %vm15270_vm1 }
 0x20e   : > { %9337 = vmatprep.mubr.msk.f32.mxu0 %vm10171_vm0, %v15259_v43  ;;  %v12048_v58 = vpop.f32.mrb[94].mxu1  ;;  %vm15330_vm12 = vmmov %vm15270_vm1 }
 0x20f   : > { %v12046_v10 = vadd.f32 %v11717_v3, %v1256_v41  ;;  %v9271_v46 = vpop.f32.mrb[95].mxu1 }
 0x210   : > { %v1213_v32 = vpop.f32.mrb[140].mxu0 }
 0x211   : > { %v1257_v53 = vadd.f32 %v1213_v32, %v11797_v31  ;;  %v9028_v24 = vpop.f32.mrb[141].mxu0  ;;  %9338 = vmatmul.mubr.msk.f32.gmra.mrb[246].mxu0 %vm15307_vm11, %v2234_v37  ;;  %v2236_v31 = vld [vmem:[%s10354_s20 + $0xe0] sm:$0xff]  ;;  %vm15331_vm11 = vmmov %vm15270_vm1 }
 0x212   : > { %9340 = vmatprep.mubr.msk.f32.mxu0 %vm10171_vm0, %v15259_v43  ;;  %v12058_v25 = vpop.f32.mrb[96].mxu1 }
 0x213   : > { %v12056_v20 = vadd.f32 %v11730_v48, %v1257_v53  ;;  %v9353_v45 = vpop.f32.mrb[97].mxu1 }
 0x214   : > { %v1218_v3 = vpop.f32.mrb[142].mxu0 }
 0x215   : > { %v1258_v41 = vadd.f32 %v1218_v3, %v11806_v8  ;;  %v9031_v56 = vpop.f32.mrb[143].mxu0  ;;  %9341 = vmatmul.mubr.msk.f32.gmra.mrb[248].mxu0 %vm15308_vm6, %v2235_v13  ;;  %v2237_v8 = vld [vmem:[%s10354_s20 + $0xe8] sm:$0xff]  ;;  %vm15332_vm6 = vmmov %vm15270_vm1 }
 0x216   : > { %9343 = vmatprep.mubr.msk.f32.mxu0 %vm10171_vm0, %v15259_v43  ;;  %v12068_v32 = vpop.f32.mrb[98].mxu1 }
 0x217   : > { %v12066_v37 = vadd.f32 %v11743_v21, %v1258_v41  ;;  %v9356_v46 = vpop.f32.mrb[99].mxu1 }
 0x218   : > { %v1223_v48 = vpop.f32.mrb[144].mxu0 }
 0x219   : > { %v1259_v53 = vadd.f32 %v1223_v48, %v11815_v27  ;;  %v9034_v24 = vpop.f32.mrb[145].mxu0  ;;  %9344 = vmatmul.mubr.msk.f32.gmra.mrb[250].mxu0 %vm15309_vm10, %v2236_v31  ;;  %v2847_v27 = vld [vmem:[%s10354_s20 + $0x2a] sm:$0xff]  ;;  %vm15333_vm10 = vmmov %vm15270_vm1 }
 0x21a   : > { %9346 = vmatprep.mubr.msk.f32.mxu0 %vm10171_vm0, %v15259_v43  ;;  %v12078_v3 = vpop.f32.mrb[100].mxu1 }
 0x21b   : > { %v12076_v13 = vadd.f32 %v11756_v22, %v1259_v53  ;;  %v9359_v45 = vpop.f32.mrb[101].mxu1 }
 0x21c   : > { %v1228_v21 = vpop.f32.mrb[146].mxu0 }
 0x21d   : > { %v1260_v41 = vadd.f32 %v1228_v21, %v11824_v29  ;;  %v9037_v56 = vpop.f32.mrb[147].mxu0  ;;  %9347 = vmatmul.mubr.msk.f32.gmra.mrb[252].mxu0 %vm15310_vm2, %v2237_v8  ;;  %v2848_v29 = vld [vmem:[%s10354_s20 + $0x32] sm:$0xff]  ;;  %vm15334_vm2 = vmmov %vm15270_vm1 }
 0x21e   : > { %9428 = vmatprep.mubr.msk.f32.mxu0 %vm10171_vm0, %v15259_v43  ;;  %v12088_v48 = vpop.f32.mrb[102].mxu1 }
 0x21f   : > { %v12086_v31 = vadd.f32 %v11769_v1, %v1260_v41  ;;  %v9362_v46 = vpop.f32.mrb[103].mxu1 }
 0x220   : > { %v1233_v22 = vpop.f32.mrb[148].mxu0 }
 0x221   : > { %v1261_v53 = vadd.f32 %v1233_v22, %v11836_v55  ;;  %v9040_v24 = vpop.f32.mrb[149].mxu0  ;;  %9429 = vmatmul.mubr.msk.f32.vlgmr.msra.gmra.mrb[254].mxu0 %vm15311_vm7, %v2847_v27  ;;  %v2849_v55 = vld [vmem:[%s10354_s20 + $0x3a] sm:$0xff]  ;;  %vm15335_vm7 = vmmov %vm15270_vm1 }
 0x222   : > { %9431 = vmatprep.mubr.msk.f32.mxu0 %vm10171_vm0, %v15259_v43  ;;  %v12098_v1 = vpop.f32.mrb[104].mxu1 }
 0x223   : > { %v12096_v8 = vadd.f32 %v11780_v17, %v1261_v53  ;;  %v9365_v45 = vpop.f32.mrb[105].mxu1 }
 0x224   : > { %v1430_v21 = vpop.f32.mrb[150].mxu0 }
 0x225   : > { %v1554_v41 = vadd.f32 %v1430_v21, %v11845_v33  ;;  %v9045_v56 = vpop.f32.mrb[151].mxu0  ;;  %9432 = vmatmul.mubr.msk.f32.gmra.mrb[0].mxu0 %vm15270_vm1, %v2848_v29  ;;  %v2850_v33 = vld [vmem:[%s10354_s20 + $0x42] sm:$0xff] }
 0x226   : > { %9434 = vmatprep.mubr.msk.f32.mxu0 %vm10171_vm0, %v15259_v43  ;;  %v12105_v27 = vpop.f32.mrb[106].mxu1 }
 0x227   : > { %v9368_v17 = vpop.f32.mrb[107].mxu1 }
 0x228   : > { %v1435_v22 = vpop.f32.mrb[152].mxu0 }
 0x229   : > { %v1555_v46 = vadd.f32 %v1435_v22, %v11854_v11  ;;  %v9048_v53 = vpop.f32.mrb[153].mxu0  ;;  %9435 = vmatmul.mubr.msk.f32.gmra.mrb[2].mxu0 %vm15312_vm5, %v2849_v55  ;;  %v2851_v11 = vld [vmem:[%s10354_s20 + $0x4a] sm:$0xff]  ;;  %vm15336_vm5 = vmmov %vm15270_vm1 }
 0x22a   : > { %9437 = vmatprep.mubr.msk.f32.mxu0 %vm10171_vm0, %v15259_v43  ;;  %v12112_v24 = vpop.f32.mrb[108].mxu1 }
 0x22b   : > { %v9371_v21 = vpop.f32.mrb[109].mxu1 }
 0x22c   : > { %v1747_v29 = vpop.f32.mrb[154].mxu0 }
 0x22d   : > { %v1871_v45 = vadd.f32 %v1747_v29, %v1554_v41  ;;  %v9122_v56 = vpop.f32.mrb[155].mxu0  ;;  %9438 = vmatmul.mubr.msk.f32.gmra.mrb[4].mxu0 %vm15313_vm8, %v2850_v33  ;;  %v2852_v41 = vld [vmem:[%s10354_s20 + $0x52] sm:$0xff]  ;;  %vm15337_vm8 = vmmov %vm15270_vm1 }
 0x22e   : > { %9440 = vmatprep.mubr.msk.f32.mxu0 %vm10171_vm0, %v15259_v43  ;;  %v12121_v55 = vpop.f32.mrb[110].mxu1  ;;  %v15315_v33 = vld [vmem:[#allocation32_spill] sm:$0xff] }
 0x22f   : > { %v12119_v22 = vadd.f32 %v11803_v30, %v1871_v45  ;;  %v9374_v53 = vpop.f32.mrb[111].mxu1 }
 0x230   : > { %v1752_v17 = vpop.f32.mrb[156].mxu0 }
 0x231   : > { %v1872_v34 = vadd.f32 %v1752_v17, %v1555_v46  ;;  %v9125_v15 = vpop.f32.mrb[157].mxu0  ;;  %9441 = vmatmul.mubr.msk.f32.gmra.mrb[6].mxu0 %vm15314_vm9, %v2851_v11  ;;  %v15317_v46 = vld [vmem:[#allocation33_spill] sm:$0xff]  ;;  %vm15338_vm9 = vmmov %vm15270_vm1 }
 0x232   : > { %9443 = vmatprep.mubr.msk.f32.mxu0 %vm10171_vm0, %v15259_v43  ;;  %v12130_v21 = vpop.f32.mrb[112].mxu1  ;;  %v2853_v15 = vld [vmem:[%s10354_s20 + $0x5a] sm:$0xff] }
 0x233   : > { %v12128_v29 = vadd.f32 %v15315_v33, %v1872_v34  ;;  %v9377_v45 = vpop.f32.mrb[113].mxu1 }
 0x234   : > { %v1757_v30 = vpop.f32.mrb[158].mxu0 }
 0x235   : > { %v1873_v56 = vadd.f32 %v1757_v30, %v11868_v4  ;;  %v9128_v6 = vpop.f32.mrb[159].mxu0  ;;  %9444 = vmatmul.mubr.msk.f32.gmra.mrb[8].mxu0 %vm15316_vm15, %v2852_v41  ;;  %v2854_v4 = vld [vmem:[%s10354_s20 + $0x62] sm:$0xff]  ;;  %vm15340_vm15 = vmmov %vm15270_vm1 }
 0x236   : > { %9446 = vmatprep.mubr.msk.f32.mxu0 %vm10171_vm0, %v15259_v43  ;;  %v12140_v17 = vpop.f32.mrb[114].mxu1  ;;  %v15320_v6 = vld [vmem:[#allocation34_spill] sm:$0xff] }
 0x237   : > { %v12138_v11 = vadd.f32 %v15317_v46, %v1873_v56  ;;  %15318 = vst [vmem:[#allocation32_spill] sm:$0xff] %v12140_v17  ;;  %v9380_v53 = vpop.f32.mrb[115].mxu1 }
 0x238   : > { %v1762_v34 = vpop.f32.mrb[160].mxu0 }
 0x239   : > { %v1874_v33 = vadd.f32 %v1762_v34, %v11878_v49  ;;  %v9131_v45 = vpop.f32.mrb[161].mxu0  ;;  %9447 = vmatmul.mubr.msk.f32.gmra.mrb[10].mxu0 %vm15319_vm3, %v2853_v15  ;;  %v2855_v49 = vld [vmem:[%s10354_s20 + $0x6a] sm:$0xff]  ;;  %vm15342_vm3 = vmmov %vm15270_vm1 }
 0x23a   : > { %9449 = vmatprep.mubr.msk.f32.mxu0 %vm10171_vm0, %v15259_v43  ;;  %v12150_v30 = vpop.f32.mrb[116].mxu1  ;;  %v15323_v15 = vld [vmem:[#allocation35_spill] sm:$0xff] }
 0x23b   : > { %v12148_v41 = vadd.f32 %v15320_v6, %v1874_v33  ;;  %15321 = vst [vmem:[#allocation33_spill] sm:$0xff] %v12150_v30  ;;  %v9383_v46 = vpop.f32.mrb[117].mxu1 }
 0x23c   : > { %v1767_v56 = vpop.f32.mrb[162].mxu0 }
 0x23d   : > { %v1875_v17 = vadd.f32 %v1767_v56, %v11888_v9  ;;  %v9134_v53 = vpop.f32.mrb[163].mxu0  ;;  %9450 = vmatmul.mubr.msk.f32.gmra.mrb[12].mxu0 %vm15322_vm4, %v2854_v4  ;;  %v2856_v9 = vld [vmem:[%s10354_s20 + $0x72] sm:$0xff]  ;;  %vm15343_vm4 = vmmov %vm15270_vm1 }
 0x23e   : > { %9452 = vmatprep.mubr.msk.f32.mxu0 %vm10171_vm0, %v15259_v43  ;;  %v12160_v45 = vpop.f32.mrb[118].mxu1  ;;  %v15326_v4 = vld [vmem:[#allocation36_spill] sm:$0xff] }
 0x23f   : > { %v12158_v34 = vadd.f32 %v15323_v15, %v1875_v17  ;;  %15324 = vst [vmem:[#allocation34_spill] sm:$0xff] %v12160_v45  ;;  %v9386_v6 = vpop.f32.mrb[119].mxu1 }
 0x240   : > { %v1772_v33 = vpop.f32.mrb[164].mxu0 }
 0x241   : > { %v1876_v30 = vadd.f32 %v1772_v33, %v11898_v63  ;;  %v9137_v46 = vpop.f32.mrb[165].mxu0  ;;  %9453 = vmatmul.mubr.msk.f32.gmra.mrb[14].mxu0 %vm15325_vm13, %v2855_v49  ;;  %v2857_v63 = vld [vmem:[%s10354_s20 + $0x7a] sm:$0xff]  ;;  %vm3750_vm13 = vcmask 261120  }
 0x242   : > { %9455 = vmatprep.mubr.msk.f32.mxu0 %vm10171_vm0, %v15259_v43  ;;  %v12170_v53 = vpop.f32.mrb[120].mxu1  ;;  %v15329_v49 = vld [vmem:[#allocation37_spill] sm:$0xff]  ;;  %3776 = vst.msk [vmem:[#allocation2 + $0xc8] sm:$0xff] %vm3750_vm13, %v15259_v43 }
 0x243   : > { %v12168_v56 = vadd.f32 %v15326_v4, %v1876_v30  ;;  %15327 = vst [vmem:[#allocation35_spill] sm:$0xff] %v12170_v53  ;;  %v9389_v15 = vpop.f32.mrb[121].mxu1 }
 0x244   : > { %v1777_v17 = vpop.f32.mrb[166].mxu0 }
 0x245   : > { %v1877_v45 = vadd.f32 %v1777_v17, %v11908_v57  ;;  %v9140_v6 = vpop.f32.mrb[167].mxu0  ;;  %9456 = vmatmul.mubr.msk.f32.gmra.mrb[16].mxu0 %vm15328_vm14, %v2856_v9  ;;  %v2858_v57 = vld [vmem:[%s10354_s20 + $0x82] sm:$0xff]  ;;  %vm15344_vm14 = vmmov %vm15270_vm1 }
 0x246   : > { %9458 = vmatprep.mubr.msk.f32.mxu0 %vm10171_vm0, %v15259_v43  ;;  %v12180_v46 = vpop.f32.mrb[122].mxu1 }
 0x247   : > { %v12178_v33 = vadd.f32 %v15329_v49, %v1877_v45  ;;  %v9392_v4 = vpop.f32.mrb[123].mxu1 }
 0x248   : > { %v1782_v30 = vpop.f32.mrb[168].mxu0 }
 0x249   : > { %v1878_v53 = vadd.f32 %v1782_v30, %v11918_v23  ;;  %v9143_v15 = vpop.f32.mrb[169].mxu0  ;;  %9459 = vmatmul.mubr.msk.f32.gmra.mrb[18].mxu0 %vm15330_vm12, %v2857_v63  ;;  %v2859_v23 = vld [vmem:[%s10354_s20 + $0x8a] sm:$0xff]  ;;  %vm15345_vm12 = vmmov %vm15270_vm1 }
 0x24a   : > { %9461 = vmatprep.mubr.msk.f32.mxu0 %vm10171_vm0, %v15259_v43  ;;  %v12190_v17 = vpop.f32.mrb[124].mxu1 }
 0x24b   : > { %v12188_v9 = vadd.f32 %v11870_v42, %v1878_v53  ;;  %v9395_v6 = vpop.f32.mrb[125].mxu1 }
 0x24c   : > { %v1787_v45 = vpop.f32.mrb[170].mxu0 }
 0x24d   : > { %v1879_v49 = vadd.f32 %v1787_v45, %v11928_v12  ;;  %v9146_v4 = vpop.f32.mrb[171].mxu0  ;;  %9462 = vmatmul.mubr.msk.f32.gmra.mrb[20].mxu0 %vm15331_vm11, %v2858_v57  ;;  %v9994_v12 = vld [vmem:[%s15000_s3 + $0x10] sm:$0xff]  }
 0x24e   : > { %9464 = vmatprep.mubr.msk.f32.mxu0 %vm10171_vm0, %v15259_v43  ;;  %v12200_v30 = vpop.f32.mrb[126].mxu1  ;;  %v2860_v57 = vld [vmem:[%s10354_s20 + $0x92] sm:$0xff]  ;;  %9503 = vmatprep.subr.bf16.mxu1 %v9994_v12 }
 0x24f   : > { %v12198_v63 = vadd.f32 %v11880_v14, %v1879_v49  ;;  %v9398_v53 = vpop.f32.mrb[127].mxu1  ;;  %9504 = vmatpush3.bf16.msra.mxu1 %v9994_v12 }
 0x250   : > { %v1792_v42 = vpop.f32.mrb[172].mxu0 }
 0x251   : > { %v1880_v15 = vadd.f32 %v1792_v42, %v11938_v26  ;;  %v9149_v6 = vpop.f32.mrb[173].mxu0  ;;  %9465 = vmatmul.mubr.msk.f32.gmra.mrb[22].mxu0 %vm15332_vm6, %v2859_v23  ;;  %v2861_v42 = vld [vmem:[%s10354_s20 + $0x9a] sm:$0xff] }
 0x252   : > { %9467 = vmatprep.mubr.msk.f32.mxu0 %vm10171_vm0, %v15259_v43  ;;  %v12213_v45 = vpop.f32.mrb[128].mxu1 }
 0x253   : > { %v12211_v14 = vadd.f32 %v11890_v40, %v1880_v15  ;;  %v9401_v26 = vpop.f32.mrb[129].mxu1 }
 0x254   : > { %v1797_v49 = vpop.f32.mrb[174].mxu0 }
 0x255   : > { %v1881_v4 = vadd.f32 %v1797_v49, %v11948_v7  ;;  %v9152_v23 = vpop.f32.mrb[175].mxu0  ;;  %9468 = vmatmul.mubr.msk.f32.gmra.mrb[24].mxu0 %vm15333_vm10, %v2860_v57  ;;  %v2862_v7 = vld [vmem:[%s10354_s20 + $0xa2] sm:$0xff] }
 0x256   : > { %9470 = vmatprep.mubr.msk.f32.mxu0 %vm10171_vm0, %v15259_v43  ;;  %v12223_v40 = vpop.f32.mrb[130].mxu1 }
 0x257   : > { %v12221_v53 = vadd.f32 %v11900_v36, %v1881_v4  ;;  %v9404_v6 = vpop.f32.mrb[131].mxu1 }
 0x258   : > { %v1802_v15 = vpop.f32.mrb[176].mxu0 }
 0x259   : > { %v1882_v12 = vadd.f32 %v1802_v15, %v11958_v18  ;;  %v9155_v26 = vpop.f32.mrb[177].mxu0  ;;  %9471 = vmatmul.mubr.msk.f32.gmra.mrb[26].mxu0 %vm15334_vm2, %v2861_v42  ;;  %v2863_v18 = vld [vmem:[%s10354_s20 + $0xaa] sm:$0xff] }
 0x25a   : > { %9473 = vmatprep.mubr.msk.f32.mxu0 %vm10171_vm0, %v15259_v43  ;;  %v12233_v49 = vpop.f32.mrb[132].mxu1 }
 0x25b   : > { %v12231_v57 = vadd.f32 %v11910_v54, %v1882_v12  ;;  %v9407_v4 = vpop.f32.mrb[133].mxu1 }
 0x25c   : > { %v1807_v36 = vpop.f32.mrb[178].mxu0 }
 0x25d   : > { %v1883_v23 = vadd.f32 %v1807_v36, %v11968_v62  ;;  %v9158_v6 = vpop.f32.mrb[179].mxu0  ;;  %9474 = vmatmul.mubr.msk.f32.gmra.mrb[28].mxu0 %vm15335_vm7, %v2862_v7  ;;  %v2864_v62 = vld [vmem:[%s10354_s20 + $0xb2] sm:$0xff] }
 0x25e   : > { %9476 = vmatprep.mubr.msk.f32.mxu0 %vm10171_vm0, %v15259_v43  ;;  %v12243_v15 = vpop.f32.mrb[134].mxu1 }
 0x25f   : > { %v12241_v42 = vadd.f32 %v11920_v16, %v1883_v23  ;;  %v9410_v12 = vpop.f32.mrb[135].mxu1 }
 0x260   : > { %v1812_v54 = vpop.f32.mrb[180].mxu0 }
 0x261   : > { %v1884_v26 = vadd.f32 %v1812_v54, %v11978_v59  ;;  %v9161_v4 = vpop.f32.mrb[181].mxu0  ;;  %9477 = vmatmul.mubr.msk.f32.gmra.mrb[30].mxu0 %vm15270_vm1, %v2863_v18  ;;  %v2865_v59 = vld [vmem:[%s10354_s20 + $0xba] sm:$0xff] }
 0x262   : > { %9479 = vmatprep.mubr.msk.f32.mxu0 %vm10171_vm0, %v15259_v43  ;;  %v12253_v36 = vpop.f32.mrb[136].mxu1 }
 0x263   : > { %v12251_v7 = vadd.f32 %v11930_v2, %v1884_v26  ;;  %v9413_v23 = vpop.f32.mrb[137].mxu1 }
 0x264   : > { %v1817_v16 = vpop.f32.mrb[182].mxu0 }
 0x265   : > { %v1885_v6 = vadd.f32 %v1817_v16, %v11990_v35  ;;  %v9164_v12 = vpop.f32.mrb[183].mxu0  ;;  %9480 = vmatmul.mubr.msk.f32.gmra.mrb[32].mxu0 %vm15336_vm5, %v2864_v62  ;;  %v2866_v35 = vld [vmem:[%s10354_s20 + $0xc2] sm:$0xff] }
 0x266   : > { %9482 = vmatprep.mubr.msk.f32.mxu0 %vm10171_vm0, %v15259_v43  ;;  %v12263_v54 = vpop.f32.mrb[138].mxu1 }
 0x267   : > { %v12261_v18 = vadd.f32 %v11940_v51, %v1885_v6  ;;  %v9416_v26 = vpop.f32.mrb[139].mxu1 }
 0x268   : > { %v1822_v2 = vpop.f32.mrb[184].mxu0 }
 0x269   : > { %v1886_v4 = vadd.f32 %v1822_v2, %v12003_v44  ;;  %v9167_v23 = vpop.f32.mrb[185].mxu0  ;;  %9483 = vmatmul.mubr.msk.f32.gmra.mrb[34].mxu0 %vm15337_vm8, %v2865_v59  ;;  %v2867_v44 = vld [vmem:[%s10354_s20 + $0xca] sm:$0xff] }
 0x26a   : > { %9485 = vmatprep.mubr.msk.f32.mxu0 %vm10171_vm0, %v15259_v43  ;;  %v12273_v16 = vpop.f32.mrb[140].mxu1 }
 0x26b   : > { %v12271_v62 = vadd.f32 %v11950_v50, %v1886_v4  ;;  %v9419_v6 = vpop.f32.mrb[141].mxu1 }
 0x26c   : > { %v1827_v51 = vpop.f32.mrb[186].mxu0 }
 0x26d   : > { %v1887_v12 = vadd.f32 %v1827_v51, %v12015_v61  ;;  %v9170_v26 = vpop.f32.mrb[187].mxu0  ;;  %9486 = vmatmul.mubr.msk.f32.gmra.mrb[36].mxu0 %vm15338_vm9, %v2866_v35  ;;  %v2868_v61 = vld [vmem:[%s10354_s20 + $0xd2] sm:$0xff]  ;;  %v15341_v35 = vld [vmem:[#allocation38_spill] sm:$0xff] }
 0x26e   : > { %9488 = vmatprep.mubr.msk.f32.mxu0 %vm10171_vm0, %v15259_v43  ;;  %v12283_v2 = vpop.f32.mrb[142].mxu1 }
 0x26f   : > { %v12281_v59 = vadd.f32 %v11960_v52, %v1887_v12  ;;  %15339 = vst [vmem:[#allocation36_spill] sm:$0xff] %v12283_v2  ;;  %v9422_v4 = vpop.f32.mrb[143].mxu1 }
 0x270   : > { %v1832_v50 = vpop.f32.mrb[188].mxu0 }
 0x271   : > { %v1888_v23 = vadd.f32 %v1832_v50, %v12025_v47  ;;  %v9173_v6 = vpop.f32.mrb[189].mxu0  ;;  %9489 = vmatmul.mubr.msk.f32.gmra.mrb[38].mxu0 %vm15340_vm15, %v2867_v44  ;;  %v2869_v47 = vld [vmem:[%s10354_s20 + $0xda] sm:$0xff] }
 0x272   : > { %9491 = vmatprep.mubr.msk.f32.mxu0 %vm10171_vm0, %v15259_v43  ;;  %v12293_v52 = vpop.f32.mrb[144].mxu1 }
 0x273   : > { %v12291_v51 = vadd.f32 %v15341_v35, %v1888_v23  ;;  %v9425_v26 = vpop.f32.mrb[145].mxu1 }
 0x274   : > { %v1837_v12 = vpop.f32.mrb[190].mxu0 }
 0x275   : > { %v1889_v2 = vadd.f32 %v1837_v12, %v12036_v38  ;;  %v9176_v4 = vpop.f32.mrb[191].mxu0  ;;  %9492 = vmatmul.mubr.msk.f32.gmra.mrb[40].mxu0 %vm15342_vm3, %v2868_v61  ;;  %v2870_v38 = vld [vmem:[%s10354_s20 + $0xe2] sm:$0xff] }
 0x276   : > { %9494 = vmatprep.mubr.msk.f32.mxu0 %vm10171_vm0, %v15259_v43 }
 0x277   : > { %v12301_v44 = vadd.f32 %v11982_v60, %v1889_v2 }
 0x278   : > { %v1842_v50 = vpop.f32.mrb[192].mxu0 }
 0x279   : > { %v1890_v23 = vadd.f32 %v1842_v50, %v12046_v10  ;;  %v9179_v6 = vpop.f32.mrb[193].mxu0  ;;  %9495 = vmatmul.mubr.msk.f32.gmra.mrb[42].mxu0 %vm15343_vm4, %v2869_v47  ;;  %v2871_v10 = vld [vmem:[%s10354_s20 + $0xea] sm:$0xff]  ;;  %s10180_s20 = smov [#allocation3]  }
 0x27a   : > { %9497 = vmatprep.mubr.msk.f32.mxu0 %vm10171_vm0, %v15259_v43 }
 0x27b   : > { %v12309_v61 = vadd.f32 %v11993_v39, %v1890_v23 }
 0x27c   : > { %v1847_v35 = vpop.f32.mrb[194].mxu0 }
 0x27d   : > { %v1891_v60 = vadd.f32 %v1847_v35, %v12056_v20  ;;  %v9182_v2 = vpop.f32.mrb[195].mxu0  ;;  %9498 = vmatmul.mubr.msk.f32.gmra.mrb[44].mxu0 %vm15344_vm14, %v2870_v38 }
 0x27e   : > { %9500 = vmatprep.mubr.msk.f32.mxu0 %vm10171_vm0, %v15259_v43 }
 0x27f   : > { %v12319_v12 = vadd.f32 %v12005_v5, %v1891_v60  ;;  %v9995_v5 = vld [vmem:[%s15000_s3 + $0x18] sm:$0xff]  }
 0x280   : > { %v1852_v26 = vpop.f32.mrb[196].mxu0  ;;  %9505 = vmatprep.subr.bf16.mxu1 %v9995_v5 }
 0x281   : > { %v1892_v39 = vadd.f32 %v1852_v26, %v12066_v37  ;;  %v9185_v4 = vpop.f32.mrb[197].mxu0  ;;  %9501 = vmatmul.mubr.msk.f32.gmra.mrb[46].mxu0 %vm15345_vm12, %v2871_v10  ;;  %9506 = vmatpush3.bf16.msra.mxu1 %v9995_v5 }
 0x283   : > { %v12324_v47 = vadd.f32 %v12017_v0, %v1892_v39 }
 0x284   : > { %v1857_v20 = vpop.f32.mrb[198].mxu0 }
 0x285   : > { %v1893_v50 = vadd.f32 %v1857_v20, %v12076_v13  ;;  %v9188_v23 = vpop.f32.mrb[199].mxu0 }
 0x287   : > { %v12328_v6 = vadd.f32 %v12027_v19, %v1893_v50 }
 0x288   : > { %v1862_v43 = vpop.f32.mrb[200].mxu0 }
 0x289   : > { %v1894_v37 = vadd.f32 %v1862_v43, %v12086_v31  ;;  %v9191_v38 = vpop.f32.mrb[201].mxu0 }
 0x28b   : > { %v12335_v35 = vadd.f32 %v12038_v28, %v1894_v37 }
 0x28c   : > { %v1867_v0 = vpop.f32.mrb[202].mxu0 }
 0x28d   : > { %v1895_v13 = vadd.f32 %v1867_v0, %v12096_v8  ;;  %v9194_v60 = vpop.f32.mrb[203].mxu0 }
 0x28f   : > { %v12339_v19 = vadd.f32 %v12048_v58, %v1895_v13 }
 0x290   : > { %v2381_v2 = vpop.f32.mrb[204].mxu0 }
 0x291   : > { %v2505_v10 = vadd.f32 %v2381_v2, %v12119_v22  ;;  %v9276_v26 = vpop.f32.mrb[205].mxu0 }
 0x293   : > { %v12343_v39 = vadd.f32 %v12058_v25, %v2505_v10 }
 0x294   : > { %v2386_v31 = vpop.f32.mrb[206].mxu0 }
 0x295   : > { %v2506_v4 = vadd.f32 %v2386_v31, %v12128_v29  ;;  %v9279_v28 = vpop.f32.mrb[207].mxu0 }
 0x297   : > { %v12347_v20 = vadd.f32 %v12068_v32, %v2506_v4 }
 0x298   : > { %v2391_v50 = vpop.f32.mrb[208].mxu0 }
 0x299   : > { %v2507_v8 = vadd.f32 %v2391_v50, %v12138_v11  ;;  %v9282_v23 = vpop.f32.mrb[209].mxu0 }
 0x29b   : > { %v12351_v58 = vadd.f32 %v12078_v3, %v2507_v8 }
 0x29c   : > { %v2396_v43 = vpop.f32.mrb[210].mxu0 }
 0x29d   : > { %v2508_v22 = vadd.f32 %v2396_v43, %v12148_v41  ;;  %v9285_v5 = vpop.f32.mrb[211].mxu0 }
 0x29f   : > { %v12355_v25 = vadd.f32 %v12088_v48, %v2508_v22 }
 0x2a0   : > { %v2401_v37 = vpop.f32.mrb[212].mxu0 }
 0x2a1   : > { %v2509_v29 = vadd.f32 %v2401_v37, %v12158_v34  ;;  %v9288_v38 = vpop.f32.mrb[213].mxu0  ;;  %v15348_v37 = vld [vmem:[#allocation34_spill] sm:$0xff] }
 0x2a3   : > { %v12359_v32 = vadd.f32 %v12098_v1, %v2509_v29 }
 0x2a4   : > { %v2406_v0 = vpop.f32.mrb[214].mxu0 }
 0x2a5   : > { %v2510_v11 = vadd.f32 %v2406_v0, %v12168_v56  ;;  %v9291_v13 = vpop.f32.mrb[215].mxu0 }
 0x2a7   : > { %v12363_v3 = vadd.f32 %v12105_v27, %v2510_v11  ;;  %v15349_v11 = vld [vmem:[#allocation35_spill] sm:$0xff] }
 0x2a8   : > { %v2411_v60 = vpop.f32.mrb[216].mxu0 }
 0x2a9   : > { %v2511_v41 = vadd.f32 %v2411_v60, %v12178_v33  ;;  %v9294_v2 = vpop.f32.mrb[217].mxu0 }
 0x2ab   : > { %v12367_v48 = vadd.f32 %v12112_v24, %v2511_v41  ;;  %v15346_v24 = vld [vmem:[#allocation32_spill] sm:$0xff] }
 0x2ac   : > { %v2416_v10 = vpop.f32.mrb[218].mxu0 }
 0x2ad   : > { %v2512_v34 = vadd.f32 %v2416_v10, %v12188_v9  ;;  %v9297_v26 = vpop.f32.mrb[219].mxu0 }
 0x2af   : > { %v12371_v1 = vadd.f32 %v12121_v55, %v2512_v34  ;;  %v15347_v55 = vld [vmem:[#allocation33_spill] sm:$0xff] }
 0x2b0   : > { %v2421_v31 = vpop.f32.mrb[220].mxu0 }
 0x2b1   : > { %v2513_v56 = vadd.f32 %v2421_v31, %v12198_v63  ;;  %v9300_v4 = vpop.f32.mrb[221].mxu0 }
 0x2b3   : > { %v12375_v27 = vadd.f32 %v12130_v21, %v2513_v56  ;;  %v12388_v21 = vld [vmem:[%s15000_s3] sm:$0xff]  }
 0x2b4   : > { %v2426_v28 = vpop.f32.mrb[222].mxu0  ;;  %9527 = vmatprep.subr.bf16.mxu1 %v12388_v21 }
 0x2b5   : > { %v2514_v33 = vadd.f32 %v2426_v28, %v12211_v14  ;;  %v9303_v50 = vpop.f32.mrb[223].mxu0 }
 0x2b7   : > { %v12379_v8 = vadd.f32 %v15346_v24, %v2514_v33 }
 0x2b8   : > { %v2431_v23 = vpop.f32.mrb[224].mxu0 }
 0x2b9   : > { %v2515_v9 = vadd.f32 %v2431_v23, %v12221_v53  ;;  %v9306_v43 = vpop.f32.mrb[225].mxu0 }
 0x2bb   : > { %v12383_v22 = vadd.f32 %v15347_v55, %v2515_v9 }
 0x2bc   : > { %v2436_v5 = vpop.f32.mrb[226].mxu0 }
 0x2bd   : > { %v2516_v63 = vadd.f32 %v2436_v5, %v12231_v57  ;;  %v9309_v14 = vpop.f32.mrb[227].mxu0 }
 0x2bf   : > { %v12393_v29 = vadd.f32 %v15348_v37, %v2516_v63 }
 0x2c0   : > { %v2441_v38 = vpop.f32.mrb[228].mxu0 }
 0x2c1   : > { %v2517_v53 = vadd.f32 %v2441_v38, %v12241_v42  ;;  %v9312_v0 = vpop.f32.mrb[229].mxu0 }
 0x2c3   : > { %v12397_v13 = vadd.f32 %v15349_v11, %v2517_v53 }
 0x2c4   : > { %v2446_v60 = vpop.f32.mrb[230].mxu0 }
 0x2c5   : > { %v2518_v41 = vadd.f32 %v2446_v60, %v12251_v7  ;;  %v9315_v2 = vpop.f32.mrb[231].mxu0 }
 0x2c7   : > { %v12401_v10 = vadd.f32 %v12180_v46, %v2518_v41 }
 0x2c8   : > { %v2451_v57 = vpop.f32.mrb[232].mxu0 }
 0x2c9   : > { %v2519_v34 = vadd.f32 %v2451_v57, %v12261_v18  ;;  %v9318_v26 = vpop.f32.mrb[233].mxu0 }
 0x2cb   : > { %v12405_v31 = vadd.f32 %v12190_v17, %v2519_v34 }
 0x2cc   : > { %v2456_v56 = vpop.f32.mrb[234].mxu0 }
 0x2cd   : > { %v2520_v42 = vadd.f32 %v2456_v56, %v12271_v62  ;;  %v9321_v4 = vpop.f32.mrb[235].mxu0 }
 0x2cf   : > { %v12409_v28 = vadd.f32 %v12200_v30, %v2520_v42 }
 0x2d0   : > { %v2461_v33 = vpop.f32.mrb[236].mxu0 }
 0x2d1   : > { %v2521_v7 = vadd.f32 %v2461_v33, %v12281_v59  ;;  %v9324_v50 = vpop.f32.mrb[237].mxu0  ;;  %v15351_v33 = vld [vmem:[#allocation13_spill] sm:$0xff] }
 0x2d2   : > { %vm3700_vm0 = vcmp.eq.s32.totalorder %v15351_v33, 1 }
 0x2d3   : > { %v12413_v46 = vadd.f32 %v12213_v45, %v2521_v7 }
 0x2d4   : > { %v2466_v24 = vpop.f32.mrb[238].mxu0 }
 0x2d5   : > { %v2522_v18 = vadd.f32 %v2466_v24, %v12291_v51  ;;  %v9327_v23 = vpop.f32.mrb[239].mxu0 }
 0x2d6   : > { %v15352_v23 = vld [vmem:[#allocation11_spill] sm:$0xff] }
 0x2d7   : > { %v12417_v17 = vadd.f32 %v12223_v40, %v2522_v18  ;;  %vm3701_vm11 = vcmp.eq.s32.totalorder %v15352_v23, 1 }
 0x2d8   : > { %v2471_v9 = vpop.f32.mrb[240].mxu0 }
 0x2d9   : > { %v2523_v62 = vadd.f32 %v2471_v9, %v12301_v44  ;;  %v9330_v43 = vpop.f32.mrb[241].mxu0 }
 0x2db   : > { %v12421_v30 = vadd.f32 %v12233_v49, %v2523_v62 }
 0x2dc   : > { %v2476_v55 = vpop.f32.mrb[242].mxu0 }
 0x2dd   : > { %v2524_v59 = vadd.f32 %v2476_v55, %v12309_v61  ;;  %v9333_v5 = vpop.f32.mrb[243].mxu0 }
 0x2de   : > { %v15353_v5 = vld [vmem:[#allocation12_spill] sm:$0xff] }
 0x2df   : > { %v12425_v45 = vadd.f32 %v12243_v15, %v2524_v59  ;;  %vm3702_vm6 = vcmp.eq.s32.totalorder %v15353_v5, 1 }
 0x2e0   : > { %v2481_v63 = vpop.f32.mrb[244].mxu0 }
 0x2e1   : > { %v2525_v51 = vadd.f32 %v2481_v63, %v12319_v12  ;;  %v9336_v14 = vpop.f32.mrb[245].mxu0 }
 0x2e3   : > { %v12429_v40 = vadd.f32 %v12253_v36, %v2525_v51  ;;  %v15350_v36 = vld [vmem:[#allocation36_spill] sm:$0xff] }
 0x2e4   : > { %v2486_v37 = vpop.f32.mrb[246].mxu0 }
 0x2e5   : > { %v2526_v44 = vadd.f32 %v2486_v37, %v12324_v47  ;;  %v9339_v38 = vpop.f32.mrb[247].mxu0 }
 0x2e6   : > { %v15354_v38 = vld [vmem:[#allocation16_spill] sm:$0xff] }
 0x2e7   : > { %v12433_v49 = vadd.f32 %v12263_v54, %v2526_v44  ;;  %vm3703_vm10 = vcmp.eq.s32.totalorder %v15354_v38, 1 }
 0x2e8   : > { %v2491_v53 = vpop.f32.mrb[248].mxu0 }
 0x2e9   : > { %v2527_v61 = vadd.f32 %v2491_v53, %v12328_v6  ;;  %v9342_v0 = vpop.f32.mrb[249].mxu0 }
 0x2eb   : > { %v12437_v15 = vadd.f32 %v12273_v16, %v2527_v61  ;;  %v12450_v16 = vld [vmem:[%s14999_s2] ss:$0 sm:$0xff] }
 0x2ec   : > { %v2496_v11 = vpop.f32.mrb[250].mxu0 }
 0x2ed   : > { %v2528_v12 = vadd.f32 %v2496_v11, %v12335_v35  ;;  %v9345_v60 = vpop.f32.mrb[251].mxu0 }
 0x2ee   : > { %v15355_v60 = vld [vmem:[#allocation14_spill] sm:$0xff] }
 0x2ef   : > { %v12441_v41 = vadd.f32 %v15350_v36, %v2528_v12  ;;  %vm3704_vm2 = vcmp.eq.s32.totalorder %v15355_v60, 1 }
 0x2f0   : > { %v2501_v2 = vpop.f32.mrb[252].mxu0 }
 0x2f1   : > { %v2529_v47 = vadd.f32 %v2501_v2, %v12339_v19  ;;  %v9348_v57 = vpop.f32.mrb[253].mxu0 }
 0x2f3   : > { %v12445_v54 = vadd.f32 %v12293_v52, %v2529_v47 }
 0x2f4   : > { %v3015_v34 = vpop.f32.mrb[254].mxu0 }
 0x2f5   : > { %v3139_v6 = vadd.f32 %v3015_v34, %v12343_v39  ;;  %v9430_v35 = vpop.f32.mrb[255].mxu0 }
 0x2f7   : > { %v3171_v26 = vadd.f32 %v12450_v16, %v3139_v6 }
 0x2f8   : > { %v3020_v56 = vpop.f32.mrb[0].mxu0 }
 0x2f9   : > { %v3196_v42 = vmax.f32 %v3171_v26, 0.0  ;;  %v3140_v4 = vadd.f32 %v3020_v56, %v12347_v20  ;;  %v9433_v19 = vpop.f32.mrb[1].mxu0  ;;  %v15356_v56 = vld [vmem:[#allocation18_spill] sm:$0xff] }
 0x2fa   : > { %vm3705_vm7 = vcmp.eq.s32.totalorder %v15356_v56, 1 }
 0x2fb   : > { %v3725_v52 = vsel %vm3700_vm0, %v3196_v42, 0.0  ;;  %v3172_v7 = vadd.f32 %v12450_v16, %v3140_v4 }
 0x2fc   : > { %3751 = vst.msk [vmem:[#allocation2] sm:$0xff] %vm3750_vm13, %v3725_v52  ;;  %v3025_v50 = vpop.f32.mrb[2].mxu0 }
 0x2fd   : > { %v3197_v24 = vmax.f32 %v3172_v7, 0.0  ;;  %v3141_v18 = vadd.f32 %v3025_v50, %v12351_v58  ;;  %v9436_v39 = vpop.f32.mrb[3].mxu0  ;;  %v15357_v7 = vld [vmem:[#allocation15_spill] sm:$0xff] }
 0x2fe   : > { %vm3706_vm1 = vcmp.eq.s32.totalorder %v15357_v7, 1 }
 0x2ff   : > { %v3726_v9 = vsel %vm3701_vm11, %v3197_v24, 0.0  ;;  %v3173_v62 = vadd.f32 %v12450_v16, %v3141_v18 }
 0x300   : > { %3752 = vst.msk [vmem:[#allocation2 + $0x8] sm:$0xff] %vm3750_vm13, %v3726_v9  ;;  %v3030_v20 = vpop.f32.mrb[4].mxu0  ;;  %v9997_v9 = vld [vmem:[%s15000_s3 + $0x8] sm:$0xff]  }
 0x301   : > { %v3198_v43 = vmax.f32 %v3173_v62, 0.0  ;;  %v3142_v55 = vadd.f32 %v3030_v20, %v12355_v25  ;;  %v9439_v59 = vpop.f32.mrb[5].mxu0 }
 0x303   : > { %v3727_v63 = vsel %vm3702_vm6, %v3198_v43, 0.0  ;;  %v3174_v51 = vadd.f32 %v12450_v16, %v3142_v55  ;;  %v15358_v43 = vld [vmem:[#allocation20_spill] sm:$0xff] }
 0x304   : > { %3753 = vst.msk [vmem:[#allocation2 + $0x10] sm:$0xff] %vm3750_vm13, %v3727_v63  ;;  %v3035_v58 = vpop.f32.mrb[6].mxu0  ;;  %vm3707_vm5 = vcmp.eq.s32.totalorder %v15358_v43, 1  ;;  %v12495_v63 = vld [vmem:[%s15000_s3 + $0x20] sm:$0xff]  }
 0x305   : > { %v3199_v14 = vmax.f32 %v3174_v51, 0.0  ;;  %v3143_v37 = vadd.f32 %v3035_v58, %v12359_v32  ;;  %v9442_v44 = vpop.f32.mrb[7].mxu0 }
 0x307   : > { %v3728_v53 = vsel %vm3703_vm10, %v3199_v14, 0.0  ;;  %v3175_v61 = vadd.f32 %v12450_v16, %v3143_v37  ;;  %v3811_v47 = vld [vmem:[#allocation2 + $0x1] sm:$0xff] }
 0x308   : > { %3754 = vst.msk [vmem:[#allocation2 + $0x18] sm:$0xff] %vm3750_vm13, %v3728_v53  ;;  %v3040_v25 = vpop.f32.mrb[8].mxu0  ;;  %v15359_v14 = vld [vmem:[#allocation17_spill] sm:$0xff] }
 0x309   : > { %v3200_v0 = vmax.f32 %v3175_v61, 0.0  ;;  %v3144_v11 = vadd.f32 %v3040_v25, %v12363_v3  ;;  %v9445_v12 = vpop.f32.mrb[9].mxu0  ;;  %vm3708_vm8 = vcmp.eq.s32.totalorder %v15359_v14, 1 }
 0x30b   : > { %v3729_v36 = vsel %vm3704_vm2, %v3200_v0, 0.0  ;;  %v3176_v2 = vadd.f32 %v12450_v16, %v3144_v11  ;;  %v3812_v32 = vld [vmem:[#allocation2 + $0x9] sm:$0xff] }
 0x30c   : > { %3755 = vst.msk [vmem:[#allocation2 + $0x20] sm:$0xff] %vm3750_vm13, %v3729_v36  ;;  %v3045_v57 = vpop.f32.mrb[10].mxu0  ;;  %v3831_v34 = vpack.c.bf16 %v3812_v32, %v3811_v47  ;;  %v15360_v36 = vld [vmem:[#allocation22_spill] sm:$0xff] }
 0x30d   : > { %v3201_v6 = vmax.f32 %v3176_v2, 0.0  ;;  %v3145_v35 = vadd.f32 %v3045_v57, %v12367_v48  ;;  %v9448_v26 = vpop.f32.mrb[11].mxu0  ;;  %vm3709_vm9 = vcmp.eq.s32.totalorder %v15360_v36, 1 }
 0x30e   : > { %9507 = vmatprep.mubr.msk.bf16.mxu1 %vm3750_vm13, %v3831_v34 }
 0x30f   : > { %v3730_v3 = vsel %vm3705_vm7, %v3201_v6, 0.0  ;;  %v3177_v42 = vadd.f32 %v12450_v16, %v3145_v35  ;;  %v3813_v24 = vld [vmem:[#allocation2 + $0x11] sm:$0xff] }
 0x310   : > { %3756 = vst.msk [vmem:[#allocation2 + $0x28] sm:$0xff] %vm3750_vm13, %v3730_v3  ;;  %v3050_v4 = vpop.f32.mrb[12].mxu0 }
 0x311   : > { %v3202_v19 = vmax.f32 %v3177_v42, 0.0  ;;  %v3146_v33 = vadd.f32 %v3050_v4, %v12371_v1  ;;  %v9451_v52 = vpop.f32.mrb[13].mxu0  ;;  %v15361_v42 = vld [vmem:[#allocation19_spill] sm:$0xff] }
 0x312   : > { %vm3710_vm15 = vcmp.eq.s32.totalorder %v15361_v42, 1 }
 0x313   : > { %v3731_v50 = vsel %vm3706_vm1, %v3202_v19, 0.0  ;;  %v3178_v48 = vadd.f32 %v12450_v16, %v3146_v33  ;;  %v3814_v18 = vld [vmem:[#allocation2 + $0x19] sm:$0xff] }
 0x314   : > { %3757 = vst.msk [vmem:[#allocation2 + $0x30] sm:$0xff] %vm3750_vm13, %v3731_v50  ;;  %v3055_v39 = vpop.f32.mrb[14].mxu0  ;;  %v3832_v23 = vpack.c.bf16 %v3814_v18, %v3813_v24 }
 0x315   : > { %v3203_v62 = vmax.f32 %v3178_v48, 0.0  ;;  %v3147_v20 = vadd.f32 %v3055_v39, %v12375_v27  ;;  %v9454_v1 = vpop.f32.mrb[15].mxu0 }
 0x316   : > { %9508 = vmatmul.mubr.msk.bf16.vlgmr.msra.gmra.mrb[148].mxu1 %vm3750_vm13, %v3832_v23  ;;  %v15362_v23 = vld [vmem:[#allocation23_spill] sm:$0xff] }
 0x317   : > { %v3732_v55 = vsel %vm3707_vm5, %v3203_v62, 0.0  ;;  %v3179_v59 = vadd.f32 %v12450_v16, %v3147_v20  ;;  %9528 = vmatpush3.bf16.msra.mxu1 %v12388_v21  ;;  %v3815_v37 = vld [vmem:[#allocation2 + $0x21] sm:$0xff]  ;;  %vm3711_vm3 = vcmp.eq.s32.totalorder %v15362_v23, 1 }
 0x318   : > { %3758 = vst.msk [vmem:[#allocation2 + $0x38] sm:$0xff] %vm3750_vm13, %v3732_v55  ;;  %v3060_v5 = vpop.f32.mrb[16].mxu0  ;;  %9529 = vmatprep.subr.bf16.mxu1 %v9997_v9  ;;  %v12502_v53 = vld [vmem:[#allocation2 + $0x28] sm:$0xff] }
 0x319   : > { %v3204_v27 = vmax.f32 %v3179_v59, 0.0  ;;  %v3148_v51 = vadd.f32 %v3060_v5, %v12379_v8  ;;  %v9457_v58 = vpop.f32.mrb[17].mxu0 }
 0x31a   : > { %v15363_v58 = vld [vmem:[#allocation21_spill] sm:$0xff] }
 0x31b   : > { %v3733_v44 = vsel %vm3708_vm8, %v3204_v27, 0.0  ;;  %v3180_v38 = vadd.f32 %v12450_v16, %v3148_v51  ;;  %v12500_v21 = vld [vmem:[#allocation2 + $0x29] sm:$0xff]  ;;  %9530 = vmatpush3.bf16.msra.mxu1 %v9997_v9  ;;  %vm3712_vm4 = vcmp.eq.s32.totalorder %v15363_v58, 1 }
 0x31c   : > { %v12504_v61 = vld [vmem:[#allocation2 + $0x30] sm:$0xff]  ;;  %3759 = vst.msk [vmem:[#allocation2 + $0x40] sm:$0xff] %vm3750_vm13, %v3733_v44  ;;  %v3065_v25 = vpop.f32.mrb[18].mxu0  ;;  %v3833_v0 = vpack.c.bf16 %v12500_v21, %v3815_v37  ;;  %9551 = vmatprep.subr.bf16.mxu1 %v12495_v63 }
 0x31d   : > { %v5016_v8 = vpack.c.bf16 %v12504_v61, %v12502_v53  ;;  %v3205_v11 = vmax.f32 %v3180_v38, 0.0  ;;  %v3149_v12 = vadd.f32 %v3065_v25, %v12383_v22  ;;  %v9460_v60 = vpop.f32.mrb[19].mxu0  ;;  %v12517_v57 = vld [vmem:[#allocation2 + $0x2a] sm:$0xff] }
 0x31e   : > { %9511 = vmatprep.mubr.msk.bf16.mxu1 %vm3750_vm13, %v3833_v0 }
 0x31f   : > { %v3734_v2 = vsel %vm3709_vm9, %v3205_v11, 0.0  ;;  %v3181_v47 = vadd.f32 %v12450_v16, %v3149_v12  ;;  %v12515_v32 = vld [vmem:[#allocation2 + $0x31] sm:$0xff] }
 0x320   : > { %v12519_v34 = vld [vmem:[#allocation2 + $0x32] sm:$0xff]  ;;  %3760 = vst.msk [vmem:[#allocation2 + $0x48] sm:$0xff] %vm3750_vm13, %v3734_v2  ;;  %v3070_v6 = vpop.f32.mrb[20].mxu0  ;;  %v15364_v2 = vld [vmem:[#allocation25_spill] sm:$0xff] }
 0x321   : > { %v3206_v26 = vmax.f32 %v3181_v47, 0.0  ;;  %v3150_v56 = vadd.f32 %v3070_v6, %v12393_v29  ;;  %v9463_v3 = vpop.f32.mrb[21].mxu0  ;;  %v12531_v52 = vld [vmem:[#allocation2 + $0x38] sm:$0xff]  ;;  %vm3713_vm14 = vcmp.eq.s32.totalorder %v15364_v2, 1 }
 0x323   : > { %v3735_v4 = vsel %vm3710_vm15, %v3206_v26, 0.0  ;;  %v3182_v19 = vadd.f32 %v12450_v16, %v3150_v56  ;;  %v12529_v33 = vld [vmem:[#allocation2 + $0x39] sm:$0xff] }
 0x324   : > { %v12533_v7 = vld [vmem:[#allocation2 + $0x40] sm:$0xff]  ;;  %3761 = vst.msk [vmem:[#allocation2 + $0x50] sm:$0xff] %vm3750_vm13, %v3735_v4  ;;  %v3075_v50 = vpop.f32.mrb[22].mxu0  ;;  %v3834_v48 = vpack.c.bf16 %v12529_v33, %v12515_v32 }
 0x325   : > { %v5017_v29 = vpack.c.bf16 %v12533_v7, %v12531_v52  ;;  %v3207_v24 = vmax.f32 %v3182_v19, 0.0  ;;  %v3151_v18 = vadd.f32 %v3075_v50, %v12397_v13  ;;  %v9466_v39 = vpop.f32.mrb[23].mxu0  ;;  %v12546_v1 = vld [vmem:[#allocation2 + $0x3a] sm:$0xff] }
 0x326   : > { %9512 = vmatmul.mubr.msk.bf16.gmra.mrb[152].mxu1 %vm3750_vm13, %v3834_v48 }
 0x327   : > { %v3736_v9 = vsel %vm3711_vm3, %v3207_v24, 0.0  ;;  %v3183_v62 = vadd.f32 %v12450_v16, %v3151_v18  ;;  %v12544_v20 = vld [vmem:[#allocation2 + $0x41] sm:$0xff]  ;;  %v15365_v24 = vld [vmem:[#allocation24_spill] sm:$0xff] }
 0x328   : > { %v12548_v43 = vld [vmem:[#allocation2 + $0x42] sm:$0xff]  ;;  %3762 = vst.msk [vmem:[#allocation2 + $0x58] sm:$0xff] %vm3750_vm13, %v3736_v9  ;;  %v3080_v55 = vpop.f32.mrb[24].mxu0  ;;  %vm3714_vm12 = vcmp.eq.s32.totalorder %v15365_v24, 1 }
 0x329   : > { %v3208_v5 = vmax.f32 %v3183_v62, 0.0  ;;  %v3152_v27 = vadd.f32 %v3080_v55, %v12401_v10  ;;  %v9469_v51 = vpop.f32.mrb[25].mxu0  ;;  %v12560_v38 = vld [vmem:[#allocation2 + $0x48] sm:$0xff] }
 0x32b   : > { %v3737_v14 = vsel %vm3712_vm4, %v3208_v5, 0.0  ;;  %v3184_v37 = vadd.f32 %v12450_v16, %v3152_v27  ;;  %v12558_v44 = vld [vmem:[#allocation2 + $0x49] sm:$0xff] }
 0x32c   : > { %v12562_v25 = vld [vmem:[#allocation2 + $0x50] sm:$0xff]  ;;  %3763 = vst.msk [vmem:[#allocation2 + $0x60] sm:$0xff] %vm3750_vm13, %v3737_v14  ;;  %v3085_v0 = vpop.f32.mrb[26].mxu0  ;;  %v3835_v11 = vpack.c.bf16 %v12558_v44, %v12544_v20 }
 0x32d   : > { %v3209_v12 = vmax.f32 %v3184_v37, 0.0  ;;  %v3153_v60 = vadd.f32 %v3085_v0, %v12405_v31  ;;  %v9472_v36 = vpop.f32.mrb[27].mxu0  ;;  %v12575_v56 = vld [vmem:[#allocation2 + $0x4a] sm:$0xff] }
 0x32e   : > { %9515 = vmatprep.mubr.msk.bf16.mxu1 %vm3750_vm13, %v3835_v11  ;;  %v15366_v14 = vld [vmem:[#allocation27_spill] sm:$0xff] }
 0x32f   : > { %v3738_v47 = vsel %vm3713_vm14, %v3209_v12, 0.0  ;;  %v3185_v6 = vadd.f32 %v12450_v16, %v3153_v60  ;;  %v12573_v26 = vld [vmem:[#allocation2 + $0x51] sm:$0xff]  ;;  %vm3715_vm0 = vcmp.eq.s32.totalorder %v15366_v14, 1  ;;  %v15368_v14 = vld [vmem:[#allocation30_spill] sm:$0xff] }
 0x330   : > { %v12577_v3 = vld [vmem:[#allocation2 + $0x52] sm:$0xff]  ;;  %3764 = vst.msk [vmem:[#allocation2 + $0x68] sm:$0xff] %vm3750_vm13, %v3738_v47  ;;  %v3090_v42 = vpop.f32.mrb[28].mxu0  ;;  %vm3717_vm6 = vcmp.eq.s32.totalorder %v15368_v14, 1 }
 0x331   : > { %v3210_v19 = vmax.f32 %v3185_v6, 0.0  ;;  %v3154_v50 = vadd.f32 %v3090_v42, %v12409_v28  ;;  %v9475_v48 = vpop.f32.mrb[29].mxu0  ;;  %v12589_v9 = vld [vmem:[#allocation2 + $0x58] sm:$0xff] }
 0x332   : > { %v3780_v28 = vld [vmem:[#allocation2 + $0x18] sm:$0xff] }
 0x333   : > { %v3739_v18 = vsel %vm3714_vm12, %v3210_v19, 0.0  ;;  %v3186_v39 = vadd.f32 %v12450_v16, %v3154_v50  ;;  %v12587_v23 = vld [vmem:[#allocation2 + $0x59] sm:$0xff]  ;;  %v15367_v19 = vld [vmem:[#allocation26_spill] sm:$0xff] }
 0x334   : > { %v12591_v62 = vld [vmem:[#allocation2 + $0x60] sm:$0xff]  ;;  %3765 = vst.msk [vmem:[#allocation2 + $0x70] sm:$0xff] %vm3750_vm13, %v3739_v18  ;;  %v3095_v55 = vpop.f32.mrb[30].mxu0  ;;  %v3836_v5 = vpack.c.bf16 %v12587_v23, %v12573_v26  ;;  %vm3716_vm11 = vcmp.eq.s32.totalorder %v15367_v19, 1 }
 0x335   : > { %v3211_v27 = vmax.f32 %v3186_v39, 0.0  ;;  %v3155_v51 = vadd.f32 %v3095_v55, %v12413_v46  ;;  %v9478_v58 = vpop.f32.mrb[31].mxu0  ;;  %v12604_v12 = vld [vmem:[#allocation2 + $0x5a] sm:$0xff] }
 0x336   : > { %9516 = vmatmul.mubr.msk.bf16.gmra.mrb[156].mxu1 %vm3750_vm13, %v3836_v5 }
 0x337   : > { %v3740_v37 = vsel %vm3715_vm0, %v3211_v27, 0.0  ;;  %v3187_v0 = vadd.f32 %v12450_v16, %v3155_v51  ;;  %v12602_v11 = vld [vmem:[#allocation2 + $0x61] sm:$0xff] }
 0x338   : > { %v12606_v60 = vld [vmem:[#allocation2 + $0x62] sm:$0xff]  ;;  %3766 = vst.msk [vmem:[#allocation2 + $0x78] sm:$0xff] %vm3750_vm13, %v3740_v37  ;;  %v3100_v36 = vpop.f32.mrb[32].mxu0 }
 0x339   : > { %v3212_v47 = vmax.f32 %v3187_v0, 0.0  ;;  %v3156_v6 = vadd.f32 %v3100_v36, %v12417_v17  ;;  %v9481_v42 = vpop.f32.mrb[33].mxu0  ;;  %v12618_v18 = vld [vmem:[#allocation2 + $0x68] sm:$0xff] }
 0x33b   : > { %v3741_v50 = vsel %vm3716_vm11, %v3212_v47, 0.0  ;;  %v3188_v48 = vadd.f32 %v12450_v16, %v3156_v6  ;;  %v12616_v24 = vld [vmem:[#allocation2 + $0x69] sm:$0xff] }
 0x33c   : > { %v12620_v39 = vld [vmem:[#allocation2 + $0x70] sm:$0xff]  ;;  %3767 = vst.msk [vmem:[#allocation2 + $0x80] sm:$0xff] %vm3750_vm13, %v3741_v50  ;;  %v3105_v55 = vpop.f32.mrb[34].mxu0  ;;  %v3837_v5 = vpack.c.bf16 %v12616_v24, %v12602_v11 }
 0x33d   : > { %v3213_v27 = vmax.f32 %v3188_v48, 0.0  ;;  %v3157_v51 = vadd.f32 %v3105_v55, %v12421_v30  ;;  %v9484_v58 = vpop.f32.mrb[35].mxu0  ;;  %v12633_v47 = vld [vmem:[#allocation2 + $0x6a] sm:$0xff] }
 0x33e   : > { %9519 = vmatprep.mubr.msk.bf16.mxu1 %vm3750_vm13, %v3837_v5  ;;  %v15369_v5 = vld [vmem:[#allocation28_spill] sm:$0xff] }
 0x33f   : > { %v3742_v37 = vsel %vm3717_vm6, %v3213_v27, 0.0  ;;  %v3189_v0 = vadd.f32 %v12450_v16, %v3157_v51  ;;  %v12631_v36 = vld [vmem:[#allocation2 + $0x71] sm:$0xff]  ;;  %vm3718_vm10 = vcmp.eq.s32.totalorder %v15369_v5, 1 }
 0x340   : > { %v12635_v6 = vld [vmem:[#allocation2 + $0x72] sm:$0xff]  ;;  %3768 = vst.msk [vmem:[#allocation2 + $0x88] sm:$0xff] %vm3750_vm13, %v3742_v37  ;;  %v3110_v42 = vpop.f32.mrb[36].mxu0 }
 0x341   : > { %v3214_v50 = vmax.f32 %v3189_v0, 0.0  ;;  %v3158_v48 = vadd.f32 %v3110_v42, %v12425_v45  ;;  %v9487_v55 = vpop.f32.mrb[37].mxu0  ;;  %v12647_v14 = vld [vmem:[#allocation2 + $0x78] sm:$0xff] }
 0x343   : > { %v3743_v27 = vsel %vm3718_vm10, %v3214_v50, 0.0  ;;  %v3190_v51 = vadd.f32 %v12450_v16, %v3158_v48  ;;  %v12645_v58 = vld [vmem:[#allocation2 + $0x79] sm:$0xff]  ;;  %v15370_v48 = vld [vmem:[#allocation31_spill] sm:$0xff] }
 0x344   : > { %v12649_v37 = vld [vmem:[#allocation2 + $0x80] sm:$0xff]  ;;  %3769 = vst.msk [vmem:[#allocation2 + $0x90] sm:$0xff] %vm3750_vm13, %v3743_v27  ;;  %v3115_v2 = vpop.f32.mrb[38].mxu0  ;;  %v3838_v0 = vpack.c.bf16 %v12645_v58, %v12631_v36  ;;  %vm3719_vm2 = vcmp.eq.s32.totalorder %v15370_v48, 1 }
 0x345   : > { %v3215_v42 = vmax.f32 %v3190_v51, 0.0  ;;  %v3159_v50 = vadd.f32 %v3115_v2, %v12429_v40  ;;  %v9490_v55 = vpop.f32.mrb[39].mxu0  ;;  %v12662_v27 = vld [vmem:[#allocation2 + $0x7a] sm:$0xff] }
 0x346   : > { %9520 = vmatmul.mubr.msk.bf16.gmra.mrb[160].mxu1 %vm3750_vm13, %v3838_v0 }
 0x347   : > { %v3744_v5 = vsel %vm3719_vm2, %v3215_v42, 0.0  ;;  %v3191_v19 = vadd.f32 %v12450_v16, %v3159_v50  ;;  %v12660_v4 = vld [vmem:[#allocation2 + $0x81] sm:$0xff] }
 0x348   : > { %v12664_v59 = vld [vmem:[#allocation2 + $0x82] sm:$0xff]  ;;  %3770 = vst.msk [vmem:[#allocation2 + $0x98] sm:$0xff] %vm3750_vm13, %v3744_v5  ;;  %v3120_v35 = vpop.f32.mrb[40].mxu0 }
 0x349   : > { %v3216_v51 = vmax.f32 %v3191_v19, 0.0  ;;  %v3160_v0 = vadd.f32 %v3120_v35, %v12433_v49  ;;  %v9493_v42 = vpop.f32.mrb[41].mxu0  ;;  %v15371_v50 = vld [vmem:[#allocation29_spill] sm:$0xff]  ;;  %v12676_v46 = vld [vmem:[#allocation2 + $0x88] sm:$0xff] }
 0x34a   : > { %vm3720_vm7 = vcmp.eq.s32.totalorder %v15371_v50, 1 }
 0x34b   : > { %v3745_v55 = vsel %vm3720_vm7, %v3216_v51, 0.0  ;;  %v3192_v48 = vadd.f32 %v12450_v16, %v3160_v0  ;;  %v12674_v30 = vld [vmem:[#allocation2 + $0x89] sm:$0xff]  ;;  %v15372_v0 = vld [vmem:[#allocation40_spill] sm:$0xff] }
 0x34c   : > { %v12678_v5 = vld [vmem:[#allocation2 + $0x90] sm:$0xff]  ;;  %3771 = vst.msk [vmem:[#allocation2 + $0xa0] sm:$0xff] %vm3750_vm13, %v3745_v55  ;;  %v3125_v40 = vpop.f32.mrb[42].mxu0  ;;  %v3839_v19 = vpack.c.bf16 %v12674_v30, %v12660_v4  ;;  %vm3721_vm1 = vcmp.eq.s32.totalorder %v15372_v0, 1  ;;  %v3696_v0 = vpop.permute.xlu0 %3695 }
 0x34d   : > { %v3217_v35 = vmax.f32 %v3192_v48, 0.0  ;;  %v3161_v51 = vadd.f32 %v3125_v40, %v12437_v15  ;;  %v9496_v42 = vpop.f32.mrb[43].mxu0  ;;  %v12691_v55 = vld [vmem:[#allocation2 + $0x8a] sm:$0xff]  ;;  %v3777_v40 = vld [vmem:[#allocation2] sm:$0xff]  ;;  %vm3723_vm8 = vcmp.eq.s32.totalorder %v3696_v0, 1  ;;  %v3803_v0 = vpack.c.bf16 %v12618_v18, %v12591_v62 }
 0x34e   : > { %9523 = vmatprep.mubr.msk.bf16.mxu1 %vm3750_vm13, %v3839_v19  ;;  %v3778_v42 = vld [vmem:[#allocation2 + $0x8] sm:$0xff] }
 0x34f   : > { %v3746_v50 = vsel %vm3721_vm1, %v3217_v35, 0.0  ;;  %v3193_v2 = vadd.f32 %v12450_v16, %v3161_v51  ;;  %v12689_v31 = vld [vmem:[#allocation2 + $0x91] sm:$0xff] }
 0x350   : > { %v12693_v13 = vld [vmem:[#allocation2 + $0x92] sm:$0xff]  ;;  %3772 = vst.msk [vmem:[#allocation2 + $0xa8] sm:$0xff] %vm3750_vm13, %v3746_v50  ;;  %v3130_v22 = vpop.f32.mrb[44].mxu0 }
 0x351   : > { %v3218_v48 = vmax.f32 %v3193_v2, 0.0  ;;  %v3162_v19 = vadd.f32 %v3130_v22, %v12441_v41  ;;  %v9499_v35 = vpop.f32.mrb[45].mxu0  ;;  %v15373_v51 = vld [vmem:[#allocation39_spill] sm:$0xff]  ;;  %v3797_v22 = vpack.c.bf16 %v3778_v42, %v3777_v40  ;;  %v3781_v40 = vld [vmem:[#allocation2 + $0x20] sm:$0xff] }
 0x352   : > { %vm3722_vm5 = vcmp.eq.s32.totalorder %v15373_v51, 1  ;;  %v3799_v42 = vpack.c.bf16 %v12502_v53, %v3781_v40  ;;  %v10001_v40 = vld [vmem:[%s15000_s3 + $0x38] sm:$0xff]   ;;  %v10010_v53 = vld [vmem:[%s15000_s3 + $0x80] sm:$0xff]  }
 0x353   : > { %v3747_v49 = vsel %vm3722_vm5, %v3218_v48, 0.0  ;;  %v3194_v45 = vadd.f32 %v12450_v16, %v3162_v19  ;;  %v12703_v17 = vld [vmem:[#allocation2 + $0x99] sm:$0xff]  ;;  %v3699_v48 = vpop.permute.xlu1 %3698 }
 0x354   : > { %3773 = vst.msk [vmem:[#allocation2 + $0xb0] sm:$0xff] %vm3750_vm13, %v3747_v49  ;;  %v3135_v50 = vpop.f32.mrb[46].mxu0  ;;  %v3840_v15 = vpack.c.bf16 %v12703_v17, %v12689_v31  ;;  %vm3724_vm9 = vcmp.eq.s32.totalorder %v3699_v48, 1  ;;  %v4156_v48 = vld [vmem:[#allocation2 + $0x2] sm:$0xff] }
 0x355   : > { %v3219_v2 = vmax.f32 %v3194_v45, 0.0  ;;  %v3163_v41 = vadd.f32 %v3135_v50, %v12445_v54  ;;  %v9502_v35 = vpop.f32.mrb[47].mxu0  ;;  %v3779_v45 = vld [vmem:[#allocation2 + $0x10] sm:$0xff]  ;;  %v3804_v50 = vpack.c.bf16 %v12647_v14, %v12620_v39 }
 0x356   : > { %9524 = vmatmul.mubr.msk.bf16.gmra.mrb[164].mxu1 %vm3750_vm13, %v3840_v15  ;;  %v3798_v54 = vpack.c.bf16 %v3780_v28, %v3779_v45  ;;  %v9999_v15 = vld [vmem:[%s15000_s3 + $0x28] sm:$0xff]   ;;  %v3801_v28 = vpack.c.bf16 %v12560_v38, %v12533_v7  ;;  %v15378_v7 = vpack.c.bf16 %v12678_v5, %v12676_v46 }
 0x357   : > { %v3748_v51 = vsel %vm3723_vm8, %v3219_v2, 0.0  ;;  %v3195_v19 = vadd.f32 %v12450_v16, %v3163_v41  ;;  %9531 = vmatprep.mubr.msk.bf16.mxu1 %vm3750_vm13, %v3797_v22  ;;  %v10000_v16 = vld [vmem:[%s15000_s3 + $0x30] sm:$0xff]   ;;  %v3805_v2 = vpack.c.bf16 %v12676_v46, %v12649_v37  ;;  %v12742_v41 = vld [vmem:[#allocation2 + $0x98] sm:$0xff]  ;;  %v15379_v46 = vpack.c.bf16 %v12515_v32, %v12500_v21 }
 0x358   : > { %3774 = vst.msk [vmem:[#allocation2 + $0xb8] sm:$0xff] %vm3750_vm13, %v3748_v51  ;;  %v4157_v22 = vld [vmem:[#allocation2 + $0xa] sm:$0xff]  ;;  %v3806_v35 = vpack.c.bf16 %v12742_v41, %v12678_v5  ;;  %v15380_v5 = vpack.c.bf16 %v12544_v20, %v12529_v33  ;;  %v15382_v21 = vpack.c.bf16 %v12602_v11, %v12587_v23  ;;  %v15383_v32 = vpack.c.bf16 %v12631_v36, %v12616_v24 }
 0x359   : > { %v3220_v49 = vmax.f32 %v3195_v19, 0.0  ;;  %v4176_v51 = vpack.c.bf16 %v4157_v22, %v4156_v48  ;;  %v4159_v19 = vld [vmem:[#allocation2 + $0x1a] sm:$0xff]  ;;  %v15384_v33 = vpack.c.bf16 %v12660_v4, %v12645_v58  ;;  %v15385_v20 = vpack.c.bf16 %v12689_v31, %v12674_v30 }
 0x35a   : > { %v4367_v22 = vld [vmem:[#allocation2 + $0x1c] sm:$0xff]  ;;  %v4366_v48 = vld [vmem:[#allocation2 + $0x14] sm:$0xff]  ;;  %v15386_v31 = vpack.c.bf16 %v12519_v34, %v12517_v57  ;;  %v15387_v30 = vpack.c.bf16 %v12548_v43, %v12546_v1  ;;  %v15389_v58 = vpack.c.bf16 %v12606_v60, %v12604_v12 }
 0x35b   : > { %v3749_v10 = vsel %vm3724_vm9, %v3220_v49, 0.0  ;;  %v4158_v49 = vld [vmem:[#allocation2 + $0x12] sm:$0xff]  ;;  %v5222_v11 = vld [vmem:[#allocation2 + $0xa9] sm:$0xff] }
 0x35c   : > { %3775 = vst.msk [vmem:[#allocation2 + $0xc0] sm:$0xff] %vm3750_vm13, %v3749_v10  ;;  %v3800_v10 = vpack.c.bf16 %v12531_v52, %v12504_v61  ;;  %v4177_v45 = vpack.c.bf16 %v4159_v19, %v4158_v49  ;;  %v4369_v19 = vld [vmem:[#allocation2 + $0x2c] sm:$0xff]  ;;  %v4371_v49 = vld [vmem:[#allocation2 + $0x3c] sm:$0xff]  ;;  %v15375_v61 = vpack.c.bf16 %v12591_v62, %v12589_v9  ;;  %v15377_v52 = vpack.c.bf16 %v12649_v37, %v12647_v14 }
 0x35d   : > { %v10011_v37 = vld [vmem:[%s15000_s3 + $0x88] sm:$0xff]  }
 0x35e   : > { %9532 = vmatmul.mubr.msk.bf16.vlgmr.msra.gmra.mrb[148].mxu1 %vm3750_vm13, %v3798_v54  ;;  %v4160_v54 = vld [vmem:[#allocation2 + $0x22] sm:$0xff] }
 0x35f   : > { %9552 = vmatpush3.bf16.msra.mxu1 %v12495_v63  ;;  %9535 = vmatprep.mubr.msk.bf16.mxu1 %vm3750_vm13, %v3799_v42  ;;  %v3802_v63 = vpack.c.bf16 %v12589_v9, %v12562_v25  ;;  %v10002_v42 = vld [vmem:[%s15000_s3 + $0x40] sm:$0xff]   ;;  %v5012_v9 = vld [vmem:[#allocation2 + $0xa8] sm:$0xff] }
 0x360   : > { %9553 = vmatprep.subr.bf16.mxu1 %v9999_v15 }
 0x363   : > { %9554 = vmatpush3.bf16.msra.mxu1 %v9999_v15  ;;  %v4178_v15 = vpack.c.bf16 %v12517_v57, %v4160_v54  ;;  %v5224_v24 = vld [vmem:[#allocation2 + $0xb9] sm:$0xff]  ;;  %v5225_v36 = vld [vmem:[#allocation2 + $0xc1] sm:$0xff]  ;;  %v15390_v57 = vpack.c.bf16 %v12635_v6, %v12633_v47 }
 0x364   : > { %9575 = vmatprep.subr.bf16.mxu1 %v10000_v16  ;;  %v5235_v4 = vpack.c.bf16 %v5225_v36, %v5224_v24 }
 0x366   : > { %9536 = vmatmul.mubr.msk.bf16.gmra.mrb[152].mxu1 %vm3750_vm13, %v3800_v10  ;;  %v4179_v10 = vpack.c.bf16 %v12546_v1, %v12519_v34  ;;  %v15391_v34 = vpack.c.bf16 %v12664_v59, %v12662_v27  ;;  %v15392_v1 = vpack.c.bf16 %v12693_v13, %v12691_v55 }
 0x367   : > { %9539 = vmatprep.mubr.msk.bf16.mxu1 %vm3750_vm13, %v3801_v28  ;;  %v4180_v28 = vpack.c.bf16 %v12575_v56, %v12548_v43  ;;  %v5431_v43 = vld [vmem:[#allocation2 + $0xa2] sm:$0xff] }
 0x36e   : > { %9540 = vmatmul.mubr.msk.bf16.gmra.mrb[156].mxu1 %vm3750_vm13, %v3802_v63  ;;  %v4182_v63 = vpack.c.bf16 %v12633_v47, %v12606_v60  ;;  %v5434_v47 = vld [vmem:[#allocation2 + $0xba] sm:$0xff] }
 0x36f   : > { %9543 = vmatprep.mubr.msk.bf16.mxu1 %vm3750_vm13, %v3803_v0  ;;  %v4183_v0 = vpack.c.bf16 %v12662_v27, %v12635_v6  ;;  %v5435_v6 = vld [vmem:[#allocation2 + $0xc2] sm:$0xff] }
 0x370   : > { %v12949_v27 = vld [vmem:[%s15005_s8 + $0x8] sm:$0xff] }
 0x371   : > { %5933 = vrot.lane.b32.xlu1 %v12949_v27, %s10174_s24 }
 0x376   : > { %9544 = vmatmul.mubr.msk.bf16.gmra.mrb[160].mxu1 %vm3750_vm13, %v3804_v50  ;;  %v4184_v50 = vpack.c.bf16 %v12691_v55, %v12664_v59  ;;  %v5445_v59 = vpack.c.bf16 %v5435_v6, %v5434_v47  ;;  %v12956_v55 = vld [vmem:[%s15005_s8 + $0x10] sm:$0xff] }
 0x377   : > { %9547 = vmatprep.mubr.msk.bf16.mxu1 %vm3750_vm13, %v3805_v2  ;;  %v12775_v2 = vld [vmem:[#allocation2 + $0x9a] sm:$0xff] }
 0x37e   : > { %9548 = vmatmul.mubr.msk.bf16.gmra.mrb[164].mxu1 %vm3750_vm13, %v3806_v35  ;;  %v4185_v35 = vpack.c.bf16 %v12775_v2, %v12693_v13  ;;  %v12942_v13 = vld [vmem:[%s15005_s8] sm:$0xff] }
 0x37f   : > { %9555 = vmatprep.mubr.msk.bf16.mxu1 %vm3750_vm13, %v4176_v51  ;;  %v4386_v51 = vpack.c.bf16 %v4367_v22, %v4366_v48  ;;  %v4374_v22 = vld [vmem:[#allocation2 + $0x54] sm:$0xff]  ;;  %v4379_v48 = vld [vmem:[#allocation2 + $0x7c] sm:$0xff]  ;;  %5931 = vrot.lane.b32.xlu0 %v12942_v13, %s10174_s24 }
 0x383   : > { %5935 = vrot.lane.b32.xlu0 %v12956_v55, %s10174_s24 }
 0x386   : > { %9556 = vmatmul.mubr.msk.bf16.vlgmr.msra.gmra.mrb[148].mxu1 %vm3750_vm13, %v4177_v45  ;;  %v4368_v45 = vld [vmem:[#allocation2 + $0x24] sm:$0xff] }
 0x387   : > { %9576 = vmatpush3.bf16.msra.mxu1 %v10000_v16  ;;  %9559 = vmatprep.mubr.msk.bf16.mxu1 %vm3750_vm13, %v4178_v15  ;;  %v4181_v16 = vpack.c.bf16 %v12604_v12, %v12577_v3  ;;  %v4387_v54 = vpack.c.bf16 %v4369_v19, %v4368_v45  ;;  %v10003_v15 = vld [vmem:[%s15000_s3 + $0x48] sm:$0xff]  }
 0x388   : > { %9577 = vmatprep.subr.bf16.mxu1 %v10001_v40  ;;  %v5432_v12 = vld [vmem:[#allocation2 + $0xaa] sm:$0xff] }
 0x38b   : > { %9578 = vmatpush3.bf16.msra.mxu1 %v10001_v40  ;;  %v4370_v40 = vld [vmem:[#allocation2 + $0x34] sm:$0xff] }
 0x38c   : > { %9599 = vmatprep.subr.bf16.mxu1 %v10002_v42 }
 0x38e   : > { %9560 = vmatmul.mubr.msk.bf16.gmra.mrb[152].mxu1 %vm3750_vm13, %v4179_v10  ;;  %v4388_v10 = vpack.c.bf16 %v4371_v49, %v4370_v40  ;;  %v4378_v49 = vld [vmem:[#allocation2 + $0x74] sm:$0xff]  ;;  %v4383_v40 = vld [vmem:[#allocation2 + $0x9c] sm:$0xff] }
 0x38f   : > { %9563 = vmatprep.mubr.msk.bf16.mxu1 %vm3750_vm13, %v4180_v28  ;;  %v10004_v28 = vld [vmem:[%s15000_s3 + $0x50] sm:$0xff]   ;;  %v4392_v45 = vpack.c.bf16 %v4379_v48, %v4378_v49  ;;  %v4578_v49 = vld [vmem:[#allocation2 + $0x25] sm:$0xff] }
 0x396   : > { %9564 = vmatmul.mubr.msk.bf16.gmra.mrb[156].mxu1 %vm3750_vm13, %v4181_v16  ;;  %v4373_v16 = vld [vmem:[#allocation2 + $0x4c] sm:$0xff] }
 0x397   : > { %9567 = vmatprep.mubr.msk.bf16.mxu1 %vm3750_vm13, %v4182_v63  ;;  %v4375_v63 = vld [vmem:[#allocation2 + $0x5c] sm:$0xff] }
 0x39e   : > { %9568 = vmatmul.mubr.msk.bf16.gmra.mrb[160].mxu1 %vm3750_vm13, %v4183_v0  ;;  %v4372_v0 = vld [vmem:[#allocation2 + $0x44] sm:$0xff] }
 0x39f   : > { %9571 = vmatprep.mubr.msk.bf16.mxu1 %vm3750_vm13, %v4184_v50  ;;  %v4389_v50 = vpack.c.bf16 %v4373_v16, %v4372_v0  ;;  %v4382_v16 = vld [vmem:[#allocation2 + $0x94] sm:$0xff]  ;;  %v4385_v0 = vld [vmem:[#allocation2 + $0xac] sm:$0xff] }
 0x3a6   : > { %9572 = vmatmul.mubr.msk.bf16.gmra.mrb[164].mxu1 %vm3750_vm13, %v4185_v35  ;;  %v4390_v35 = vpack.c.bf16 %v4375_v63, %v4374_v22  ;;  %v4394_v63 = vpack.c.bf16 %v4383_v40, %v4382_v16  ;;  %v4384_v22 = vld [vmem:[#allocation2 + $0xa4] sm:$0xff]  ;;  %v10005_v40 = vld [vmem:[%s15000_s3 + $0x58] sm:$0xff]   ;;  %v4583_v16 = vld [vmem:[#allocation2 + $0x4d] sm:$0xff] }
 0x3a7   : > { %9579 = vmatprep.mubr.msk.bf16.mxu1 %vm3750_vm13, %v4386_v51  ;;  %v4376_v51 = vld [vmem:[#allocation2 + $0x64] sm:$0xff] }
 0x3ae   : > { %9580 = vmatmul.mubr.msk.bf16.vlgmr.msra.gmra.mrb[148].mxu1 %vm3750_vm13, %v4387_v54  ;;  %v4381_v54 = vld [vmem:[#allocation2 + $0x8c] sm:$0xff] }
 0x3af   : > { %9600 = vmatpush3.bf16.msra.mxu1 %v10002_v42  ;;  %9583 = vmatprep.mubr.msk.bf16.mxu1 %vm3750_vm13, %v4388_v10  ;;  %v4377_v42 = vld [vmem:[#allocation2 + $0x6c] sm:$0xff] }
 0x3b0   : > { %9601 = vmatprep.subr.bf16.mxu1 %v10003_v15  ;;  %v4391_v19 = vpack.c.bf16 %v4377_v42, %v4376_v51  ;;  %v4576_v42 = vld [vmem:[#allocation2 + $0x15] sm:$0xff]  ;;  %v4579_v51 = vld [vmem:[#allocation2 + $0x2d] sm:$0xff] }
 0x3b3   : > { %9602 = vmatpush3.bf16.msra.mxu1 %v10003_v15  ;;  %v4380_v15 = vld [vmem:[#allocation2 + $0x84] sm:$0xff] }
 0x3b4   : > { %9623 = vmatprep.subr.bf16.mxu1 %v10004_v28  ;;  %v4393_v10 = vpack.c.bf16 %v4381_v54, %v4380_v15  ;;  %v4580_v54 = vld [vmem:[#allocation2 + $0x35] sm:$0xff] }
 0x3b6   : > { %9584 = vmatmul.mubr.msk.bf16.gmra.mrb[152].mxu1 %vm3750_vm13, %v4389_v50  ;;  %v4577_v50 = vld [vmem:[#allocation2 + $0x1d] sm:$0xff] }
 0x3b7   : > { %9587 = vmatprep.mubr.msk.bf16.mxu1 %vm3750_vm13, %v4390_v35  ;;  %v4395_v35 = vpack.c.bf16 %v4385_v0, %v4384_v22  ;;  %v4596_v48 = vpack.c.bf16 %v4577_v50, %v4576_v42  ;;  %v4582_v0 = vld [vmem:[#allocation2 + $0x45] sm:$0xff]  ;;  %v4584_v22 = vld [vmem:[#allocation2 + $0x55] sm:$0xff]  ;;  %v4589_v42 = vld [vmem:[#allocation2 + $0x7d] sm:$0xff] }
 0x3b8   : > { %v4599_v50 = vpack.c.bf16 %v4583_v16, %v4582_v0  ;;  %v4592_v16 = vld [vmem:[#allocation2 + $0x95] sm:$0xff]  ;;  %v4595_v0 = vld [vmem:[#allocation2 + $0xad] sm:$0xff] }
 0x3be   : > { %9588 = vmatmul.mubr.msk.bf16.gmra.mrb[156].mxu1 %vm3750_vm13, %v4391_v19  ;;  %v4581_v19 = vld [vmem:[#allocation2 + $0x3d] sm:$0xff] }
 0x3bf   : > { %9591 = vmatprep.mubr.msk.bf16.mxu1 %vm3750_vm13, %v4392_v45  ;;  %v4597_v45 = vpack.c.bf16 %v4579_v51, %v4578_v49  ;;  %v4598_v15 = vpack.c.bf16 %v4581_v19, %v4580_v54  ;;  %v4588_v19 = vld [vmem:[#allocation2 + $0x75] sm:$0xff]  ;;  %v4593_v54 = vld [vmem:[#allocation2 + $0x9d] sm:$0xff] }
 0x3c0   : > { %v4602_v49 = vpack.c.bf16 %v4589_v42, %v4588_v19  ;;  %v4788_v19 = vld [vmem:[#allocation2 + $0x26] sm:$0xff] }
 0x3c6   : > { %9592 = vmatmul.mubr.msk.bf16.gmra.mrb[160].mxu1 %vm3750_vm13, %v4393_v10  ;;  %v10006_v10 = vld [vmem:[%s15000_s3 + $0x60] sm:$0xff]  }
 0x3c7   : > { %9595 = vmatprep.mubr.msk.bf16.mxu1 %vm3750_vm13, %v4394_v63  ;;  %v4585_v63 = vld [vmem:[#allocation2 + $0x5d] sm:$0xff] }
 0x3ce   : > { %9596 = vmatmul.mubr.msk.bf16.gmra.mrb[164].mxu1 %vm3750_vm13, %v4395_v35  ;;  %v4600_v35 = vpack.c.bf16 %v4585_v63, %v4584_v22  ;;  %v4604_v63 = vpack.c.bf16 %v4593_v54, %v4592_v16  ;;  %v4594_v22 = vld [vmem:[#allocation2 + $0xa5] sm:$0xff]  ;;  %v4793_v16 = vld [vmem:[#allocation2 + $0x4e] sm:$0xff] }
 0x3cf   : > { %9603 = vmatprep.mubr.msk.bf16.mxu1 %vm3750_vm13, %v4596_v48  ;;  %v4586_v48 = vld [vmem:[#allocation2 + $0x65] sm:$0xff] }
 0x3d0   : > { %v10007_v54 = vld [vmem:[%s15000_s3 + $0x68] sm:$0xff]  }
 0x3d6   : > { %9604 = vmatmul.mubr.msk.bf16.vlgmr.msra.gmra.mrb[148].mxu1 %vm3750_vm13, %v4597_v45  ;;  %v4591_v45 = vld [vmem:[#allocation2 + $0x8d] sm:$0xff] }
 0x3d7   : > { %9624 = vmatpush3.bf16.msra.mxu1 %v10004_v28  ;;  %9607 = vmatprep.mubr.msk.bf16.mxu1 %vm3750_vm13, %v4598_v15  ;;  %v4587_v28 = vld [vmem:[#allocation2 + $0x6d] sm:$0xff] }
 0x3d8   : > { %9625 = vmatprep.subr.bf16.mxu1 %v10005_v40  ;;  %v4601_v51 = vpack.c.bf16 %v4587_v28, %v4586_v48  ;;  %v4786_v28 = vld [vmem:[#allocation2 + $0x16] sm:$0xff]  ;;  %v4789_v48 = vld [vmem:[#allocation2 + $0x2e] sm:$0xff] }
 0x3db   : > { %9626 = vmatpush3.bf16.msra.mxu1 %v10005_v40  ;;  %v4590_v40 = vld [vmem:[#allocation2 + $0x85] sm:$0xff] }
 0x3dc   : > { %9647 = vmatprep.subr.bf16.mxu1 %v10006_v10  ;;  %v4603_v15 = vpack.c.bf16 %v4591_v45, %v4590_v40  ;;  %v4790_v45 = vld [vmem:[#allocation2 + $0x36] sm:$0xff] }
 0x3de   : > { %9608 = vmatmul.mubr.msk.bf16.gmra.mrb[152].mxu1 %vm3750_vm13, %v4599_v50  ;;  %v4787_v50 = vld [vmem:[#allocation2 + $0x1e] sm:$0xff] }
 0x3df   : > { %9611 = vmatprep.mubr.msk.bf16.mxu1 %vm3750_vm13, %v4600_v35  ;;  %v4605_v35 = vpack.c.bf16 %v4595_v0, %v4594_v22  ;;  %v4806_v42 = vpack.c.bf16 %v4787_v50, %v4786_v28  ;;  %v4792_v0 = vld [vmem:[#allocation2 + $0x46] sm:$0xff]  ;;  %v4794_v22 = vld [vmem:[#allocation2 + $0x56] sm:$0xff]  ;;  %v4799_v28 = vld [vmem:[#allocation2 + $0x7e] sm:$0xff] }
 0x3e0   : > { %v4809_v50 = vpack.c.bf16 %v4793_v16, %v4792_v0  ;;  %v4802_v16 = vld [vmem:[#allocation2 + $0x96] sm:$0xff]  ;;  %v10012_v0 = vld [vmem:[%s15002_s5] sm:$0xff]  }
 0x3e1   : > { %9719 = vmatprep.subr.bf16.mxu0 %v10012_v0 }
 0x3e2   : > { %9720 = vmatpush3.bf16.msra.mxu0 %v10012_v0  ;;  %v13033_v0 = vld [vmem:[%s15005_s8 + $0x68] sm:$0xff] }
 0x3e6   : > { %9612 = vmatmul.mubr.msk.bf16.gmra.mrb[156].mxu1 %vm3750_vm13, %v4601_v51  ;;  %v4791_v51 = vld [vmem:[#allocation2 + $0x3e] sm:$0xff] }
 0x3e7   : > { %9615 = vmatprep.mubr.msk.bf16.mxu1 %vm3750_vm13, %v4602_v49  ;;  %v4807_v49 = vpack.c.bf16 %v4789_v48, %v4788_v19  ;;  %v4808_v40 = vpack.c.bf16 %v4791_v51, %v4790_v45  ;;  %v4798_v51 = vld [vmem:[#allocation2 + $0x76] sm:$0xff]  ;;  %v4803_v45 = vld [vmem:[#allocation2 + $0x9e] sm:$0xff] }
 0x3e8   : > { %v4812_v19 = vpack.c.bf16 %v4799_v28, %v4798_v51  ;;  %v10009_v28 = vld [vmem:[%s15000_s3 + $0x78] sm:$0xff]   ;;  %v12977_v51 = vld [vmem:[%s15005_s8 + $0x28] sm:$0xff] }
 0x3ee   : > { %9616 = vmatmul.mubr.msk.bf16.gmra.mrb[160].mxu1 %vm3750_vm13, %v4603_v15  ;;  %v10008_v15 = vld [vmem:[%s15000_s3 + $0x70] sm:$0xff]  }
 0x3ef   : > { %9619 = vmatprep.mubr.msk.bf16.mxu1 %vm3750_vm13, %v4604_v63  ;;  %v4795_v63 = vld [vmem:[#allocation2 + $0x5e] sm:$0xff] }
 0x3f6   : > { %9620 = vmatmul.mubr.msk.bf16.gmra.mrb[164].mxu1 %vm3750_vm13, %v4605_v35  ;;  %v4810_v35 = vpack.c.bf16 %v4795_v63, %v4794_v22  ;;  %v4814_v63 = vpack.c.bf16 %v4803_v45, %v4802_v16  ;;  %v4805_v22 = vld [vmem:[#allocation2 + $0xae] sm:$0xff]  ;;  %v12998_v45 = vld [vmem:[%s15005_s8 + $0x40] sm:$0xff]  ;;  %v13019_v16 = vld [vmem:[%s15005_s8 + $0x58] sm:$0xff] }
 0x3f7   : > { %9627 = vmatprep.mubr.msk.bf16.mxu1 %vm3750_vm13, %v4806_v42  ;;  %v4796_v42 = vld [vmem:[#allocation2 + $0x66] sm:$0xff] }
 0x3fe   : > { %9628 = vmatmul.mubr.msk.bf16.vlgmr.msra.gmra.mrb[148].mxu1 %vm3750_vm13, %v4807_v49  ;;  %v4801_v49 = vld [vmem:[#allocation2 + $0x8e] sm:$0xff] }
 0x3ff   : > { %9648 = vmatpush3.bf16.msra.mxu1 %v10006_v10  ;;  %9631 = vmatprep.mubr.msk.bf16.mxu1 %vm3750_vm13, %v4808_v40  ;;  %v4797_v10 = vld [vmem:[#allocation2 + $0x6e] sm:$0xff] }
 0x400   : > { %9649 = vmatprep.subr.bf16.mxu1 %v10007_v54  ;;  %v4811_v48 = vpack.c.bf16 %v4797_v10, %v4796_v42  ;;  %v15374_v42 = vpack.c.bf16 %v12562_v25, %v12560_v38  ;;  %v5013_v38 = vld [vmem:[#allocation2 + $0xb0] sm:$0xff] }
 0x401   : > { %v5024_v62 = vpack.c.bf16 %v5013_v38, %v5012_v9 }
 0x403   : > { %9650 = vmatpush3.bf16.msra.mxu1 %v10007_v54  ;;  %v4800_v54 = vld [vmem:[#allocation2 + $0x86] sm:$0xff] }
 0x404   : > { %9671 = vmatprep.subr.bf16.mxu1 %v10008_v15  ;;  %v4813_v40 = vpack.c.bf16 %v4801_v49, %v4800_v54  ;;  %v12991_v49 = vld [vmem:[%s15005_s8 + $0x38] sm:$0xff]  ;;  %v13005_v54 = vld [vmem:[%s15005_s8 + $0x48] sm:$0xff] }
 0x406   : > { %9632 = vmatmul.mubr.msk.bf16.gmra.mrb[152].mxu1 %vm3750_vm13, %v4809_v50  ;;  %v10013_v50 = vld [vmem:[%s15002_s5 + $0x8] sm:$0xff]  }
 0x407   : > { %9635 = vmatprep.mubr.msk.bf16.mxu1 %vm3750_vm13, %v4810_v35  ;;  %9721 = vmatprep.subr.bf16.mxu0 %v10013_v50  ;;  %v4804_v35 = vld [vmem:[#allocation2 + $0xa6] sm:$0xff] }
 0x408   : > { %v4815_v10 = vpack.c.bf16 %v4805_v22, %v4804_v35  ;;  %9722 = vmatpush3.bf16.msra.mxu0 %v10013_v50  ;;  %v13040_v50 = vld [vmem:[%s15005_s8 + $0x70] sm:$0xff]  ;;  %v13047_v22 = vld [vmem:[%s15005_s8 + $0x78] sm:$0xff]  ;;  %v13054_v35 = vld [vmem:[%s15005_s8 + $0x80] sm:$0xff] }
 0x40e   : > { %9636 = vmatmul.mubr.msk.bf16.gmra.mrb[156].mxu1 %vm3750_vm13, %v4811_v48  ;;  %v12970_v48 = vld [vmem:[%s15005_s8 + $0x20] sm:$0xff] }
 0x40f   : > { %9639 = vmatprep.mubr.msk.bf16.mxu1 %vm3750_vm13, %v4812_v19  ;;  %5939 = vrot.lane.b32.xlu0 %v12970_v48, %s10174_s24  ;;  %v12984_v19 = vld [vmem:[%s15005_s8 + $0x30] sm:$0xff] }
 0x413   : > { %5943 = vrot.lane.b32.xlu0 %v12984_v19, %s10174_s24 }
 0x416   : > { %9640 = vmatmul.mubr.msk.bf16.gmra.mrb[160].mxu1 %vm3750_vm13, %v4813_v40  ;;  %v13012_v40 = vld [vmem:[%s15005_s8 + $0x50] sm:$0xff] }
 0x417   : > { %9643 = vmatprep.mubr.msk.bf16.mxu1 %vm3750_vm13, %v4814_v63  ;;  %5947 = vrot.lane.b32.xlu0 %v12998_v45, %s10174_s24  ;;  %v13026_v63 = vld [vmem:[%s15005_s8 + $0x60] sm:$0xff] }
 0x41b   : > { %5951 = vrot.lane.b32.xlu0 %v13012_v40, %s10174_s24 }
 0x41e   : > { %9644 = vmatmul.mubr.msk.bf16.gmra.mrb[164].mxu1 %vm3750_vm13, %v4815_v10  ;;  %v13061_v10 = vld [vmem:[%s15005_s8 + $0x88] sm:$0xff] }
 0x41f   : > { %9651 = vmatprep.mubr.msk.bf16.mxu1 %vm3750_vm13, %v5016_v8  ;;  %v15376_v8 = vpack.c.bf16 %v12620_v39, %v12618_v18  ;;  %v5015_v18 = vld [vmem:[#allocation2 + $0xc0] sm:$0xff]  ;;  %v5014_v39 = vld [vmem:[#allocation2 + $0xb8] sm:$0xff]  ;;  %5955 = vrot.lane.b32.xlu0 %v13026_v63, %s10174_s24 }
 0x420   : > { %v5025_v14 = vpack.c.bf16 %v5015_v18, %v5014_v39 }
 0x423   : > { %5959 = vrot.lane.b32.xlu0 %v13040_v50, %s10174_s24 }
 0x426   : > { %9652 = vmatmul.mubr.msk.bf16.vlgmr.msra.gmra.mrb[148].mxu1 %vm3750_vm13, %v5017_v29  ;;  %v5011_v29 = vld [vmem:[#allocation2 + $0xa0] sm:$0xff] }
 0x427   : > { %9672 = vmatpush3.bf16.msra.mxu1 %v10008_v15  ;;  %9655 = vmatprep.mubr.msk.bf16.mxu1 %vm3750_vm13, %v15374_v42  ;;  %v5023_v25 = vpack.c.bf16 %v5011_v29, %v12742_v41  ;;  %v15381_v41 = vpack.c.bf16 %v12573_v26, %v12558_v44  ;;  %v5221_v44 = vld [vmem:[#allocation2 + $0xa1] sm:$0xff]  ;;  %v5223_v26 = vld [vmem:[#allocation2 + $0xb1] sm:$0xff] }
 0x428   : > { %9673 = vmatprep.subr.bf16.mxu1 %v10009_v28  ;;  %v5233_v23 = vpack.c.bf16 %v5221_v44, %v12703_v17  ;;  %v5234_v15 = vpack.c.bf16 %v5223_v26, %v5222_v11  ;;  %v15388_v17 = vpack.c.bf16 %v12577_v3, %v12575_v56  ;;  %v5433_v56 = vld [vmem:[#allocation2 + $0xb2] sm:$0xff]  ;;  %v5443_v3 = vpack.c.bf16 %v5431_v43, %v12775_v2  ;;  %v13228_v44 = vld [vmem:[%s15001_s4] ss:$0 sm:$0xff] }
 0x429   : > { %v5444_v60 = vpack.c.bf16 %v5433_v56, %v5432_v12  ;;  %v12963_v2 = vld [vmem:[%s15005_s8 + $0x18] sm:$0xff]  ;;  %5963 = vrot.lane.b32.xlu0 %v13054_v35, %s10174_s24 }
 0x42a   : > { %5937 = vrot.lane.b32.xlu1 %v12963_v2, %s10174_s24  ;;  %v13075_v42 = vld [vmem:[%s15005_s8 + $0x98] sm:$0xff] }
 0x42b   : > { %9674 = vmatpush3.bf16.msra.mxu1 %v10009_v28  ;;  %v13068_v28 = vld [vmem:[%s15005_s8 + $0x90] sm:$0xff] }
 0x42c   : > { %9695 = vmatprep.subr.bf16.mxu1 %v10010_v53 }
 0x42d   : > { %5967 = vrot.lane.b32.xlu0 %v13068_v28, %s10174_s24 }
 0x42e   : > { %9656 = vmatmul.mubr.msk.bf16.gmra.mrb[152].mxu1 %vm3750_vm13, %v15375_v61  ;;  %5941 = vrot.lane.b32.xlu1 %v12977_v51, %s10174_s24 }
 0x42f   : > { %9659 = vmatprep.mubr.msk.bf16.mxu1 %vm3750_vm13, %v15376_v8 }
 0x431   : > { %6011 = vrot.lane.b32.xlu0 %v12942_v13, %s10175_s15 }
 0x432   : > { %5945 = vrot.lane.b32.xlu1 %v12991_v49, %s10174_s24 }
 0x435   : > { %6015 = vrot.lane.b32.xlu0 %v12956_v55, %s10175_s15 }
 0x436   : > { %9660 = vmatmul.mubr.msk.bf16.gmra.mrb[156].mxu1 %vm3750_vm13, %v15377_v52  ;;  %5949 = vrot.lane.b32.xlu1 %v13005_v54, %s10174_s24 }
 0x437   : > { %9663 = vmatprep.mubr.msk.bf16.mxu1 %vm3750_vm13, %v15378_v7 }
 0x439   : > { %6019 = vrot.lane.b32.xlu0 %v12970_v48, %s10175_s15 }
 0x43a   : > { %5953 = vrot.lane.b32.xlu1 %v13019_v16, %s10174_s24 }
 0x43d   : > { %6023 = vrot.lane.b32.xlu0 %v12984_v19, %s10175_s15 }
 0x43e   : > { %9664 = vmatmul.mubr.msk.bf16.gmra.mrb[160].mxu1 %vm3750_vm13, %v5023_v25  ;;  %5957 = vrot.lane.b32.xlu1 %v13033_v0, %s10174_s24 }
 0x43f   : > { %9667 = vmatprep.mubr.msk.bf16.mxu1 %vm3750_vm13, %v5024_v62 }
 0x441   : > { %6027 = vrot.lane.b32.xlu0 %v12998_v45, %s10175_s15 }
 0x442   : > { %5961 = vrot.lane.b32.xlu1 %v13047_v22, %s10174_s24 }
 0x445   : > { %6031 = vrot.lane.b32.xlu0 %v13012_v40, %s10175_s15 }
 0x446   : > { %9668 = vmatmul.mubr.msk.bf16.gmra.mrb[164].mxu1 %vm3750_vm13, %v5025_v14  ;;  %5965 = vrot.lane.b32.xlu1 %v13061_v10, %s10174_s24 }
 0x447   : > { %9675 = vmatprep.mubr.msk.bf16.mxu1 %vm3750_vm13, %v15379_v46 }
 0x449   : > { %6035 = vrot.lane.b32.xlu0 %v13026_v63, %s10175_s15 }
 0x44a   : > { %5969 = vrot.lane.b32.xlu1 %v13075_v42, %s10174_s24 }
 0x44d   : > { %6039 = vrot.lane.b32.xlu0 %v13040_v50, %s10175_s15 }
 0x44e   : > { %9676 = vmatmul.mubr.msk.bf16.vlgmr.msra.gmra.mrb[148].mxu1 %vm3750_vm13, %v15380_v5  ;;  %6013 = vrot.lane.b32.xlu1 %v12949_v27, %s10175_s15 }
 0x44f   : > { %9696 = vmatpush3.bf16.msra.mxu1 %v10010_v53  ;;  %9679 = vmatprep.mubr.msk.bf16.mxu1 %vm3750_vm13, %v15381_v41  ;;  %v5890_v53 = vstv %s5889_s21 }
 0x450   : > { %9697 = vmatprep.subr.bf16.mxu1 %v10011_v37  ;;  %v13120_v61 = vadd.f32 %v5890_v53, %v12942_v13  ;;  %v13125_v8 = vadd.f32 %v5890_v53, %v12949_v27  ;;  %v13130_v52 = vadd.f32 %v5890_v53, %v12956_v55  ;;  %v13135_v7 = vadd.f32 %v5890_v53, %v12963_v2 }
 0x451   : > { %6043 = vrot.lane.b32.xlu0 %v13054_v35, %s10175_s15  ;;  %v13140_v29 = vadd.f32 %v5890_v53, %v12970_v48  ;;  %v13145_v38 = vadd.f32 %v5890_v53, %v12977_v51  ;;  %v13150_v25 = vadd.f32 %v5890_v53, %v12984_v19  ;;  %v13155_v9 = vadd.f32 %v5890_v53, %v12991_v49 }
 0x452   : > { %6017 = vrot.lane.b32.xlu1 %v12963_v2, %s10175_s15  ;;  %v13160_v62 = vadd.f32 %v5890_v53, %v12998_v45  ;;  %v13165_v18 = vadd.f32 %v5890_v53, %v13005_v54  ;;  %v13170_v39 = vadd.f32 %v5890_v53, %v13012_v40  ;;  %v13175_v14 = vadd.f32 %v5890_v53, %v13019_v16 }
 0x453   : > { %9698 = vmatpush3.bf16.msra.mxu1 %v10011_v37  ;;  %v13180_v46 = vadd.f32 %v5890_v53, %v13026_v63  ;;  %v13185_v37 = vadd.f32 %v5890_v53, %v13033_v0  ;;  %v13190_v5 = vadd.f32 %v5890_v53, %v13040_v50  ;;  %v13195_v41 = vadd.f32 %v5890_v53, %v13047_v22 }
 0x454   : > { %vm6851_vm15 = vcmp.lt.f32.partialorder %v13120_v61, 16.0  ;;  %vm6852_vm3 = vcmp.lt.f32.partialorder %v13125_v8, 16.0  ;;  %vm6853_vm4 = vcmp.lt.f32.partialorder %v13130_v52, 16.0  ;;  %vm6854_vm14 = vcmp.lt.f32.partialorder %v13135_v7, 16.0 }
 0x455   : > { %6047 = vrot.lane.b32.xlu0 %v13068_v28, %s10175_s15  ;;  %vm6855_vm12 = vcmp.lt.f32.partialorder %v13140_v29, 16.0  ;;  %vm6856_vm0 = vcmp.lt.f32.partialorder %v13145_v38, 16.0  ;;  %vm6857_vm11 = vcmp.lt.f32.partialorder %v13150_v25, 16.0  ;;  %vm6858_vm6 = vcmp.lt.f32.partialorder %v13155_v9, 16.0 }
 0x456   : > { %9680 = vmatmul.mubr.msk.bf16.gmra.mrb[152].mxu1 %vm3750_vm13, %v15382_v21  ;;  %6021 = vrot.lane.b32.xlu1 %v12977_v51, %s10175_s15  ;;  %v13200_v21 = vadd.f32 %v5890_v53, %v13054_v35  ;;  %vm6859_vm10 = vcmp.lt.f32.partialorder %v13160_v62, 16.0  ;;  %vm6861_vm2 = vcmp.lt.f32.partialorder %v13170_v39, 16.0  ;;  %vm6862_vm7 = vcmp.lt.f32.partialorder %v13175_v14, 16.0 }
 0x457   : > { %9683 = vmatprep.mubr.msk.bf16.mxu1 %vm3750_vm13, %v15383_v32  ;;  %v13205_v32 = vadd.f32 %v5890_v53, %v13061_v10  ;;  %vm6863_vm1 = vcmp.lt.f32.partialorder %v13180_v46, 16.0  ;;  %vm6864_vm5 = vcmp.lt.f32.partialorder %v13185_v37, 16.0  ;;  %vm6865_vm8 = vcmp.lt.f32.partialorder %v13190_v5, 16.0 }
 0x458   : > { %vm6866_vm9 = vcmp.lt.f32.partialorder %v13195_v41, 16.0 }
 0x459   : > { %6131 = vrot.lane.b32.xlu0 %v13120_v61, %s10175_s15 }
 0x45a   : > { %6025 = vrot.lane.b32.xlu1 %v12991_v49, %s10175_s15 }
 0x45d   : > { %6135 = vrot.lane.b32.xlu0 %v13130_v52, %s10175_s15 }
 0x45e   : > { %9684 = vmatmul.mubr.msk.bf16.gmra.mrb[156].mxu1 %vm3750_vm13, %v15384_v33  ;;  %6029 = vrot.lane.b32.xlu1 %v13005_v54, %s10175_s15  ;;  %v13210_v33 = vadd.f32 %v5890_v53, %v13068_v28 }
 0x45f   : > { %9687 = vmatprep.mubr.msk.bf16.mxu1 %vm3750_vm13, %v15385_v20  ;;  %v13215_v20 = vadd.f32 %v5890_v53, %v13075_v42 }
 0x461   : > { %6139 = vrot.lane.b32.xlu0 %v13140_v29, %s10175_s15 }
 0x462   : > { %6033 = vrot.lane.b32.xlu1 %v13019_v16, %s10175_s15 }
 0x465   : > { %6143 = vrot.lane.b32.xlu0 %v13150_v25, %s10175_s15 }
 0x466   : > { %9688 = vmatmul.mubr.msk.bf16.gmra.mrb[160].mxu1 %vm3750_vm13, %v5233_v23  ;;  %6037 = vrot.lane.b32.xlu1 %v13033_v0, %s10175_s15 }
 0x467   : > { %9691 = vmatprep.mubr.msk.bf16.mxu1 %vm3750_vm13, %v5234_v15 }
 0x469   : > { %6147 = vrot.lane.b32.xlu0 %v13160_v62, %s10175_s15 }
 0x46a   : > { %6041 = vrot.lane.b32.xlu1 %v13047_v22, %s10175_s15 }
 0x46d   : > { %6151 = vrot.lane.b32.xlu0 %v13170_v39, %s10175_s15 }
 0x46e   : > { %9692 = vmatmul.mubr.msk.bf16.gmra.mrb[164].mxu1 %vm3750_vm13, %v5235_v4  ;;  %6045 = vrot.lane.b32.xlu1 %v13061_v10, %s10175_s15 }
 0x46f   : > { %9699 = vmatprep.mubr.msk.bf16.mxu1 %vm3750_vm13, %v15386_v31 }
 0x471   : > { %6155 = vrot.lane.b32.xlu0 %v13180_v46, %s10175_s15 }
 0x472   : > { %6049 = vrot.lane.b32.xlu1 %v13075_v42, %s10175_s15 }
 0x475   : > { %6159 = vrot.lane.b32.xlu0 %v13190_v5, %s10175_s15 }
 0x476   : > { %9700 = vmatmul.mubr.msk.bf16.vlgmr.msra.gmra.mrb[148].mxu1 %vm3750_vm13, %v15387_v30  ;;  %6133 = vrot.lane.b32.xlu1 %v13125_v8, %s10175_s15 }
 0x477   : > { %9703 = vmatprep.mubr.msk.bf16.mxu1 %vm3750_vm13, %v15388_v17 }
 0x479   : > { %6163 = vrot.lane.b32.xlu0 %v13200_v21, %s10175_s15 }
 0x47a   : > { %6137 = vrot.lane.b32.xlu1 %v13135_v7, %s10175_s15 }
 0x47d   : > { %6167 = vrot.lane.b32.xlu0 %v13210_v33, %s10175_s15 }
 0x47e   : > { %9704 = vmatmul.mubr.msk.bf16.gmra.mrb[152].mxu1 %vm3750_vm13, %v15389_v58  ;;  %6141 = vrot.lane.b32.xlu1 %v13145_v38, %s10175_s15 }
 0x47f   : > { %9707 = vmatprep.mubr.msk.bf16.mxu1 %vm3750_vm13, %v15390_v57 }
 0x481   : > { %6271 = vrot.lane.b32.xlu0 %v12942_v13, %s10176_s14 }
 0x482   : > { %6145 = vrot.lane.b32.xlu1 %v13155_v9, %s10175_s15 }
 0x485   : > { %6275 = vrot.lane.b32.xlu0 %v12956_v55, %s10176_s14 }
 0x486   : > { %9708 = vmatmul.mubr.msk.bf16.gmra.mrb[156].mxu1 %vm3750_vm13, %v15391_v34  ;;  %6149 = vrot.lane.b32.xlu1 %v13165_v18, %s10175_s15 }
 0x487   : > { %9711 = vmatprep.mubr.msk.bf16.mxu1 %vm3750_vm13, %v15392_v1 }
 0x489   : > { %6279 = vrot.lane.b32.xlu0 %v12970_v48, %s10176_s14 }
 0x48a   : > { %6153 = vrot.lane.b32.xlu1 %v13175_v14, %s10175_s15 }
 0x48d   : > { %6283 = vrot.lane.b32.xlu0 %v12984_v19, %s10176_s14 }
 0x48e   : > { %9712 = vmatmul.mubr.msk.bf16.gmra.mrb[160].mxu1 %vm3750_vm13, %v5443_v3  ;;  %6157 = vrot.lane.b32.xlu1 %v13185_v37, %s10175_s15 }
 0x48f   : > { %9715 = vmatprep.mubr.msk.bf16.mxu1 %vm3750_vm13, %v5444_v60 }
 0x491   : > { %6287 = vrot.lane.b32.xlu0 %v12998_v45, %s10176_s14 }
 0x492   : > { %6161 = vrot.lane.b32.xlu1 %v13195_v41, %s10175_s15 }
 0x495   : > { %6291 = vrot.lane.b32.xlu0 %v13012_v40, %s10176_s14 }
 0x496   : > { %9716 = vmatmul.mubr.msk.bf16.gmra.mrb[164].mxu1 %vm3750_vm13, %v5445_v59  ;;  %6165 = vrot.lane.b32.xlu1 %v13205_v32, %s10175_s15 }
 0x499   : > { %6295 = vrot.lane.b32.xlu0 %v13026_v63, %s10176_s14 }
 0x49a   : > { %6169 = vrot.lane.b32.xlu1 %v13215_v20, %s10175_s15 }
 0x49d   : > { %6299 = vrot.lane.b32.xlu0 %v13040_v50, %s10176_s14 }
 0x49e   : > { %6273 = vrot.lane.b32.xlu1 %v12949_v27, %s10176_s14 }
 0x4a1   : > { %6303 = vrot.lane.b32.xlu0 %v13054_v35, %s10176_s14  ;;  %v15394_v35 = vmov 0  }
 0x4a2   : > { %6277 = vrot.lane.b32.xlu1 %v12963_v2, %s10176_s14  ;;  %v6873_v52 = vsel %vm6853_vm4, 1, %v15394_v35  ;;  %v6876_v29 = vsel %vm6856_vm0, 1, %v15394_v35  ;;  %v6877_v38 = vsel %vm6857_vm11, 1, %v15394_v35  ;;  %v6878_v25 = vsel %vm6858_vm6, 1, %v15394_v35 }
 0x4a3   : > { %v6881_v62 = vsel %vm6861_vm2, 1, %v15394_v35  ;;  %v6883_v39 = vsel %vm6863_vm1, 1, %v15394_v35  ;;  %v6884_v14 = vsel %vm6864_vm5, 1, %v15394_v35  ;;  %v6885_v46 = vsel %vm6865_vm8, 1, %v15394_v35 }
 0x4a4   : > { %v6886_v37 = vsel %vm6866_vm9, 1, %v15394_v35  ;;  %vm6869_vm4 = vcmp.lt.f32.partialorder %v13210_v33, 16.0 }
 0x4a5   : > { %6307 = vrot.lane.b32.xlu0 %v13068_v28, %s10176_s14  ;;  %v6872_v28 = vsel %vm6852_vm3, 1, %v15394_v35  ;;  %vm6868_vm3 = vcmp.lt.f32.partialorder %v13205_v32, 16.0 }
 0x4a6   : > { %6281 = vrot.lane.b32.xlu1 %v12977_v51, %s10176_s14  ;;  %v6888_v41 = vsel %vm6868_vm3, 1, %v15394_v35 }
 0x4aa   : > { %6285 = vrot.lane.b32.xlu1 %v12991_v49, %s10176_s14 }
 0x4ae   : > { %6289 = vrot.lane.b32.xlu1 %v13005_v54, %s10176_s14 }
 0x4b2   : > { %6293 = vrot.lane.b32.xlu1 %v13019_v16, %s10176_s14 }
 0x4b6   : > { %6297 = vrot.lane.b32.xlu1 %v13033_v0, %s10176_s14 }
 0x4ba   : > { %6301 = vrot.lane.b32.xlu1 %v13047_v22, %s10176_s14 }
 0x4be   : > { %6305 = vrot.lane.b32.xlu1 %v13061_v10, %s10176_s14 }
 0x4c2   : > { %6309 = vrot.lane.b32.xlu1 %v13075_v42, %s10176_s14 }
 0x4c6   : > { %6893 = vrot.lane.b32.xlu1 %v6872_v28, %s10176_s14 }
 0x549   : > { %v9701_v26 = vpop.f32.mrb[148].mxu1 }
 0x54a   : > { %v5635_v23 = vadd.f32 %v9701_v26, %v13228_v44  ;;  %v5527_v11 = vpop.f32.mrb[149].mxu1 }
 0x54b   : > { %v5633_v15 = vadd.f32 %v13228_v44, %v5527_v11  ;;  %v9702_v24 = vpop.f32.mrb[150].mxu1 }
 0x54c   : > { %v5636_v36 = vadd.f32 %v9702_v24, %v13228_v44  ;;  %v5530_v4 = vpop.f32.mrb[151].mxu1  ;;  %v5655_v30 = vmax.f32 %v5635_v23, 0.0 }
 0x54d   : > { %v5634_v31 = vadd.f32 %v13228_v44, %v5530_v4  ;;  %v5653_v58 = vmax.f32 %v5633_v15, 0.0 }
 0x54e   : > { %v5656_v17 = vmax.f32 %v5636_v36, 0.0 }
 0x54f   : > { %v5654_v57 = vmax.f32 %v5634_v31, 0.0 }
 0x550   : > { %v5674_v34 = vpack.c.bf16 %v5656_v17, %v5655_v30 }
 0x551   : > { %v5673_v1 = vpack.c.bf16 %v5654_v57, %v5653_v58  ;;  %v9705_v43 = vpop.f32.mrb[152].mxu1 }
 0x552   : > { %v5639_v56 = vadd.f32 %v9705_v43, %v13228_v44  ;;  %v5543_v3 = vpop.f32.mrb[153].mxu1 }
 0x553   : > { %v5637_v12 = vadd.f32 %v13228_v44, %v5543_v3  ;;  %v9706_v60 = vpop.f32.mrb[154].mxu1  ;;  %9723 = vmatprep.mubr.msk.bf16.mxu0 %vm3750_vm13, %v5673_v1 }
 0x554   : > { %v5640_v47 = vadd.f32 %v9706_v60, %v13228_v44  ;;  %v5546_v6 = vpop.f32.mrb[155].mxu1  ;;  %9724 = vmatmul.mubr.msk.bf16.vlgmr.msra.gmra.mrb[48].mxu0 %vm3750_vm13, %v5674_v34  ;;  %v5659_v13 = vmax.f32 %v5639_v56, 0.0  ;;  %v6871_v60 = vsel %vm6851_vm15, 1, %v15394_v35  ;;  %vm6867_vm15 = vcmp.lt.f32.partialorder %v13200_v21, 16.0 }
 0x555   : > { %v5638_v59 = vadd.f32 %v13228_v44, %v5546_v6  ;;  %v5657_v55 = vmax.f32 %v5637_v12, 0.0  ;;  %6891 = vrot.lane.b32.xlu0 %v6871_v60, %s10176_s14  ;;  %v6887_v5 = vsel %vm6867_vm15, 1, %v15394_v35  ;;  %v6889_v21 = vsel %vm6869_vm4, 1, %v15394_v35 }
 0x556   : > { %v5660_v27 = vmax.f32 %v5640_v47, 0.0 }
 0x557   : > { %v5658_v2 = vmax.f32 %v5638_v59, 0.0 }
 0x558   : > { %v5676_v48 = vpack.c.bf16 %v5660_v27, %v5659_v13 }
 0x559   : > { %v5675_v51 = vpack.c.bf16 %v5658_v2, %v5657_v55  ;;  %v9709_v19 = vpop.f32.mrb[156].mxu1  ;;  %6895 = vrot.lane.b32.xlu0 %v6873_v52, %s10176_s14 }
 0x55a   : > { %v5643_v49 = vadd.f32 %v9709_v19, %v13228_v44  ;;  %v5559_v53 = vpop.f32.mrb[157].mxu1  ;;  %v13308_v19 = vpop.permute.xlu0 %5931 }
 0x55b   : > { %v5641_v45 = vadd.f32 %v13228_v44, %v5559_v53  ;;  %v9710_v26 = vpop.f32.mrb[158].mxu1  ;;  %9727 = vmatprep.mubr.msk.bf16.mxu0 %vm3750_vm13, %v5675_v51  ;;  %15395 = vst [vmem:[#allocation37_spill] sm:$0xff] %v13308_v19 }
 0x55c   : > { %v5644_v54 = vadd.f32 %v9710_v26, %v13228_v44  ;;  %v5562_v23 = vpop.f32.mrb[159].mxu1  ;;  %9728 = vmatmul.mubr.msk.bf16.gmra.mrb[52].mxu0 %vm3750_vm13, %v5676_v48  ;;  %v5663_v11 = vmax.f32 %v5643_v49, 0.0  ;;  %v6874_v48 = vsel %vm6854_vm14, 1, %v15394_v35  ;;  %v13315_v49 = vpop.permute.xlu1 %5933  ;;  %vm6870_vm14 = vcmp.lt.f32.partialorder %v13215_v20, 16.0 }
 0x55d   : > { %v5642_v40 = vadd.f32 %v13228_v44, %v5562_v23  ;;  %v5661_v16 = vmax.f32 %v5641_v45, 0.0  ;;  %6897 = vrot.lane.b32.xlu1 %v6874_v48, %s10176_s14  ;;  %15396 = vst [vmem:[#allocation38_spill] sm:$0xff] %v13315_v49  ;;  %v6879_v45 = vsel %vm6859_vm10, 1, %v15394_v35 }
 0x55e   : > { %v5664_v15 = vmax.f32 %v5644_v54, 0.0  ;;  %v13323_v53 = vpop.permute.xlu0 %5935 }
 0x55f   : > { %v5662_v24 = vmax.f32 %v5642_v40, 0.0 }
 0x560   : > { %v5678_v36 = vpack.c.bf16 %v5664_v15, %v5663_v11  ;;  %v13328_v26 = vpop.permute.xlu1 %5937 }
 0x561   : > { %v5677_v4 = vpack.c.bf16 %v5662_v24, %v5661_v16  ;;  %v9713_v31 = vpop.f32.mrb[160].mxu1  ;;  %6901 = vrot.lane.b32.xlu1 %v6876_v29, %s10176_s14 }
 0x562   : > { %v5647_v30 = vadd.f32 %v9713_v31, %v13228_v44  ;;  %v5575_v17 = vpop.f32.mrb[161].mxu1  ;;  %v13336_v54 = vpop.permute.xlu0 %5939 }
 0x563   : > { %v5645_v63 = vadd.f32 %v13228_v44, %v5575_v17  ;;  %v9714_v58 = vpop.f32.mrb[162].mxu1  ;;  %9731 = vmatprep.mubr.msk.bf16.mxu0 %vm3750_vm13, %v5677_v4  ;;  %15397 = vst [vmem:[#allocation32_spill] sm:$0xff] %v13336_v54 }
 0x564   : > { %v5648_v0 = vadd.f32 %v9714_v58, %v13228_v44  ;;  %v5578_v57 = vpop.f32.mrb[163].mxu1  ;;  %9732 = vmatmul.mubr.msk.bf16.gmra.mrb[56].mxu0 %vm3750_vm13, %v5678_v36  ;;  %v5667_v34 = vmax.f32 %v5647_v30, 0.0  ;;  %v13341_v23 = vpop.permute.xlu1 %5941  ;;  %v6890_v58 = vsel %vm6870_vm14, 1, %v15394_v35 }
 0x565   : > { %v5646_v50 = vadd.f32 %v13228_v44, %v5578_v57  ;;  %v5665_v22 = vmax.f32 %v5645_v63, 0.0  ;;  %6905 = vrot.lane.b32.xlu1 %v6878_v25, %s10176_s14  ;;  %15398 = vst [vmem:[#allocation33_spill] sm:$0xff] %v13341_v23 }
 0x566   : > { %v5668_v1 = vmax.f32 %v5648_v0, 0.0  ;;  %v13349_v40 = vpop.permute.xlu0 %5943 }
 0x567   : > { %v5666_v43 = vmax.f32 %v5646_v50, 0.0  ;;  %15399 = vst [vmem:[#allocation34_spill] sm:$0xff] %v13349_v40 }
 0x568   : > { %v5680_v56 = vpack.c.bf16 %v5668_v1, %v5667_v34  ;;  %v13354_v11 = vpop.permute.xlu1 %5945 }
 0x569   : > { %v5679_v3 = vpack.c.bf16 %v5666_v43, %v5665_v22  ;;  %v9717_v12 = vpop.f32.mrb[164].mxu1  ;;  %15400 = vst [vmem:[#allocation35_spill] sm:$0xff] %v13354_v11 }
 0x56a   : > { %v5651_v47 = vadd.f32 %v9717_v12, %v13228_v44  ;;  %v5591_v6 = vpop.f32.mrb[165].mxu1  ;;  %v13362_v15 = vpop.permute.xlu0 %5947 }
 0x56b   : > { %v5649_v10 = vadd.f32 %v13228_v44, %v5591_v6  ;;  %v9718_v61 = vpop.f32.mrb[166].mxu1  ;;  %9735 = vmatprep.mubr.msk.bf16.mxu0 %vm3750_vm13, %v5679_v3  ;;  %15401 = vst [vmem:[#allocation36_spill] sm:$0xff] %v13362_v15 }
 0x56c   : > { %v5652_v8 = vadd.f32 %v9718_v61, %v13228_v44  ;;  %v5594_v59 = vpop.f32.mrb[167].mxu1  ;;  %9736 = vmatmul.mubr.msk.bf16.gmra.mrb[60].mxu0 %vm3750_vm13, %v5680_v56  ;;  %v5671_v13 = vmax.f32 %v5651_v47, 0.0  ;;  %v13367_v16 = vpop.permute.xlu1 %5949 }
 0x56d   : > { %v5650_v42 = vadd.f32 %v13228_v44, %v5594_v59  ;;  %v5669_v55 = vmax.f32 %v5649_v10, 0.0  ;;  %v6875_v44 = vsel %vm6855_vm12, 1, %v15394_v35  ;;  %15402 = vst [vmem:[#allocation13_spill] sm:$0xff] %v13367_v16 }
 0x56e   : > { %v5672_v27 = vmax.f32 %v5652_v8, 0.0  ;;  %6899 = vrot.lane.b32.xlu0 %v6875_v44, %s10176_s14  ;;  %v13372_v24 = vpop.permute.xlu0 %5951 }
 0x56f   : > { %v5670_v2 = vmax.f32 %v5650_v42, 0.0  ;;  %15403 = vst [vmem:[#allocation11_spill] sm:$0xff] %v13372_v24 }
 0x570   : > { %v5682_v51 = vpack.c.bf16 %v5672_v27, %v5671_v13  ;;  %v13375_v32 = vpop.permute.xlu1 %5953 }
 0x571   : > { %v5681_v7 = vpack.c.bf16 %v5670_v2, %v5669_v55  ;;  %15404 = vst [vmem:[#allocation12_spill] sm:$0xff] %v13375_v32 }
 0x572   : > { %6903 = vrot.lane.b32.xlu0 %v6877_v38, %s10176_s14  ;;  %v13377_v36 = vpop.permute.xlu0 %5955 }
 0x573   : > { %9739 = vmatprep.mubr.msk.bf16.mxu0 %vm3750_vm13, %v5681_v7  ;;  %15405 = vst [vmem:[#allocation16_spill] sm:$0xff] %v13377_v36 }
 0x574   : > { %9740 = vmatmul.mubr.msk.bf16.gmra.mrb[64].mxu0 %vm3750_vm13, %v5682_v51  ;;  %vm6860_vm13 = vcmp.lt.f32.partialorder %v13165_v18, 16.0  ;;  %v6882_v18 = vsel %vm6862_vm7, 1, %v15394_v35  ;;  %v13379_v4 = vpop.permute.xlu1 %5957 }
 0x575   : > { %v6880_v9 = vsel %vm6860_vm13, 1, %v15394_v35  ;;  %15406 = vst [vmem:[#allocation14_spill] sm:$0xff] %v13379_v4 }
 0x576   : > { %6907 = vrot.lane.b32.xlu0 %v6879_v45, %s10176_s14  ;;  %6909 = vrot.lane.b32.xlu1 %v6880_v9, %s10176_s14  ;;  %v13381_v33 = vpop.permute.xlu0 %5959 }
 0x577   : > { %15407 = vst [vmem:[#allocation18_spill] sm:$0xff] %v13381_v33 }
 0x578   : > { %v13383_v31 = vpop.permute.xlu1 %5961 }
 0x579   : > { %15408 = vst [vmem:[#allocation15_spill] sm:$0xff] %v13383_v31 }
 0x57a   : > { %6911 = vrot.lane.b32.xlu0 %v6881_v62, %s10176_s14  ;;  %6913 = vrot.lane.b32.xlu1 %v6882_v18, %s10176_s14  ;;  %v13385_v30 = vpop.permute.xlu0 %5963 }
 0x57b   : > { %15409 = vst [vmem:[#allocation20_spill] sm:$0xff] %v13385_v30 }
 0x57c   : > { %v13387_v17 = vpop.permute.xlu1 %5965 }
 0x57d   : > { %15410 = vst [vmem:[#allocation17_spill] sm:$0xff] %v13387_v17 }
 0x57e   : > { %6915 = vrot.lane.b32.xlu0 %v6883_v39, %s10176_s14  ;;  %6917 = vrot.lane.b32.xlu1 %v6884_v14, %s10176_s14  ;;  %v13389_v63 = vpop.permute.xlu0 %5967 }
 0x57f   : > { %15411 = vst [vmem:[#allocation22_spill] sm:$0xff] %v13389_v63 }
 0x580   : > { %v13393_v0 = vpop.permute.xlu1 %5969 }
 0x581   : > { %15412 = vst [vmem:[#allocation19_spill] sm:$0xff] %v13393_v0 }
 0x582   : > { %6919 = vrot.lane.b32.xlu0 %v6885_v46, %s10176_s14  ;;  %6921 = vrot.lane.b32.xlu1 %v6886_v37, %s10176_s14  ;;  %v13396_v57 = vpop.permute.xlu0 %6011 }
 0x583   : > { %15413 = vst [vmem:[#allocation23_spill] sm:$0xff] %v13396_v57 }
 0x584   : > { %v13398_v50 = vpop.permute.xlu1 %6013 }
 0x585   : > { %15414 = vst [vmem:[#allocation21_spill] sm:$0xff] %v13398_v50 }
 0x586   : > { %6923 = vrot.lane.b32.xlu0 %v6887_v5, %s10176_s14  ;;  %6925 = vrot.lane.b32.xlu1 %v6888_v41, %s10176_s14  ;;  %v13400_v34 = vpop.permute.xlu0 %6015  ;;  %v13479_v5 = vld [vmem:[%s15003_s6] ss:$0 sm:$0xff] }
 0x588   : > { %v13402_v1 = vpop.permute.xlu1 %6017 }
 0x58a   : > { %6927 = vrot.lane.b32.xlu0 %v6889_v21, %s10176_s14  ;;  %6929 = vrot.lane.b32.xlu1 %v6890_v58, %s10176_s14  ;;  %v13404_v22 = vpop.permute.xlu0 %6019 }
 0x58c   : > { %v13406_v43 = vpop.permute.xlu1 %6021 }
 0x58e   : > { %v13408_v56 = vpop.permute.xlu0 %6023 }
 0x58f   : > { %15415 = vst [vmem:[#allocation25_spill] sm:$0xff] %v13408_v56 }
 0x590   : > { %v13410_v20 = vpop.permute.xlu1 %6025 }
 0x591   : > { %15416 = vst [vmem:[#allocation24_spill] sm:$0xff] %v13410_v20 }
 0x592   : > { %v13412_v3 = vpop.permute.xlu0 %6027 }
 0x594   : > { %v13414_v12 = vpop.permute.xlu1 %6029 }
 0x596   : > { %v13416_v35 = vpop.permute.xlu0 %6031 }
 0x598   : > { %v13418_v60 = vpop.permute.xlu1 %6033 }
 0x59a   : > { %v13420_v47 = vpop.permute.xlu0 %6035 }
 0x59c   : > { %v13422_v6 = vpop.permute.xlu1 %6037 }
 0x59e   : > { %v13424_v10 = vpop.permute.xlu0 %6039 }
 0x5a0   : > { %v13426_v61 = vpop.permute.xlu1 %6041 }
 0x5a2   : > { %v13428_v28 = vpop.permute.xlu0 %6043 }
 0x5a3   : > { %15417 = vst [vmem:[#allocation27_spill] sm:$0xff] %v13428_v28 }
 0x5a4   : > { %v13430_v8 = vpop.permute.xlu1 %6045 }
 0x5a5   : > { %15418 = vst [vmem:[#allocation26_spill] sm:$0xff] %v13430_v8 }
 0x5a6   : > { %v13432_v59 = vpop.permute.xlu0 %6047 }
 0x5a7   : > { %15419 = vst [vmem:[#allocation30_spill] sm:$0xff] %v13432_v59 }
 0x5a8   : > { %v13434_v42 = vpop.permute.xlu1 %6049 }
 0x5a9   : > { %15420 = vst [vmem:[#allocation28_spill] sm:$0xff] %v13434_v42 }
 0x5aa   : > { %v13436_v52 = vpop.permute.xlu0 %6131 }
 0x5ab   : > { %15421 = vst [vmem:[#allocation31_spill] sm:$0xff] %v13436_v52 }
 0x5ac   : > { %v13438_v13 = vpop.permute.xlu1 %6133 }
 0x5ad   : > { %15422 = vst [vmem:[#allocation29_spill] sm:$0xff] %v13438_v13 }
 0x5ae   : > { %v13440_v27 = vpop.permute.xlu0 %6135 }
 0x5b0   : > { %v13442_v55 = vpop.permute.xlu1 %6137 }
 0x5b2   : > { %v13444_v2 = vpop.permute.xlu0 %6139 }
 0x5b3   : > { %15423 = vst [vmem:[#allocation40_spill] sm:$0xff] %v13444_v2 }
 0x5b4   : > { %v13446_v48 = vpop.permute.xlu1 %6141 }
 0x5b5   : > { %15424 = vst [vmem:[#allocation39_spill] sm:$0xff] %v13446_v48 }
 0x5b6   : > { %v13448_v51 = vpop.permute.xlu0 %6143 }
 0x5b7   : > { %15425 = vst [vmem:[#allocation41_spill] sm:$0xff] %v13448_v51 }
 0x5b8   : > { %v13450_v7 = vpop.permute.xlu1 %6145 }
 0x5b9   : > { %15426 = vst [vmem:[#allocation42_spill] sm:$0xff] %v13450_v7 }
 0x5ba   : > { %v13452_v44 = vpop.permute.xlu0 %6147 }
 0x5bb   : > { %15427 = vst [vmem:[#allocation43_spill] sm:$0xff] %v13452_v44 }
 0x5bc   : > { %v13454_v29 = vpop.permute.xlu1 %6149 }
 0x5bd   : > { %15428 = vst [vmem:[#allocation44_spill] sm:$0xff] %v13454_v29 }
 0x5be   : > { %v13456_v38 = vpop.permute.xlu0 %6151 }
 0x5bf   : > { %15429 = vst [vmem:[#allocation45_spill] sm:$0xff] %v13456_v38 }
 0x5c0   : > { %v13458_v25 = vpop.permute.xlu1 %6153 }
 0x5c1   : > { %15430 = vst [vmem:[#allocation46_spill] sm:$0xff] %v13458_v25 }
 0x5c2   : > { %v13460_v45 = vpop.permute.xlu0 %6155 }
 0x5c3   : > { %15431 = vst [vmem:[#allocation47_spill] sm:$0xff] %v13460_v45 }
 0x5c4   : > { %v13462_v9 = vpop.permute.xlu1 %6157 }
 0x5c5   : > { %15432 = vst [vmem:[#allocation48_spill] sm:$0xff] %v13462_v9 }
 0x5c6   : > { %v13464_v62 = vpop.permute.xlu0 %6159 }
 0x5c7   : > { %15433 = vst [vmem:[#allocation49_spill] sm:$0xff] %v13464_v62 }
 0x5c8   : > { %v13466_v18 = vpop.permute.xlu1 %6161 }
 0x5c9   : > { %15434 = vst [vmem:[#allocation50_spill] sm:$0xff] %v13466_v18 }
 0x5ca   : > { %v13468_v39 = vpop.permute.xlu0 %6163 }
 0x5cb   : > { %15435 = vst [vmem:[#allocation51_spill] sm:$0xff] %v13468_v39 }
 0x5cc   : > { %v13470_v14 = vpop.permute.xlu1 %6165 }
 0x5cd   : > { %15436 = vst [vmem:[#allocation52_spill] sm:$0xff] %v13470_v14 }
 0x5ce   : > { %v13472_v46 = vpop.permute.xlu0 %6167 }
 0x5cf   : > { %15437 = vst [vmem:[#allocation53_spill] sm:$0xff] %v13472_v46 }
 0x5d0   : > { %v13474_v37 = vpop.permute.xlu1 %6169 }
 0x5d1   : > { %15438 = vst [vmem:[#allocation54_spill] sm:$0xff] %v13474_v37 }
 0x5d2   : > { %v13481_v41 = vpop.permute.xlu0 %6271 }
 0x5d4   : > { %v13486_v30 = vpop.permute.xlu1 %6273 }
 0x5d6   : > { %v6276_v9 = vpop.permute.xlu0 %6275 }
 0x5d8   : > { %v6278_v18 = vpop.permute.xlu1 %6277 }
 0x627   : > { %v9725_v21 = vpop.f32.mrb[48].mxu0 }
 0x628   : > { %v13484_v58 = vadd.f32 %v9725_v21, %v13479_v5  ;;  %v5770_v17 = vpop.f32.mrb[49].mxu0 }
 0x629   : > { %v9726_v39 = vpop.f32.mrb[50].mxu0  ;;  %v13495_v0 = vadd.f32 %v13479_v5, %v5770_v17 }
 0x62a   : > { %v5851_v14 = vmin.f32 %v13484_v58, 4.1351666  ;;  %v13490_v46 = vadd.f32 %v9726_v39, %v13479_v5  ;;  %6995 = vrot.lane.b32.xlu0 %v13484_v58, %s10177_s28  ;;  %v5773_v37 = vpop.f32.mrb[51].mxu0 }
 0x62b   : > { %v13501_v45 = vadd.f32 %v13479_v5, %v5773_v37  ;;  %v5849_v4 = vmin.f32 %v13495_v0, 4.1351666 }
 0x62c   : > { %v6215_v63 = vmul.f32 1.442695, %v5851_v14  ;;  %v5852_v21 = vmin.f32 %v13490_v46, 4.1351666  ;;  %6997 = vrot.lane.b32.xlu1 %v13490_v46, %s10177_s28 }
 0x62d   : > { %15439 = vst [vmem:[#allocation55_spill] sm:$0xff] %v13501_v45  ;;  %v5850_v37 = vmin.f32 %v13501_v45, 4.1351666  ;;  %v6211_v33 = vmul.f32 1.442695, %v5849_v4 }
 0x62e   : > { %v6217_v39 = vmul.f32 1.442695, %v5852_v21  ;;  %6991 = vrot.lane.b32.xlu0 %v13495_v0, %s10177_s28  ;;  %10014 = vpow2.f32 %v6215_v63  ;;  %v13517_v63 = vpop.permute.xlu0 %6279 }
 0x62f   : > { %v9729_v17 = vpop.f32.mrb[52].mxu0  ;;  %v6213_v29 = vmul.f32 1.442695, %v5850_v37 }
 0x630   : > { %v13507_v14 = vadd.f32 %v9729_v17, %v13479_v5  ;;  %v5786_v62 = vpop.f32.mrb[53].mxu0  ;;  %6993 = vrot.lane.b32.xlu1 %v13501_v45, %s10177_s28  ;;  %10016 = vpow2.f32 %v6217_v39  ;;  %v13524_v39 = vpop.permute.xlu1 %6281 }
 0x631   : > { %v9730_v36 = vpop.f32.mrb[54].mxu0  ;;  %v13520_v17 = vadd.f32 %v13479_v5, %v5786_v62  ;;  %10018 = vpow2.f32 %v6211_v33 }
 0x632   : > { %15440 = vst [vmem:[#allocation56_spill] sm:$0xff] %v13507_v14  ;;  %v13513_v21 = vadd.f32 %v9730_v36, %v13479_v5  ;;  %v5789_v31 = vpop.f32.mrb[55].mxu0  ;;  %7003 = vrot.lane.b32.xlu0 %v13507_v14, %s10177_s28  ;;  %v13536_v62 = vpop.permute.xlu0 %6283  ;;  %10020 = vpow2.f32 %v6213_v29  ;;  %v5855_v48 = vmin.f32 %v13507_v14, 4.1351666 }
 0x633   : > { %15442 = vst [vmem:[#allocation58_spill] sm:$0xff] %v13520_v17  ;;  %v13527_v44 = vadd.f32 %v13479_v5, %v5789_v31 }
 0x634   : > { %15441 = vst [vmem:[#allocation57_spill] sm:$0xff] %v13513_v21  ;;  %7005 = vrot.lane.b32.xlu1 %v13513_v21, %s10177_s28  ;;  %v13543_v33 = vpop.permute.xlu1 %6285  ;;  %v5856_v51 = vmin.f32 %v13513_v21, 4.1351666  ;;  %v6223_v49 = vmul.f32 1.442695, %v5855_v48 }
 0x635   : > { %15443 = vst [vmem:[#allocation59_spill] sm:$0xff] %v13527_v44 }
 0x636   : > { %6999 = vrot.lane.b32.xlu0 %v13520_v17, %s10177_s28  ;;  %v6225_v45 = vmul.f32 1.442695, %v5856_v51  ;;  %10022 = vpow2.f32 %v6223_v49 }
 0x637   : > { %v9733_v36 = vpop.f32.mrb[56].mxu0 }
 0x638   : > { %v13532_v25 = vadd.f32 %v9733_v36, %v13479_v5  ;;  %v5802_v4 = vpop.f32.mrb[57].mxu0  ;;  %7001 = vrot.lane.b32.xlu1 %v13527_v44, %s10177_s28  ;;  %v10015_v16 = vpop.eup %10014  ;;  %10024 = vpow2.f32 %v6225_v45 }
 0x639   : > { %v9734_v37 = vpop.f32.mrb[58].mxu0  ;;  %v13546_v15 = vadd.f32 %v13479_v5, %v5802_v4  ;;  %v6253_v32 = vmul.f32 %v10015_v16, %v13400_v34  ;;  %v6333_v4 = vmul.f32 %v10015_v16, %v6276_v9  ;;  %v13562_v7 = vpop.permute.xlu1 %6289 }
 0x63a   : > { %15444 = vst [vmem:[#allocation60_spill] sm:$0xff] %v13532_v25  ;;  %v13539_v31 = vadd.f32 %v9734_v37, %v13479_v5  ;;  %v5805_v38 = vpop.f32.mrb[59].mxu0  ;;  %7011 = vrot.lane.b32.xlu0 %v13532_v25, %s10177_s28  ;;  %v10017_v36 = vpop.eup %10016 }
 0x63b   : > { %v13552_v29 = vadd.f32 %v13479_v5, %v5805_v38  ;;  %v13556_v37 = vpop.permute.xlu0 %6287  ;;  %v6254_v24 = vmul.f32 %v10017_v36, %v13402_v1  ;;  %v6353_v54 = vmul.f32 0.5, %v6253_v32  ;;  %v10019_v38 = vpop.eup %10018  ;;  %v6334_v40 = vmul.f32 %v10017_v36, %v6278_v18 }
 0x63c   : > { %7013 = vrot.lane.b32.xlu1 %v13539_v31, %s10177_s28  ;;  %v10021_v14 = vpop.eup %10020  ;;  %v6513_v16 = vmul.f32 0.5, %v6333_v4  ;;  %v6251_v32 = vmul.f32 %v10019_v38, %v13396_v57  ;;  %v6331_v48 = vmul.f32 %v10019_v38, %v13481_v41 }
 0x63d   : > { %15445 = vst [vmem:[#allocation61_spill] sm:$0xff] %v13552_v29  ;;  %v6354_v52 = vmul.f32 0.5, %v6254_v24  ;;  %v6514_v19 = vmul.f32 0.5, %v6334_v40  ;;  %v13571_v21 = vpop.permute.xlu1 %6293  ;;  %v6252_v18 = vmul.f32 %v10021_v14, %v13398_v50  ;;  %v5854_v40 = vmin.f32 %v13527_v44, 4.1351666 }
 0x63e   : > { %7007 = vrot.lane.b32.xlu0 %v13546_v15, %s10177_s28  ;;  %v6351_v51 = vmul.f32 0.5, %v6251_v32  ;;  %v6332_v49 = vmul.f32 %v10021_v14, %v13486_v30  ;;  %v6511_v32 = vmul.f32 0.5, %v6331_v48 }
 0x63f   : > { %v9737_v2 = vpop.f32.mrb[60].mxu0  ;;  %v13567_v9 = vpop.permute.xlu0 %6291  ;;  %v6221_v44 = vmul.f32 1.442695, %v5854_v40 }
 0x640   : > { %v5818_v23 = vpop.f32.mrb[61].mxu0  ;;  %7009 = vrot.lane.b32.xlu1 %v13552_v29, %s10177_s28  ;;  %v6512_v30 = vmul.f32 0.5, %v6332_v49  ;;  %v13599_v14 = vadd.f32 %v9737_v2, %v13479_v5 }
 0x641   : > { %v9738_v11 = vpop.f32.mrb[62].mxu0 }
 0x642   : > { %v5821_v13 = vpop.f32.mrb[63].mxu0  ;;  %6395 = vrot.lane.b32.xlu0 %v6353_v54, %s10178_s29  ;;  %v5853_v54 = vmin.f32 %v13520_v17, 4.1351666  ;;  %15449 = vst [vmem:[#allocation65_spill] sm:$0xff] %v13599_v14 }
 0x643   : > { %v13589_v38 = vpop.permute.xlu0 %6295  ;;  %v13618_v49 = vadd.f32 %v13479_v5, %v5821_v13  ;;  %v5860_v13 = vmin.f32 %v13539_v31, 4.1351666 }
 0x644   : > { %6397 = vrot.lane.b32.xlu1 %v6354_v52, %s10178_s29 }
 0x645   : > { %15452 = vst [vmem:[#allocation68_spill] sm:$0xff] %v13618_v49 }
 0x646   : > { %6555 = vrot.lane.b32.xlu0 %v6513_v16, %s10178_s29 }
 0x647   : > { %v9741_v24 = vpop.f32.mrb[64].mxu0 }
 0x648   : > { %v13577_v52 = vadd.f32 %v9741_v24, %v13479_v5  ;;  %v5834_v36 = vpop.f32.mrb[65].mxu0  ;;  %6557 = vrot.lane.b32.xlu1 %v6514_v19, %s10178_s29  ;;  %v6352_v24 = vmul.f32 0.5, %v6252_v18  ;;  %v6219_v19 = vmul.f32 1.442695, %v5853_v54  ;;  %v10023_v18 = vpop.eup %10022  ;;  %v13605_v54 = vadd.f32 %v9738_v11, %v13479_v5 }
 0x649   : > { %v13582_v4 = vadd.f32 %v13479_v5, %v5834_v36  ;;  %v9742_v16 = vpop.f32.mrb[66].mxu0  ;;  %v13595_v36 = vpop.permute.xlu1 %6297  ;;  %v6257_v2 = vmul.f32 %v10023_v18, %v13408_v56 }
 0x64a   : > { %15446 = vst [vmem:[#allocation62_spill] sm:$0xff] %v13577_v52  ;;  %v13586_v17 = vadd.f32 %v9742_v16, %v13479_v5  ;;  %v5837_v41 = vpop.f32.mrb[67].mxu0  ;;  %6391 = vrot.lane.b32.xlu0 %v6351_v51, %s10178_s29  ;;  %10026 = vpow2.f32 %v6219_v19  ;;  %v13601_v51 = vpop.permute.xlu0 %6299  ;;  %15450 = vst [vmem:[#allocation66_spill] sm:$0xff] %v13605_v54  ;;  %v13612_v16 = vadd.f32 %v13479_v5, %v5818_v23 }
 0x64b   : > { %15447 = vst [vmem:[#allocation63_spill] sm:$0xff] %v13582_v4  ;;  %v13592_v45 = vadd.f32 %v13479_v5, %v5837_v41  ;;  %10028 = vpow2.f32 %v6221_v44  ;;  %v10025_v40 = vpop.eup %10024  ;;  %v5859_v41 = vmin.f32 %v13532_v25, 4.1351666  ;;  %v6337_v23 = vmul.f32 %v10023_v18, %v13536_v62 }
 0x64c   : > { %6393 = vrot.lane.b32.xlu1 %v6352_v24, %s10178_s29  ;;  %15451 = vst [vmem:[#allocation67_spill] sm:$0xff] %v13612_v16  ;;  %v6258_v11 = vmul.f32 %v10025_v40, %v13410_v20  ;;  %v6357_v19 = vmul.f32 0.5, %v6257_v2  ;;  %v6338_v5 = vmul.f32 %v10025_v40, %v13543_v33  ;;  %v6233_v18 = vmul.f32 1.442695, %v5860_v13 }
 0x64d   : > { %15448 = vst [vmem:[#allocation64_spill] sm:$0xff] %v13592_v45  ;;  %v13607_v48 = vpop.permute.xlu1 %6301  ;;  %v6231_v20 = vmul.f32 1.442695, %v5859_v41  ;;  %v6517_v50 = vmul.f32 0.5, %v6337_v23  ;;  %v5857_v40 = vmin.f32 %v13546_v15, 4.1351666 }
 0x64e   : > { %6551 = vrot.lane.b32.xlu0 %v6511_v32, %s10178_s29  ;;  %v13620_v44 = vpop.permute.xlu0 %6303  ;;  %v6518_v57 = vmul.f32 0.5, %v6338_v5 }
 0x64f   : > { %10030 = vpow2.f32 %v6231_v20  ;;  %v6227_v20 = vmul.f32 1.442695, %v5857_v40 }
 0x650   : > { %6553 = vrot.lane.b32.xlu1 %v6512_v30, %s10178_s29  ;;  %v6358_v30 = vmul.f32 0.5, %v6258_v11  ;;  %10032 = vpow2.f32 %v6233_v18  ;;  %v5864_v18 = vmin.f32 %v13605_v54, 4.1351666 }
 0x651   : > { %v13627_v24 = vpop.permute.xlu1 %6305  ;;  %10034 = vpow2.f32 %v6227_v20  ;;  %v5861_v20 = vmin.f32 %v13612_v16, 4.1351666 }
 0x652   : > { %7019 = vrot.lane.b32.xlu0 %v13599_v14, %s10177_s28  ;;  %v13634_v25 = vpop.permute.xlu0 %6307 }
 0x654   : > { %7021 = vrot.lane.b32.xlu1 %v13605_v54, %s10177_s28  ;;  %v10027_v32 = vpop.eup %10026 }
 0x655   : > { %v10029_v56 = vpop.eup %10028  ;;  %v6255_v62 = vmul.f32 %v10027_v32, %v13404_v22  ;;  %v13638_v2 = vpop.permute.xlu1 %6309  ;;  %v6335_v11 = vmul.f32 %v10027_v32, %v13517_v63 }
 0x656   : > { %7015 = vrot.lane.b32.xlu0 %v13612_v16, %s10177_s28  ;;  %v6256_v33 = vmul.f32 %v10029_v56, %v13406_v43  ;;  %v13645_v23 = vpop.permute.xlu0 %6891  ;;  %v6336_v13 = vmul.f32 %v10029_v56, %v13524_v39 }
 0x657   : > { %v6355_v41 = vmul.f32 0.5, %v6255_v62  ;;  %v5863_v62 = vmin.f32 %v13599_v14, 4.1351666  ;;  %vm6931_vm2 = vcmp.ne.s32.totalorder %v13645_v23, 0 }
 0x658   : > { %7017 = vrot.lane.b32.xlu1 %v13618_v49, %s10177_s28  ;;  %v6516_v32 = vmul.f32 0.5, %v6336_v13 }
 0x659   : > { %v13650_v5 = vpop.permute.xlu1 %6893  ;;  %v10031_v39 = vpop.eup %10030  ;;  %v6239_v40 = vmul.f32 1.442695, %v5863_v62  ;;  %v5862_v62 = vmin.f32 %v13618_v49, 4.1351666 }
 0x65a   : > { %6403 = vrot.lane.b32.xlu0 %v6357_v19, %s10178_s29  ;;  %v5858_v19 = vmin.f32 %v13552_v29, 4.1351666  ;;  %v6235_v29 = vmul.f32 1.442695, %v5861_v20  ;;  %vm6932_vm5 = vcmp.ne.s32.totalorder %v13650_v5, 0 }
 0x65c   : > { %6405 = vrot.lane.b32.xlu1 %v6358_v30, %s10178_s29  ;;  %v6515_v30 = vmul.f32 0.5, %v6335_v11  ;;  %v6229_v63 = vmul.f32 1.442695, %v5858_v19  ;;  %v6261_v11 = vmul.f32 %v10031_v39, %v13416_v35  ;;  %v6241_v19 = vmul.f32 1.442695, %v5864_v18 }
 0x65d   : > { %v13658_v56 = vpop.permute.xlu1 %6897 }
 0x65e   : > { %6563 = vrot.lane.b32.xlu0 %v6517_v50, %s10178_s29  ;;  %v6356_v50 = vmul.f32 0.5, %v6256_v33  ;;  %10036 = vpow2.f32 %v6229_v63  ;;  %v10033_v33 = vpop.eup %10032  ;;  %v6361_v63 = vmul.f32 0.5, %v6261_v11  ;;  %v6237_v11 = vmul.f32 1.442695, %v5862_v62 }
 0x65f   : > { %v6262_v13 = vmul.f32 %v10033_v33, %v13418_v60  ;;  %10038 = vpow2.f32 %v6239_v40  ;;  %v6342_v18 = vmul.f32 %v10033_v33, %v13571_v21  ;;  %v5867_v33 = vmin.f32 %v13577_v52, 4.1351666 }
 0x660   : > { %6565 = vrot.lane.b32.xlu1 %v6518_v57, %s10178_s29  ;;  %v13654_v57 = vpop.permute.xlu0 %6895  ;;  %10040 = vpow2.f32 %v6241_v19  ;;  %vm6934_vm6 = vcmp.ne.s32.totalorder %v13658_v56, 0  ;;  %v15456_v56 = vmov 0 }
 0x661   : > { %v6362_v54 = vmul.f32 0.5, %v6262_v13  ;;  %v6522_v19 = vmul.f32 0.5, %v6342_v18  ;;  %10042 = vpow2.f32 %v6235_v29  ;;  %vm6933_vm0 = vcmp.ne.s32.totalorder %v13654_v57, 0 }
 0x662   : > { %6399 = vrot.lane.b32.xlu0 %v6355_v41, %s10178_s29  ;;  %10044 = vpow2.f32 %v6237_v11 }
 0x664   : > { %6401 = vrot.lane.b32.xlu1 %v6356_v50, %s10178_s29  ;;  %v13666_v41 = vpop.permute.xlu0 %6899  ;;  %v13671_v50 = vpop.permute.xlu1 %6901 }
 0x666   : > { %6559 = vrot.lane.b32.xlu0 %v6515_v30, %s10178_s29  ;;  %v6341_v30 = vmul.f32 %v10031_v39, %v13567_v9 }
 0x668   : > { %6561 = vrot.lane.b32.xlu1 %v6516_v32, %s10178_s29  ;;  %v10035_v32 = vpop.eup %10034  ;;  %v13680_v14 = vpop.permute.xlu0 %6903  ;;  %v6521_v16 = vmul.f32 0.5, %v6341_v30 }
 0x669   : > { %v10037_v40 = vpop.eup %10036  ;;  %v6259_v9 = vmul.f32 %v10035_v32, %v13412_v3  ;;  %v13684_v39 = vpop.permute.xlu1 %6905  ;;  %v6339_v13 = vmul.f32 %v10035_v32, %v13556_v37  ;;  %vm6937_vm15 = vcmp.ne.s32.totalorder %v13680_v14, 0 }
 0x66a   : > { %7027 = vrot.lane.b32.xlu0 %v13577_v52, %s10177_s28  ;;  %v6260_v21 = vmul.f32 %v10037_v40, %v13414_v12  ;;  %v6340_v62 = vmul.f32 %v10037_v40, %v13562_v7  ;;  %v6247_v52 = vmul.f32 1.442695, %v5867_v33  ;;  %v5865_v7 = vmin.f32 %v13582_v4, 4.1351666 }
 0x66b   : > { %v6359_v20 = vmul.f32 0.5, %v6259_v9  ;;  %v6519_v49 = vmul.f32 0.5, %v6339_v13  ;;  %vm6938_vm14 = vcmp.ne.s32.totalorder %v13684_v39, 0 }
 0x66c   : > { %7029 = vrot.lane.b32.xlu1 %v13586_v17, %s10177_s28  ;;  %v13691_v30 = vpop.permute.xlu0 %6907  ;;  %v6520_v9 = vmul.f32 0.5, %v6340_v62  ;;  %10046 = vpow2.f32 %v6247_v52  ;;  %v6243_v52 = vmul.f32 1.442695, %v5865_v7 }
 0x66d   : > { %v13696_v18 = vpop.permute.xlu1 %6909 }
 0x66e   : > { %7023 = vrot.lane.b32.xlu0 %v13582_v4, %s10177_s28 }
 0x670   : > { %7025 = vrot.lane.b32.xlu1 %v13592_v45, %s10177_s28  ;;  %s10078_s28 = sshll.u32 %s10180_s20, 4  ;;  %s10079_s28 = int_to_ptr.vmem [resolvable:$false] %s10078_s28 }
 0x671   : > { %v13707_v33 = vpop.permute.xlu1 %6913 }
 0x672   : > { %6411 = vrot.lane.b32.xlu0 %v6361_v63, %s10178_s29  ;;  %v5868_v63 = vmin.f32 %v13586_v17, 4.1351666 }
 0x674   : > { %6413 = vrot.lane.b32.xlu1 %v6362_v54, %s10178_s29  ;;  %v10039_v54 = vpop.eup %10038  ;;  %v6249_v32 = vmul.f32 1.442695, %v5868_v63 }
 0x675   : > { %v10041_v29 = vpop.eup %10040  ;;  %v6265_v37 = vmul.f32 %v10039_v54, %v13424_v10  ;;  %v6345_v40 = vmul.f32 %v10039_v54, %v13601_v51 }
 0x676   : > { %6571 = vrot.lane.b32.xlu0 %v6521_v16, %s10178_s29  ;;  %v6360_v16 = vmul.f32 0.5, %v6260_v21  ;;  %v6266_v11 = vmul.f32 %v10041_v29, %v13426_v61  ;;  %v10043_v13 = vpop.eup %10042  ;;  %10048 = vpow2.f32 %v6249_v32 }
 0x677   : > { %v6365_v21 = vmul.f32 0.5, %v6265_v37  ;;  %v10045_v62 = vpop.eup %10044  ;;  %v6263_v51 = vmul.f32 %v10043_v13, %v13420_v47  ;;  %10050 = vpow2.f32 %v6243_v52 }
 0x678   : > { %6573 = vrot.lane.b32.xlu1 %v6522_v19, %s10178_s29  ;;  %v13702_v19 = vpop.permute.xlu0 %6911  ;;  %v6366_v63 = vmul.f32 0.5, %v6266_v11  ;;  %v6264_v32 = vmul.f32 %v10045_v62, %v13422_v6  ;;  %v10047_v11 = vpop.eup %10046  ;;  %v6344_v7 = vmul.f32 %v10045_v62, %v13595_v36 }
 0x679   : > { %v6349_v36 = vmul.f32 %v10047_v11, %v13634_v25 }
 0x67a   : > { %6407 = vrot.lane.b32.xlu0 %v6359_v20, %s10178_s29  ;;  %v5866_v20 = vmin.f32 %v13592_v45, 4.1351666  ;;  %v13718_v45 = vpop.permute.xlu1 %6917 }
 0x67c   : > { %6409 = vrot.lane.b32.xlu1 %v6360_v16, %s10178_s29  ;;  %v6525_v16 = vmul.f32 0.5, %v6345_v40  ;;  %v13714_v54 = vpop.permute.xlu0 %6915  ;;  %v6245_v37 = vmul.f32 1.442695, %v5866_v20  ;;  %v6364_v40 = vmul.f32 0.5, %v6264_v32 }
 0x67e   : > { %6567 = vrot.lane.b32.xlu0 %v6519_v49, %s10178_s29  ;;  %v6346_v49 = vmul.f32 %v10041_v29, %v13607_v48  ;;  %v6343_v48 = vmul.f32 %v10043_v13, %v13589_v38  ;;  %v6363_v29 = vmul.f32 0.5, %v6263_v51  ;;  %10052 = vpow2.f32 %v6245_v37 }
 0x67f   : > { %v6269_v38 = vmul.f32 %v10047_v11, %v13432_v59  ;;  %v6524_v13 = vmul.f32 0.5, %v6344_v7 }
 0x680   : > { %6569 = vrot.lane.b32.xlu1 %v6520_v9, %s10178_s29  ;;  %v6526_v9 = vmul.f32 0.5, %v6346_v49  ;;  %v10049_v20 = vpop.eup %10048  ;;  %v6523_v49 = vmul.f32 0.5, %v6343_v48 }
 0x681   : > { %v6270_v52 = vmul.f32 %v10049_v20, %v13434_v42  ;;  %v6369_v62 = vmul.f32 0.5, %v6269_v38  ;;  %v10051_v51 = vpop.eup %10050  ;;  %v6350_v37 = vmul.f32 %v10049_v20, %v13638_v2 }
 0x682   : > { %6419 = vrot.lane.b32.xlu0 %v6365_v21, %s10178_s29  ;;  %v13724_v21 = vpop.permute.xlu0 %6919  ;;  %v6267_v7 = vmul.f32 %v10051_v51, %v13428_v28  ;;  %v6347_v2 = vmul.f32 %v10051_v51, %v13620_v44 }
 0x683   : > { %v6530_v25 = vmul.f32 0.5, %v6350_v37  ;;  %v15453_v37 = vmov 0 }
 0x684   : > { %6421 = vrot.lane.b32.xlu1 %v6366_v63, %s10178_s29  ;;  %v13727_v63 = vpop.permute.xlu1 %6921 }
 0x686   : > { %6579 = vrot.lane.b32.xlu0 %v6525_v16, %s10178_s29  ;;  %v13734_v16 = vpop.permute.xlu0 %6923 }
 0x688   : > { %6581 = vrot.lane.b32.xlu1 %v6526_v9, %s10178_s29  ;;  %v6370_v9 = vmul.f32 0.5, %v6270_v52  ;;  %v13738_v32 = vpop.permute.xlu1 %6925  ;;  %v10053_v48 = vpop.eup %10052  ;;  %v6527_v52 = vmul.f32 0.5, %v6347_v2  ;;  %v13804_v2 = vld [vmem:[%s15005_s8 + $0x30] sm:$0xff] }
 0x689   : > { %v6348_v38 = vmul.f32 %v10053_v48, %v13627_v24  ;;  %v13764_v24 = vld [vmem:[%s15005_s8 + $0x18] sm:$0xff]  ;;  %vm6837_vm9 = vcmp.gt.f32.partialorder %v13804_v2, 0.5 }
 0x68a   : > { %6415 = vrot.lane.b32.xlu0 %v6363_v29, %s10178_s29  ;;  %v6529_v29 = vmul.f32 0.5, %v6349_v36  ;;  %v13743_v11 = vpop.permute.xlu0 %6927  ;;  %vm6834_vm11 = vcmp.gt.f32.partialorder %v13764_v24, 0.5 }
 0x68b   : > { %v6528_v44 = vmul.f32 0.5, %v6348_v38  ;;  %vm13782_vm7 = vmand %vm6834_vm11, %vm6934_vm6  ;;  %vm6935_vm11 = vcmp.ne.s32.totalorder %v13666_v41, 0 }
 0x68c   : > { %6417 = vrot.lane.b32.xlu1 %v6364_v40, %s10178_s29  ;;  %v6268_v40 = vmul.f32 %v10053_v48, %v13430_v8  ;;  %v13748_v20 = vpop.permute.xlu1 %6929  ;;  %v15457_v56 = vsel %vm13782_vm7, 4294967295, %v15456_v56 }
 0x68d   : > { %15458 = vst [vmem:[#allocation70_spill] sm:$0xff] %v15457_v56 }
 0x68e   : > { %6575 = vrot.lane.b32.xlu0 %v6523_v49, %s10178_s29  ;;  %v6367_v49 = vmul.f32 0.5, %v6267_v7  ;;  %v13790_v7 = vld [vmem:[%s15005_s8 + $0x8] sm:$0xff] }
 0x68f   : > { %vm6832_vm1 = vcmp.gt.f32.partialorder %v13790_v7, 0.5 }
 0x690   : > { %6577 = vrot.lane.b32.xlu1 %v6524_v13, %s10178_s29  ;;  %v6368_v13 = vmul.f32 0.5, %v6268_v40  ;;  %vm13810_vm3 = vmand %vm6832_vm1, %vm6932_vm5 }
 0x692   : > { %6427 = vrot.lane.b32.xlu0 %v6369_v62, %s10178_s29  ;;  %v13756_v62 = vld [vmem:[%s15005_s8 + $0x10] sm:$0xff] }
 0x693   : > { %vm6833_vm12 = vcmp.gt.f32.partialorder %v13756_v62, 0.5 }
 0x694   : > { %6429 = vrot.lane.b32.xlu1 %v6370_v9, %s10178_s29  ;;  %vm13768_vm10 = vmand %vm6833_vm12, %vm6933_vm0  ;;  %v13776_v9 = vld [vmem:[%s15005_s8] sm:$0xff] }
 0x695   : > { %v15454_v37 = vsel %vm13768_vm10, 4294967295, %v15453_v37  ;;  %vm6831_vm13 = vcmp.gt.f32.partialorder %v13776_v9, 0.5  ;;  %vm13824_vm12 = vmand %vm6837_vm9, %vm6937_vm15  ;;  %vm6941_vm9 = vcmp.ne.s32.totalorder %v13702_v19, 0 }
 0x696   : > { %6587 = vrot.lane.b32.xlu0 %v6529_v29, %s10178_s29  ;;  %15455 = vst [vmem:[#allocation69_spill] sm:$0xff] %v15454_v37  ;;  %vm13796_vm8 = vmand %vm6831_vm13, %vm6931_vm2  ;;  %vm6936_vm2 = vcmp.ne.s32.totalorder %v13671_v50, 0 }
 0x698   : > { %6589 = vrot.lane.b32.xlu1 %v6530_v25, %s10178_s29  ;;  %v15459_v25 = vmov 0 }
 0x699   : > { %v15460_v25 = vsel %vm13796_vm8, 4294967295, %v15459_v25 }
 0x69a   : > { %6423 = vrot.lane.b32.xlu0 %v6367_v49, %s10178_s29  ;;  %15461 = vst [vmem:[#allocation71_spill] sm:$0xff] %v15460_v25  ;;  %v15462_v49 = vmov 0 }
 0x69b   : > { %v15463_v49 = vsel %vm13810_vm3, 4294967295, %v15462_v49 }
 0x69c   : > { %v6996_v36 = vpop.permute.xlu0 %6995  ;;  %6425 = vrot.lane.b32.xlu1 %v6368_v13, %s10178_s29  ;;  %15464 = vst [vmem:[#allocation72_spill] sm:$0xff] %v15463_v49  ;;  %v13818_v13 = vld [vmem:[%s15005_s8 + $0x38] sm:$0xff] }
 0x69d   : > { %v7053_v48 = vsel %vm13768_vm10, %v6996_v36, -1e+30  ;;  %vm6838_vm4 = vcmp.gt.f32.partialorder %v13818_v13, 0.5 }
 0x69e   : > { %v6998_v51 = vpop.permute.xlu1 %6997  ;;  %6583 = vrot.lane.b32.xlu0 %v6527_v52, %s10178_s29  ;;  %v15465_v52 = vmov 0  ;;  %vm13838_vm6 = vmand %vm6838_vm4, %vm6938_vm14  ;;  %vm6942_vm14 = vcmp.ne.s32.totalorder %v13707_v33, 0 }
 0x69f   : > { %v7054_v23 = vsel %vm13782_vm7, %v6998_v51, -1e+30  ;;  %v15466_v52 = vsel %vm13824_vm12, 4294967295, %v15465_v52  ;;  %v15468_v51 = vmov 0 }
 0x6a0   : > { %6585 = vrot.lane.b32.xlu1 %v6528_v44, %s10178_s29  ;;  %v6992_v57 = vpop.permute.xlu0 %6991  ;;  %15467 = vst [vmem:[#allocation73_spill] sm:$0xff] %v15466_v52  ;;  %v13832_v44 = vld [vmem:[%s15005_s8 + $0x20] sm:$0xff]  ;;  %v15469_v51 = vsel %vm13838_vm6, 4294967295, %v15468_v51 }
 0x6a1   : > { %v7051_v5 = vsel %vm13796_vm8, %v6992_v57, -1e+30  ;;  %vm6835_vm0 = vcmp.gt.f32.partialorder %v13832_v44, 0.5  ;;  %15470 = vst [vmem:[#allocation74_spill] sm:$0xff] %v15469_v51  ;;  %v15489_v52 = vld [vmem:[#allocation37_spill] sm:$0xff] }
 0x6a2   : > { %v6994_v29 = vpop.permute.xlu1 %6993  ;;  %7495 = vrot.lane.b32.xlu0 %v7053_v48, %s10179_s17  ;;  %v13846_v48 = vld [vmem:[%s15005_s8 + $0x28] sm:$0xff]  ;;  %vm13852_vm1 = vmand %vm6835_vm0, %vm6935_vm11 }
 0x6a3   : > { %v7052_v14 = vsel %vm13810_vm3, %v6994_v29, -1e+30  ;;  %vm6836_vm13 = vcmp.gt.f32.partialorder %v13846_v48, 0.5  ;;  %v15471_v29 = vmov 0 }
 0x6a4   : > { %7497 = vrot.lane.b32.xlu1 %v7054_v23, %s10179_s17  ;;  %v7004_v40 = vpop.permute.xlu0 %7003  ;;  %v15472_v29 = vsel %vm13852_vm1, 4294967295, %v15471_v29  ;;  %vm13866_vm15 = vmand %vm6836_vm13, %vm6936_vm2  ;;  %vm6939_vm13 = vcmp.ne.s32.totalorder %v13691_v30, 0 }
 0x6a5   : > { %v7057_v39 = vsel %vm13824_vm12, %v7004_v40, -1e+30  ;;  %15473 = vst [vmem:[#allocation75_spill] sm:$0xff] %v15472_v29  ;;  %v13860_v40 = vld [vmem:[%s15005_s8 + $0x50] sm:$0xff] }
 0x6a6   : > { %v7006_v38 = vpop.permute.xlu1 %7005  ;;  %7491 = vrot.lane.b32.xlu0 %v7051_v5, %s10179_s17  ;;  %vm6841_vm5 = vcmp.gt.f32.partialorder %v13860_v40, 0.5  ;;  %v15474_v5 = vmov 0 }
 0x6a7   : > { %v7058_v41 = vsel %vm13838_vm6, %v7006_v38, -1e+30  ;;  %v15475_v5 = vsel %vm13866_vm15, 4294967295, %v15474_v5  ;;  %vm13882_vm0 = vmand %vm6841_vm5, %vm6941_vm9  ;;  %vm6940_vm9 = vcmp.ne.s32.totalorder %v13696_v18, 0 }
 0x6a8   : > { %7493 = vrot.lane.b32.xlu1 %v7052_v14, %s10179_s17  ;;  %v7000_v36 = vpop.permute.xlu0 %6999  ;;  %15476 = vst [vmem:[#allocation76_spill] sm:$0xff] %v15475_v5  ;;  %v13874_v14 = vld [vmem:[%s15005_s8 + $0x58] sm:$0xff]  ;;  %v13906_v5 = vld [vmem:[%s15005_s8 + $0x48] sm:$0xff] }
 0x6a9   : > { %v7055_v50 = vsel %vm13852_vm1, %v7000_v36, -1e+30  ;;  %vm6842_vm4 = vcmp.gt.f32.partialorder %v13874_v14, 0.5  ;;  %v5993_v36 = vmul.f32 %v13323_v53, %v13484_v58  ;;  %v5994_v53 = vmul.f32 %v13328_v26, %v13490_v46 }
 0x6aa   : > { %v7002_v57 = vpop.permute.xlu1 %7001  ;;  %7503 = vrot.lane.b32.xlu0 %v7057_v39, %s10179_s17  ;;  %v15477_v39 = vmov 0  ;;  %vm13898_vm2 = vmand %vm6842_vm4, %vm6942_vm14  ;;  %vm6840_vm5 = vcmp.gt.f32.partialorder %v13906_v5, 0.5 }
 0x6ab   : > { %v7056_v19 = vsel %vm13866_vm15, %v7002_v57, -1e+30  ;;  %v15478_v39 = vsel %vm13882_vm0, 4294967295, %v15477_v39  ;;  %v15480_v57 = vmov 0  ;;  %v13913_v26 = vadd.f32 %v13400_v34, %v5993_v36  ;;  %vm13928_vm14 = vmand %vm6840_vm5, %vm6940_vm9 }
 0x6ac   : > { %7505 = vrot.lane.b32.xlu1 %v7058_v41, %s10179_s17  ;;  %v7012_v23 = vpop.permute.xlu0 %7011  ;;  %15479 = vst [vmem:[#allocation77_spill] sm:$0xff] %v15478_v39  ;;  %v15481_v57 = vsel %vm13898_vm2, 4294967295, %v15480_v57  ;;  %v6093_v39 = vmul.f32 %v13756_v62, %v13484_v58  ;;  %v6094_v34 = vmul.f32 %v13764_v24, %v13490_v46  ;;  %v15486_v36 = vmov 0 }
 0x6ad   : > { %v7061_v33 = vsel %vm13882_vm0, %v7012_v23, -1e+30  ;;  %15482 = vst [vmem:[#allocation78_spill] sm:$0xff] %v15481_v57  ;;  %v15483_v23 = vmov 0  ;;  %v15487_v36 = vsel %vm13928_vm14, 4294967295, %v15486_v36  ;;  %vm6946_vm9 = vcmp.ne.s32.totalorder %v13727_v63, 0 }
 0x6ae   : > { %v7014_v38 = vpop.permute.xlu1 %7013  ;;  %7499 = vrot.lane.b32.xlu0 %v7055_v50, %s10179_s17  ;;  %v13890_v50 = vld [vmem:[%s15005_s8 + $0x40] sm:$0xff]  ;;  %15488 = vst [vmem:[#allocation80_spill] sm:$0xff] %v15487_v36  ;;  %v13938_v46 = vadd.f32 %v13442_v55, %v6094_v34  ;;  %v15492_v34 = vld [vmem:[#allocation23_spill] sm:$0xff] }
 0x6af   : > { %vm6839_vm11 = vcmp.gt.f32.partialorder %v13890_v50, 0.5  ;;  %v7062_v30 = vsel %vm13898_vm2, %v7014_v38, -1e+30  ;;  %v6074_v38 = vadd.f32 %v13402_v1, %v5994_v53 }
 0x6b0   : > { %7501 = vrot.lane.b32.xlu1 %v7056_v19, %s10179_s17  ;;  %v7008_v41 = vpop.permute.xlu0 %7007  ;;  %vm13915_vm4 = vmand %vm6839_vm11, %vm6939_vm13  ;;  %vm6945_vm13 = vcmp.ne.s32.totalorder %v13724_v21, 0 }
 0x6b1   : > { %v15484_v23 = vsel %vm13915_vm4, 4294967295, %v15483_v23  ;;  %v7059_v29 = vsel %vm13915_vm4, %v7008_v41, -1e+30  ;;  %v6193_v41 = vadd.f32 %v13440_v27, %v6093_v39  ;;  %v15490_v27 = vld [vmem:[#allocation55_spill] sm:$0xff]  ;;  %v15491_v39 = vld [vmem:[#allocation38_spill] sm:$0xff] }
 0x6b2   : > { %v7010_v19 = vpop.permute.xlu1 %7009  ;;  %7511 = vrot.lane.b32.xlu0 %v7061_v33, %s10179_s17  ;;  %15485 = vst [vmem:[#allocation79_spill] sm:$0xff] %v15484_v23 }
 0x6b3   : > { %v7060_v58 = vsel %vm13928_vm14, %v7010_v19, -1e+30 }
 0x6b4   : > { %7513 = vrot.lane.b32.xlu1 %v7062_v30, %s10179_s17  ;;  %v6396_v33 = vpop.permute.xlu0 %6395 }
 0x6b5   : > { %v6453_v18 = vsub.f32 %v13913_v26, %v6396_v33 }
 0x6b6   : > { %v6398_v57 = vpop.permute.xlu1 %6397  ;;  %7507 = vrot.lane.b32.xlu0 %v7059_v29, %s10179_s17  ;;  %v5991_v29 = vmul.f32 %v15489_v52, %v13495_v0  ;;  %v6091_v52 = vmul.f32 %v13776_v9, %v13495_v0  ;;  %v15494_v9 = vld [vmem:[#allocation31_spill] sm:$0xff] }
 0x6b7   : > { %v6473_v62 = vmax.f32 %v6453_v18, 0.0  ;;  %v6454_v30 = vsub.f32 %v6074_v38, %v6398_v57 }
 0x6b8   : > { %7509 = vrot.lane.b32.xlu1 %v7060_v58, %s10179_s17  ;;  %v6556_v1 = vpop.permute.xlu0 %6555  ;;  %v6071_v36 = vadd.f32 %v15492_v34, %v5991_v29  ;;  %v13964_v29 = vld [vmem:[%s15005_s8 + $0x70] sm:$0xff] }
 0x6b9   : > { %v6493_v53 = vmin.f32 %v6473_v62, 15.0  ;;  %v6474_v23 = vmax.f32 %v6454_v30, 0.0  ;;  %v6613_v24 = vsub.f32 %v6193_v41, %v6556_v1  ;;  %v5992_v62 = vmul.f32 %v15491_v39, %v15490_v27 }
 0x6ba   : > { %v6558_v51 = vpop.permute.xlu1 %6557  ;;  %vm6845_vm11 = vcmp.gt.f32.partialorder %v13964_v29, 0.5  ;;  %v6753_v42 = vadd.f32 %v6556_v1, %v6193_v41  ;;  %v15501_v41 = vmov 0 }
 0x6bb   : > { %v6494_v49 = vmin.f32 %v6474_v23, 15.0  ;;  %v6614_v19 = vsub.f32 %v13938_v46, %v6558_v51  ;;  %7095 = vrot.lane.b32.xlu0 %v6493_v53, %s10176_s14  ;;  %v6633_v18 = vmax.f32 %v6613_v24, 0.0  ;;  %v15493_v24 = vld [vmem:[#allocation21_spill] sm:$0xff]  ;;  %vm13980_vm14 = vmand %vm6845_vm11, %vm6945_vm13  ;;  %vm6943_vm13 = vcmp.ne.s32.totalorder %v13714_v54, 0 }
 0x6bc   : > { %v13944_v58 = vpop.permute.xlu0 %6391  ;;  %v6072_v56 = vadd.f32 %v15493_v24, %v5992_v62  ;;  %v15498_v62 = vld [vmem:[#allocation29_spill] sm:$0xff] }
 0x6bd   : > { %v6634_v30 = vmax.f32 %v6614_v19, 0.0  ;;  %7097 = vrot.lane.b32.xlu1 %v6494_v49, %s10176_s14  ;;  %v6653_v55 = vmin.f32 %v6633_v18, 15.0  ;;  %v6451_v53 = vsub.f32 %v6071_v36, %v13944_v58  ;;  %v6092_v49 = vmul.f32 %v13790_v7, %v15490_v27  ;;  %v13976_v7 = vld [vmem:[%s15005_s8 + $0x78] sm:$0xff] }
 0x6be   : > { %v13950_v25 = vpop.permute.xlu1 %6393  ;;  %v6191_v19 = vadd.f32 %v15494_v9, %v6091_v52  ;;  %vm6846_vm5 = vcmp.gt.f32.partialorder %v13976_v7, 0.5  ;;  %v15495_v27 = vmov 0  ;;  %v15499_v52 = vmov 0 }
 0x6bf   : > { %v6654_v23 = vmin.f32 %v6634_v30, 15.0  ;;  %7195 = vrot.lane.b32.xlu0 %v6653_v55, %s10175_s15  ;;  %v6452_v0 = vsub.f32 %v6072_v56, %v13950_v25  ;;  %v15496_v27 = vsel %vm13980_vm14, 4294967295, %v15495_v27  ;;  %v6471_v21 = vmax.f32 %v6451_v53, 0.0  ;;  %vm13988_vm4 = vmand %vm6846_vm5, %vm6946_vm9 }
 0x6c0   : > { %v13957_v37 = vpop.permute.xlu0 %6551  ;;  %15497 = vst [vmem:[#allocation37_spill] sm:$0xff] %v15496_v27  ;;  %v6192_v30 = vadd.f32 %v15498_v62, %v6092_v49  ;;  %v15500_v52 = vsel %vm13988_vm4, 4294967295, %v15499_v52  ;;  %v6673_v9 = vadd.f32 %v6396_v33, %v13913_v26  ;;  %v6674_v27 = vadd.f32 %v6398_v57, %v6074_v38  ;;  %v14005_v26 = vld [vmem:[%s15005_s8 + $0x60] sm:$0xff] }
 0x6c1   : > { %7197 = vrot.lane.b32.xlu1 %v6654_v23, %s10175_s15  ;;  %v6611_v39 = vsub.f32 %v6191_v19, %v13957_v37  ;;  %v6472_v23 = vmax.f32 %v6452_v0, 0.0  ;;  %v6491_v49 = vmin.f32 %v6471_v21, 15.0  ;;  %vm6843_vm11 = vcmp.gt.f32.partialorder %v14005_v26, 0.5 }
 0x6c2   : > { %v13971_v18 = vpop.permute.xlu1 %6553  ;;  %v8415_v0 = vadd.f32 -1.0, %v6673_v9  ;;  %v8416_v57 = vadd.f32 -1.0, %v6674_v27  ;;  %v6754_v33 = vadd.f32 %v6558_v51, %v13938_v46  ;;  %vm6944_vm9 = vcmp.ne.s32.totalorder %v13718_v45, 0  ;;  %v15507_v9 = vld [vmem:[#allocation56_spill] sm:$0xff] }
 0x6c3   : > { %v6612_v63 = vsub.f32 %v6192_v30, %v13971_v18  ;;  %v6631_v62 = vmax.f32 %v6611_v39, 0.0  ;;  %v6492_v8 = vmin.f32 %v6472_v23, 15.0  ;;  %v8435_v51 = vadd.f32 -1.0, %v6753_v42 }
 0x6c4   : > { %v7020_v55 = vpop.permute.xlu0 %7019  ;;  %v6713_v54 = vmax.f32 %v8415_v0, 0.0  ;;  %v15504_v46 = vmov 0  ;;  %v6714_v45 = vmax.f32 %v8416_v57, 0.0  ;;  %v8436_v27 = vadd.f32 -1.0, %v6754_v33 }
 0x6c5   : > { %v7065_v34 = vsel %vm13980_vm14, %v7020_v55, -1e+30  ;;  %v6632_v28 = vmax.f32 %v6612_v63, 0.0  ;;  %v6651_v59 = vmin.f32 %v6631_v62, 15.0  ;;  %v6672_v39 = vadd.f32 %v13950_v25, %v6072_v56 }
 0x6c6   : > { %v7022_v24 = vpop.permute.xlu1 %7021  ;;  %7519 = vrot.lane.b32.xlu0 %v7065_v34, %s10179_s17  ;;  %v6734_v56 = vmin.f32 %v6714_v45, 15.0  ;;  %v6794_v25 = vmax.f32 %v8436_v27, 0.0  ;;  %v6752_v0 = vadd.f32 %v13971_v18, %v6192_v30  ;;  %v15511_v30 = vld [vmem:[#allocation25_spill] sm:$0xff] }
 0x6c7   : > { %v7066_v53 = vsel %vm13988_vm4, %v7022_v24, -1e+30  ;;  %v6652_v38 = vmin.f32 %v6632_v28, 15.0  ;;  %vm14020_vm4 = vmand %vm6843_vm11, %vm6943_vm13  ;;  %v6671_v28 = vadd.f32 %v13944_v58, %v6071_v36  ;;  %v6733_v36 = vmin.f32 %v6713_v54, 15.0 }
 0x6c8   : > { %7521 = vrot.lane.b32.xlu1 %v7066_v53, %s10179_s17  ;;  %v7016_v55 = vpop.permute.xlu0 %7015  ;;  %v15502_v41 = vsel %vm14020_vm4, 4294967295, %v15501_v41  ;;  %v6793_v58 = vmax.f32 %v8435_v51, 0.0  ;;  %v6751_v24 = vadd.f32 %v13957_v37, %v6191_v19  ;;  %v15509_v37 = vld [vmem:[#allocation57_spill] sm:$0xff]  ;;  %v15510_v19 = vld [vmem:[#allocation35_spill] sm:$0xff]  ;;  %v8434_v18 = vadd.f32 -1.0, %v6752_v0 }
 0x6c9   : > { %15503 = vst [vmem:[#allocation55_spill] sm:$0xff] %v15502_v41  ;;  %v7063_v1 = vsel %vm14020_vm4, %v7016_v55, -1e+30  ;;  %v8413_v63 = vadd.f32 -1.0, %v6671_v28  ;;  %v8414_v55 = vadd.f32 -1.0, %v6672_v39  ;;  %v5998_v54 = vmul.f32 %v15510_v19, %v15509_v37 }
 0x6ca   : > { %v7018_v4 = vpop.permute.xlu1 %7017  ;;  %7091 = vrot.lane.b32.xlu0 %v6491_v49, %s10176_s14  ;;  %v15508_v49 = vld [vmem:[#allocation34_spill] sm:$0xff]  ;;  %v6097_v28 = vmul.f32 %v13804_v2, %v15507_v9  ;;  %vm6949_vm13 = vcmp.ne.s32.totalorder %v13743_v11, 0  ;;  %v15520_v11 = vmov 0 }
 0x6cb   : > { %v5997_v62 = vmul.f32 %v15508_v49, %v15507_v9  ;;  %v6711_v33 = vmax.f32 %v8413_v63, 0.0  ;;  %v6712_v45 = vmax.f32 %v8414_v55, 0.0 }
 0x6cc   : > { %7093 = vrot.lane.b32.xlu1 %v6492_v8, %s10176_s14  ;;  %v14000_v34 = vpop.permute.xlu0 %6403  ;;  %v14016_v8 = vld [vmem:[%s15005_s8 + $0x68] sm:$0xff] }
 0x6cd   : > { %vm6844_vm5 = vcmp.gt.f32.partialorder %v14016_v8, 0.5  ;;  %v14058_v27 = vadd.f32 %v15511_v30, %v5997_v62  ;;  %v6732_v49 = vmin.f32 %v6712_v45, 15.0  ;;  %v6792_v62 = vmax.f32 %v8434_v18, 0.0  ;;  %v15515_v45 = vld [vmem:[#allocation58_spill] sm:$0xff]  ;;  %v15516_v18 = vld [vmem:[#allocation32_spill] sm:$0xff] }
 0x6ce   : > { %v14010_v21 = vpop.permute.xlu1 %6405  ;;  %7191 = vrot.lane.b32.xlu0 %v6651_v59, %s10175_s15  ;;  %vm14030_vm14 = vmand %vm6844_vm5, %vm6944_vm9  ;;  %v5995_v30 = vmul.f32 %v15516_v18, %v15515_v45  ;;  %v6095_v18 = vmul.f32 %v13832_v44, %v15515_v45  ;;  %v14118_v44 = vld [vmem:[%s15005_s8 + $0x90] sm:$0xff]  ;;  %vm6950_vm9 = vcmp.ne.s32.totalorder %v13748_v20, 0 }
 0x6cf   : > { %v15505_v46 = vsel %vm14030_vm14, 4294967295, %v15504_v46  ;;  %v7064_v42 = vsel %vm14030_vm14, %v7018_v4, -1e+30  ;;  %v6813_v4 = vmin.f32 %v6793_v58, 15.0  ;;  %v6457_v63 = vsub.f32 %v14058_v27, %v14000_v34 }
 0x6d0   : > { %7193 = vrot.lane.b32.xlu1 %v6652_v38, %s10175_s15  ;;  %v14026_v59 = vpop.permute.xlu0 %6563  ;;  %15506 = vst [vmem:[#allocation38_spill] sm:$0xff] %v15505_v46  ;;  %v8433_v38 = vadd.f32 -1.0, %v6751_v24  ;;  %v15512_v24 = vld [vmem:[#allocation24_spill] sm:$0xff]  ;;  %vm6849_vm11 = vcmp.gt.f32.partialorder %v14118_v44, 0.5 }
 0x6d1   : > { %v14068_v2 = vadd.f32 %v15512_v24, %v5998_v54  ;;  %v6812_v54 = vmin.f32 %v6792_v62, 15.0  ;;  %v15518_v24 = vld [vmem:[#allocation33_spill] sm:$0xff]  ;;  %vm14135_vm14 = vmand %vm6849_vm11, %vm6949_vm13  ;;  %vm6947_vm13 = vcmp.ne.s32.totalorder %v13734_v16, 0  ;;  %v15527_v16 = vmov 0 }
 0x6d2   : > { %v14035_v23 = vpop.permute.xlu1 %6565  ;;  %7515 = vrot.lane.b32.xlu0 %v7063_v1, %s10179_s17  ;;  %v6814_v1 = vmin.f32 %v6794_v25, 15.0  ;;  %v6791_v58 = vmax.f32 %v8433_v38, 0.0  ;;  %v15513_v25 = vld [vmem:[#allocation41_spill] sm:$0xff]  ;;  %v15514_v38 = vld [vmem:[#allocation42_spill] sm:$0xff]  ;;  %v15521_v11 = vsel %vm14135_vm14, 4294967295, %v15520_v11 }
 0x6d3   : > { %v14074_v55 = vadd.f32 %v15513_v25, %v6097_v28  ;;  %15522 = vst [vmem:[#allocation23_spill] sm:$0xff] %v15521_v11 }
 0x6d4   : > { %7517 = vrot.lane.b32.xlu1 %v7064_v42, %s10179_s17  ;;  %v14042_v53 = vpop.permute.xlu0 %6399  ;;  %v6098_v42 = vmul.f32 %v13818_v13, %v15509_v37  ;;  %v6811_v0 = vmin.f32 %v6791_v58, 15.0 }
 0x6d6   : > { %v14047_v57 = vpop.permute.xlu1 %6401  ;;  %7295 = vrot.lane.b32.xlu0 %v6733_v36, %s10176_s14  ;;  %v6731_v36 = vmin.f32 %v6711_v33, 15.0  ;;  %v6617_v33 = vsub.f32 %v14074_v55, %v14026_v59  ;;  %v14080_v37 = vadd.f32 %v15514_v38, %v6098_v42  ;;  %v15517_v42 = vld [vmem:[#allocation59_spill] sm:$0xff]  ;;  %v14098_v38 = vadd.f32 %v13404_v22, %v5995_v30  ;;  %v14131_v30 = vld [vmem:[%s15005_s8 + $0x98] sm:$0xff] }
 0x6d7   : > { %v5996_v25 = vmul.f32 %v15518_v24, %v15517_v42  ;;  %vm6850_vm5 = vcmp.gt.f32.partialorder %v14131_v30, 0.5 }
 0x6d8   : > { %7297 = vrot.lane.b32.xlu1 %v6734_v56, %s10176_s14  ;;  %v14053_v51 = vpop.permute.xlu0 %6559  ;;  %v6458_v56 = vsub.f32 %v14068_v2, %v14010_v21  ;;  %v6618_v28 = vsub.f32 %v14080_v37, %v14035_v23  ;;  %vm14146_vm4 = vmand %vm6850_vm5, %vm6950_vm9  ;;  %vm6948_vm9 = vcmp.ne.s32.totalorder %v13738_v32, 0 }
 0x6da   : > { %v14060_v39 = vpop.permute.xlu1 %6561  ;;  %7395 = vrot.lane.b32.xlu0 %v6813_v4, %s10175_s15  ;;  %v6477_v4 = vmax.f32 %v6457_v63, 0.0  ;;  %v6637_v63 = vmax.f32 %v6617_v33, 0.0  ;;  %v14108_v33 = vadd.f32 %v13406_v43, %v5996_v25 }
 0x6dc   : > { %7397 = vrot.lane.b32.xlu1 %v6814_v1, %s10175_s15  ;;  %v7028_v9 = vpop.permute.xlu0 %7027  ;;  %v6478_v1 = vmax.f32 %v6458_v56, 0.0  ;;  %v6497_v58 = vmin.f32 %v6477_v4, 15.0  ;;  %v6638_v56 = vmax.f32 %v6618_v28, 0.0  ;;  %v6455_v4 = vsub.f32 %v14098_v38, %v14042_v53  ;;  %v15519_v28 = vld [vmem:[#allocation40_spill] sm:$0xff] }
 0x6dd   : > { %v6456_v43 = vsub.f32 %v14108_v33, %v14047_v57  ;;  %v6195_v45 = vadd.f32 %v15519_v28, %v6095_v18 }
 0x6de   : > { %v7030_v13 = vpop.permute.xlu1 %7029  ;;  %7291 = vrot.lane.b32.xlu0 %v6731_v36, %s10176_s14  ;;  %v6498_v62 = vmin.f32 %v6478_v1, 15.0  ;;  %v6658_v1 = vmin.f32 %v6638_v56, 15.0  ;;  %v15524_v56 = vmov 0 }
 0x6df   : > { %v15525_v56 = vsel %vm14146_vm4, 4294967295, %v15524_v56  ;;  %v6476_v20 = vmax.f32 %v6456_v43, 0.0  ;;  %v6678_v43 = vadd.f32 %v14010_v21, %v14068_v2  ;;  %v6758_v2 = vadd.f32 %v14035_v23, %v14080_v37 }
 0x6e0   : > { %7293 = vrot.lane.b32.xlu1 %v6732_v49, %s10176_s14  ;;  %v14083_v19 = vpop.permute.xlu0 %7023  ;;  %15526 = vst [vmem:[#allocation21_spill] sm:$0xff] %v15525_v56  ;;  %v6675_v37 = vadd.f32 %v14042_v53, %v14098_v38 }
 0x6e1   : > { %v8420_v21 = vadd.f32 -1.0, %v6678_v43 }
 0x6e2   : > { %v14089_v36 = vpop.permute.xlu1 %7025  ;;  %7391 = vrot.lane.b32.xlu0 %v6811_v0, %s10175_s15  ;;  %v6657_v0 = vmin.f32 %v6637_v63, 15.0  ;;  %v6615_v63 = vsub.f32 %v6195_v45, %v14053_v51 }
 0x6e3   : > { %v6718_v32 = vmax.f32 %v8420_v21, 0.0 }
 0x6e4   : > { %7393 = vrot.lane.b32.xlu1 %v6812_v54, %s10175_s15  ;;  %v14095_v49 = vpop.permute.xlu0 %6411  ;;  %v6096_v54 = vmul.f32 %v13846_v48, %v15517_v42  ;;  %v15523_v42 = vld [vmem:[#allocation39_spill] sm:$0xff]  ;;  %v6635_v28 = vmax.f32 %v6615_v63, 0.0 }
 0x6e6   : > { %v14102_v46 = vpop.permute.xlu1 %6413  ;;  %7103 = vrot.lane.b32.xlu0 %v6497_v58, %s10176_s14  ;;  %v6475_v58 = vmax.f32 %v6455_v4, 0.0  ;;  %v6196_v24 = vadd.f32 %v15523_v42, %v6096_v54  ;;  %v7070_v4 = vsel %vm14146_vm4, %v7030_v13, -1e+30  ;;  %v6677_v54 = vadd.f32 %v14000_v34, %v14058_v27 }
 0x6e7   : > { %v6496_v42 = vmin.f32 %v6476_v20, 15.0  ;;  %v6757_v13 = vadd.f32 %v14026_v59, %v14074_v55  ;;  %v6655_v34 = vmin.f32 %v6635_v28, 15.0  ;;  %v14186_v55 = vld [vmem:[%s15005_s8 + $0x88] sm:$0xff] }
 0x6e8   : > { %7105 = vrot.lane.b32.xlu1 %v6498_v62, %s10176_s14  ;;  %v14113_v22 = vpop.permute.xlu0 %6571  ;;  %v7069_v62 = vsel %vm14135_vm14, %v7028_v9, -1e+30  ;;  %v6616_v18 = vsub.f32 %v6196_v24, %v14060_v39  ;;  %vm6848_vm5 = vcmp.gt.f32.partialorder %v14186_v55, 0.5 }
 0x6e9   : > { %v8439_v23 = vadd.f32 -1.0, %v6757_v13  ;;  %vm14202_vm14 = vmand %vm6848_vm5, %vm6948_vm9  ;;  %v15532_v13 = vld [vmem:[#allocation60_spill] sm:$0xff]  ;;  %vm15590_vm9 = vnez %v15500_v52 }
 0x6ea   : > { %v14125_v48 = vpop.permute.xlu1 %6573  ;;  %7203 = vrot.lane.b32.xlu0 %v6657_v0, %s10175_s15  ;;  %v6636_v11 = vmax.f32 %v6616_v18, 0.0  ;;  %v7068_v53 = vsel %vm14202_vm14, %v14089_v36, -1e+30 }
 0x6eb   : > { %v6797_v43 = vmax.f32 %v8439_v23, 0.0 }
 0x6ec   : > { %7205 = vrot.lane.b32.xlu1 %v6658_v1, %s10175_s15  ;;  %v14142_v25 = vpop.permute.xlu0 %6407  ;;  %v6495_v1 = vmin.f32 %v6475_v58, 15.0  ;;  %v14174_v58 = vld [vmem:[%s15005_s8 + $0x80] sm:$0xff]  ;;  %v6656_v63 = vmin.f32 %v6636_v11, 15.0 }
 0x6ed   : > { %vm6847_vm11 = vcmp.gt.f32.partialorder %v14174_v58, 0.5  ;;  %v6817_v36 = vmin.f32 %v6797_v43, 15.0 }
 0x6ee   : > { %v14151_v0 = vpop.permute.xlu1 %6409  ;;  %7527 = vrot.lane.b32.xlu0 %v7069_v62, %s10179_s17  ;;  %v8419_v62 = vadd.f32 -1.0, %v6677_v54  ;;  %vm14190_vm4 = vmand %vm6847_vm11, %vm6947_vm13  ;;  %v8440_v54 = vadd.f32 -1.0, %v6758_v2 }
 0x6ef   : > { %v15528_v16 = vsel %vm14190_vm4, 4294967295, %v15527_v16  ;;  %v7067_v18 = vsel %vm14190_vm4, %v14083_v19, -1e+30  ;;  %v8417_v19 = vadd.f32 -1.0, %v6675_v37 }
 0x6f0   : > { %7529 = vrot.lane.b32.xlu1 %v7070_v4, %s10179_s17  ;;  %v14159_v9 = vpop.permute.xlu0 %6567  ;;  %v6717_v20 = vmax.f32 %v8419_v62, 0.0  ;;  %v15529_v4 = vmov 0  ;;  %v6798_v21 = vmax.f32 %v8440_v54, 0.0 }
 0x6f1   : > { %v15530_v4 = vsel %vm14202_vm14, 4294967295, %v15529_v4 }
 0x6f2   : > { %v14163_v41 = vpop.permute.xlu1 %6569  ;;  %7099 = vrot.lane.b32.xlu0 %v6495_v1, %s10176_s14  ;;  %15531 = vst [vmem:[#allocation31_spill] sm:$0xff] %v15530_v4  ;;  %v6676_v1 = vadd.f32 %v14047_v57, %v14108_v33  ;;  %v6737_v38 = vmin.f32 %v6717_v20, 15.0  ;;  %v6738_v33 = vmin.f32 %v6718_v32, 15.0  ;;  %v6715_v20 = vmax.f32 %v8417_v19, 0.0 }
 0x6f3   : > { %v6818_v54 = vmin.f32 %v6798_v21, 15.0 }
 0x6f4   : > { %7101 = vrot.lane.b32.xlu1 %v6496_v42, %s10176_s14  ;;  %v14169_v27 = vpop.permute.xlu0 %6419  ;;  %v6755_v42 = vadd.f32 %v14053_v51, %v6195_v45  ;;  %v8418_v2 = vadd.f32 -1.0, %v6676_v1  ;;  %v15534_v51 = vld [vmem:[#allocation12_spill] sm:$0xff]  ;;  %v6735_v43 = vmin.f32 %v6715_v20, 15.0 }
 0x6f5   : > { %v6002_v45 = vmul.f32 %v15534_v51, %v13539_v31 }
 0x6f6   : > { %v14180_v59 = vpop.permute.xlu1 %6421  ;;  %7199 = vrot.lane.b32.xlu0 %v6655_v34, %s10175_s15  ;;  %v15533_v34 = vld [vmem:[#allocation11_spill] sm:$0xff]  ;;  %v8437_v23 = vadd.f32 -1.0, %v6755_v42  ;;  %v6716_v1 = vmax.f32 %v8418_v2, 0.0  ;;  %v15536_v2 = vld [vmem:[#allocation45_spill] sm:$0xff] }
 0x6f7   : > { %v6001_v57 = vmul.f32 %v15533_v34, %v15532_v13  ;;  %v6082_v34 = vadd.f32 %v13418_v60, %v6002_v45  ;;  %v15539_v45 = vld [vmem:[#allocation46_spill] sm:$0xff] }
 0x6f8   : > { %7201 = vrot.lane.b32.xlu1 %v6656_v63, %s10175_s15  ;;  %v14197_v11 = vpop.permute.xlu0 %6579  ;;  %v6756_v63 = vadd.f32 %v14060_v39, %v6196_v24  ;;  %v6101_v39 = vmul.f32 %v13860_v40, %v15532_v13  ;;  %v6795_v19 = vmax.f32 %v8437_v23, 0.0  ;;  %v6736_v13 = vmin.f32 %v6716_v1, 15.0 }
 0x6f9   : > { %v6081_v32 = vadd.f32 %v13416_v35, %v6001_v57  ;;  %v15535_v57 = vld [vmem:[#allocation36_spill] sm:$0xff]  ;;  %v6462_v21 = vsub.f32 %v6082_v34, %v14102_v46 }
 0x6fa   : > { %v14208_v28 = vpop.permute.xlu1 %6581  ;;  %7523 = vrot.lane.b32.xlu0 %v7067_v18, %s10179_s17  ;;  %v5999_v40 = vmul.f32 %v15535_v57, %v13546_v15  ;;  %v6815_v20 = vmin.f32 %v6795_v19, 15.0 }
 0x6fb   : > { %v6461_v42 = vsub.f32 %v6081_v32, %v14095_v49  ;;  %v6482_v57 = vmax.f32 %v6462_v21, 0.0 }
 0x6fc   : > { %7525 = vrot.lane.b32.xlu1 %v7068_v53, %s10179_s17  ;;  %v14216_v62 = vpop.permute.xlu0 %6415  ;;  %v8438_v53 = vadd.f32 -1.0, %v6756_v63  ;;  %v6201_v63 = vadd.f32 %v15536_v2, %v6101_v39  ;;  %v6079_v2 = vadd.f32 %v13412_v3, %v5999_v40  ;;  %v15540_v40 = vld [vmem:[#allocation43_spill] sm:$0xff]  ;;  %s9908_s17 = smul.u32 40, %s10156_s13 }
 0x6fd   : > { %v6481_v23 = vmax.f32 %v6461_v42, 0.0 }
 0x6fe   : > { %v14221_v18 = vpop.permute.xlu1 %6417  ;;  %7303 = vrot.lane.b32.xlu0 %v6737_v38, %s10176_s14  ;;  %v6102_v38 = vmul.f32 %v13874_v14, %v13539_v31  ;;  %v15537_v14 = vld [vmem:[#allocation61_spill] sm:$0xff]  ;;  %v6621_v51 = vsub.f32 %v6201_v63, %v14113_v22 }
 0x6ff   : > { %v6501_v19 = vmin.f32 %v6481_v23, 15.0  ;;  %v6681_v23 = vadd.f32 %v14095_v49, %v6081_v32  ;;  %v6761_v49 = vadd.f32 %v14113_v22, %v6201_v63 }
 0x700   : > { %7305 = vrot.lane.b32.xlu1 %v6738_v33, %s10176_s14  ;;  %v14227_v37 = vpop.permute.xlu0 %6575  ;;  %v6796_v33 = vmax.f32 %v8438_v53, 0.0  ;;  %v6099_v53 = vmul.f32 %v13890_v50, %v13546_v15  ;;  %v6641_v42 = vmax.f32 %v6621_v51, 0.0  ;;  %v6502_v50 = vmin.f32 %v6482_v57, 15.0 }
 0x701   : > { %v6682_v57 = vadd.f32 %v14102_v46, %v6082_v34 }
 0x702   : > { %v14232_v24 = vpop.permute.xlu1 %6577  ;;  %7403 = vrot.lane.b32.xlu0 %v6817_v36, %s10175_s15  ;;  %v15538_v36 = vld [vmem:[#allocation13_spill] sm:$0xff]  ;;  %v6816_v39 = vmin.f32 %v6796_v33, 15.0  ;;  %v6199_v21 = vadd.f32 %v15540_v40, %v6099_v53  ;;  %v6661_v51 = vmin.f32 %v6641_v42, 15.0 }
 0x703   : > { %v6000_v60 = vmul.f32 %v15538_v36, %v15537_v14 }
 0x704   : > { %7405 = vrot.lane.b32.xlu1 %v6818_v54, %s10175_s15  ;;  %v14240_v35 = vpop.permute.xlu0 %6427  ;;  %v6202_v54 = vadd.f32 %v15539_v45, %v6102_v38  ;;  %v6100_v38 = vmul.f32 %v13906_v5, %v15537_v14  ;;  %v15541_v5 = vld [vmem:[#allocation44_spill] sm:$0xff] }
 0x705   : > { %v6080_v45 = vadd.f32 %v13414_v12, %v6000_v60  ;;  %v6619_v60 = vsub.f32 %v6199_v21, %v14159_v9 }
 0x706   : > { %v14246_v31 = vpop.permute.xlu1 %6429  ;;  %7299 = vrot.lane.b32.xlu0 %v6735_v43, %s10176_s14  ;;  %v6622_v43 = vsub.f32 %v6202_v54, %v14125_v48  ;;  %v6200_v14 = vadd.f32 %v15541_v5, %v6100_v38  ;;  %v8423_v38 = vadd.f32 -1.0, %v6681_v23  ;;  %v6762_v46 = vadd.f32 %v14125_v48, %v6202_v54 }
 0x707   : > { %v6460_v3 = vsub.f32 %v6080_v45, %v14151_v0  ;;  %v8443_v5 = vadd.f32 -1.0, %v6761_v49  ;;  %v6679_v23 = vadd.f32 %v14142_v25, %v6079_v2 }
 0x708   : > { %7301 = vrot.lane.b32.xlu1 %v6736_v13, %s10176_s14  ;;  %v14254_v1 = vpop.permute.xlu0 %6587  ;;  %v6459_v13 = vsub.f32 %v6079_v2, %v14142_v25  ;;  %v6642_v33 = vmax.f32 %v6622_v43, 0.0  ;;  %v6620_v40 = vsub.f32 %v6200_v14, %v14163_v41  ;;  %v15542_v2 = vld [vmem:[#allocation65_spill] sm:$0xff] }
 0x709   : > { %v6480_v53 = vmax.f32 %v6460_v3, 0.0  ;;  %v6721_v3 = vmax.f32 %v8423_v38, 0.0  ;;  %v15543_v38 = vld [vmem:[#allocation18_spill] sm:$0xff] }
 0x70a   : > { %v14260_v36 = vpop.permute.xlu1 %6589  ;;  %7399 = vrot.lane.b32.xlu0 %v6815_v20, %s10175_s15  ;;  %v6479_v12 = vmax.f32 %v6459_v13, 0.0  ;;  %v6662_v43 = vmin.f32 %v6642_v33, 15.0  ;;  %v8424_v13 = vadd.f32 -1.0, %v6682_v57  ;;  %v6005_v49 = vmul.f32 %v15543_v38, %v15542_v2  ;;  %v15547_v38 = vld [vmem:[#allocation16_spill] sm:$0xff] }
 0x70b   : > { %v6500_v34 = vmin.f32 %v6480_v53, 15.0  ;;  %v6741_v57 = vmin.f32 %v6721_v3, 15.0  ;;  %v8421_v53 = vadd.f32 -1.0, %v6679_v23 }
 0x70c   : > { %7401 = vrot.lane.b32.xlu1 %v6816_v39, %s10175_s15  ;;  %v14268_v15 = vpop.permute.xlu0 %6423  ;;  %v6499_v32 = vmin.f32 %v6479_v12, 15.0  ;;  %v8444_v12 = vadd.f32 -1.0, %v6762_v46  ;;  %v6085_v23 = vadd.f32 %v13424_v10, %v6005_v49 }
 0x70e   : > { %v14272_v20 = vpop.permute.xlu1 %6425  ;;  %7111 = vrot.lane.b32.xlu0 %v6501_v19, %s10176_s14  ;;  %v6639_v19 = vmax.f32 %v6619_v60, 0.0  ;;  %v6680_v60 = vadd.f32 %v14151_v0, %v6080_v45  ;;  %v6760_v45 = vadd.f32 %v14163_v41, %v6200_v14  ;;  %v6105_v41 = vmul.f32 %v13964_v29, %v15542_v2 }
 0x710   : > { %7113 = vrot.lane.b32.xlu1 %v6502_v50, %s10176_s14  ;;  %v14279_v39 = vpop.permute.xlu0 %6583  ;;  %v6640_v50 = vmax.f32 %v6620_v40, 0.0  ;;  %v6659_v22 = vmin.f32 %v6639_v19, 15.0  ;;  %v6759_v40 = vadd.f32 %v14159_v9, %v6199_v21  ;;  %v6802_v19 = vmax.f32 %v8444_v12, 0.0  ;;  %v15544_v9 = vld [vmem:[#allocation66_spill] sm:$0xff]  ;;  %v15545_v21 = vld [vmem:[#allocation15_spill] sm:$0xff] }
 0x711   : > { %v8422_v0 = vadd.f32 -1.0, %v6680_v60  ;;  %v6006_v3 = vmul.f32 %v15545_v21, %v15544_v9  ;;  %v8442_v12 = vadd.f32 -1.0, %v6760_v45  ;;  %v6106_v60 = vmul.f32 %v13976_v7, %v15544_v9  ;;  %v15549_v45 = vld [vmem:[#allocation68_spill] sm:$0xff]  ;;  %v15551_v21 = vld [vmem:[#allocation50_spill] sm:$0xff] }
 0x712   : > { %v14283_v4 = vpop.permute.xlu1 %6585  ;;  %7211 = vrot.lane.b32.xlu0 %v6661_v51, %s10175_s15  ;;  %v6722_v51 = vmax.f32 %v8424_v13, 0.0  ;;  %v6660_v48 = vmin.f32 %v6640_v50, 15.0  ;;  %v8441_v50 = vadd.f32 -1.0, %v6759_v40  ;;  %v15546_v40 = vld [vmem:[#allocation67_spill] sm:$0xff] }
 0x713   : > { %v6003_v29 = vmul.f32 %v15547_v38, %v15546_v40  ;;  %v6800_v49 = vmax.f32 %v8442_v12, 0.0 }
 0x714   : > { %7213 = vrot.lane.b32.xlu1 %v6662_v43, %s10175_s15  ;;  %v14288_v42 = vpop.permute.xlu0 %7495  ;;  %v6801_v43 = vmax.f32 %v8443_v5, 0.0 }
 0x715   : > { %v6820_v12 = vmin.f32 %v6800_v49, 15.0  ;;  %v6083_v38 = vadd.f32 %v13420_v47, %v6003_v29  ;;  %v15552_v47 = vld [vmem:[#allocation47_spill] sm:$0xff] }
 0x716   : > { %v14291_v33 = vpop.permute.xlu1 %7497  ;;  %7107 = vrot.lane.b32.xlu0 %v6499_v32, %s10176_s14  ;;  %v6742_v32 = vmin.f32 %v6722_v51, 15.0  ;;  %v6821_v46 = vmin.f32 %v6801_v43, 15.0  ;;  %v6720_v51 = vmax.f32 %v8422_v0, 0.0  ;;  %v6465_v43 = vsub.f32 %v6085_v23, %v14169_v27 }
 0x718   : > { %7109 = vrot.lane.b32.xlu1 %v6500_v34, %s10176_s14  ;;  %v14296_v63 = vpop.permute.xlu0 %7491  ;;  %v6719_v34 = vmax.f32 %v8421_v53, 0.0  ;;  %v6086_v53 = vadd.f32 %v13426_v61, %v6006_v3  ;;  %v6740_v2 = vmin.f32 %v6720_v51, 15.0  ;;  %v6206_v3 = vadd.f32 %v15551_v21, %v6106_v60 }
 0x719   : > { %v6103_v51 = vmul.f32 %v14005_v26, %v15546_v40  ;;  %v6104_v60 = vmul.f32 %v14016_v8, %v15549_v45 }
 0x71a   : > { %v14299_v54 = vpop.permute.xlu1 %7493  ;;  %7207 = vrot.lane.b32.xlu0 %v6659_v22, %s10175_s15  ;;  %v6822_v22 = vmin.f32 %v6802_v19, 15.0  ;;  %v15548_v19 = vld [vmem:[#allocation49_spill] sm:$0xff]  ;;  %v6686_v21 = vadd.f32 %v14180_v59, %v6086_v53 }
 0x71b   : > { %v6205_v0 = vadd.f32 %v15548_v19, %v6105_v41  ;;  %v6203_v29 = vadd.f32 %v15552_v47, %v6103_v51  ;;  %v6683_v47 = vadd.f32 %v14216_v62, %v6083_v38 }
 0x71c   : > { %7209 = vrot.lane.b32.xlu1 %v6660_v48, %s10175_s15  ;;  %v14304_v25 = vpop.permute.xlu0 %7503  ;;  %v6739_v48 = vmin.f32 %v6719_v34, 15.0 }
 0x71d   : > { %v6625_v9 = vsub.f32 %v6205_v0, %v14197_v11 }
 0x71e   : > { %v14309_v13 = vpop.permute.xlu1 %7505  ;;  %7311 = vrot.lane.b32.xlu0 %v6741_v57, %s10176_s14  ;;  %v6799_v57 = vmax.f32 %v8441_v50, 0.0  ;;  %v6485_v50 = vmax.f32 %v6465_v43, 0.0 }
 0x71f   : > { %v6645_v43 = vmax.f32 %v6625_v9, 0.0 }
 0x720   : > { %7313 = vrot.lane.b32.xlu1 %v6742_v32, %s10176_s14  ;;  %v14315_v5 = vpop.permute.xlu0 %7499  ;;  %v6466_v32 = vsub.f32 %v6086_v53, %v14180_v59  ;;  %v6819_v34 = vmin.f32 %v6799_v57, 15.0  ;;  %v6505_v57 = vmin.f32 %v6485_v50, 15.0 }
 0x721   : > { %v6665_v50 = vmin.f32 %v6645_v43, 15.0  ;;  %v8428_v43 = vadd.f32 -1.0, %v6686_v21  ;;  %v8425_v21 = vadd.f32 -1.0, %v6683_v47 }
 0x722   : > { %v14320_v14 = vpop.permute.xlu1 %7501  ;;  %7411 = vrot.lane.b32.xlu0 %v6821_v46, %s10175_s15  ;;  %v15550_v46 = vld [vmem:[#allocation14_spill] sm:$0xff]  ;;  %v6486_v41 = vmax.f32 %v6466_v32, 0.0 }
 0x723   : > { %v6004_v61 = vmul.f32 %v15550_v46, %v15549_v45  ;;  %v6685_v45 = vadd.f32 %v14169_v27, %v6085_v23 }
 0x724   : > { %7413 = vrot.lane.b32.xlu1 %v6822_v22, %s10175_s15  ;;  %v14328_v10 = vpop.permute.xlu0 %7511  ;;  %v6506_v26 = vmin.f32 %v6486_v41, 15.0 }
 0x725   : > { %v6084_v46 = vadd.f32 %v13422_v6, %v6004_v61  ;;  %v6623_v6 = vsub.f32 %v6203_v29, %v14227_v37 }
 0x726   : > { %v14334_v7 = vpop.permute.xlu1 %7513  ;;  %7307 = vrot.lane.b32.xlu0 %v6739_v48, %s10176_s14  ;;  %v6626_v48 = vsub.f32 %v6206_v3, %v14208_v28 }
 0x727   : > { %v6464_v49 = vsub.f32 %v6084_v46, %v14221_v18  ;;  %v6643_v23 = vmax.f32 %v6623_v6, 0.0 }
 0x728   : > { %7309 = vrot.lane.b32.xlu1 %v6740_v2, %s10176_s14  ;;  %v14342_v22 = vpop.permute.xlu0 %7507  ;;  %v6463_v2 = vsub.f32 %v6083_v38, %v14216_v62  ;;  %v6646_v40 = vmax.f32 %v6626_v48, 0.0  ;;  %v8427_v48 = vadd.f32 -1.0, %v6685_v45  ;;  %v15554_v38 = vld [vmem:[#allocation62_spill] sm:$0xff] }
 0x729   : > { %v6484_v51 = vmax.f32 %v6464_v49, 0.0 }
 0x72a   : > { %v14348_v19 = vpop.permute.xlu1 %7509  ;;  %7407 = vrot.lane.b32.xlu0 %v6819_v34, %s10175_s15  ;;  %v15553_v34 = vld [vmem:[#allocation48_spill] sm:$0xff]  ;;  %v6483_v9 = vmax.f32 %v6463_v2, 0.0  ;;  %v6766_v2 = vadd.f32 %v14208_v28, %v6206_v3 }
 0x72b   : > { %v6204_v8 = vadd.f32 %v15553_v34, %v6104_v60  ;;  %v6765_v60 = vadd.f32 %v14197_v11, %v6205_v0  ;;  %v6663_v11 = vmin.f32 %v6643_v23, 15.0  ;;  %v6726_v34 = vmax.f32 %v8428_v43, 0.0 }
 0x72c   : > { %7409 = vrot.lane.b32.xlu1 %v6820_v12, %s10175_s15  ;;  %v6666_v12 = vmin.f32 %v6646_v40, 15.0  ;;  %v6503_v27 = vmin.f32 %v6483_v9, 15.0  ;;  %v6725_v40 = vmax.f32 %v8427_v48, 0.0  ;;  %v8448_v45 = vadd.f32 -1.0, %v6766_v2 }
 0x72d   : > { %v14358_v32 = vpop.permute.xlu0 %7095  ;;  %v6624_v41 = vsub.f32 %v6204_v8, %v14232_v24  ;;  %v8447_v49 = vadd.f32 -1.0, %v6765_v60  ;;  %v6746_v48 = vmin.f32 %v6726_v34, 15.0  ;;  %v6723_v43 = vmax.f32 %v8425_v21, 0.0 }
 0x72e   : > { %7119 = vrot.lane.b32.xlu0 %v6505_v57, %s10176_s14  ;;  %v6745_v9 = vmin.f32 %v6725_v40, 15.0  ;;  %v6806_v60 = vmax.f32 %v8448_v45, 0.0  ;;  %v6110_v34 = vmul.f32 %v14131_v30, %v13586_v17  ;;  %v15563_v30 = vld [vmem:[#allocation64_spill] sm:$0xff] }
 0x72f   : > { %v14364_v61 = vpop.permute.xlu1 %7097  ;;  %v6644_v59 = vmax.f32 %v6624_v41, 0.0  ;;  %v6805_v6 = vmax.f32 %v8447_v49, 0.0  ;;  %v6743_v45 = vmin.f32 %v6723_v43, 15.0 }
 0x730   : > { %7121 = vrot.lane.b32.xlu1 %v6506_v26, %s10176_s14  ;;  %v6504_v26 = vmin.f32 %v6484_v51, 15.0  ;;  %v15555_v51 = vld [vmem:[#allocation22_spill] sm:$0xff]  ;;  %v6826_v49 = vmin.f32 %v6806_v60, 15.0  ;;  %v15561_v60 = vld [vmem:[#allocation53_spill] sm:$0xff] }
 0x731   : > { %v14371_v57 = vpop.permute.xlu0 %7195  ;;  %v6664_v28 = vmin.f32 %v6644_v59, 15.0  ;;  %v6009_v41 = vmul.f32 %v15555_v51, %v15554_v38  ;;  %v6825_v23 = vmin.f32 %v6805_v6, 15.0  ;;  %v15557_v59 = vld [vmem:[#allocation30_spill] sm:$0xff]  ;;  %v15560_v51 = vld [vmem:[#allocation20_spill] sm:$0xff] }
 0x732   : > { %7219 = vrot.lane.b32.xlu0 %v6665_v50, %s10175_s15  ;;  %v6684_v50 = vadd.f32 %v14221_v18, %v6084_v46  ;;  %v6764_v46 = vadd.f32 %v14232_v24, %v6204_v8  ;;  %v6109_v24 = vmul.f32 %v14118_v44, %v15554_v38 }
 0x733   : > { %v14375_v53 = vpop.permute.xlu1 %7197  ;;  %v6089_v40 = vadd.f32 %v15557_v59, %v6009_v41 }
 0x734   : > { %7221 = vrot.lane.b32.xlu1 %v6666_v12, %s10175_s15  ;;  %v6763_v12 = vadd.f32 %v14227_v37, %v6203_v29  ;;  %v8426_v18 = vadd.f32 -1.0, %v6684_v50  ;;  %v15556_v37 = vld [vmem:[#allocation19_spill] sm:$0xff] }
 0x735   : > { %v6010_v29 = vmul.f32 %v15556_v37, %v13586_v17 }
 0x736   : > { %7115 = vrot.lane.b32.xlu0 %v6503_v27, %s10176_s14  ;;  %v8445_v2 = vadd.f32 -1.0, %v6763_v12  ;;  %v6724_v47 = vmax.f32 %v8426_v18, 0.0  ;;  %v15559_v12 = vld [vmem:[#allocation63_spill] sm:$0xff]  ;;  %v6209_v18 = vadd.f32 %v15561_v60, %v6109_v24 }
 0x737   : > { %v6007_v44 = vmul.f32 %v15560_v51, %v15559_v12 }
 0x738   : > { %7117 = vrot.lane.b32.xlu1 %v6504_v26, %s10176_s14  ;;  %v14380_v0 = vpop.permute.xlu0 %7519  ;;  %v6803_v50 = vmax.f32 %v8445_v2, 0.0  ;;  %v6744_v38 = vmin.f32 %v6724_v47, 15.0  ;;  %v6629_v37 = vsub.f32 %v6209_v18, %v14254_v1  ;;  %v6107_v47 = vmul.f32 %v14174_v58, %v15559_v12 }
 0x73a   : > { %v14383_v3 = vpop.permute.xlu1 %7521  ;;  %7215 = vrot.lane.b32.xlu0 %v6663_v11, %s10175_s15  ;;  %v8446_v11 = vadd.f32 -1.0, %v6764_v46  ;;  %v15564_v46 = vld [vmem:[#allocation17_spill] sm:$0xff]  ;;  %v6823_v43 = vmin.f32 %v6803_v50, 15.0 }
 0x73c   : > { %7217 = vrot.lane.b32.xlu1 %v6664_v28, %s10175_s15  ;;  %v14388_v62 = vpop.permute.xlu0 %7091  ;;  %v6469_v28 = vsub.f32 %v6089_v40, %v14240_v35  ;;  %v6804_v41 = vmax.f32 %v8446_v11, 0.0 }
 0x73e   : > { %v14393_v27 = vpop.permute.xlu1 %7093  ;;  %7319 = vrot.lane.b32.xlu0 %v6745_v9, %s10176_s14  ;;  %v15558_v9 = vld [vmem:[#allocation28_spill] sm:$0xff]  ;;  %v6489_v2 = vmax.f32 %v6469_v28, 0.0  ;;  %v6824_v11 = vmin.f32 %v6804_v41, 15.0  ;;  %v6649_v28 = vmax.f32 %v6629_v37, 0.0 }
 0x73f   : > { %v6090_v6 = vadd.f32 %v15558_v9, %v6010_v29  ;;  %v15565_v29 = vld [vmem:[#allocation54_spill] sm:$0xff]  ;;  %v15566_v9 = vld [vmem:[#allocation27_spill] sm:$0xff] }
 0x740   : > { %7321 = vrot.lane.b32.xlu1 %v6746_v48, %s10176_s14  ;;  %v14399_v26 = vpop.permute.xlu0 %7191  ;;  %v6210_v59 = vadd.f32 %v15565_v29, %v6110_v34  ;;  %v6087_v51 = vadd.f32 %v15566_v9, %v6007_v44  ;;  %v6108_v34 = vmul.f32 %v14186_v55, %v15563_v30  ;;  %v6509_v50 = vmin.f32 %v6489_v2, 15.0  ;;  %v15569_v55 = vld [vmem:[#allocation52_spill] sm:$0xff] }
 0x741   : > { %v6470_v48 = vsub.f32 %v6090_v6, %v14246_v31  ;;  %v6689_v2 = vadd.f32 %v14240_v35, %v6089_v40  ;;  %v6669_v37 = vmin.f32 %v6649_v28, 15.0  ;;  %v6769_v35 = vadd.f32 %v14254_v1, %v6209_v18 }
 0x742   : > { %v14404_v8 = vpop.permute.xlu1 %7193  ;;  %7419 = vrot.lane.b32.xlu0 %v6825_v23, %s10175_s15  ;;  %v6008_v23 = vmul.f32 %v15564_v46, %v15563_v30  ;;  %v15567_v46 = vld [vmem:[#allocation26_spill] sm:$0xff]  ;;  %v6208_v30 = vadd.f32 %v15569_v55, %v6108_v34 }
 0x743   : > { %v6490_v24 = vmax.f32 %v6470_v48, 0.0  ;;  %v15568_v48 = vld [vmem:[#allocation51_spill] sm:$0xff]  ;;  %v8431_v34 = vadd.f32 -1.0, %v6689_v2  ;;  %v8451_v55 = vadd.f32 -1.0, %v6769_v35  ;;  %v6687_v2 = vadd.f32 %v14268_v15, %v6087_v51 }
 0x744   : > { %7421 = vrot.lane.b32.xlu1 %v6826_v49, %s10175_s15  ;;  %v14412_v21 = vpop.permute.xlu0 %7515  ;;  %v6088_v29 = vadd.f32 %v15567_v46, %v6008_v23  ;;  %v6207_v9 = vadd.f32 %v15568_v48, %v6107_v47  ;;  %v6628_v48 = vsub.f32 %v6208_v30, %v14283_v4 }
 0x745   : > { %v6510_v12 = vmin.f32 %v6490_v24, 15.0 }
 0x746   : > { %v14418_v17 = vpop.permute.xlu1 %7517  ;;  %7315 = vrot.lane.b32.xlu0 %v6743_v45, %s10176_s14  ;;  %v6630_v45 = vsub.f32 %v6210_v59, %v14260_v36  ;;  %v6468_v44 = vsub.f32 %v6088_v29, %v14272_v20 }
 0x747   : > { %15562 = vst [vmem:[#allocation29_spill] sm:$0xff] %v14418_v17 }
 0x748   : > { %7317 = vrot.lane.b32.xlu1 %v6744_v38, %s10176_s14  ;;  %v14426_v49 = vpop.permute.xlu0 %7295  ;;  %v6467_v38 = vsub.f32 %v6087_v51, %v14268_v15  ;;  %v6650_v41 = vmax.f32 %v6630_v45, 0.0  ;;  %v6690_v45 = vadd.f32 %v14246_v31, %v6090_v6  ;;  %v6488_v47 = vmax.f32 %v6468_v44, 0.0 }
 0x749   : > { %v6770_v31 = vadd.f32 %v14260_v36, %v6210_v59  ;;  %v6729_v44 = vmax.f32 %v8431_v34, 0.0 }
 0x74a   : > { %v14432_v60 = vpop.permute.xlu1 %7297  ;;  %7415 = vrot.lane.b32.xlu0 %v6823_v43, %s10175_s15  ;;  %v6487_v23 = vmax.f32 %v6467_v38, 0.0  ;;  %v6670_v46 = vmin.f32 %v6650_v41, 15.0  ;;  %v8432_v38 = vadd.f32 -1.0, %v6690_v45  ;;  %v6508_v6 = vmin.f32 %v6488_v47, 15.0 }
 0x74b   : > { %v6749_v45 = vmin.f32 %v6729_v44, 15.0  ;;  %v8429_v47 = vadd.f32 -1.0, %v6687_v2 }
 0x74c   : > { %7417 = vrot.lane.b32.xlu1 %v6824_v11, %s10175_s15  ;;  %v14440_v58 = vpop.permute.xlu0 %7395  ;;  %v6627_v11 = vsub.f32 %v6207_v9, %v14279_v39  ;;  %v6507_v40 = vmin.f32 %v6487_v23, 15.0  ;;  %v8452_v23 = vadd.f32 -1.0, %v6770_v31 }
 0x74e   : > { %v14444_v43 = vpop.permute.xlu1 %7397  ;;  %7127 = vrot.lane.b32.xlu0 %v6509_v50, %s10176_s14  ;;  %v6647_v50 = vmax.f32 %v6627_v11, 0.0  ;;  %v6688_v11 = vadd.f32 %v14272_v20, %v6088_v29  ;;  %v6810_v34 = vmax.f32 %v8452_v23, 0.0 }
 0x750   : > { %7129 = vrot.lane.b32.xlu1 %v6510_v12, %s10176_s14  ;;  %v14451_v24 = vpop.permute.xlu0 %7291  ;;  %v6648_v12 = vmax.f32 %v6628_v48, 0.0  ;;  %v6667_v1 = vmin.f32 %v6647_v50, 15.0  ;;  %v6767_v48 = vadd.f32 %v14279_v39, %v6207_v9  ;;  %v8430_v35 = vadd.f32 -1.0, %v6688_v11 }
 0x751   : > { %v6727_v50 = vmax.f32 %v8429_v47, 0.0  ;;  %v6830_v39 = vmin.f32 %v6810_v34, 15.0  ;;  %v7153_v47 = vsel %vm13768_vm10, %v14358_v32, 0.0  ;;  %v7154_v34 = vsel %vm13782_vm7, %v14364_v61, 0.0 }
 0x752   : > { %v14455_v17 = vpop.permute.xlu1 %7293  ;;  %7227 = vrot.lane.b32.xlu0 %v6669_v37, %s10175_s15  ;;  %v6730_v37 = vmax.f32 %v8432_v38, 0.0  ;;  %v6668_v36 = vmin.f32 %v6648_v12, 15.0  ;;  %v8449_v38 = vadd.f32 -1.0, %v6767_v48  ;;  %v6728_v9 = vmax.f32 %v8430_v35, 0.0 }
 0x753   : > { %v6747_v44 = vmin.f32 %v6727_v50, 15.0  ;;  %v7254_v32 = vsel %vm13782_vm7, %v14375_v53, 0.0  ;;  %v7251_v53 = vsel %vm13796_vm8, %v14399_v26, 0.0  ;;  %v7454_v26 = vsel %vm13782_vm7, %v14444_v43, 0.0 }
 0x754   : > { %7229 = vrot.lane.b32.xlu1 %v6670_v46, %s10175_s15  ;;  %v14460_v28 = vpop.permute.xlu0 %7391  ;;  %v6809_v46 = vmax.f32 %v8451_v55, 0.0  ;;  %v6750_v51 = vmin.f32 %v6730_v37, 15.0  ;;  %v6748_v55 = vmin.f32 %v6728_v9, 15.0  ;;  %v7152_v9 = vsel %vm13810_vm3, %v14393_v27, 0.0 }
 0x755   : > { %v7453_v27 = vsel %vm13768_vm10, %v14440_v58, 0.0 }
 0x756   : > { %v14463_v41 = vpop.permute.xlu1 %7393  ;;  %7123 = vrot.lane.b32.xlu0 %v6507_v40, %s10176_s14  ;;  %v6768_v40 = vadd.f32 %v14283_v4, %v6208_v30  ;;  %v6829_v29 = vmin.f32 %v6809_v46, 15.0  ;;  %v6807_v4 = vmax.f32 %v8449_v38, 0.0  ;;  %v7151_v38 = vsel %vm13796_vm8, %v14388_v62, 0.0 }
 0x757   : > { %v7252_v62 = vsel %vm13810_vm3, %v14404_v8, 0.0  ;;  %v7451_v8 = vsel %vm13796_vm8, %v14460_v28, 0.0  ;;  %v7452_v58 = vsel %vm13810_vm3, %v14463_v41, 0.0 }
 0x758   : > { %7125 = vrot.lane.b32.xlu1 %v6508_v6, %s10176_s14  ;;  %v14468_v18 = vpop.permute.xlu0 %7103  ;;  %v8450_v6 = vadd.f32 -1.0, %v6768_v40  ;;  %v6827_v37 = vmin.f32 %v6807_v4, 15.0  ;;  %v7253_v40 = vsel %vm13768_vm10, %v14371_v57, 0.0 }
 0x759   : > { %v7157_v43 = vsel %vm13824_vm12, %v14468_v18, 0.0 }
 0x75a   : > { %v14471_v59 = vpop.permute.xlu1 %7105  ;;  %7223 = vrot.lane.b32.xlu0 %v6667_v1, %s10175_s15  ;;  %v6808_v2 = vmax.f32 %v8450_v6, 0.0 }
 0x75b   : > { %v7158_v28 = vsel %vm13838_vm6, %v14471_v59, 0.0 }
 0x75c   : > { %7225 = vrot.lane.b32.xlu1 %v6668_v36, %s10175_s15  ;;  %v14476_v15 = vpop.permute.xlu0 %7203  ;;  %v6828_v11 = vmin.f32 %v6808_v2, 15.0 }
 0x75d   : > { %v7257_v41 = vsel %vm13824_vm12, %v14476_v15, 0.0 }
 0x75e   : > { %v14479_v20 = vpop.permute.xlu1 %7205  ;;  %7327 = vrot.lane.b32.xlu0 %v6749_v45, %s10176_s14 }
 0x75f   : > { %v7258_v18 = vsel %vm13838_vm6, %v14479_v20, 0.0 }
 0x760   : > { %7329 = vrot.lane.b32.xlu1 %v6750_v51, %s10176_s14  ;;  %v14483_v31 = vpop.permute.xlu0 %7527 }
 0x761   : > { %15570 = vst [vmem:[#allocation56_spill] sm:$0xff] %v14483_v31 }
 0x762   : > { %v14485_v12 = vpop.permute.xlu1 %7529  ;;  %7427 = vrot.lane.b32.xlu0 %v6829_v29, %s10175_s15 }
 0x763   : > { %15571 = vst [vmem:[#allocation34_spill] sm:$0xff] %v14485_v12 }
 0x764   : > { %7429 = vrot.lane.b32.xlu1 %v6830_v39, %s10175_s15  ;;  %v14489_v30 = vpop.permute.xlu0 %7099 }
 0x765   : > { %v7155_v59 = vsel %vm13852_vm1, %v14489_v30, 0.0 }
 0x766   : > { %v7102_v1 = vpop.permute.xlu1 %7101  ;;  %7323 = vrot.lane.b32.xlu0 %v6747_v44, %s10176_s14 }
 0x767   : > { %v7156_v15 = vsel %vm13866_vm15, %v7102_v1, 0.0 }
 0x768   : > { %7325 = vrot.lane.b32.xlu1 %v6748_v55, %s10176_s14  ;;  %v7200_v23 = vpop.permute.xlu0 %7199 }
 0x769   : > { %v7255_v20 = vsel %vm13852_vm1, %v7200_v23, 0.0 }
 0x76a   : > { %v7202_v36 = vpop.permute.xlu1 %7201  ;;  %7423 = vrot.lane.b32.xlu0 %v6827_v37, %s10175_s15 }
 0x76b   : > { %v7256_v30 = vsel %vm13866_vm15, %v7202_v36, 0.0 }
 0x76c   : > { %7425 = vrot.lane.b32.xlu1 %v6828_v11, %s10175_s15  ;;  %v14495_v45 = vpop.permute.xlu0 %7523 }
 0x76d   : > { %15572 = vst [vmem:[#allocation57_spill] sm:$0xff] %v14495_v45 }
 0x76e   : > { %v14500_v48 = vpop.permute.xlu1 %7525  ;;  %7575 = vrot.lane.b32.xlu0 %v7153_v47, %s10178_s29 }
 0x76f   : > { %15574 = vst [vmem:[#allocation35_spill] sm:$0xff] %v14500_v48 }
 0x770   : > { %7577 = vrot.lane.b32.xlu1 %v7154_v34, %s10178_s29  ;;  %v14507_v35 = vpop.permute.xlu0 %7303 }
 0x772   : > { %v14512_v29 = vpop.permute.xlu1 %7305  ;;  %7655 = vrot.lane.b32.xlu0 %v7253_v40, %s10174_s24 }
 0x774   : > { %7657 = vrot.lane.b32.xlu1 %v7254_v32, %s10174_s24  ;;  %v7404_v50 = vpop.permute.xlu0 %7403 }
 0x775   : > { %v7457_v1 = vsel %vm13824_vm12, %v7404_v50, 0.0 }
 0x776   : > { %v7406_v39 = vpop.permute.xlu1 %7405  ;;  %7571 = vrot.lane.b32.xlu0 %v7151_v38, %s10178_s29 }
 0x778   : > { %7573 = vrot.lane.b32.xlu1 %v7152_v9, %s10178_s29  ;;  %v14527_v6 = vpop.permute.xlu0 %7299 }
 0x77a   : > { %v14532_v44 = vpop.permute.xlu1 %7301  ;;  %7651 = vrot.lane.b32.xlu0 %v7251_v53, %s10174_s24 }
 0x77c   : > { %7653 = vrot.lane.b32.xlu1 %v7252_v62, %s10174_s24  ;;  %v7400_v4 = vpop.permute.xlu0 %7399 }
 0x77e   : > { %v7402_v55 = vpop.permute.xlu1 %7401  ;;  %7735 = vrot.lane.b32.xlu0 %v7453_v27, %s10175_s15 }
 0x77f   : > { %v7456_v50 = vsel %vm13866_vm15, %v7402_v55, 0.0 }
 0x780   : > { %7737 = vrot.lane.b32.xlu1 %v7454_v26, %s10175_s15  ;;  %v7112_v2 = vpop.permute.xlu0 %7111 }
 0x782   : > { %v7114_v37 = vpop.permute.xlu1 %7113  ;;  %7731 = vrot.lane.b32.xlu0 %v7451_v8, %s10175_s15 }
 0x784   : > { %7733 = vrot.lane.b32.xlu1 %v7452_v58, %s10175_s15  ;;  %v7212_v11 = vpop.permute.xlu0 %7211 }
 0x786   : > { %v7214_v34 = vpop.permute.xlu1 %7213  ;;  %7583 = vrot.lane.b32.xlu0 %v7157_v43, %s10178_s29 }
 0x787   : > { %v7262_v55 = vsel %vm13898_vm2, %v7214_v34, 0.0 }
 0x788   : > { %7585 = vrot.lane.b32.xlu1 %v7158_v28, %s10178_s29  ;;  %v7108_v32 = vpop.permute.xlu0 %7107  ;;  %v7458_v28 = vsel %vm13838_vm6, %v7406_v39, 0.0  ;;  %v7161_v39 = vsel %vm13882_vm0, %v7112_v2, 0.0 }
 0x78a   : > { %v7110_v38 = vpop.permute.xlu1 %7109  ;;  %7663 = vrot.lane.b32.xlu0 %v7257_v41, %s10174_s24  ;;  %v7455_v41 = vsel %vm13852_vm1, %v7400_v4, 0.0 }
 0x78c   : > { %7665 = vrot.lane.b32.xlu1 %v7258_v18, %s10174_s24  ;;  %v7208_v9 = vpop.permute.xlu0 %7207 }
 0x78e   : > { %v7210_v62 = vpop.permute.xlu1 %7209  ;;  %7579 = vrot.lane.b32.xlu0 %v7155_v59, %s10178_s29 }
 0x790   : > { %7581 = vrot.lane.b32.xlu1 %v7156_v15, %s10178_s29  ;;  %v14578_v26 = vpop.permute.xlu0 %7311 }
 0x792   : > { %v14582_v8 = vpop.permute.xlu1 %7313  ;;  %7659 = vrot.lane.b32.xlu0 %v7255_v20, %s10174_s24 }
 0x794   : > { %7661 = vrot.lane.b32.xlu1 %v7256_v30, %s10174_s24  ;;  %v7412_v58 = vpop.permute.xlu0 %7411  ;;  %v7162_v30 = vsel %vm13898_vm2, %v7114_v37, 0.0  ;;  %v15586_v37 = vld [vmem:[#allocation80_spill] sm:$0xff] }
 0x795   : > { %vm15587_vm13 = vnez %v15586_v37 }
 0x796   : > { %v7414_v43 = vpop.permute.xlu1 %7413  ;;  %7743 = vrot.lane.b32.xlu0 %v7457_v1, %s10175_s15  ;;  %v7261_v1 = vsel %vm13882_vm0, %v7212_v11, 0.0  ;;  %v7260_v34 = vsel %vm15587_vm13, %v7210_v62, 0.0 }
 0x798   : > { %7745 = vrot.lane.b32.xlu1 %v7458_v28, %s10175_s15  ;;  %v14594_v23 = vpop.permute.xlu0 %7307 }
 0x79a   : > { %v14598_v36 = vpop.permute.xlu1 %7309  ;;  %7739 = vrot.lane.b32.xlu0 %v7455_v41, %s10175_s15  ;;  %v15584_v41 = vld [vmem:[#allocation79_spill] sm:$0xff] }
 0x79b   : > { %vm15585_vm11 = vnez %v15584_v41 }
 0x79c   : > { %7741 = vrot.lane.b32.xlu1 %v7456_v50, %s10175_s15  ;;  %v7408_v18 = vpop.permute.xlu0 %7407  ;;  %v7159_v50 = vsel %vm15585_vm11, %v7108_v32, 0.0 }
 0x79e   : > { %v7410_v15 = vpop.permute.xlu1 %7409  ;;  %7591 = vrot.lane.b32.xlu0 %v7161_v39, %s10178_s29 }
 0x7a0   : > { %7593 = vrot.lane.b32.xlu1 %v7162_v30, %s10178_s29  ;;  %v7120_v4 = vpop.permute.xlu0 %7119  ;;  %v7160_v30 = vsel %vm15587_vm13, %v7110_v38, 0.0  ;;  %v7462_v38 = vsel %vm13898_vm2, %v7414_v43, 0.0 }
 0x7a2   : > { %v7122_v28 = vpop.permute.xlu1 %7121  ;;  %7671 = vrot.lane.b32.xlu0 %v7261_v1, %s10174_s24  ;;  %v7259_v1 = vsel %vm15585_vm11, %v7208_v9, 0.0 }
 0x7a4   : > { %7673 = vrot.lane.b32.xlu1 %v7262_v55, %s10174_s24  ;;  %v7220_v2 = vpop.permute.xlu0 %7219  ;;  %v7461_v55 = vsel %vm13882_vm0, %v7412_v58, 0.0  ;;  %v7460_v58 = vsel %vm15587_vm13, %v7410_v15, 0.0 }
 0x7a6   : > { %v7222_v39 = vpop.permute.xlu1 %7221  ;;  %7587 = vrot.lane.b32.xlu0 %v7159_v50, %s10178_s29 }
 0x7a8   : > { %7589 = vrot.lane.b32.xlu1 %v7160_v30, %s10178_s29  ;;  %v7116_v11 = vpop.permute.xlu0 %7115  ;;  %v7459_v30 = vsel %vm15585_vm11, %v7408_v18, 0.0 }
 0x7aa   : > { %v7118_v12 = vpop.permute.xlu1 %7117  ;;  %7667 = vrot.lane.b32.xlu0 %v7259_v1, %s10174_s24 }
 0x7ac   : > { %7669 = vrot.lane.b32.xlu1 %v7260_v34, %s10174_s24  ;;  %v7216_v32 = vpop.permute.xlu0 %7215  ;;  %v15588_v34 = vld [vmem:[#allocation37_spill] sm:$0xff] }
 0x7ad   : > { %vm15589_vm5 = vnez %v15588_v34 }
 0x7ae   : > { %v7218_v50 = vpop.permute.xlu1 %7217  ;;  %7751 = vrot.lane.b32.xlu0 %v7461_v55, %s10175_s15  ;;  %v7165_v43 = vsel %vm15589_vm5, %v7120_v4, 0.0  ;;  %v7266_v4 = vsel %vm15590_vm9, %v7222_v39, 0.0 }
 0x7b0   : > { %7753 = vrot.lane.b32.xlu1 %v7462_v38, %s10175_s15  ;;  %v14634_v9 = vpop.permute.xlu0 %7319  ;;  %v7166_v38 = vsel %vm15590_vm9, %v7122_v28, 0.0 }
 0x7b2   : > { %v14638_v62 = vpop.permute.xlu1 %7321  ;;  %7747 = vrot.lane.b32.xlu0 %v7459_v30, %s10175_s15  ;;  %v7265_v30 = vsel %vm15589_vm5, %v7220_v2, 0.0 }
 0x7b4   : > { %7749 = vrot.lane.b32.xlu1 %v7460_v58, %s10175_s15  ;;  %v7420_v1 = vpop.permute.xlu0 %7419 }
 0x7b6   : > { %v7422_v55 = vpop.permute.xlu1 %7421  ;;  %7599 = vrot.lane.b32.xlu0 %v7165_v43, %s10178_s29  ;;  %v15592_v43 = vld [vmem:[#allocation55_spill] sm:$0xff] }
 0x7b7   : > { %vm15593_vm13 = vnez %v15592_v43 }
 0x7b8   : > { %7601 = vrot.lane.b32.xlu1 %v7166_v38, %s10178_s29  ;;  %v14650_v18 = vpop.permute.xlu0 %7315  ;;  %v7163_v28 = vsel %vm15593_vm13, %v7116_v11, 0.0  ;;  %v15594_v38 = vld [vmem:[#allocation38_spill] sm:$0xff] }
 0x7b9   : > { %vm15595_vm11 = vnez %v15594_v38 }
 0x7ba   : > { %v14654_v15 = vpop.permute.xlu1 %7317  ;;  %7679 = vrot.lane.b32.xlu0 %v7265_v30, %s10174_s24  ;;  %v7164_v48 = vsel %vm15595_vm11, %v7118_v12, 0.0  ;;  %v7263_v30 = vsel %vm15593_vm13, %v7216_v32, 0.0  ;;  %v7264_v39 = vsel %vm15595_vm11, %v7218_v50, 0.0  ;;  %v7466_v12 = vsel %vm15590_vm9, %v7422_v55, 0.0 }
 0x7bb   : > { %15591 = vst [vmem:[#allocation25_spill] sm:$0xff] %v14654_v15  ;;  %vm15598_vm9 = vnez %v15525_v56 }
 0x7bc   : > { %7681 = vrot.lane.b32.xlu1 %v7266_v4, %s10174_s24  ;;  %v7416_v58 = vpop.permute.xlu0 %7415  ;;  %v7465_v4 = vsel %vm15589_vm5, %v7420_v1, 0.0 }
 0x7bd   : > { %v7463_v32 = vsel %vm15593_vm13, %v7416_v58, 0.0 }
 0x7be   : > { %v7418_v31 = vpop.permute.xlu1 %7417  ;;  %7595 = vrot.lane.b32.xlu0 %v7163_v28, %s10178_s29 }
 0x7bf   : > { %v7464_v50 = vsel %vm15595_vm11, %v7418_v31, 0.0  ;;  %vm7875_vm11 = vcmask 121856  }
 0x7c0   : > { %7597 = vrot.lane.b32.xlu1 %v7164_v48, %s10178_s29  ;;  %v7128_v2 = vpop.permute.xlu0 %7127 }
 0x7c2   : > { %v7130_v45 = vpop.permute.xlu1 %7129  ;;  %7675 = vrot.lane.b32.xlu0 %v7263_v30, %s10174_s24 }
 0x7c3   : > { %v7170_v55 = vsel %vm15598_vm9, %v7130_v45, 0.0 }
 0x7c4   : > { %7677 = vrot.lane.b32.xlu1 %v7264_v39, %s10174_s24  ;;  %v7228_v11 = vpop.permute.xlu0 %7227  ;;  %v15596_v39 = vld [vmem:[#allocation23_spill] sm:$0xff] }
 0x7c5   : > { %vm15597_vm5 = vnez %v15596_v39 }
 0x7c6   : > { %v7230_v28 = vpop.permute.xlu1 %7229  ;;  %7759 = vrot.lane.b32.xlu0 %v7465_v4, %s10175_s15  ;;  %v7169_v4 = vsel %vm15597_vm5, %v7128_v2, 0.0 }
 0x7c7   : > { %v7270_v2 = vsel %vm15598_vm9, %v7230_v28, 0.0 }
 0x7c8   : > { %7761 = vrot.lane.b32.xlu1 %v7466_v12, %s10175_s15  ;;  %v7124_v48 = vpop.permute.xlu0 %7123  ;;  %v7269_v12 = vsel %vm15597_vm5, %v7228_v11, 0.0 }
 0x7c9   : > { %v7167_v45 = vsel %vm14190_vm4, %v7124_v48, 0.0 }
 0x7ca   : > { %v7126_v30 = vpop.permute.xlu1 %7125  ;;  %7755 = vrot.lane.b32.xlu0 %v7463_v32, %s10175_s15 }
 0x7cc   : > { %7757 = vrot.lane.b32.xlu1 %v7464_v50, %s10175_s15  ;;  %v7224_v1 = vpop.permute.xlu0 %7223 }
 0x7ce   : > { %v7226_v15 = vpop.permute.xlu1 %7225  ;;  %7607 = vrot.lane.b32.xlu0 %v7169_v4, %s10178_s29  ;;  %v15601_v4 = vld [vmem:[#allocation31_spill] sm:$0xff] }
 0x7cf   : > { %v7268_v48 = vsel %vm14202_vm14, %v7226_v15, 0.0 }
 0x7d0   : > { %7609 = vrot.lane.b32.xlu1 %v7170_v55, %s10178_s29  ;;  %v14690_v58 = vpop.permute.xlu0 %7327  ;;  %v7168_v55 = vsel %vm14202_vm14, %v7126_v30, 0.0 }
 0x7d1   : > { %15599 = vst [vmem:[#allocation24_spill] sm:$0xff] %v14690_v58 }
 0x7d2   : > { %v14694_v31 = vpop.permute.xlu1 %7329  ;;  %7687 = vrot.lane.b32.xlu0 %v7269_v12, %s10174_s24  ;;  %v7267_v12 = vsel %vm14190_vm4, %v7224_v1, 0.0 }
 0x7d3   : > { %15600 = vst [vmem:[#allocation41_spill] sm:$0xff] %v14694_v31 }
 0x7d4   : > { %7689 = vrot.lane.b32.xlu1 %v7270_v2, %s10174_s24  ;;  %v7428_v32 = vpop.permute.xlu0 %7427 }
 0x7d5   : > { %v7469_v15 = vsel %vm15597_vm5, %v7428_v32, 0.0  ;;  %vm7833_vm5 = vcmask 72704  }
 0x7d6   : > { %v7430_v50 = vpop.permute.xlu1 %7429  ;;  %7603 = vrot.lane.b32.xlu0 %v7167_v45, %s10178_s29 }
 0x7d8   : > { %7605 = vrot.lane.b32.xlu1 %v7168_v55, %s10178_s29  ;;  %v14706_v11 = vpop.permute.xlu0 %7323  ;;  %s7924_s29 = smul.u32 20, %s10152_s12 }
 0x7da   : > { %v14710_v28 = vpop.permute.xlu1 %7325  ;;  %7683 = vrot.lane.b32.xlu0 %v7267_v12, %s10174_s24  ;;  %s7929_s12 = sadd.s32 %s9908_s17, %s7924_s29 }
 0x7db   : > { %s8453_s25 = sshll.u32 %s7929_s12, 7 }
 0x7dc   : > { %7685 = vrot.lane.b32.xlu1 %v7268_v48, %s10174_s24  ;;  %v7424_v2 = vpop.permute.xlu0 %7423  ;;  %v7470_v48 = vsel %vm15598_vm9, %v7430_v50, 0.0  ;;  %s347_s24 = sand.u32 1, %s10144_s10   ;;  %vm7854_vm9 = vcmask 97280   ;;  %s14939_s21 = scalar_lea.hbm %s15006_s9, %s8453_s25 }
 0x7dd   : > { %v7467_v30 = vsel %vm14190_vm4, %v7424_v2, 0.0  ;;  %vm7791_vm4 = vcmask 23552   ;;  %s9905_s14 = smul.u32 160, %s347_s24  ;;  %s14945_s26 = scalar_lea.sflag [#allocation4], %s347_s24 }
 0x7de   : > { %v7426_v45 = vpop.permute.xlu1 %7425  ;;  %7763 = vrot.lane.b32.xlu0 %v7467_v30, %s10175_s15 }
 0x7df   : > { %v7468_v1 = vsel %vm14202_vm14, %v7426_v45, 0.0  ;;  %vm7812_vm14 = vcmask 48128  }
 0x7e0   : > { %7765 = vrot.lane.b32.xlu1 %v7468_v1, %s10175_s15  ;;  %v7576_v55 = vpop.permute.xlu0 %7575 }
 0x7e1   : > { %v7794_v1 = vsel %vm7791_vm4, %v14288_v42, %v7576_v55 }
 0x7e2   : > { %v7578_v12 = vpop.permute.xlu1 %7577  ;;  %7767 = vrot.lane.b32.xlu0 %v7469_v15, %s10175_s15 }
 0x7e3   : > { %v7795_v50 = vsel %vm7791_vm4, %v14291_v33, %v7578_v12 }
 0x7e4   : > { %7769 = vrot.lane.b32.xlu1 %v7470_v48, %s10175_s15  ;;  %v7656_v2 = vpop.permute.xlu0 %7655  ;;  %v7353_v48 = vsel %vm13768_vm10, %v14426_v49, 0.0  ;;  %s14756_s15 = scalar_lea.vmem [#allocation3], %s9905_s14  ;;  %vm15602_vm10 = vnez %v15584_v41  ;;  %s10080_s14 = scalar_lea.vmem %s10079_s28, 5120 }
 0x7e5   : > { %v7815_v32 = vsel %vm7812_vm14, %v7794_v1, %v7656_v2  ;;  %v7354_v2 = vsel %vm13782_vm7, %v14432_v60, 0.0  ;;  %vm15603_vm7 = vnez %v15586_v37  ;;  %s7932_s13 = sshll.u32 %s14756_s15, 4  ;;  %s14932_s13 = int_to_ptr.vmem [resolvable:$true] %s7932_s13 }
 0x7e6   : > { %v7658_v30 = vpop.permute.xlu1 %7657  ;;  %v7836_v55 = vsel %vm7833_vm5, %v7815_v32, %v7353_v48  ;;  %s10074_s27 = scalar_lea.vmem %s14932_s13, 2560  ;;  %p10081_p4 = scmp.lt.s32.totalorder %s14932_s13, %s10079_s28 }
 0x7e7   : > { %v7816_v56 = vsel %vm7812_vm14, %v7795_v50, %v7658_v30  ;;  %p10075_p0 = scmp.ne.s32.totalorder %s14932_s13, %s10074_s27  ;;  %p10082_p5 = scmp.lt.s32.totalorder %s10080_s14, %s10074_s27 }
 0x7e8   : > { %v7572_v31 = vpop.permute.xlu0 %7571  ;;  %v7837_v30 = vsel %vm7833_vm5, %v7816_v56, %v7354_v2 }
 0x7e9   : > { %v7792_v42 = vsel %vm7791_vm4, %v14296_v63, %v7572_v31  ;;  %v7351_v63 = vsel %vm13796_vm8, %v14451_v24, 0.0  ;;  %v7352_v24 = vsel %vm13810_vm3, %v14455_v17, 0.0  ;;  %vm15604_vm8 = vnez %v15588_v34  ;;  %p10076_p1 = pnand %p10075_p0, %p10284_p3  ;;  %p10083_p6 = por %p10082_p5, %p10081_p4 }
 0x7ea   : > { %v7574_v45 = vpop.permute.xlu1 %7573  ;;  %vm15605_vm3 = vnez %v15500_v52 }
 0x7eb   : > { %v7793_v49 = vsel %vm7791_vm4, %v14299_v54, %v7574_v45  ;;  %p10077_p2 = pneg %p10076_p1 }
 0x7ec   : > { %v7652_v39 = vpop.permute.xlu0 %7651 }
 0x7ed   : > { %v7813_v33 = vsel %vm7812_vm14, %v7792_v42, %v7652_v39  ;;  %p10084_p7 = pnand %p10083_p6, %p10077_p2 }
 0x7ee   : > { %v7654_v15 = vpop.permute.xlu1 %7653  ;;  %v7834_v56 = vsel %vm7833_vm5, %v7813_v33, %v7351_v63 }
 0x7ef   : > { %v7814_v31 = vsel %vm7812_vm14, %v7793_v49, %v7654_v15 }
 0x7f0   : > { %v7736_v58 = vpop.permute.xlu0 %7735 }
 0x7f1   : > { %v7857_v12 = vsel %vm7854_vm9, %v7836_v55, %v7736_v58  ;;  %v7835_v58 = vsel %vm7833_vm5, %v7814_v31, %v7352_v24 }
 0x7f2   : > { %v7878_v46 = vsel %vm7875_vm11, %v7857_v12, 0.0  ;;  %v7738_v1 = vpop.permute.xlu1 %7737 }
 0x7f3   : > { %7898 = vst [vmem:[%s14756_s15 + $0x10] sm:$0xff] %v7878_v46  ;;  %v7858_v54 = vsel %vm7854_vm9, %v7837_v30, %v7738_v1  ;;  %v7357_v30 = vsel %vm13824_vm12, %v14507_v35, 0.0  ;;  %vm15608_vm12 = vnez %v15594_v38 }
 0x7f4   : > { %v7879_v60 = vsel %vm7875_vm11, %v7858_v54, 0.0  ;;  %v7732_v51 = vpop.permute.xlu0 %7731  ;;  %v7358_v54 = vsel %vm13838_vm6, %v14512_v29, 0.0  ;;  %vm15611_vm6 = vnez %v15528_v16  ;;  %v15614_v16 = vld [vmem:[#allocation34_spill] sm:$0xff] }
 0x7f5   : > { %7899 = vst [vmem:[%s14756_s15 + $0x18] sm:$0xff] %v7879_v60  ;;  %v7855_v61 = vsel %vm7854_vm9, %v7834_v56, %v7732_v51  ;;  %v7355_v51 = vsel %vm13852_vm1, %v14527_v6, 0.0  ;;  %vm15613_vm1 = vnez %v15601_v4 }
 0x7f6   : > { %v7876_v39 = vsel %vm7875_vm11, %v7855_v61, 0.0  ;;  %v7734_v45 = vpop.permute.xlu1 %7733 }
 0x7f7   : > { %7896 = vst [vmem:[%s14756_s15] sm:$0xff] %v7876_v39  ;;  %v7856_v32 = vsel %vm7854_vm9, %v7835_v58, %v7734_v45  ;;  %v7356_v39 = vsel %vm13866_vm15, %v14532_v44, 0.0 }
 0x7f8   : > { %v7877_v50 = vsel %vm7875_vm11, %v7856_v32, 0.0  ;;  %v7584_v15 = vpop.permute.xlu0 %7583 }
 0x7f9   : > { %7897 = vst [vmem:[%s14756_s15 + $0x8] sm:$0xff] %v7877_v50  ;;  %v7798_v2 = vsel %vm7791_vm4, %v14304_v25, %v7584_v15 }
 0x7fa   : > { %v7586_v48 = vpop.permute.xlu1 %7585 }
 0x7fb   : > { %v7799_v49 = vsel %vm7791_vm4, %v14309_v13, %v7586_v48 }
 0x7fc   : > { %v7664_v42 = vpop.permute.xlu0 %7663 }
 0x7fd   : > { %v7819_v12 = vsel %vm7812_vm14, %v7798_v2, %v7664_v42 }
 0x7fe   : > { %v7666_v55 = vpop.permute.xlu1 %7665  ;;  %v7840_v31 = vsel %vm7833_vm5, %v7819_v12, %v7357_v30 }
 0x7ff   : > { %v7820_v1 = vsel %vm7812_vm14, %v7799_v49, %v7666_v55  ;;  %v7361_v49 = vsel %vm13882_vm0, %v14578_v26, 0.0 }
 0x800   : > { %v7580_v57 = vpop.permute.xlu0 %7579 }
 0x801   : > { %v7796_v63 = vsel %vm7791_vm4, %v14315_v5, %v7580_v57  ;;  %v7841_v5 = vsel %vm7833_vm5, %v7820_v1, %v7358_v54  ;;  %v7359_v54 = vsel %vm15602_vm10, %v14594_v23, 0.0 }
 0x802   : > { %v7582_v17 = vpop.permute.xlu1 %7581 }
 0x803   : > { %v7797_v35 = vsel %vm7791_vm4, %v14320_v14, %v7582_v17 }
 0x804   : > { %v7660_v33 = vpop.permute.xlu0 %7659 }
 0x805   : > { %v7817_v13 = vsel %vm7812_vm14, %v7796_v63, %v7660_v33  ;;  %v7362_v63 = vsel %vm13898_vm2, %v14582_v8, 0.0 }
 0x806   : > { %v7662_v46 = vpop.permute.xlu1 %7661  ;;  %v7838_v14 = vsel %vm7833_vm5, %v7817_v13, %v7355_v51 }
 0x807   : > { %v7818_v40 = vsel %vm7812_vm14, %v7797_v35, %v7662_v46  ;;  %v7360_v35 = vsel %vm15603_vm7, %v14598_v36, 0.0 }
 0x808   : > { %v7744_v25 = vpop.permute.xlu0 %7743  ;;  %v7839_v53 = vsel %vm7833_vm5, %v7818_v40, %v7356_v39 }
 0x809   : > { %v7861_v60 = vsel %vm7854_vm9, %v7840_v31, %v7744_v25 }
 0x80a   : > { %v7882_v47 = vsel %vm7875_vm11, %v7861_v60, 0.0  ;;  %v7746_v56 = vpop.permute.xlu1 %7745 }
 0x80b   : > { %7902 = vst [vmem:[%s14756_s15 + $0x30] sm:$0xff] %v7882_v47  ;;  %v7862_v29 = vsel %vm7854_vm9, %v7841_v5, %v7746_v56 }
 0x80c   : > { %v7883_v24 = vsel %vm7875_vm11, %v7862_v29, 0.0  ;;  %v7740_v61 = vpop.permute.xlu0 %7739 }
 0x80d   : > { %7903 = vst [vmem:[%s14756_s15 + $0x38] sm:$0xff] %v7883_v24  ;;  %v7859_v58 = vsel %vm7854_vm9, %v7838_v14, %v7740_v61 }
 0x80e   : > { %v7880_v6 = vsel %vm7875_vm11, %v7859_v58, 0.0  ;;  %v7742_v45 = vpop.permute.xlu1 %7741 }
 0x80f   : > { %7900 = vst [vmem:[%s14756_s15 + $0x20] sm:$0xff] %v7880_v6  ;;  %v7860_v32 = vsel %vm7854_vm9, %v7839_v53, %v7742_v45  ;;  %v7365_v45 = vsel %vm15604_vm8, %v14634_v9, 0.0 }
 0x810   : > { %v7881_v50 = vsel %vm7875_vm11, %v7860_v32, 0.0  ;;  %v7592_v15 = vpop.permute.xlu0 %7591 }
 0x811   : > { %7901 = vst [vmem:[%s14756_s15 + $0x28] sm:$0xff] %v7881_v50  ;;  %v7802_v57 = vsel %vm7791_vm4, %v14328_v10, %v7592_v15 }
 0x812   : > { %v7594_v48 = vpop.permute.xlu1 %7593 }
 0x813   : > { %v7803_v33 = vsel %vm7791_vm4, %v14334_v7, %v7594_v48  ;;  %v7366_v48 = vsel %vm15605_vm3, %v14638_v62, 0.0 }
 0x814   : > { %v7672_v42 = vpop.permute.xlu0 %7671 }
 0x815   : > { %v7823_v2 = vsel %vm7812_vm14, %v7802_v57, %v7672_v42 }
 0x816   : > { %v7674_v55 = vpop.permute.xlu1 %7673  ;;  %v7844_v1 = vsel %vm7833_vm5, %v7823_v2, %v7361_v49 }
 0x817   : > { %v7824_v46 = vsel %vm7812_vm14, %v7803_v33, %v7674_v55  ;;  %v15606_v55 = vld [vmem:[#allocation29_spill] sm:$0xff] }
 0x818   : > { %v7588_v27 = vpop.permute.xlu0 %7587  ;;  %v15607_v33 = vld [vmem:[#allocation25_spill] sm:$0xff] }
 0x819   : > { %v7800_v30 = vsel %vm7791_vm4, %v14342_v22, %v7588_v27  ;;  %v7845_v22 = vsel %vm7833_vm5, %v7824_v46, %v7362_v63 }
 0x81a   : > { %v7590_v44 = vpop.permute.xlu1 %7589 }
 0x81b   : > { %v7801_v26 = vsel %vm7791_vm4, %v14348_v19, %v7590_v44  ;;  %v7363_v44 = vsel %vm15593_vm13, %v14650_v18, 0.0 }
 0x81c   : > { %v7668_v17 = vpop.permute.xlu0 %7667 }
 0x81d   : > { %v7821_v7 = vsel %vm7812_vm14, %v7800_v30, %v7668_v17 }
 0x81e   : > { %v7670_v12 = vpop.permute.xlu1 %7669  ;;  %v7842_v19 = vsel %vm7833_vm5, %v7821_v7, %v7359_v54 }
 0x81f   : > { %v7822_v20 = vsel %vm7812_vm14, %v7801_v26, %v7670_v12  ;;  %v7364_v12 = vsel %vm15608_vm12, %v15607_v33, 0.0 }
 0x820   : > { %v7752_v10 = vpop.permute.xlu0 %7751  ;;  %v7843_v41 = vsel %vm7833_vm5, %v7822_v20, %v7360_v35  ;;  %v15610_v20 = vld [vmem:[#allocation35_spill] sm:$0xff]  ;;  %v15612_v35 = vld [vmem:[#allocation56_spill] sm:$0xff] }
 0x821   : > { %v7865_v31 = vsel %vm7854_vm9, %v7844_v1, %v7752_v10 }
 0x822   : > { %v7886_v59 = vsel %vm7875_vm11, %v7865_v31, 0.0  ;;  %v7754_v25 = vpop.permute.xlu1 %7753 }
 0x823   : > { %7906 = vst [vmem:[%s14756_s15 + $0x50] sm:$0xff] %v7886_v59  ;;  %v7866_v8 = vsel %vm7854_vm9, %v7845_v22, %v7754_v25  ;;  %v15609_v59 = vld [vmem:[#allocation57_spill] sm:$0xff] }
 0x824   : > { %v7887_v13 = vsel %vm7875_vm11, %v7866_v8, 0.0  ;;  %v7748_v60 = vpop.permute.xlu0 %7747 }
 0x825   : > { %7907 = vst [vmem:[%s14756_s15 + $0x58] sm:$0xff] %v7887_v13  ;;  %v7863_v47 = vsel %vm7854_vm9, %v7842_v19, %v7748_v60  ;;  %v7367_v19 = vsel %vm15611_vm6, %v14706_v11, 0.0 }
 0x826   : > { %v7884_v23 = vsel %vm7875_vm11, %v7863_v47, 0.0  ;;  %v7750_v5 = vpop.permute.xlu1 %7749 }
 0x827   : > { %7904 = vst [vmem:[%s14756_s15 + $0x40] sm:$0xff] %v7884_v23  ;;  %v7864_v56 = vsel %vm7854_vm9, %v7843_v41, %v7750_v5  ;;  %v7368_v5 = vsel %vm15613_vm1, %v14710_v28, 0.0 }
 0x828   : > { %v7885_v51 = vsel %vm7875_vm11, %v7864_v56, 0.0  ;;  %v7600_v40 = vpop.permute.xlu0 %7599 }
 0x829   : > { %7905 = vst [vmem:[%s14756_s15 + $0x48] sm:$0xff] %v7885_v51  ;;  %v7806_v61 = vsel %vm7791_vm4, %v14380_v0, %v7600_v40 }
 0x82a   : > { %v7602_v29 = vpop.permute.xlu1 %7601 }
 0x82b   : > { %v7807_v6 = vsel %vm7791_vm4, %v14383_v3, %v7602_v29 }
 0x82c   : > { %v7680_v24 = vpop.permute.xlu0 %7679 }
 0x82d   : > { %v7827_v58 = vsel %vm7812_vm14, %v7806_v61, %v7680_v24 }
 0x82e   : > { %v7682_v14 = vpop.permute.xlu1 %7681  ;;  %v7848_v15 = vsel %vm7833_vm5, %v7827_v58, %v7365_v45 }
 0x82f   : > { %v7828_v32 = vsel %vm7812_vm14, %v7807_v6, %v7682_v14  ;;  %v15615_v14 = vld [vmem:[#allocation24_spill] sm:$0xff]  ;;  %v15618_v6 = vld [vmem:[#allocation41_spill] sm:$0xff] }
 0x830   : > { %v7596_v37 = vpop.permute.xlu0 %7595 }
 0x831   : > { %v7804_v50 = vsel %vm7791_vm4, %v14412_v21, %v7596_v37  ;;  %v7849_v21 = vsel %vm7833_vm5, %v7828_v32, %v7366_v48  ;;  %v15616_v37 = vld [vmem:[#allocation23_spill] sm:$0xff] }
 0x832   : > { %v7598_v36 = vpop.permute.xlu1 %7597  ;;  %vm15617_vm15 = vnez %v15616_v37 }
 0x833   : > { %v7805_v9 = vsel %vm7791_vm4, %v15606_v55, %v7598_v36  ;;  %v7369_v36 = vsel %vm15617_vm15, %v15615_v14, 0.0 }
 0x834   : > { %v7676_v39 = vpop.permute.xlu0 %7675 }
 0x835   : > { %v7825_v3 = vsel %vm7812_vm14, %v7804_v50, %v7676_v39 }
 0x836   : > { %v7678_v53 = vpop.permute.xlu1 %7677  ;;  %v7846_v17 = vsel %vm7833_vm5, %v7825_v3, %v7363_v44 }
 0x837   : > { %v7826_v52 = vsel %vm7812_vm14, %v7805_v9, %v7678_v53  ;;  %v15619_v53 = vld [vmem:[#allocation21_spill] sm:$0xff] }
 0x838   : > { %v7760_v0 = vpop.permute.xlu0 %7759  ;;  %v7847_v43 = vsel %vm7833_vm5, %v7826_v52, %v7364_v12  ;;  %vm15620_vm0 = vnez %v15619_v53 }
 0x839   : > { %v7869_v42 = vsel %vm7854_vm9, %v7848_v15, %v7760_v0  ;;  %v7370_v45 = vsel %vm15620_vm0, %v15618_v6, 0.0 }
 0x83a   : > { %v7890_v34 = vsel %vm7875_vm11, %v7869_v42, 0.0  ;;  %v7762_v27 = vpop.permute.xlu1 %7761 }
 0x83b   : > { %7910 = vst [vmem:[%s14756_s15 + $0x70] sm:$0xff] %v7890_v34  ;;  %v7870_v62 = vsel %vm7854_vm9, %v7849_v21, %v7762_v27 }
 0x83c   : > { %v7891_v57 = vsel %vm7875_vm11, %v7870_v62, 0.0  ;;  %v7756_v2 = vpop.permute.xlu0 %7755 }
 0x83d   : > { %7911 = vst [vmem:[%s14756_s15 + $0x78] sm:$0xff] %v7891_v57  ;;  %v7867_v49 = vsel %vm7854_vm9, %v7846_v17, %v7756_v2 }
 0x83e   : > { %v7888_v18 = vsel %vm7875_vm11, %v7867_v49, 0.0  ;;  %v7758_v46 = vpop.permute.xlu1 %7757 }
 0x83f   : > { %7908 = vst [vmem:[%s14756_s15 + $0x60] sm:$0xff] %v7888_v18  ;;  %v7868_v30 = vsel %vm7854_vm9, %v7847_v43, %v7758_v46 }
 0x840   : > { %v7889_v1 = vsel %vm7875_vm11, %v7868_v30, 0.0  ;;  %v7608_v10 = vpop.permute.xlu0 %7607 }
 0x841   : > { %7909 = vst [vmem:[%s14756_s15 + $0x68] sm:$0xff] %v7889_v1  ;;  %v7810_v47 = vsel %vm7791_vm4, %v15612_v35, %v7608_v10 }
 0x842   : > { %v7610_v63 = vpop.permute.xlu1 %7609 }
 0x843   : > { %v7811_v11 = vsel %vm7791_vm4, %v15614_v16, %v7610_v63 }
 0x844   : > { %v7688_v38 = vpop.permute.xlu0 %7687 }
 0x845   : > { %v7831_v56 = vsel %vm7812_vm14, %v7810_v47, %v7688_v38 }
 0x846   : > { %v7690_v7 = vpop.permute.xlu1 %7689  ;;  %v7852_v39 = vsel %vm7833_vm5, %v7831_v56, %v7369_v36 }
 0x847   : > { %v7832_v4 = vsel %vm7812_vm14, %v7811_v11, %v7690_v7 }
 0x848   : > { %v7604_v31 = vpop.permute.xlu0 %7603  ;;  %v7853_v15 = vsel %vm7833_vm5, %v7832_v4, %v7370_v45 }
 0x849   : > { %v7808_v22 = vsel %vm7791_vm4, %v15609_v59, %v7604_v31 }
 0x84a   : > { %v7606_v26 = vpop.permute.xlu1 %7605 }
 0x84b   : > { %v7809_v8 = vsel %vm7791_vm4, %v15610_v20, %v7606_v26 }
 0x84c   : > { %v7684_v25 = vpop.permute.xlu0 %7683 }
 0x84d   : > { %v7829_v54 = vsel %vm7812_vm14, %v7808_v22, %v7684_v25 }
 0x84e   : > { %v7686_v13 = vpop.permute.xlu1 %7685  ;;  %v7850_v23 = vsel %vm7833_vm5, %v7829_v54, %v7367_v19 }
 0x84f   : > { %v7830_v60 = vsel %vm7812_vm14, %v7809_v8, %v7686_v13 }
 0x850   : > { %v7764_v41 = vpop.permute.xlu0 %7763  ;;  %v7851_v29 = vsel %vm7833_vm5, %v7830_v60, %v7368_v5 }
 0x851   : > { %v7871_v51 = vsel %vm7854_vm9, %v7850_v23, %v7764_v41 }
 0x852   : > { %v7892_v40 = vsel %vm7875_vm11, %v7871_v51, 0.0  ;;  %v7766_v24 = vpop.permute.xlu1 %7765 }
 0x853   : > { %7912 = vst [vmem:[%s14756_s15 + $0x80] sm:$0xff] %v7892_v40  ;;  %v7872_v28 = vsel %vm7854_vm9, %v7851_v29, %v7766_v24 }
 0x854   : > { %v7893_v61 = vsel %vm7875_vm11, %v7872_v28, 0.0  ;;  %v7768_v58 = vpop.permute.xlu0 %7767 }
 0x855   : > { %7913 = vst [vmem:[%s14756_s15 + $0x88] sm:$0xff] %v7893_v61  ;;  %v7873_v32 = vsel %vm7854_vm9, %v7852_v39, %v7768_v58 }
 0x856   : > { %v7894_v50 = vsel %vm7875_vm11, %v7873_v32, 0.0  ;;  %v7770_v0 = vpop.permute.xlu1 %7769 }
 0x857   : > { %7914 = vst [vmem:[%s14756_s15 + $0x90] sm:$0xff] %v7894_v50  ;;  %v7874_v48 = vsel %vm7854_vm9, %v7853_v15, %v7770_v0 }
 0x858   : > { %v7895_v3 = vsel %vm7875_vm11, %v7874_v48, 0.0 }
 0x859   : > { %7915 = vst [vmem:[%s14756_s15 + $0x98] sm:$0xff] %v7895_v3 }
 0x85a   : > { %10087 = shalt.err (!%p10084_p7)
}
 0x85b   : > { %s10088_s24 = scalar_lea.hbm %s14939_s21, 2560  ;;  %s10092_s17 = scalar_lea.hbm %s15006_s9, 10240 }
 0x85c   : > { %p10089_p9 = scmp.ne.s32.totalorder %s14939_s21, %s10088_s24  ;;  %p10093_p12 = scmp.lt.u32.totalorder %s14939_s21, %s15006_s9 }
 0x85d   : > { %p10094_p13 = scmp.lt.u32.totalorder %s10092_s17, %s10088_s24  ;;  %p10096_p1 = scmp.lt.u32.totalorder %s10088_s24, %s14939_s21 }
 0x85e   : > { %p10090_p10 = pnand %p10089_p9, %p10284_p3 }
 0x85f   : > { %p10095_p0 = por %p10094_p13, %p10093_p12 }
 0x860   : > { %p10091_p11 = pneg %p10090_p10 }
 0x861   : > { %p10097_p2 = por %p10096_p1, %p10095_p0 }
 0x863   : > { %p10098_p4 = pnand %p10097_p2, %p10091_p11 }
 0x865   : > { %10101 = shalt.err (!%p10098_p4)
}
 0x866   : > { %s10181_s18 = smov 128   ;;  %s10182_s19 = smov 8  }
 0x867   : > { %9909 = dma.vmem_to_hbm [thread:$0]  (%p10284_p3), %s14932_s13, 2560, %s14939_s21, %s14945_s26, %s10181_s18, %s10181_s18, %s10182_s19  }
 0x868 PF: > { %p9915_p5 = scmp.ge.s32.totalorder %s10168_s16, 2  ;;  %s7947_s27 = sand.u32 1, %s10140_s30  }
 0x869   : > { %s7948_s20 = scalar_lea.sflag [#allocation4], %s7947_s27 }
 0x86a   : > { %p9912_p6 = pnand %p9915_p5, %p10293_p8 }
 0x86c   : > { %10135 = dma.done.wait (!%p9912_p6), %s7948_s20, 2560  }
 0x86d   : > { %10137 = vsyncadd (!%p9912_p6), %s7948_s20, 4294964736  ;;  %s22_s16 = sadd.s32 1, %s10168_s16   ;;  %s15621_s28 = sld [smem:[#allocation10_spill]] }
 0x86e   : > { %p19_p7 = scmp.ge.s32.totalorder %s22_s16, 6   ;;  %s15622_s12 = sld [smem:[#allocation6_spill]] }
 0x86f   : > { %s15623_s13 = sld [smem:[#allocation7_spill]]  ;;  %s15624_s14 = sld [smem:[#allocation8_spill]] }
 0x870   : > { %s15625_s15 = sld [smem:[#allocation9_spill]]  ;;  %s15626_s30 = smov %s10144_s10 }
 0x871   : > { %s15627_s10 = smov %s10148_s11  ;;  %21 = sbr.rel (!%p19_p7) target bundleno = 5 (0x5), region = 107 }
 0x873   : > { %s15628_s11 = smov %s15621_s28 }
 0x878   :  { %7953 = vsyncpa [#allocation4], 1 }
 0x879   :  { %7955 = vsyncpa [#allocation4 + $0x1], 1 }

</bundles_post_ra>
